<compile_context>
chip_gen: v6e
topology: v6e:2x2x1
jax: 0.10.0
libtpu: 0.0.40
codegen_flags: <defaults>
</compile_context>

<pallas_src>
import functools

import jax
import jax.numpy as jnp
from jax import lax
from jax.experimental import pallas as pl
from jax.experimental.pallas import tpu as pltpu

KSIZE = 4
PAD = 1                      # int((kernel_size - 1) // 2) with kernel_size=4
LEAKY_SLOPE = 0.2
BN_EPS = 1e-5
LANE = 128
SUBLANE = 8

# Grid-constant blocks (weights / affine) do not need double buffering.
_CONST_BUFFERING = pl.Buffered(1) if hasattr(pl, "Buffered") else None


def _round_up(x, m):
    return (x + m - 1) // m * m


def _vmem_limit_bytes():
    """Generation-aware VMEM limit (use the 128 MiB on v5e/v6e, stay safe on v7x)."""
    cap = 64 * 1024 * 1024                       # v7x-safe default
    try:
        cap = int(pltpu.get_tpu_info().vmem_capacity_bytes)
    except Exception:                            # best-effort query only
        pass
    return max(32 * 1024 * 1024, min(cap - 16 * 1024 * 1024, 112 * 1024 * 1024))


def _pick_band_rows(ho, wo_pad, hin, win, cin_s, n_taps, cout_pad, out_bytes, budget):
    """Largest divisor of Ho whose per-step VMEM footprint fits the budget."""
    w_sub = _round_up(win, SUBLANE)
    c_lane = _round_up(cin_s, LANE)
    img = 2 * hin * w_sub * c_lane * 2                        # image block, 2 buffers
    wts = n_taps * _round_up(cin_s, SUBLANE) * cout_pad * 2   # weights, single buffer

    def fits(tr):
        out_blk = 2 * tr * _round_up(wo_pad, SUBLANE) * cout_pad * out_bytes
        slab = (tr + KSIZE - 1) * w_sub * c_lane * 2          # in-kernel slab value
        acc = tr * wo_pad * cout_pad * 4                      # f32 accumulator
        xt = 2 * tr * wo_pad * c_lane * 2                     # per-tap patch temp
        return img + wts + out_blk + slab + acc + xt <= budget

    best = 1
    for tr in range(1, ho + 1):
        if ho % tr == 0 and fits(tr):
            best = tr
    return best


# ----------------------------------------------------------------------------
# Pallas kernel: one output row-band = sum over taps of a fat MXU matmul with a
# fused per-channel affine (+ LeakyReLU) f32 epilogue, lane-dense NHWC store.
# ----------------------------------------------------------------------------
def _conv_tap_kernel(x_ref, w_ref, sc_ref, sh_ref, o_ref, *,
                     taps, tr, wo, wo_pad, apply_act):
    # x_ref : (Hin, Win, Cin_s) bf16  -- full padded (/space-to-depth) image
    # w_ref : (T, Cin_s, Cout_pad) bf16 tap-major weight slabs
    # sc/sh : (1, Cout_pad) f32       -- folded BN scale / (bias+BN) shift
    # o_ref : (tr, Wo, Cout_pad)
    kk = max(di for di, _ in taps) + 1
    rows_in = tr + kk - 1
    r0 = pl.program_id(1) * tr
    slab = x_ref[pl.ds(r0, rows_in), :, :]                    # (rows_in, Win, Cin_s)
    cin_s = slab.shape[-1]

    acc = None
    for t, (di, dj) in enumerate(taps):
        xt = slab[di:di + tr, dj:dj + wo_pad, :].reshape(tr * wo_pad, cin_s)
        part = jnp.dot(xt, w_ref[t], preferred_element_type=jnp.float32)
        acc = part if acc is None else acc + part

    y = acc * sc_ref[...] + sh_ref[...]
    if apply_act:
        y = jnp.where(y >= 0, y, LEAKY_SLOPE * y)
    y = y.reshape(tr, wo_pad, -1)[:, :wo, :]                  # drop width padding
    o_ref[...] = y.astype(o_ref.dtype)


# ----------------------------------------------------------------------------
# One discriminator layer.
# ----------------------------------------------------------------------------
def _run_layer(x_nhwc, w_mat, sc, sh, meta, vmem_limit):
    stride, apply_act = meta["stride"], meta["act"]
    out_dtype = meta["out_dtype"]
    n, h, w, cs = x_nhwc.shape

    xp = jnp.pad(x_nhwc, ((0, 0), (PAD, PAD), (PAD, PAD), (0, 0)))
    if stride == 2:
        assert h % 2 == 0 and w % 2 == 0, "stride-2 layer needs even spatial dims"
        hpad, wpad = h + 2 * PAD, w + 2 * PAD
        # 2x2 space-to-depth: stride-2 k=4 conv becomes stride-1 k=2 conv, so the
        # kernel only needs contiguous (unstrided) tap slices.
        x_in = (xp.reshape(n, hpad // 2, 2, wpad // 2, 2, cs)
                  .transpose(0, 1, 3, 2, 4, 5)
                  .reshape(n, hpad // 2, wpad // 2, 4 * cs))
        taps = tuple((di, dj) for di in range(2) for dj in range(2))
        kk = 2
        ho, wo = h // 2, w // 2
    else:
        x_in = xp
        taps = tuple((i, j) for i in range(KSIZE) for j in range(KSIZE))
        kk = KSIZE
        ho, wo = h - 1, w - 1
    assert ho >= 1 and wo >= 1, "spatial dims too small for this layer"

    # Pad width so per-tap matmul blocks are sublane aligned (wo_pad % 8 == 0);
    # extra output columns are dropped in-kernel before the store.
    wo_pad = _round_up(wo, SUBLANE)
    win_needed = wo_pad + kk - 1
    _, hin, win, cin_s = x_in.shape
    if win_needed > win:
        x_in = jnp.pad(x_in, ((0, 0), (0, 0), (0, win_needed - win), (0, 0)))
        win = win_needed

    n_taps, k_eff, cout_pad = w_mat.shape
    assert n_taps == len(taps) and k_eff == cin_s

    out_bytes = jnp.dtype(out_dtype).itemsize
    tr = _pick_band_rows(ho, wo_pad, hin, win, cin_s, n_taps, cout_pad,
                         out_bytes, budget=int(vmem_limit * 0.7))
    n_bands = ho // tr

    kern = functools.partial(_conv_tap_kernel, taps=taps, tr=tr, wo=wo,
                             wo_pad=wo_pad, apply_act=apply_act)

    flops = 2 * n * ho * wo_pad * n_taps * k_eff * cout_pad
    bytes_accessed = (x_in.size * x_in.dtype.itemsize
                      + w_mat.size * w_mat.dtype.itemsize
                      + n * ho * wo * cout_pad * out_bytes)

    return pl.pallas_call(
        kern,
        out_shape=jax.ShapeDtypeStruct((n, ho, wo, cout_pad), out_dtype),
        grid=(n, n_bands),
        in_specs=[
            # Whole padded image of one sample; block index independent of the
            # band axis -> DMA'd once per sample, reused across bands.
            pl.BlockSpec((None, hin, win, cin_s), lambda i, b: (i, 0, 0, 0)),
            pl.BlockSpec((n_taps, k_eff, cout_pad), lambda i, b: (0, 0, 0),
                         pipeline_mode=_CONST_BUFFERING),
            pl.BlockSpec((1, cout_pad), lambda i, b: (0, 0),
                         pipeline_mode=_CONST_BUFFERING),
            pl.BlockSpec((1, cout_pad), lambda i, b: (0, 0),
                         pipeline_mode=_CONST_BUFFERING),
        ],
        out_specs=pl.BlockSpec((None, tr, wo, cout_pad), lambda i, b: (i, b, 0, 0)),
        compiler_params=pltpu.CompilerParams(
            dimension_semantics=("parallel", "parallel"),
            vmem_limit_bytes=vmem_limit),
        cost_estimate=pl.CostEstimate(flops=flops, transcendentals=0,
                                      bytes_accessed=bytes_accessed),
    )(x_in, w_mat, sc, sh)


# ----------------------------------------------------------------------------
# Parameter construction (mirrors NLayerDiscriminator.__init__).
# ----------------------------------------------------------------------------
def init_params(key, input_nc, ndf, n_layers):
    cfgs = [(input_nc, ndf, 2, False)]
    nf = ndf
    for i in range(n_layers):
        prev, nf = nf, min(nf * 2, 512)
        stride = 2 if i != n_layers - 1 else 1
        cfgs.append((prev, nf, stride, True))
    cfgs.append((nf, 1, 1, False))

    params = []
    for (cin, cout, stride, has_bn) in cfgs:
        key, kw, kb, kg, kbt = jax.random.split(key, 5)
        w = 0.05 * jax.random.normal(kw, (KSIZE, KSIZE, cin, cout), jnp.float32)
        b = 0.05 * jax.random.normal(kb, (cout,), jnp.float32)
        if has_bn:
            gamma = 1.0 + 0.1 * jax.random.normal(kg, (cout,), jnp.float32)
            beta = 0.1 * jax.random.normal(kbt, (cout,), jnp.float32)
            rmean = jnp.zeros((cout,), jnp.float32)     # fresh BN running stats
            rvar = jnp.ones((cout,), jnp.float32)
            inv = gamma * jax.lax.rsqrt(rvar + BN_EPS)
            scale = inv
            shift = beta + (b - rmean) * inv            # conv bias folded into BN
        else:
            scale = jnp.ones((cout,), jnp.float32)
            shift = b
        params.append(dict(w=w, scale=scale, shift=shift, stride=stride, act=has_bn))
    return params


def _prep_weight_mat(w, cin_stored, cout_pad, stride):
    """HWIO weights -> tap-major (T, Cin_stored[*4], Cout_pad) bf16 slabs."""
    kh, kw, cin, cout = w.shape
    wz = jnp.pad(w, ((0, 0), (0, 0), (0, cin_stored - cin), (0, cout_pad - cout)))
    if stride == 2:
        # (di,pi,dj,pj,c,o) -> (di,dj,pi,pj,c,o): matches the 2x2 space-to-depth
        # channel ordering (row-parity, col-parity, channel) of the activation.
        wz = wz.reshape(2, 2, 2, 2, cin_stored, cout_pad).transpose(0, 2, 1, 3, 4, 5)
        w_mat = wz.reshape(4, 4 * cin_stored, cout_pad)
    else:
        w_mat = wz.reshape(kh * kw, cin_stored, cout_pad)
    return w_mat.astype(jnp.bfloat16)


def prepare_discriminator(params, input_nc):
    """Hoisted (non-jitted) one-time weight prep in the kernel's layout."""
    meta, arrays = [], []
    cin_stored = input_nc
    for li, p in enumerate(params):
        cout = p["w"].shape[-1]
        last = li == len(params) - 1
        cout_pad = _round_up(cout, LANE)
        arrays.append((
            _prep_weight_mat(p["w"], cin_stored, cout_pad, p["stride"]),
            jnp.pad(p["scale"].astype(jnp.float32).reshape(1, -1),
                    ((0, 0), (0, cout_pad - cout))),
            jnp.pad(p["shift"].astype(jnp.float32).reshape(1, -1),
                    ((0, 0), (0, cout_pad - cout))),
        ))
        meta.append(dict(stride=p["stride"], act=p["act"], cout=cout,
                         out_dtype=jnp.float32 if last else jnp.bfloat16))
        cin_stored = cout_pad   # zero-padded channels carried forward (no HBM slice)
    return meta, arrays


def build_forward(meta, vmem_limit):
    @jax.jit
    def forward(x_nchw, layer_arrays):
        x = jnp.transpose(x_nchw, (0, 2, 3, 1)).astype(jnp.bfloat16)   # NCHW -> NHWC
        for m, (w_mat, sc, sh) in zip(meta, layer_arrays):
            x = _run_layer(x, w_mat, sc, sh, m, vmem_limit)
        x = x[..., :meta[-1]["cout"]]            # drop lane padding of the 1-ch head
        return jnp.transpose(x, (0, 3, 1, 2))    # NHWC -> NCHW
    return forward


# ----------------------------------------------------------------------------
# Pure-JAX f32 reference (correctness check only).
# ----------------------------------------------------------------------------
def reference_forward(x_nchw, params):
    x = jnp.transpose(x_nchw, (0, 2, 3, 1))
    for p in params:
        y = lax.conv_general_dilated(
            x, p["w"], window_strides=(p["stride"], p["stride"]),
            padding=((PAD, PAD), (PAD, PAD)),
            dimension_numbers=("NHWC", "HWIO", "NHWC"),
            precision=lax.Precision.HIGHEST)
        y = y * p["scale"] + p["shift"]
        if p["act"]:
            y = jnp.where(y >= 0, y, LEAKY_SLOPE * y)
        x = y
    return jnp.transpose(x, (0, 3, 1, 2))


if __name__ == "__main__":
    # Small deterministic example: batch=2, input_nc=4, 32x32 spatial, ndf=8,
    # n_layers=3  ->  spatial path 32 -> 16 -> 8 -> 4 -> 3 -> 2.
    input_nc, ndf, n_layers = 4, 8, 3
    key = jax.random.PRNGKey(0)
    kx, kp = jax.random.split(key)
    x = jax.random.normal(kx, (2, input_nc, 32, 32), jnp.float32)      # NCHW
    params = init_params(kp, input_nc, ndf, n_layers)

    meta, arrays = prepare_discriminator(params, input_nc)
    forward = build_forward(meta, _vmem_limit_bytes())

    out = jax.block_until_ready(forward(x, arrays))
    expected_shape = (2, 1, 2, 2)
    assert out.shape == expected_shape, (out.shape, expected_shape)

    ref = jax.block_until_ready(reference_forward(x, params))
    # bf16 matmul operands + bf16 inter-layer activations vs. an f32 HIGHEST
    # reference: allow a few bf16 ulps of accumulated error.
    max_err = float(jnp.max(jnp.abs(out - ref)))
    assert jnp.allclose(out, ref, rtol=2e-2, atol=2e-2), max_err

    print("KERNEL_OK")
</pallas_src>

<mosaic_0001>
module attributes {stable_mosaic.version = 11 : i64} {
  func.func @_conv_tap_kernel(%arg0: i32, %arg1: i32, %arg2: memref<1x17x17x16xbf16, #tpu.memory_space<vmem>>, %arg3: memref<4x16x128xbf16, #tpu.memory_space<vmem>>, %arg4: memref<1x128xf32, #tpu.memory_space<vmem>>, %arg5: memref<1x128xf32, #tpu.memory_space<vmem>>, %arg6: memref<1x16x16x128xbf16, #tpu.memory_space<vmem>>) attributes {dimension_semantics = [#tpu.dimension_semantics<parallel>, #tpu.dimension_semantics<parallel>], iteration_bounds = array<i64: 2, 1>, scalar_prefetch = 0 : i64, scratch_operands = 0 : i64, tpu.core_type = #tpu.core_type<tc>, window_params = [{transform_indices = @transform_0, window_bounds = array<i64: 1, 17, 17, 16>}, {pipeline_mode = #tpu.pipeline_mode<synchronous>, transform_indices = @transform_1, window_bounds = array<i64: 4, 16, 128>}, {pipeline_mode = #tpu.pipeline_mode<synchronous>, transform_indices = @transform_2, window_bounds = array<i64: 1, 128>}, {pipeline_mode = #tpu.pipeline_mode<synchronous>, transform_indices = @transform_3, window_bounds = array<i64: 1, 128>}, {transform_indices = @transform_4, window_bounds = array<i64: 1, 16, 16, 128>}]} {
    %c16_i32 = arith.constant 16 : i32
    %0 = arith.muli %arg1, %c16_i32 : i32
    %c0 = arith.constant 0 : index
    %1 = arith.index_cast %0 : i32 to index
    %c0_0 = arith.constant 0 : index
    %c0_1 = arith.constant 0 : index
    %2 = vector.load %arg2[%c0, %1, %c0_0, %c0_1] : memref<1x17x17x16xbf16, #tpu.memory_space<vmem>>, vector<1x17x17x16xbf16>
    %3 = vector.shape_cast %2 : vector<1x17x17x16xbf16> to vector<17x17x16xbf16>
    %4 = vector.extract_strided_slice %3 {offsets = [0, 0, 0], sizes = [16, 16, 16], strides = [1, 1, 1]} : vector<17x17x16xbf16> to vector<16x16x16xbf16>
    %5 = vector.shape_cast %4 : vector<16x16x16xbf16> to vector<256x16xbf16>
    %c0_2 = arith.constant 0 : index
    %c0_3 = arith.constant 0 : index
    %c0_4 = arith.constant 0 : index
    %6 = vector.load %arg3[%c0_2, %c0_3, %c0_4] : memref<4x16x128xbf16, #tpu.memory_space<vmem>>, vector<1x16x128xbf16>
    %7 = vector.shape_cast %6 : vector<1x16x128xbf16> to vector<16x128xbf16>
    %cst = arith.constant dense<0.000000e+00> : vector<256x128xf32>
    %8 = tpu.matmul %5, %7, %cst {dimension_numbers = #tpu.dot_dimension_numbers<[1], [0], [0], [1], [0, 0, 1, 1], [], []>} : vector<256x16xbf16>, vector<16x128xbf16>, vector<256x128xf32> -> vector<256x128xf32>
    %9 = vector.extract_strided_slice %3 {offsets = [0, 1, 0], sizes = [16, 16, 16], strides = [1, 1, 1]} : vector<17x17x16xbf16> to vector<16x16x16xbf16>
    %10 = vector.shape_cast %9 : vector<16x16x16xbf16> to vector<256x16xbf16>
    %c1 = arith.constant 1 : index
    %c0_5 = arith.constant 0 : index
    %c0_6 = arith.constant 0 : index
    %11 = vector.load %arg3[%c1, %c0_5, %c0_6] : memref<4x16x128xbf16, #tpu.memory_space<vmem>>, vector<1x16x128xbf16>
    %12 = vector.shape_cast %11 : vector<1x16x128xbf16> to vector<16x128xbf16>
    %cst_7 = arith.constant dense<0.000000e+00> : vector<256x128xf32>
    %13 = tpu.matmul %10, %12, %cst_7 {dimension_numbers = #tpu.dot_dimension_numbers<[1], [0], [0], [1], [0, 0, 1, 1], [], []>} : vector<256x16xbf16>, vector<16x128xbf16>, vector<256x128xf32> -> vector<256x128xf32>
    %14 = arith.addf %8, %13 : vector<256x128xf32>
    %15 = vector.extract_strided_slice %3 {offsets = [1, 0, 0], sizes = [16, 16, 16], strides = [1, 1, 1]} : vector<17x17x16xbf16> to vector<16x16x16xbf16>
    %16 = vector.shape_cast %15 : vector<16x16x16xbf16> to vector<256x16xbf16>
    %c2 = arith.constant 2 : index
    %c0_8 = arith.constant 0 : index
    %c0_9 = arith.constant 0 : index
    %17 = vector.load %arg3[%c2, %c0_8, %c0_9] : memref<4x16x128xbf16, #tpu.memory_space<vmem>>, vector<1x16x128xbf16>
    %18 = vector.shape_cast %17 : vector<1x16x128xbf16> to vector<16x128xbf16>
    %cst_10 = arith.constant dense<0.000000e+00> : vector<256x128xf32>
    %19 = tpu.matmul %16, %18, %cst_10 {dimension_numbers = #tpu.dot_dimension_numbers<[1], [0], [0], [1], [0, 0, 1, 1], [], []>} : vector<256x16xbf16>, vector<16x128xbf16>, vector<256x128xf32> -> vector<256x128xf32>
    %20 = arith.addf %14, %19 : vector<256x128xf32>
    %21 = vector.extract_strided_slice %3 {offsets = [1, 1, 0], sizes = [16, 16, 16], strides = [1, 1, 1]} : vector<17x17x16xbf16> to vector<16x16x16xbf16>
    %22 = vector.shape_cast %21 : vector<16x16x16xbf16> to vector<256x16xbf16>
    %c3 = arith.constant 3 : index
    %c0_11 = arith.constant 0 : index
    %c0_12 = arith.constant 0 : index
    %23 = vector.load %arg3[%c3, %c0_11, %c0_12] : memref<4x16x128xbf16, #tpu.memory_space<vmem>>, vector<1x16x128xbf16>
    %24 = vector.shape_cast %23 : vector<1x16x128xbf16> to vector<16x128xbf16>
    %cst_13 = arith.constant dense<0.000000e+00> : vector<256x128xf32>
    %25 = tpu.matmul %22, %24, %cst_13 {dimension_numbers = #tpu.dot_dimension_numbers<[1], [0], [0], [1], [0, 0, 1, 1], [], []>} : vector<256x16xbf16>, vector<16x128xbf16>, vector<256x128xf32> -> vector<256x128xf32>
    %26 = arith.addf %20, %25 : vector<256x128xf32>
    %c0_14 = arith.constant 0 : index
    %c0_15 = arith.constant 0 : index
    %27 = vector.load %arg4[%c0_14, %c0_15] : memref<1x128xf32, #tpu.memory_space<vmem>>, vector<1x128xf32>
    %28 = vector.broadcast %27 : vector<1x128xf32> to vector<256x128xf32>
    %29 = arith.mulf %26, %28 : vector<256x128xf32>
    %c0_16 = arith.constant 0 : index
    %c0_17 = arith.constant 0 : index
    %30 = vector.load %arg5[%c0_16, %c0_17] : memref<1x128xf32, #tpu.memory_space<vmem>>, vector<1x128xf32>
    %31 = vector.broadcast %30 : vector<1x128xf32> to vector<256x128xf32>
    %32 = arith.addf %29, %31 : vector<256x128xf32>
    %33 = vector.shape_cast %32 : vector<256x128xf32> to vector<16x16x128xf32>
    %34 = arith.truncf %33 : vector<16x16x128xf32> to vector<16x16x128xbf16>
    %c0_18 = arith.constant 0 : index
    %c0_19 = arith.constant 0 : index
    %c0_20 = arith.constant 0 : index
    %c0_21 = arith.constant 0 : index
    %35 = vector.load %arg6[%c0_18, %c0_19, %c0_20, %c0_21] : memref<1x16x16x128xbf16, #tpu.memory_space<vmem>>, vector<1x16x16x128xbf16>
    %36 = vector.shape_cast %35 : vector<1x16x16x128xbf16> to vector<16x16x128xbf16>
    %37 = vector.shape_cast %34 : vector<16x16x128xbf16> to vector<1x16x16x128xbf16>
    tpu.vector_store %arg6[%c0_18, %c0_19, %c0_20, %c0_21], %37 {strides = array<i32>} : memref<1x16x16x128xbf16, #tpu.memory_space<vmem>>, vector<1x16x16x128xbf16>,
    return
  }
  func.func @transform_0(%arg0: i32, %arg1: i32) -> (i32, i32, i32, i32) {
    %c0_i32 = arith.constant 0 : i32
    %c0_i32_0 = arith.constant 0 : i32
    %c0_i32_1 = arith.constant 0 : i32
    %c0_i32_2 = arith.constant 0 : i32
    return %arg0, %c0_i32, %c0_i32_0, %c0_i32_1 : i32, i32, i32, i32
  }
  func.func @transform_1(%arg0: i32, %arg1: i32) -> (i32, i32, i32) {
    %c0_i32 = arith.constant 0 : i32
    %c0_i32_0 = arith.constant 0 : i32
    %c0_i32_1 = arith.constant 0 : i32
    %c0_i32_2 = arith.constant 0 : i32
    return %c0_i32, %c0_i32_0, %c0_i32_1 : i32, i32, i32
  }
  func.func @transform_2(%arg0: i32, %arg1: i32) -> (i32, i32) {
    %c0_i32 = arith.constant 0 : i32
    %c0_i32_0 = arith.constant 0 : i32
    %c0_i32_1 = arith.constant 0 : i32
    return %c0_i32, %c0_i32_0 : i32, i32
  }
  func.func @transform_3(%arg0: i32, %arg1: i32) -> (i32, i32) {
    %c0_i32 = arith.constant 0 : i32
    %c0_i32_0 = arith.constant 0 : i32
    %c0_i32_1 = arith.constant 0 : i32
    return %c0_i32, %c0_i32_0 : i32, i32
  }
  func.func @transform_4(%arg0: i32, %arg1: i32) -> (i32, i32, i32, i32) {
    %c0_i32 = arith.constant 0 : i32
    %c0_i32_0 = arith.constant 0 : i32
    %c0_i32_1 = arith.constant 0 : i32
    return %arg0, %arg1, %c0_i32, %c0_i32_0 : i32, i32, i32, i32
  }
}

module attributes {stable_mosaic.version = 11 : i64} {
  func.func @_conv_tap_kernel(%arg0: i32, %arg1: i32, %arg2: memref<1x9x9x512xbf16, #tpu.memory_space<vmem>>, %arg3: memref<4x512x128xbf16, #tpu.memory_space<vmem>>, %arg4: memref<1x128xf32, #tpu.memory_space<vmem>>, %arg5: memref<1x128xf32, #tpu.memory_space<vmem>>, %arg6: memref<1x8x8x128xbf16, #tpu.memory_space<vmem>>) attributes {dimension_semantics = [#tpu.dimension_semantics<parallel>, #tpu.dimension_semantics<parallel>], iteration_bounds = array<i64: 2, 1>, scalar_prefetch = 0 : i64, scratch_operands = 0 : i64, tpu.core_type = #tpu.core_type<tc>, window_params = [{transform_indices = @transform_0, window_bounds = array<i64: 1, 9, 9, 512>}, {pipeline_mode = #tpu.pipeline_mode<synchronous>, transform_indices = @transform_1, window_bounds = array<i64: 4, 512, 128>}, {pipeline_mode = #tpu.pipeline_mode<synchronous>, transform_indices = @transform_2, window_bounds = array<i64: 1, 128>}, {pipeline_mode = #tpu.pipeline_mode<synchronous>, transform_indices = @transform_3, window_bounds = array<i64: 1, 128>}, {transform_indices = @transform_4, window_bounds = array<i64: 1, 8, 8, 128>}]} {
    %c8_i32 = arith.constant 8 : i32
    %0 = arith.muli %arg1, %c8_i32 : i32
    %c0 = arith.constant 0 : index
    %1 = arith.index_cast %0 : i32 to index
    %c0_0 = arith.constant 0 : index
    %c0_1 = arith.constant 0 : index
    %2 = vector.load %arg2[%c0, %1, %c0_0, %c0_1] : memref<1x9x9x512xbf16, #tpu.memory_space<vmem>>, vector<1x9x9x512xbf16>
    %3 = vector.shape_cast %2 : vector<1x9x9x512xbf16> to vector<9x9x512xbf16>
    %4 = vector.extract_strided_slice %3 {offsets = [0, 0, 0], sizes = [8, 8, 512], strides = [1, 1, 1]} : vector<9x9x512xbf16> to vector<8x8x512xbf16>
    %5 = vector.shape_cast %4 : vector<8x8x512xbf16> to vector<64x512xbf16>
    %c0_2 = arith.constant 0 : index
    %c0_3 = arith.constant 0 : index
    %c0_4 = arith.constant 0 : index
    %6 = vector.load %arg3[%c0_2, %c0_3, %c0_4] : memref<4x512x128xbf16, #tpu.memory_space<vmem>>, vector<1x512x128xbf16>
    %7 = vector.shape_cast %6 : vector<1x512x128xbf16> to vector<512x128xbf16>
    %cst = arith.constant dense<0.000000e+00> : vector<64x128xf32>
    %8 = tpu.matmul %5, %7, %cst {dimension_numbers = #tpu.dot_dimension_numbers<[1], [0], [0], [1], [0, 0, 1, 1], [], []>} : vector<64x512xbf16>, vector<512x128xbf16>, vector<64x128xf32> -> vector<64x128xf32>
    %9 = vector.extract_strided_slice %3 {offsets = [0, 1, 0], sizes = [8, 8, 512], strides = [1, 1, 1]} : vector<9x9x512xbf16> to vector<8x8x512xbf16>
    %10 = vector.shape_cast %9 : vector<8x8x512xbf16> to vector<64x512xbf16>
    %c1 = arith.constant 1 : index
    %c0_5 = arith.constant 0 : index
    %c0_6 = arith.constant 0 : index
    %11 = vector.load %arg3[%c1, %c0_5, %c0_6] : memref<4x512x128xbf16, #tpu.memory_space<vmem>>, vector<1x512x128xbf16>
    %12 = vector.shape_cast %11 : vector<1x512x128xbf16> to vector<512x128xbf16>
    %cst_7 = arith.constant dense<0.000000e+00> : vector<64x128xf32>
    %13 = tpu.matmul %10, %12, %cst_7 {dimension_numbers = #tpu.dot_dimension_numbers<[1], [0], [0], [1], [0, 0, 1, 1], [], []>} : vector<64x512xbf16>, vector<512x128xbf16>, vector<64x128xf32> -> vector<64x128xf32>
    %14 = arith.addf %8, %13 : vector<64x128xf32>
    %15 = vector.extract_strided_slice %3 {offsets = [1, 0, 0], sizes = [8, 8, 512], strides = [1, 1, 1]} : vector<9x9x512xbf16> to vector<8x8x512xbf16>
    %16 = vector.shape_cast %15 : vector<8x8x512xbf16> to vector<64x512xbf16>
    %c2 = arith.constant 2 : index
    %c0_8 = arith.constant 0 : index
    %c0_9 = arith.constant 0 : index
    %17 = vector.load %arg3[%c2, %c0_8, %c0_9] : memref<4x512x128xbf16, #tpu.memory_space<vmem>>, vector<1x512x128xbf16>
    %18 = vector.shape_cast %17 : vector<1x512x128xbf16> to vector<512x128xbf16>
    %cst_10 = arith.constant dense<0.000000e+00> : vector<64x128xf32>
    %19 = tpu.matmul %16, %18, %cst_10 {dimension_numbers = #tpu.dot_dimension_numbers<[1], [0], [0], [1], [0, 0, 1, 1], [], []>} : vector<64x512xbf16>, vector<512x128xbf16>, vector<64x128xf32> -> vector<64x128xf32>
    %20 = arith.addf %14, %19 : vector<64x128xf32>
    %21 = vector.extract_strided_slice %3 {offsets = [1, 1, 0], sizes = [8, 8, 512], strides = [1, 1, 1]} : vector<9x9x512xbf16> to vector<8x8x512xbf16>
    %22 = vector.shape_cast %21 : vector<8x8x512xbf16> to vector<64x512xbf16>
    %c3 = arith.constant 3 : index
    %c0_11 = arith.constant 0 : index
    %c0_12 = arith.constant 0 : index
    %23 = vector.load %arg3[%c3, %c0_11, %c0_12] : memref<4x512x128xbf16, #tpu.memory_space<vmem>>, vector<1x512x128xbf16>
    %24 = vector.shape_cast %23 : vector<1x512x128xbf16> to vector<512x128xbf16>
    %cst_13 = arith.constant dense<0.000000e+00> : vector<64x128xf32>
    %25 = tpu.matmul %22, %24, %cst_13 {dimension_numbers = #tpu.dot_dimension_numbers<[1], [0], [0], [1], [0, 0, 1, 1], [], []>} : vector<64x512xbf16>, vector<512x128xbf16>, vector<64x128xf32> -> vector<64x128xf32>
    %26 = arith.addf %20, %25 : vector<64x128xf32>
    %c0_14 = arith.constant 0 : index
    %c0_15 = arith.constant 0 : index
    %27 = vector.load %arg4[%c0_14, %c0_15] : memref<1x128xf32, #tpu.memory_space<vmem>>, vector<1x128xf32>
    %28 = vector.broadcast %27 : vector<1x128xf32> to vector<64x128xf32>
    %29 = arith.mulf %26, %28 : vector<64x128xf32>
    %c0_16 = arith.constant 0 : index
    %c0_17 = arith.constant 0 : index
    %30 = vector.load %arg5[%c0_16, %c0_17] : memref<1x128xf32, #tpu.memory_space<vmem>>, vector<1x128xf32>
    %31 = vector.broadcast %30 : vector<1x128xf32> to vector<64x128xf32>
    %32 = arith.addf %29, %31 : vector<64x128xf32>
    %cst_18 = arith.constant 0.000000e+00 : f32
    %33 = vector.broadcast %cst_18 : f32 to vector<64x128xf32>
    %34 = arith.cmpf oge, %32, %33 : vector<64x128xf32>
    %cst_19 = arith.constant 2.000000e-01 : f32
    %35 = vector.broadcast %cst_19 : f32 to vector<64x128xf32>
    %36 = arith.mulf %35, %32 : vector<64x128xf32>
    %37 = arith.select %34, %32, %36 : vector<64x128xi1>, vector<64x128xf32>
    %38 = vector.shape_cast %37 : vector<64x128xf32> to vector<8x8x128xf32>
    %39 = arith.truncf %38 : vector<8x8x128xf32> to vector<8x8x128xbf16>
    %c0_20 = arith.constant 0 : index
    %c0_21 = arith.constant 0 : index
    %c0_22 = arith.constant 0 : index
    %c0_23 = arith.constant 0 : index
    %40 = vector.load %arg6[%c0_20, %c0_21, %c0_22, %c0_23] : memref<1x8x8x128xbf16, #tpu.memory_space<vmem>>, vector<1x8x8x128xbf16>
    %41 = vector.shape_cast %40 : vector<1x8x8x128xbf16> to vector<8x8x128xbf16>
    %42 = vector.shape_cast %39 : vector<8x8x128xbf16> to vector<1x8x8x128xbf16>
    tpu.vector_store %arg6[%c0_20, %c0_21, %c0_22, %c0_23], %42 {strides = array<i32>} : memref<1x8x8x128xbf16, #tpu.memory_space<vmem>>, vector<1x8x8x128xbf16>,
    return
  }
  func.func @transform_0(%arg0: i32, %arg1: i32) -> (i32, i32, i32, i32) {
    %c0_i32 = arith.constant 0 : i32
    %c0_i32_0 = arith.constant 0 : i32
    %c0_i32_1 = arith.constant 0 : i32
    %c0_i32_2 = arith.constant 0 : i32
    return %arg0, %c0_i32, %c0_i32_0, %c0_i32_1 : i32, i32, i32, i32
  }
  func.func @transform_1(%arg0: i32, %arg1: i32) -> (i32, i32, i32) {
    %c0_i32 = arith.constant 0 : i32
    %c0_i32_0 = arith.constant 0 : i32
    %c0_i32_1 = arith.constant 0 : i32
    %c0_i32_2 = arith.constant 0 : i32
    return %c0_i32, %c0_i32_0, %c0_i32_1 : i32, i32, i32
  }
  func.func @transform_2(%arg0: i32, %arg1: i32) -> (i32, i32) {
    %c0_i32 = arith.constant 0 : i32
    %c0_i32_0 = arith.constant 0 : i32
    %c0_i32_1 = arith.constant 0 : i32
    return %c0_i32, %c0_i32_0 : i32, i32
  }
  func.func @transform_3(%arg0: i32, %arg1: i32) -> (i32, i32) {
    %c0_i32 = arith.constant 0 : i32
    %c0_i32_0 = arith.constant 0 : i32
    %c0_i32_1 = arith.constant 0 : i32
    return %c0_i32, %c0_i32_0 : i32, i32
  }
  func.func @transform_4(%arg0: i32, %arg1: i32) -> (i32, i32, i32, i32) {
    %c0_i32 = arith.constant 0 : i32
    %c0_i32_0 = arith.constant 0 : i32
    %c0_i32_1 = arith.constant 0 : i32
    return %arg0, %arg1, %c0_i32, %c0_i32_0 : i32, i32, i32, i32
  }
}

module attributes {stable_mosaic.version = 11 : i64} {
  func.func @_conv_tap_kernel(%arg0: i32, %arg1: i32, %arg2: memref<1x5x9x512xbf16, #tpu.memory_space<vmem>>, %arg3: memref<4x512x128xbf16, #tpu.memory_space<vmem>>, %arg4: memref<1x128xf32, #tpu.memory_space<vmem>>, %arg5: memref<1x128xf32, #tpu.memory_space<vmem>>, %arg6: memref<1x4x4x128xbf16, #tpu.memory_space<vmem>>) attributes {dimension_semantics = [#tpu.dimension_semantics<parallel>, #tpu.dimension_semantics<parallel>], iteration_bounds = array<i64: 2, 1>, scalar_prefetch = 0 : i64, scratch_operands = 0 : i64, tpu.core_type = #tpu.core_type<tc>, window_params = [{transform_indices = @transform_0, window_bounds = array<i64: 1, 5, 9, 512>}, {pipeline_mode = #tpu.pipeline_mode<synchronous>, transform_indices = @transform_1, window_bounds = array<i64: 4, 512, 128>}, {pipeline_mode = #tpu.pipeline_mode<synchronous>, transform_indices = @transform_2, window_bounds = array<i64: 1, 128>}, {pipeline_mode = #tpu.pipeline_mode<synchronous>, transform_indices = @transform_3, window_bounds = array<i64: 1, 128>}, {transform_indices = @transform_4, window_bounds = array<i64: 1, 4, 4, 128>}]} {
    %c4_i32 = arith.constant 4 : i32
    %0 = arith.muli %arg1, %c4_i32 : i32
    %c0 = arith.constant 0 : index
    %1 = arith.index_cast %0 : i32 to index
    %c0_0 = arith.constant 0 : index
    %c0_1 = arith.constant 0 : index
    %2 = vector.load %arg2[%c0, %1, %c0_0, %c0_1] : memref<1x5x9x512xbf16, #tpu.memory_space<vmem>>, vector<1x5x9x512xbf16>
    %3 = vector.shape_cast %2 : vector<1x5x9x512xbf16> to vector<5x9x512xbf16>
    %4 = vector.extract_strided_slice %3 {offsets = [0, 0, 0], sizes = [4, 8, 512], strides = [1, 1, 1]} : vector<5x9x512xbf16> to vector<4x8x512xbf16>
    %5 = vector.shape_cast %4 : vector<4x8x512xbf16> to vector<32x512xbf16>
    %c0_2 = arith.constant 0 : index
    %c0_3 = arith.constant 0 : index
    %c0_4 = arith.constant 0 : index
    %6 = vector.load %arg3[%c0_2, %c0_3, %c0_4] : memref<4x512x128xbf16, #tpu.memory_space<vmem>>, vector<1x512x128xbf16>
    %7 = vector.shape_cast %6 : vector<1x512x128xbf16> to vector<512x128xbf16>
    %cst = arith.constant dense<0.000000e+00> : vector<32x128xf32>
    %8 = tpu.matmul %5, %7, %cst {dimension_numbers = #tpu.dot_dimension_numbers<[1], [0], [0], [1], [0, 0, 1, 1], [], []>} : vector<32x512xbf16>, vector<512x128xbf16>, vector<32x128xf32> -> vector<32x128xf32>
    %9 = vector.extract_strided_slice %3 {offsets = [0, 1, 0], sizes = [4, 8, 512], strides = [1, 1, 1]} : vector<5x9x512xbf16> to vector<4x8x512xbf16>
    %10 = vector.shape_cast %9 : vector<4x8x512xbf16> to vector<32x512xbf16>
    %c1 = arith.constant 1 : index
    %c0_5 = arith.constant 0 : index
    %c0_6 = arith.constant 0 : index
    %11 = vector.load %arg3[%c1, %c0_5, %c0_6] : memref<4x512x128xbf16, #tpu.memory_space<vmem>>, vector<1x512x128xbf16>
    %12 = vector.shape_cast %11 : vector<1x512x128xbf16> to vector<512x128xbf16>
    %cst_7 = arith.constant dense<0.000000e+00> : vector<32x128xf32>
    %13 = tpu.matmul %10, %12, %cst_7 {dimension_numbers = #tpu.dot_dimension_numbers<[1], [0], [0], [1], [0, 0, 1, 1], [], []>} : vector<32x512xbf16>, vector<512x128xbf16>, vector<32x128xf32> -> vector<32x128xf32>
    %14 = arith.addf %8, %13 : vector<32x128xf32>
    %15 = vector.extract_strided_slice %3 {offsets = [1, 0, 0], sizes = [4, 8, 512], strides = [1, 1, 1]} : vector<5x9x512xbf16> to vector<4x8x512xbf16>
    %16 = vector.shape_cast %15 : vector<4x8x512xbf16> to vector<32x512xbf16>
    %c2 = arith.constant 2 : index
    %c0_8 = arith.constant 0 : index
    %c0_9 = arith.constant 0 : index
    %17 = vector.load %arg3[%c2, %c0_8, %c0_9] : memref<4x512x128xbf16, #tpu.memory_space<vmem>>, vector<1x512x128xbf16>
    %18 = vector.shape_cast %17 : vector<1x512x128xbf16> to vector<512x128xbf16>
    %cst_10 = arith.constant dense<0.000000e+00> : vector<32x128xf32>
    %19 = tpu.matmul %16, %18, %cst_10 {dimension_numbers = #tpu.dot_dimension_numbers<[1], [0], [0], [1], [0, 0, 1, 1], [], []>} : vector<32x512xbf16>, vector<512x128xbf16>, vector<32x128xf32> -> vector<32x128xf32>
    %20 = arith.addf %14, %19 : vector<32x128xf32>
    %21 = vector.extract_strided_slice %3 {offsets = [1, 1, 0], sizes = [4, 8, 512], strides = [1, 1, 1]} : vector<5x9x512xbf16> to vector<4x8x512xbf16>
    %22 = vector.shape_cast %21 : vector<4x8x512xbf16> to vector<32x512xbf16>
    %c3 = arith.constant 3 : index
    %c0_11 = arith.constant 0 : index
    %c0_12 = arith.constant 0 : index
    %23 = vector.load %arg3[%c3, %c0_11, %c0_12] : memref<4x512x128xbf16, #tpu.memory_space<vmem>>, vector<1x512x128xbf16>
    %24 = vector.shape_cast %23 : vector<1x512x128xbf16> to vector<512x128xbf16>
    %cst_13 = arith.constant dense<0.000000e+00> : vector<32x128xf32>
    %25 = tpu.matmul %22, %24, %cst_13 {dimension_numbers = #tpu.dot_dimension_numbers<[1], [0], [0], [1], [0, 0, 1, 1], [], []>} : vector<32x512xbf16>, vector<512x128xbf16>, vector<32x128xf32> -> vector<32x128xf32>
    %26 = arith.addf %20, %25 : vector<32x128xf32>
    %c0_14 = arith.constant 0 : index
    %c0_15 = arith.constant 0 : index
    %27 = vector.load %arg4[%c0_14, %c0_15] : memref<1x128xf32, #tpu.memory_space<vmem>>, vector<1x128xf32>
    %28 = vector.broadcast %27 : vector<1x128xf32> to vector<32x128xf32>
    %29 = arith.mulf %26, %28 : vector<32x128xf32>
    %c0_16 = arith.constant 0 : index
    %c0_17 = arith.constant 0 : index
    %30 = vector.load %arg5[%c0_16, %c0_17] : memref<1x128xf32, #tpu.memory_space<vmem>>, vector<1x128xf32>
    %31 = vector.broadcast %30 : vector<1x128xf32> to vector<32x128xf32>
    %32 = arith.addf %29, %31 : vector<32x128xf32>
    %cst_18 = arith.constant 0.000000e+00 : f32
    %33 = vector.broadcast %cst_18 : f32 to vector<32x128xf32>
    %34 = arith.cmpf oge, %32, %33 : vector<32x128xf32>
    %cst_19 = arith.constant 2.000000e-01 : f32
    %35 = vector.broadcast %cst_19 : f32 to vector<32x128xf32>
    %36 = arith.mulf %35, %32 : vector<32x128xf32>
    %37 = arith.select %34, %32, %36 : vector<32x128xi1>, vector<32x128xf32>
    %38 = vector.shape_cast %37 : vector<32x128xf32> to vector<4x8x128xf32>
    %39 = vector.extract_strided_slice %38 {offsets = [0, 0, 0], sizes = [4, 4, 128], strides = [1, 1, 1]} : vector<4x8x128xf32> to vector<4x4x128xf32>
    %40 = arith.truncf %39 : vector<4x4x128xf32> to vector<4x4x128xbf16>
    %c0_20 = arith.constant 0 : index
    %c0_21 = arith.constant 0 : index
    %c0_22 = arith.constant 0 : index
    %c0_23 = arith.constant 0 : index
    %41 = vector.load %arg6[%c0_20, %c0_21, %c0_22, %c0_23] : memref<1x4x4x128xbf16, #tpu.memory_space<vmem>>, vector<1x4x4x128xbf16>
    %42 = vector.shape_cast %41 : vector<1x4x4x128xbf16> to vector<4x4x128xbf16>
    %43 = vector.shape_cast %40 : vector<4x4x128xbf16> to vector<1x4x4x128xbf16>
    tpu.vector_store %arg6[%c0_20, %c0_21, %c0_22, %c0_23], %43 {strides = array<i32>} : memref<1x4x4x128xbf16, #tpu.memory_space<vmem>>, vector<1x4x4x128xbf16>,
    return
  }
  func.func @transform_0(%arg0: i32, %arg1: i32) -> (i32, i32, i32, i32) {
    %c0_i32 = arith.constant 0 : i32
    %c0_i32_0 = arith.constant 0 : i32
    %c0_i32_1 = arith.constant 0 : i32
    %c0_i32_2 = arith.constant 0 : i32
    return %arg0, %c0_i32, %c0_i32_0, %c0_i32_1 : i32, i32, i32, i32
  }
  func.func @transform_1(%arg0: i32, %arg1: i32) -> (i32, i32, i32) {
    %c0_i32 = arith.constant 0 : i32
    %c0_i32_0 = arith.constant 0 : i32
    %c0_i32_1 = arith.constant 0 : i32
    %c0_i32_2 = arith.constant 0 : i32
    return %c0_i32, %c0_i32_0, %c0_i32_1 : i32, i32, i32
  }
  func.func @transform_2(%arg0: i32, %arg1: i32) -> (i32, i32) {
    %c0_i32 = arith.constant 0 : i32
    %c0_i32_0 = arith.constant 0 : i32
    %c0_i32_1 = arith.constant 0 : i32
    return %c0_i32, %c0_i32_0 : i32, i32
  }
  func.func @transform_3(%arg0: i32, %arg1: i32) -> (i32, i32) {
    %c0_i32 = arith.constant 0 : i32
    %c0_i32_0 = arith.constant 0 : i32
    %c0_i32_1 = arith.constant 0 : i32
    return %c0_i32, %c0_i32_0 : i32, i32
  }
  func.func @transform_4(%arg0: i32, %arg1: i32) -> (i32, i32, i32, i32) {
    %c0_i32 = arith.constant 0 : i32
    %c0_i32_0 = arith.constant 0 : i32
    %c0_i32_1 = arith.constant 0 : i32
    return %arg0, %arg1, %c0_i32, %c0_i32_0 : i32, i32, i32, i32
  }
}

module attributes {stable_mosaic.version = 11 : i64} {
  func.func @_conv_tap_kernel(%arg0: i32, %arg1: i32, %arg2: memref<1x6x11x128xbf16, #tpu.memory_space<vmem>>, %arg3: memref<16x128x128xbf16, #tpu.memory_space<vmem>>, %arg4: memref<1x128xf32, #tpu.memory_space<vmem>>, %arg5: memref<1x128xf32, #tpu.memory_space<vmem>>, %arg6: memref<1x3x3x128xbf16, #tpu.memory_space<vmem>>) attributes {dimension_semantics = [#tpu.dimension_semantics<parallel>, #tpu.dimension_semantics<parallel>], iteration_bounds = array<i64: 2, 1>, scalar_prefetch = 0 : i64, scratch_operands = 0 : i64, tpu.core_type = #tpu.core_type<tc>, window_params = [{transform_indices = @transform_0, window_bounds = array<i64: 1, 6, 11, 128>}, {pipeline_mode = #tpu.pipeline_mode<synchronous>, transform_indices = @transform_1, window_bounds = array<i64: 16, 128, 128>}, {pipeline_mode = #tpu.pipeline_mode<synchronous>, transform_indices = @transform_2, window_bounds = array<i64: 1, 128>}, {pipeline_mode = #tpu.pipeline_mode<synchronous>, transform_indices = @transform_3, window_bounds = array<i64: 1, 128>}, {transform_indices = @transform_4, window_bounds = array<i64: 1, 3, 3, 128>}]} {
    %c3_i32 = arith.constant 3 : i32
    %0 = arith.muli %arg1, %c3_i32 : i32
    %c0 = arith.constant 0 : index
    %1 = arith.index_cast %0 : i32 to index
    %c0_0 = arith.constant 0 : index
    %c0_1 = arith.constant 0 : index
    %2 = vector.load %arg2[%c0, %1, %c0_0, %c0_1] : memref<1x6x11x128xbf16, #tpu.memory_space<vmem>>, vector<1x6x11x128xbf16>
    %3 = vector.shape_cast %2 : vector<1x6x11x128xbf16> to vector<6x11x128xbf16>
    %4 = vector.extract_strided_slice %3 {offsets = [0, 0, 0], sizes = [3, 8, 128], strides = [1, 1, 1]} : vector<6x11x128xbf16> to vector<3x8x128xbf16>
    %5 = vector.shape_cast %4 : vector<3x8x128xbf16> to vector<24x128xbf16>
    %c0_2 = arith.constant 0 : index
    %c0_3 = arith.constant 0 : index
    %c0_4 = arith.constant 0 : index
    %6 = vector.load %arg3[%c0_2, %c0_3, %c0_4] : memref<16x128x128xbf16, #tpu.memory_space<vmem>>, vector<1x128x128xbf16>
    %7 = vector.shape_cast %6 : vector<1x128x128xbf16> to vector<128x128xbf16>
    %cst = arith.constant dense<0.000000e+00> : vector<24x128xf32>
    %8 = tpu.matmul %5, %7, %cst {dimension_numbers = #tpu.dot_dimension_numbers<[1], [0], [0], [1], [0, 0, 1, 1], [], []>} : vector<24x128xbf16>, vector<128x128xbf16>, vector<24x128xf32> -> vector<24x128xf32>
    %9 = vector.extract_strided_slice %3 {offsets = [0, 1, 0], sizes = [3, 8, 128], strides = [1, 1, 1]} : vector<6x11x128xbf16> to vector<3x8x128xbf16>
    %10 = vector.shape_cast %9 : vector<3x8x128xbf16> to vector<24x128xbf16>
    %c1 = arith.constant 1 : index
    %c0_5 = arith.constant 0 : index
    %c0_6 = arith.constant 0 : index
    %11 = vector.load %arg3[%c1, %c0_5, %c0_6] : memref<16x128x128xbf16, #tpu.memory_space<vmem>>, vector<1x128x128xbf16>
    %12 = vector.shape_cast %11 : vector<1x128x128xbf16> to vector<128x128xbf16>
    %cst_7 = arith.constant dense<0.000000e+00> : vector<24x128xf32>
    %13 = tpu.matmul %10, %12, %cst_7 {dimension_numbers = #tpu.dot_dimension_numbers<[1], [0], [0], [1], [0, 0, 1, 1], [], []>} : vector<24x128xbf16>, vector<128x128xbf16>, vector<24x128xf32> -> vector<24x128xf32>
    %14 = arith.addf %8, %13 : vector<24x128xf32>
    %15 = vector.extract_strided_slice %3 {offsets = [0, 2, 0], sizes = [3, 8, 128], strides = [1, 1, 1]} : vector<6x11x128xbf16> to vector<3x8x128xbf16>
    %16 = vector.shape_cast %15 : vector<3x8x128xbf16> to vector<24x128xbf16>
    %c2 = arith.constant 2 : index
    %c0_8 = arith.constant 0 : index
    %c0_9 = arith.constant 0 : index
    %17 = vector.load %arg3[%c2, %c0_8, %c0_9] : memref<16x128x128xbf16, #tpu.memory_space<vmem>>, vector<1x128x128xbf16>
    %18 = vector.shape_cast %17 : vector<1x128x128xbf16> to vector<128x128xbf16>
    %cst_10 = arith.constant dense<0.000000e+00> : vector<24x128xf32>
    %19 = tpu.matmul %16, %18, %cst_10 {dimension_numbers = #tpu.dot_dimension_numbers<[1], [0], [0], [1], [0, 0, 1, 1], [], []>} : vector<24x128xbf16>, vector<128x128xbf16>, vector<24x128xf32> -> vector<24x128xf32>
    %20 = arith.addf %14, %19 : vector<24x128xf32>
    %21 = vector.extract_strided_slice %3 {offsets = [0, 3, 0], sizes = [3, 8, 128], strides = [1, 1, 1]} : vector<6x11x128xbf16> to vector<3x8x128xbf16>
    %22 = vector.shape_cast %21 : vector<3x8x128xbf16> to vector<24x128xbf16>
    %c3 = arith.constant 3 : index
    %c0_11 = arith.constant 0 : index
    %c0_12 = arith.constant 0 : index
    %23 = vector.load %arg3[%c3, %c0_11, %c0_12] : memref<16x128x128xbf16, #tpu.memory_space<vmem>>, vector<1x128x128xbf16>
    %24 = vector.shape_cast %23 : vector<1x128x128xbf16> to vector<128x128xbf16>
    %cst_13 = arith.constant dense<0.000000e+00> : vector<24x128xf32>
    %25 = tpu.matmul %22, %24, %cst_13 {dimension_numbers = #tpu.dot_dimension_numbers<[1], [0], [0], [1], [0, 0, 1, 1], [], []>} : vector<24x128xbf16>, vector<128x128xbf16>, vector<24x128xf32> -> vector<24x128xf32>
    %26 = arith.addf %20, %25 : vector<24x128xf32>
    %27 = vector.extract_strided_slice %3 {offsets = [1, 0, 0], sizes = [3, 8, 128], strides = [1, 1, 1]} : vector<6x11x128xbf16> to vector<3x8x128xbf16>
    %28 = vector.shape_cast %27 : vector<3x8x128xbf16> to vector<24x128xbf16>
    %c4 = arith.constant 4 : index
    %c0_14 = arith.constant 0 : index
    %c0_15 = arith.constant 0 : index
    %29 = vector.load %arg3[%c4, %c0_14, %c0_15] : memref<16x128x128xbf16, #tpu.memory_space<vmem>>, vector<1x128x128xbf16>
    %30 = vector.shape_cast %29 : vector<1x128x128xbf16> to vector<128x128xbf16>
    %cst_16 = arith.constant dense<0.000000e+00> : vector<24x128xf32>
    %31 = tpu.matmul %28, %30, %cst_16 {dimension_numbers = #tpu.dot_dimension_numbers<[1], [0], [0], [1], [0, 0, 1, 1], [], []>} : vector<24x128xbf16>, vector<128x128xbf16>, vector<24x128xf32> -> vector<24x128xf32>
    %32 = arith.addf %26, %31 : vector<24x128xf32>
    %33 = vector.extract_strided_slice %3 {offsets = [1, 1, 0], sizes = [3, 8, 128], strides = [1, 1, 1]} : vector<6x11x128xbf16> to vector<3x8x128xbf16>
    %34 = vector.shape_cast %33 : vector<3x8x128xbf16> to vector<24x128xbf16>
    %c5 = arith.constant 5 : index
    %c0_17 = arith.constant 0 : index
    %c0_18 = arith.constant 0 : index
    %35 = vector.load %arg3[%c5, %c0_17, %c0_18] : memref<16x128x128xbf16, #tpu.memory_space<vmem>>, vector<1x128x128xbf16>
    %36 = vector.shape_cast %35 : vector<1x128x128xbf16> to vector<128x128xbf16>
    %cst_19 = arith.constant dense<0.000000e+00> : vector<24x128xf32>
    %37 = tpu.matmul %34, %36, %cst_19 {dimension_numbers = #tpu.dot_dimension_numbers<[1], [0], [0], [1], [0, 0, 1, 1], [], []>} : vector<24x128xbf16>, vector<128x128xbf16>, vector<24x128xf32> -> vector<24x128xf32>
    %38 = arith.addf %32, %37 : vector<24x128xf32>
    %39 = vector.extract_strided_slice %3 {offsets = [1, 2, 0], sizes = [3, 8, 128], strides = [1, 1, 1]} : vector<6x11x128xbf16> to vector<3x8x128xbf16>
    %40 = vector.shape_cast %39 : vector<3x8x128xbf16> to vector<24x128xbf16>
    %c6 = arith.constant 6 : index
    %c0_20 = arith.constant 0 : index
    %c0_21 = arith.constant 0 : index
    %41 = vector.load %arg3[%c6, %c0_20, %c0_21] : memref<16x128x128xbf16, #tpu.memory_space<vmem>>, vector<1x128x128xbf16>
    %42 = vector.shape_cast %41 : vector<1x128x128xbf16> to vector<128x128xbf16>
    %cst_22 = arith.constant dense<0.000000e+00> : vector<24x128xf32>
    %43 = tpu.matmul %40, %42, %cst_22 {dimension_numbers = #tpu.dot_dimension_numbers<[1], [0], [0], [1], [0, 0, 1, 1], [], []>} : vector<24x128xbf16>, vector<128x128xbf16>, vector<24x128xf32> -> vector<24x128xf32>
    %44 = arith.addf %38, %43 : vector<24x128xf32>
    %45 = vector.extract_strided_slice %3 {offsets = [1, 3, 0], sizes = [3, 8, 128], strides = [1, 1, 1]} : vector<6x11x128xbf16> to vector<3x8x128xbf16>
    %46 = vector.shape_cast %45 : vector<3x8x128xbf16> to vector<24x128xbf16>
    %c7 = arith.constant 7 : index
    %c0_23 = arith.constant 0 : index
    %c0_24 = arith.constant 0 : index
    %47 = vector.load %arg3[%c7, %c0_23, %c0_24] : memref<16x128x128xbf16, #tpu.memory_space<vmem>>, vector<1x128x128xbf16>
    %48 = vector.shape_cast %47 : vector<1x128x128xbf16> to vector<128x128xbf16>
    %cst_25 = arith.constant dense<0.000000e+00> : vector<24x128xf32>
    %49 = tpu.matmul %46, %48, %cst_25 {dimension_numbers = #tpu.dot_dimension_numbers<[1], [0], [0], [1], [0, 0, 1, 1], [], []>} : vector<24x128xbf16>, vector<128x128xbf16>, vector<24x128xf32> -> vector<24x128xf32>
    %50 = arith.addf %44, %49 : vector<24x128xf32>
    %51 = vector.extract_strided_slice %3 {offsets = [2, 0, 0], sizes = [3, 8, 128], strides = [1, 1, 1]} : vector<6x11x128xbf16> to vector<3x8x128xbf16>
    %52 = vector.shape_cast %51 : vector<3x8x128xbf16> to vector<24x128xbf16>
    %c8 = arith.constant 8 : index
    %c0_26 = arith.constant 0 : index
    %c0_27 = arith.constant 0 : index
    %53 = vector.load %arg3[%c8, %c0_26, %c0_27] : memref<16x128x128xbf16, #tpu.memory_space<vmem>>, vector<1x128x128xbf16>
    %54 = vector.shape_cast %53 : vector<1x128x128xbf16> to vector<128x128xbf16>
    %cst_28 = arith.constant dense<0.000000e+00> : vector<24x128xf32>
    %55 = tpu.matmul %52, %54, %cst_28 {dimension_numbers = #tpu.dot_dimension_numbers<[1], [0], [0], [1], [0, 0, 1, 1], [], []>} : vector<24x128xbf16>, vector<128x128xbf16>, vector<24x128xf32> -> vector<24x128xf32>
    %56 = arith.addf %50, %55 : vector<24x128xf32>
    %57 = vector.extract_strided_slice %3 {offsets = [2, 1, 0], sizes = [3, 8, 128], strides = [1, 1, 1]} : vector<6x11x128xbf16> to vector<3x8x128xbf16>
    %58 = vector.shape_cast %57 : vector<3x8x128xbf16> to vector<24x128xbf16>
    %c9 = arith.constant 9 : index
    %c0_29 = arith.constant 0 : index
    %c0_30 = arith.constant 0 : index
    %59 = vector.load %arg3[%c9, %c0_29, %c0_30] : memref<16x128x128xbf16, #tpu.memory_space<vmem>>, vector<1x128x128xbf16>
    %60 = vector.shape_cast %59 : vector<1x128x128xbf16> to vector<128x128xbf16>
    %cst_31 = arith.constant dense<0.000000e+00> : vector<24x128xf32>
    %61 = tpu.matmul %58, %60, %cst_31 {dimension_numbers = #tpu.dot_dimension_numbers<[1], [0], [0], [1], [0, 0, 1, 1], [], []>} : vector<24x128xbf16>, vector<128x128xbf16>, vector<24x128xf32> -> vector<24x128xf32>
    %62 = arith.addf %56, %61 : vector<24x128xf32>
    %63 = vector.extract_strided_slice %3 {offsets = [2, 2, 0], sizes = [3, 8, 128], strides = [1, 1, 1]} : vector<6x11x128xbf16> to vector<3x8x128xbf16>
    %64 = vector.shape_cast %63 : vector<3x8x128xbf16> to vector<24x128xbf16>
    %c10 = arith.constant 10 : index
    %c0_32 = arith.constant 0 : index
    %c0_33 = arith.constant 0 : index
    %65 = vector.load %arg3[%c10, %c0_32, %c0_33] : memref<16x128x128xbf16, #tpu.memory_space<vmem>>, vector<1x128x128xbf16>
    %66 = vector.shape_cast %65 : vector<1x128x128xbf16> to vector<128x128xbf16>
    %cst_34 = arith.constant dense<0.000000e+00> : vector<24x128xf32>
    %67 = tpu.matmul %64, %66, %cst_34 {dimension_numbers = #tpu.dot_dimension_numbers<[1], [0], [0], [1], [0, 0, 1, 1], [], []>} : vector<24x128xbf16>, vector<128x128xbf16>, vector<24x128xf32> -> vector<24x128xf32>
    %68 = arith.addf %62, %67 : vector<24x128xf32>
    %69 = vector.extract_strided_slice %3 {offsets = [2, 3, 0], sizes = [3, 8, 128], strides = [1, 1, 1]} : vector<6x11x128xbf16> to vector<3x8x128xbf16>
    %70 = vector.shape_cast %69 : vector<3x8x128xbf16> to vector<24x128xbf16>
    %c11 = arith.constant 11 : index
    %c0_35 = arith.constant 0 : index
    %c0_36 = arith.constant 0 : index
    %71 = vector.load %arg3[%c11, %c0_35, %c0_36] : memref<16x128x128xbf16, #tpu.memory_space<vmem>>, vector<1x128x128xbf16>
    %72 = vector.shape_cast %71 : vector<1x128x128xbf16> to vector<128x128xbf16>
    %cst_37 = arith.constant dense<0.000000e+00> : vector<24x128xf32>
    %73 = tpu.matmul %70, %72, %cst_37 {dimension_numbers = #tpu.dot_dimension_numbers<[1], [0], [0], [1], [0, 0, 1, 1], [], []>} : vector<24x128xbf16>, vector<128x128xbf16>, vector<24x128xf32> -> vector<24x128xf32>
    %74 = arith.addf %68, %73 : vector<24x128xf32>
    %75 = vector.extract_strided_slice %3 {offsets = [3, 0, 0], sizes = [3, 8, 128], strides = [1, 1, 1]} : vector<6x11x128xbf16> to vector<3x8x128xbf16>
    %76 = vector.shape_cast %75 : vector<3x8x128xbf16> to vector<24x128xbf16>
    %c12 = arith.constant 12 : index
    %c0_38 = arith.constant 0 : index
    %c0_39 = arith.constant 0 : index
    %77 = vector.load %arg3[%c12, %c0_38, %c0_39] : memref<16x128x128xbf16, #tpu.memory_space<vmem>>, vector<1x128x128xbf16>
    %78 = vector.shape_cast %77 : vector<1x128x128xbf16> to vector<128x128xbf16>
    %cst_40 = arith.constant dense<0.000000e+00> : vector<24x128xf32>
    %79 = tpu.matmul %76, %78, %cst_40 {dimension_numbers = #tpu.dot_dimension_numbers<[1], [0], [0], [1], [0, 0, 1, 1], [], []>} : vector<24x128xbf16>, vector<128x128xbf16>, vector<24x128xf32> -> vector<24x128xf32>
    %80 = arith.addf %74, %79 : vector<24x128xf32>
    %81 = vector.extract_strided_slice %3 {offsets = [3, 1, 0], sizes = [3, 8, 128], strides = [1, 1, 1]} : vector<6x11x128xbf16> to vector<3x8x128xbf16>
    %82 = vector.shape_cast %81 : vector<3x8x128xbf16> to vector<24x128xbf16>
    %c13 = arith.constant 13 : index
    %c0_41 = arith.constant 0 : index
    %c0_42 = arith.constant 0 : index
    %83 = vector.load %arg3[%c13, %c0_41, %c0_42] : memref<16x128x128xbf16, #tpu.memory_space<vmem>>, vector<1x128x128xbf16>
    %84 = vector.shape_cast %83 : vector<1x128x128xbf16> to vector<128x128xbf16>
    %cst_43 = arith.constant dense<0.000000e+00> : vector<24x128xf32>
    %85 = tpu.matmul %82, %84, %cst_43 {dimension_numbers = #tpu.dot_dimension_numbers<[1], [0], [0], [1], [0, 0, 1, 1], [], []>} : vector<24x128xbf16>, vector<128x128xbf16>, vector<24x128xf32> -> vector<24x128xf32>
    %86 = arith.addf %80, %85 : vector<24x128xf32>
    %87 = vector.extract_strided_slice %3 {offsets = [3, 2, 0], sizes = [3, 8, 128], strides = [1, 1, 1]} : vector<6x11x128xbf16> to vector<3x8x128xbf16>
    %88 = vector.shape_cast %87 : vector<3x8x128xbf16> to vector<24x128xbf16>
    %c14 = arith.constant 14 : index
    %c0_44 = arith.constant 0 : index
    %c0_45 = arith.constant 0 : index
    %89 = vector.load %arg3[%c14, %c0_44, %c0_45] : memref<16x128x128xbf16, #tpu.memory_space<vmem>>, vector<1x128x128xbf16>
    %90 = vector.shape_cast %89 : vector<1x128x128xbf16> to vector<128x128xbf16>
    %cst_46 = arith.constant dense<0.000000e+00> : vector<24x128xf32>
    %91 = tpu.matmul %88, %90, %cst_46 {dimension_numbers = #tpu.dot_dimension_numbers<[1], [0], [0], [1], [0, 0, 1, 1], [], []>} : vector<24x128xbf16>, vector<128x128xbf16>, vector<24x128xf32> -> vector<24x128xf32>
    %92 = arith.addf %86, %91 : vector<24x128xf32>
    %93 = vector.extract_strided_slice %3 {offsets = [3, 3, 0], sizes = [3, 8, 128], strides = [1, 1, 1]} : vector<6x11x128xbf16> to vector<3x8x128xbf16>
    %94 = vector.shape_cast %93 : vector<3x8x128xbf16> to vector<24x128xbf16>
    %c15 = arith.constant 15 : index
    %c0_47 = arith.constant 0 : index
    %c0_48 = arith.constant 0 : index
    %95 = vector.load %arg3[%c15, %c0_47, %c0_48] : memref<16x128x128xbf16, #tpu.memory_space<vmem>>, vector<1x128x128xbf16>
    %96 = vector.shape_cast %95 : vector<1x128x128xbf16> to vector<128x128xbf16>
    %cst_49 = arith.constant dense<0.000000e+00> : vector<24x128xf32>
    %97 = tpu.matmul %94, %96, %cst_49 {dimension_numbers = #tpu.dot_dimension_numbers<[1], [0], [0], [1], [0, 0, 1, 1], [], []>} : vector<24x128xbf16>, vector<128x128xbf16>, vector<24x128xf32> -> vector<24x128xf32>
    %98 = arith.addf %92, %97 : vector<24x128xf32>
    %c0_50 = arith.constant 0 : index
    %c0_51 = arith.constant 0 : index
    %99 = vector.load %arg4[%c0_50, %c0_51] : memref<1x128xf32, #tpu.memory_space<vmem>>, vector<1x128xf32>
    %100 = vector.broadcast %99 : vector<1x128xf32> to vector<24x128xf32>
    %101 = arith.mulf %98, %100 : vector<24x128xf32>
    %c0_52 = arith.constant 0 : index
    %c0_53 = arith.constant 0 : index
    %102 = vector.load %arg5[%c0_52, %c0_53] : memref<1x128xf32, #tpu.memory_space<vmem>>, vector<1x128xf32>
    %103 = vector.broadcast %102 : vector<1x128xf32> to vector<24x128xf32>
    %104 = arith.addf %101, %103 : vector<24x128xf32>
    %cst_54 = arith.constant 0.000000e+00 : f32
    %105 = vector.broadcast %cst_54 : f32 to vector<24x128xf32>
    %106 = arith.cmpf oge, %104, %105 : vector<24x128xf32>
    %cst_55 = arith.constant 2.000000e-01 : f32
    %107 = vector.broadcast %cst_55 : f32 to vector<24x128xf32>
    %108 = arith.mulf %107, %104 : vector<24x128xf32>
    %109 = arith.select %106, %104, %108 : vector<24x128xi1>, vector<24x128xf32>
    %110 = vector.shape_cast %109 : vector<24x128xf32> to vector<3x8x128xf32>
    %111 = vector.extract_strided_slice %110 {offsets = [0, 0, 0], sizes = [3, 3, 128], strides = [1, 1, 1]} : vector<3x8x128xf32> to vector<3x3x128xf32>
    %112 = arith.truncf %111 : vector<3x3x128xf32> to vector<3x3x128xbf16>
    %c0_56 = arith.constant 0 : index
    %c0_57 = arith.constant 0 : index
    %c0_58 = arith.constant 0 : index
    %c0_59 = arith.constant 0 : index
    %113 = vector.load %arg6[%c0_56, %c0_57, %c0_58, %c0_59] : memref<1x3x3x128xbf16, #tpu.memory_space<vmem>>, vector<1x3x3x128xbf16>
    %114 = vector.shape_cast %113 : vector<1x3x3x128xbf16> to vector<3x3x128xbf16>
    %115 = vector.shape_cast %112 : vector<3x3x128xbf16> to vector<1x3x3x128xbf16>
    tpu.vector_store %arg6[%c0_56, %c0_57, %c0_58, %c0_59], %115 {strides = array<i32>} : memref<1x3x3x128xbf16, #tpu.memory_space<vmem>>, vector<1x3x3x128xbf16>,
    return
  }
  func.func @transform_0(%arg0: i32, %arg1: i32) -> (i32, i32, i32, i32) {
    %c0_i32 = arith.constant 0 : i32
    %c0_i32_0 = arith.constant 0 : i32
    %c0_i32_1 = arith.constant 0 : i32
    %c0_i32_2 = arith.constant 0 : i32
    return %arg0, %c0_i32, %c0_i32_0, %c0_i32_1 : i32, i32, i32, i32
  }
  func.func @transform_1(%arg0: i32, %arg1: i32) -> (i32, i32, i32) {
    %c0_i32 = arith.constant 0 : i32
    %c0_i32_0 = arith.constant 0 : i32
    %c0_i32_1 = arith.constant 0 : i32
    %c0_i32_2 = arith.constant 0 : i32
    return %c0_i32, %c0_i32_0, %c0_i32_1 : i32, i32, i32
  }
  func.func @transform_2(%arg0: i32, %arg1: i32) -> (i32, i32) {
    %c0_i32 = arith.constant 0 : i32
    %c0_i32_0 = arith.constant 0 : i32
    %c0_i32_1 = arith.constant 0 : i32
    return %c0_i32, %c0_i32_0 : i32, i32
  }
  func.func @transform_3(%arg0: i32, %arg1: i32) -> (i32, i32) {
    %c0_i32 = arith.constant 0 : i32
    %c0_i32_0 = arith.constant 0 : i32
    %c0_i32_1 = arith.constant 0 : i32
    return %c0_i32, %c0_i32_0 : i32, i32
  }
  func.func @transform_4(%arg0: i32, %arg1: i32) -> (i32, i32, i32, i32) {
    %c0_i32 = arith.constant 0 : i32
    %c0_i32_0 = arith.constant 0 : i32
    %c0_i32_1 = arith.constant 0 : i32
    return %arg0, %arg1, %c0_i32, %c0_i32_0 : i32, i32, i32, i32
  }
}

module attributes {stable_mosaic.version = 11 : i64} {
  func.func @_conv_tap_kernel(%arg0: i32, %arg1: i32, %arg2: memref<1x5x11x128xbf16, #tpu.memory_space<vmem>>, %arg3: memref<16x128x128xbf16, #tpu.memory_space<vmem>>, %arg4: memref<1x128xf32, #tpu.memory_space<vmem>>, %arg5: memref<1x128xf32, #tpu.memory_space<vmem>>, %arg6: memref<1x2x2x128xf32, #tpu.memory_space<vmem>>) attributes {dimension_semantics = [#tpu.dimension_semantics<parallel>, #tpu.dimension_semantics<parallel>], iteration_bounds = array<i64: 2, 1>, scalar_prefetch = 0 : i64, scratch_operands = 0 : i64, tpu.core_type = #tpu.core_type<tc>, window_params = [{transform_indices = @transform_0, window_bounds = array<i64: 1, 5, 11, 128>}, {pipeline_mode = #tpu.pipeline_mode<synchronous>, transform_indices = @transform_1, window_bounds = array<i64: 16, 128, 128>}, {pipeline_mode = #tpu.pipeline_mode<synchronous>, transform_indices = @transform_2, window_bounds = array<i64: 1, 128>}, {pipeline_mode = #tpu.pipeline_mode<synchronous>, transform_indices = @transform_3, window_bounds = array<i64: 1, 128>}, {transform_indices = @transform_4, window_bounds = array<i64: 1, 2, 2, 128>}]} {
    %c2_i32 = arith.constant 2 : i32
    %0 = arith.muli %arg1, %c2_i32 : i32
    %c0 = arith.constant 0 : index
    %1 = arith.index_cast %0 : i32 to index
    %c0_0 = arith.constant 0 : index
    %c0_1 = arith.constant 0 : index
    %2 = vector.load %arg2[%c0, %1, %c0_0, %c0_1] : memref<1x5x11x128xbf16, #tpu.memory_space<vmem>>, vector<1x5x11x128xbf16>
    %3 = vector.shape_cast %2 : vector<1x5x11x128xbf16> to vector<5x11x128xbf16>
    %4 = vector.extract_strided_slice %3 {offsets = [0, 0, 0], sizes = [2, 8, 128], strides = [1, 1, 1]} : vector<5x11x128xbf16> to vector<2x8x128xbf16>
    %5 = vector.shape_cast %4 : vector<2x8x128xbf16> to vector<16x128xbf16>
    %c0_2 = arith.constant 0 : index
    %c0_3 = arith.constant 0 : index
    %c0_4 = arith.constant 0 : index
    %6 = vector.load %arg3[%c0_2, %c0_3, %c0_4] : memref<16x128x128xbf16, #tpu.memory_space<vmem>>, vector<1x128x128xbf16>
    %7 = vector.shape_cast %6 : vector<1x128x128xbf16> to vector<128x128xbf16>
    %cst = arith.constant dense<0.000000e+00> : vector<16x128xf32>
    %8 = tpu.matmul %5, %7, %cst {dimension_numbers = #tpu.dot_dimension_numbers<[1], [0], [0], [1], [0, 0, 1, 1], [], []>} : vector<16x128xbf16>, vector<128x128xbf16>, vector<16x128xf32> -> vector<16x128xf32>
    %9 = vector.extract_strided_slice %3 {offsets = [0, 1, 0], sizes = [2, 8, 128], strides = [1, 1, 1]} : vector<5x11x128xbf16> to vector<2x8x128xbf16>
    %10 = vector.shape_cast %9 : vector<2x8x128xbf16> to vector<16x128xbf16>
    %c1 = arith.constant 1 : index
    %c0_5 = arith.constant 0 : index
    %c0_6 = arith.constant 0 : index
    %11 = vector.load %arg3[%c1, %c0_5, %c0_6] : memref<16x128x128xbf16, #tpu.memory_space<vmem>>, vector<1x128x128xbf16>
    %12 = vector.shape_cast %11 : vector<1x128x128xbf16> to vector<128x128xbf16>
    %cst_7 = arith.constant dense<0.000000e+00> : vector<16x128xf32>
    %13 = tpu.matmul %10, %12, %cst_7 {dimension_numbers = #tpu.dot_dimension_numbers<[1], [0], [0], [1], [0, 0, 1, 1], [], []>} : vector<16x128xbf16>, vector<128x128xbf16>, vector<16x128xf32> -> vector<16x128xf32>
    %14 = arith.addf %8, %13 : vector<16x128xf32>
    %15 = vector.extract_strided_slice %3 {offsets = [0, 2, 0], sizes = [2, 8, 128], strides = [1, 1, 1]} : vector<5x11x128xbf16> to vector<2x8x128xbf16>
    %16 = vector.shape_cast %15 : vector<2x8x128xbf16> to vector<16x128xbf16>
    %c2 = arith.constant 2 : index
    %c0_8 = arith.constant 0 : index
    %c0_9 = arith.constant 0 : index
    %17 = vector.load %arg3[%c2, %c0_8, %c0_9] : memref<16x128x128xbf16, #tpu.memory_space<vmem>>, vector<1x128x128xbf16>
    %18 = vector.shape_cast %17 : vector<1x128x128xbf16> to vector<128x128xbf16>
    %cst_10 = arith.constant dense<0.000000e+00> : vector<16x128xf32>
    %19 = tpu.matmul %16, %18, %cst_10 {dimension_numbers = #tpu.dot_dimension_numbers<[1], [0], [0], [1], [0, 0, 1, 1], [], []>} : vector<16x128xbf16>, vector<128x128xbf16>, vector<16x128xf32> -> vector<16x128xf32>
    %20 = arith.addf %14, %19 : vector<16x128xf32>
    %21 = vector.extract_strided_slice %3 {offsets = [0, 3, 0], sizes = [2, 8, 128], strides = [1, 1, 1]} : vector<5x11x128xbf16> to vector<2x8x128xbf16>
    %22 = vector.shape_cast %21 : vector<2x8x128xbf16> to vector<16x128xbf16>
    %c3 = arith.constant 3 : index
    %c0_11 = arith.constant 0 : index
    %c0_12 = arith.constant 0 : index
    %23 = vector.load %arg3[%c3, %c0_11, %c0_12] : memref<16x128x128xbf16, #tpu.memory_space<vmem>>, vector<1x128x128xbf16>
    %24 = vector.shape_cast %23 : vector<1x128x128xbf16> to vector<128x128xbf16>
    %cst_13 = arith.constant dense<0.000000e+00> : vector<16x128xf32>
    %25 = tpu.matmul %22, %24, %cst_13 {dimension_numbers = #tpu.dot_dimension_numbers<[1], [0], [0], [1], [0, 0, 1, 1], [], []>} : vector<16x128xbf16>, vector<128x128xbf16>, vector<16x128xf32> -> vector<16x128xf32>
    %26 = arith.addf %20, %25 : vector<16x128xf32>
    %27 = vector.extract_strided_slice %3 {offsets = [1, 0, 0], sizes = [2, 8, 128], strides = [1, 1, 1]} : vector<5x11x128xbf16> to vector<2x8x128xbf16>
    %28 = vector.shape_cast %27 : vector<2x8x128xbf16> to vector<16x128xbf16>
    %c4 = arith.constant 4 : index
    %c0_14 = arith.constant 0 : index
    %c0_15 = arith.constant 0 : index
    %29 = vector.load %arg3[%c4, %c0_14, %c0_15] : memref<16x128x128xbf16, #tpu.memory_space<vmem>>, vector<1x128x128xbf16>
    %30 = vector.shape_cast %29 : vector<1x128x128xbf16> to vector<128x128xbf16>
    %cst_16 = arith.constant dense<0.000000e+00> : vector<16x128xf32>
    %31 = tpu.matmul %28, %30, %cst_16 {dimension_numbers = #tpu.dot_dimension_numbers<[1], [0], [0], [1], [0, 0, 1, 1], [], []>} : vector<16x128xbf16>, vector<128x128xbf16>, vector<16x128xf32> -> vector<16x128xf32>
    %32 = arith.addf %26, %31 : vector<16x128xf32>
    %33 = vector.extract_strided_slice %3 {offsets = [1, 1, 0], sizes = [2, 8, 128], strides = [1, 1, 1]} : vector<5x11x128xbf16> to vector<2x8x128xbf16>
    %34 = vector.shape_cast %33 : vector<2x8x128xbf16> to vector<16x128xbf16>
    %c5 = arith.constant 5 : index
    %c0_17 = arith.constant 0 : index
    %c0_18 = arith.constant 0 : index
    %35 = vector.load %arg3[%c5, %c0_17, %c0_18] : memref<16x128x128xbf16, #tpu.memory_space<vmem>>, vector<1x128x128xbf16>
    %36 = vector.shape_cast %35 : vector<1x128x128xbf16> to vector<128x128xbf16>
    %cst_19 = arith.constant dense<0.000000e+00> : vector<16x128xf32>
    %37 = tpu.matmul %34, %36, %cst_19 {dimension_numbers = #tpu.dot_dimension_numbers<[1], [0], [0], [1], [0, 0, 1, 1], [], []>} : vector<16x128xbf16>, vector<128x128xbf16>, vector<16x128xf32> -> vector<16x128xf32>
    %38 = arith.addf %32, %37 : vector<16x128xf32>
    %39 = vector.extract_strided_slice %3 {offsets = [1, 2, 0], sizes = [2, 8, 128], strides = [1, 1, 1]} : vector<5x11x128xbf16> to vector<2x8x128xbf16>
    %40 = vector.shape_cast %39 : vector<2x8x128xbf16> to vector<16x128xbf16>
    %c6 = arith.constant 6 : index
    %c0_20 = arith.constant 0 : index
    %c0_21 = arith.constant 0 : index
    %41 = vector.load %arg3[%c6, %c0_20, %c0_21] : memref<16x128x128xbf16, #tpu.memory_space<vmem>>, vector<1x128x128xbf16>
    %42 = vector.shape_cast %41 : vector<1x128x128xbf16> to vector<128x128xbf16>
    %cst_22 = arith.constant dense<0.000000e+00> : vector<16x128xf32>
    %43 = tpu.matmul %40, %42, %cst_22 {dimension_numbers = #tpu.dot_dimension_numbers<[1], [0], [0], [1], [0, 0, 1, 1], [], []>} : vector<16x128xbf16>, vector<128x128xbf16>, vector<16x128xf32> -> vector<16x128xf32>
    %44 = arith.addf %38, %43 : vector<16x128xf32>
    %45 = vector.extract_strided_slice %3 {offsets = [1, 3, 0], sizes = [2, 8, 128], strides = [1, 1, 1]} : vector<5x11x128xbf16> to vector<2x8x128xbf16>
    %46 = vector.shape_cast %45 : vector<2x8x128xbf16> to vector<16x128xbf16>
    %c7 = arith.constant 7 : index
    %c0_23 = arith.constant 0 : index
    %c0_24 = arith.constant 0 : index
    %47 = vector.load %arg3[%c7, %c0_23, %c0_24] : memref<16x128x128xbf16, #tpu.memory_space<vmem>>, vector<1x128x128xbf16>
    %48 = vector.shape_cast %47 : vector<1x128x128xbf16> to vector<128x128xbf16>
    %cst_25 = arith.constant dense<0.000000e+00> : vector<16x128xf32>
    %49 = tpu.matmul %46, %48, %cst_25 {dimension_numbers = #tpu.dot_dimension_numbers<[1], [0], [0], [1], [0, 0, 1, 1], [], []>} : vector<16x128xbf16>, vector<128x128xbf16>, vector<16x128xf32> -> vector<16x128xf32>
    %50 = arith.addf %44, %49 : vector<16x128xf32>
    %51 = vector.extract_strided_slice %3 {offsets = [2, 0, 0], sizes = [2, 8, 128], strides = [1, 1, 1]} : vector<5x11x128xbf16> to vector<2x8x128xbf16>
    %52 = vector.shape_cast %51 : vector<2x8x128xbf16> to vector<16x128xbf16>
    %c8 = arith.constant 8 : index
    %c0_26 = arith.constant 0 : index
    %c0_27 = arith.constant 0 : index
    %53 = vector.load %arg3[%c8, %c0_26, %c0_27] : memref<16x128x128xbf16, #tpu.memory_space<vmem>>, vector<1x128x128xbf16>
    %54 = vector.shape_cast %53 : vector<1x128x128xbf16> to vector<128x128xbf16>
    %cst_28 = arith.constant dense<0.000000e+00> : vector<16x128xf32>
    %55 = tpu.matmul %52, %54, %cst_28 {dimension_numbers = #tpu.dot_dimension_numbers<[1], [0], [0], [1], [0, 0, 1, 1], [], []>} : vector<16x128xbf16>, vector<128x128xbf16>, vector<16x128xf32> -> vector<16x128xf32>
    %56 = arith.addf %50, %55 : vector<16x128xf32>
    %57 = vector.extract_strided_slice %3 {offsets = [2, 1, 0], sizes = [2, 8, 128], strides = [1, 1, 1]} : vector<5x11x128xbf16> to vector<2x8x128xbf16>
    %58 = vector.shape_cast %57 : vector<2x8x128xbf16> to vector<16x128xbf16>
    %c9 = arith.constant 9 : index
    %c0_29 = arith.constant 0 : index
    %c0_30 = arith.constant 0 : index
    %59 = vector.load %arg3[%c9, %c0_29, %c0_30] : memref<16x128x128xbf16, #tpu.memory_space<vmem>>, vector<1x128x128xbf16>
    %60 = vector.shape_cast %59 : vector<1x128x128xbf16> to vector<128x128xbf16>
    %cst_31 = arith.constant dense<0.000000e+00> : vector<16x128xf32>
    %61 = tpu.matmul %58, %60, %cst_31 {dimension_numbers = #tpu.dot_dimension_numbers<[1], [0], [0], [1], [0, 0, 1, 1], [], []>} : vector<16x128xbf16>, vector<128x128xbf16>, vector<16x128xf32> -> vector<16x128xf32>
    %62 = arith.addf %56, %61 : vector<16x128xf32>
    %63 = vector.extract_strided_slice %3 {offsets = [2, 2, 0], sizes = [2, 8, 128], strides = [1, 1, 1]} : vector<5x11x128xbf16> to vector<2x8x128xbf16>
    %64 = vector.shape_cast %63 : vector<2x8x128xbf16> to vector<16x128xbf16>
    %c10 = arith.constant 10 : index
    %c0_32 = arith.constant 0 : index
    %c0_33 = arith.constant 0 : index
    %65 = vector.load %arg3[%c10, %c0_32, %c0_33] : memref<16x128x128xbf16, #tpu.memory_space<vmem>>, vector<1x128x128xbf16>
    %66 = vector.shape_cast %65 : vector<1x128x128xbf16> to vector<128x128xbf16>
    %cst_34 = arith.constant dense<0.000000e+00> : vector<16x128xf32>
    %67 = tpu.matmul %64, %66, %cst_34 {dimension_numbers = #tpu.dot_dimension_numbers<[1], [0], [0], [1], [0, 0, 1, 1], [], []>} : vector<16x128xbf16>, vector<128x128xbf16>, vector<16x128xf32> -> vector<16x128xf32>
    %68 = arith.addf %62, %67 : vector<16x128xf32>
    %69 = vector.extract_strided_slice %3 {offsets = [2, 3, 0], sizes = [2, 8, 128], strides = [1, 1, 1]} : vector<5x11x128xbf16> to vector<2x8x128xbf16>
    %70 = vector.shape_cast %69 : vector<2x8x128xbf16> to vector<16x128xbf16>
    %c11 = arith.constant 11 : index
    %c0_35 = arith.constant 0 : index
    %c0_36 = arith.constant 0 : index
    %71 = vector.load %arg3[%c11, %c0_35, %c0_36] : memref<16x128x128xbf16, #tpu.memory_space<vmem>>, vector<1x128x128xbf16>
    %72 = vector.shape_cast %71 : vector<1x128x128xbf16> to vector<128x128xbf16>
    %cst_37 = arith.constant dense<0.000000e+00> : vector<16x128xf32>
    %73 = tpu.matmul %70, %72, %cst_37 {dimension_numbers = #tpu.dot_dimension_numbers<[1], [0], [0], [1], [0, 0, 1, 1], [], []>} : vector<16x128xbf16>, vector<128x128xbf16>, vector<16x128xf32> -> vector<16x128xf32>
    %74 = arith.addf %68, %73 : vector<16x128xf32>
    %75 = vector.extract_strided_slice %3 {offsets = [3, 0, 0], sizes = [2, 8, 128], strides = [1, 1, 1]} : vector<5x11x128xbf16> to vector<2x8x128xbf16>
    %76 = vector.shape_cast %75 : vector<2x8x128xbf16> to vector<16x128xbf16>
    %c12 = arith.constant 12 : index
    %c0_38 = arith.constant 0 : index
    %c0_39 = arith.constant 0 : index
    %77 = vector.load %arg3[%c12, %c0_38, %c0_39] : memref<16x128x128xbf16, #tpu.memory_space<vmem>>, vector<1x128x128xbf16>
    %78 = vector.shape_cast %77 : vector<1x128x128xbf16> to vector<128x128xbf16>
    %cst_40 = arith.constant dense<0.000000e+00> : vector<16x128xf32>
    %79 = tpu.matmul %76, %78, %cst_40 {dimension_numbers = #tpu.dot_dimension_numbers<[1], [0], [0], [1], [0, 0, 1, 1], [], []>} : vector<16x128xbf16>, vector<128x128xbf16>, vector<16x128xf32> -> vector<16x128xf32>
    %80 = arith.addf %74, %79 : vector<16x128xf32>
    %81 = vector.extract_strided_slice %3 {offsets = [3, 1, 0], sizes = [2, 8, 128], strides = [1, 1, 1]} : vector<5x11x128xbf16> to vector<2x8x128xbf16>
    %82 = vector.shape_cast %81 : vector<2x8x128xbf16> to vector<16x128xbf16>
    %c13 = arith.constant 13 : index
    %c0_41 = arith.constant 0 : index
    %c0_42 = arith.constant 0 : index
    %83 = vector.load %arg3[%c13, %c0_41, %c0_42] : memref<16x128x128xbf16, #tpu.memory_space<vmem>>, vector<1x128x128xbf16>
    %84 = vector.shape_cast %83 : vector<1x128x128xbf16> to vector<128x128xbf16>
    %cst_43 = arith.constant dense<0.000000e+00> : vector<16x128xf32>
    %85 = tpu.matmul %82, %84, %cst_43 {dimension_numbers = #tpu.dot_dimension_numbers<[1], [0], [0], [1], [0, 0, 1, 1], [], []>} : vector<16x128xbf16>, vector<128x128xbf16>, vector<16x128xf32> -> vector<16x128xf32>
    %86 = arith.addf %80, %85 : vector<16x128xf32>
    %87 = vector.extract_strided_slice %3 {offsets = [3, 2, 0], sizes = [2, 8, 128], strides = [1, 1, 1]} : vector<5x11x128xbf16> to vector<2x8x128xbf16>
    %88 = vector.shape_cast %87 : vector<2x8x128xbf16> to vector<16x128xbf16>
    %c14 = arith.constant 14 : index
    %c0_44 = arith.constant 0 : index
    %c0_45 = arith.constant 0 : index
    %89 = vector.load %arg3[%c14, %c0_44, %c0_45] : memref<16x128x128xbf16, #tpu.memory_space<vmem>>, vector<1x128x128xbf16>
    %90 = vector.shape_cast %89 : vector<1x128x128xbf16> to vector<128x128xbf16>
    %cst_46 = arith.constant dense<0.000000e+00> : vector<16x128xf32>
    %91 = tpu.matmul %88, %90, %cst_46 {dimension_numbers = #tpu.dot_dimension_numbers<[1], [0], [0], [1], [0, 0, 1, 1], [], []>} : vector<16x128xbf16>, vector<128x128xbf16>, vector<16x128xf32> -> vector<16x128xf32>
    %92 = arith.addf %86, %91 : vector<16x128xf32>
    %93 = vector.extract_strided_slice %3 {offsets = [3, 3, 0], sizes = [2, 8, 128], strides = [1, 1, 1]} : vector<5x11x128xbf16> to vector<2x8x128xbf16>
    %94 = vector.shape_cast %93 : vector<2x8x128xbf16> to vector<16x128xbf16>
    %c15 = arith.constant 15 : index
    %c0_47 = arith.constant 0 : index
    %c0_48 = arith.constant 0 : index
    %95 = vector.load %arg3[%c15, %c0_47, %c0_48] : memref<16x128x128xbf16, #tpu.memory_space<vmem>>, vector<1x128x128xbf16>
    %96 = vector.shape_cast %95 : vector<1x128x128xbf16> to vector<128x128xbf16>
    %cst_49 = arith.constant dense<0.000000e+00> : vector<16x128xf32>
    %97 = tpu.matmul %94, %96, %cst_49 {dimension_numbers = #tpu.dot_dimension_numbers<[1], [0], [0], [1], [0, 0, 1, 1], [], []>} : vector<16x128xbf16>, vector<128x128xbf16>, vector<16x128xf32> -> vector<16x128xf32>
    %98 = arith.addf %92, %97 : vector<16x128xf32>
    %c0_50 = arith.constant 0 : index
    %c0_51 = arith.constant 0 : index
    %99 = vector.load %arg4[%c0_50, %c0_51] : memref<1x128xf32, #tpu.memory_space<vmem>>, vector<1x128xf32>
    %100 = vector.broadcast %99 : vector<1x128xf32> to vector<16x128xf32>
    %101 = arith.mulf %98, %100 : vector<16x128xf32>
    %c0_52 = arith.constant 0 : index
    %c0_53 = arith.constant 0 : index
    %102 = vector.load %arg5[%c0_52, %c0_53] : memref<1x128xf32, #tpu.memory_space<vmem>>, vector<1x128xf32>
    %103 = vector.broadcast %102 : vector<1x128xf32> to vector<16x128xf32>
    %104 = arith.addf %101, %103 : vector<16x128xf32>
    %105 = vector.shape_cast %104 : vector<16x128xf32> to vector<2x8x128xf32>
    %106 = vector.extract_strided_slice %105 {offsets = [0, 0, 0], sizes = [2, 2, 128], strides = [1, 1, 1]} : vector<2x8x128xf32> to vector<2x2x128xf32>
    %c0_54 = arith.constant 0 : index
    %c0_55 = arith.constant 0 : index
    %c0_56 = arith.constant 0 : index
    %c0_57 = arith.constant 0 : index
    %107 = vector.load %arg6[%c0_54, %c0_55, %c0_56, %c0_57] : memref<1x2x2x128xf32, #tpu.memory_space<vmem>>, vector<1x2x2x128xf32>
    %108 = vector.shape_cast %107 : vector<1x2x2x128xf32> to vector<2x2x128xf32>
    %109 = vector.shape_cast %106 : vector<2x2x128xf32> to vector<1x2x2x128xf32>
    tpu.vector_store %arg6[%c0_54, %c0_55, %c0_56, %c0_57], %109 {strides = array<i32>} : memref<1x2x2x128xf32, #tpu.memory_space<vmem>>, vector<1x2x2x128xf32>,
    return
  }
  func.func @transform_0(%arg0: i32, %arg1: i32) -> (i32, i32, i32, i32) {
    %c0_i32 = arith.constant 0 : i32
    %c0_i32_0 = arith.constant 0 : i32
    %c0_i32_1 = arith.constant 0 : i32
    %c0_i32_2 = arith.constant 0 : i32
    return %arg0, %c0_i32, %c0_i32_0, %c0_i32_1 : i32, i32, i32, i32
  }
  func.func @transform_1(%arg0: i32, %arg1: i32) -> (i32, i32, i32) {
    %c0_i32 = arith.constant 0 : i32
    %c0_i32_0 = arith.constant 0 : i32
    %c0_i32_1 = arith.constant 0 : i32
    %c0_i32_2 = arith.constant 0 : i32
    return %c0_i32, %c0_i32_0, %c0_i32_1 : i32, i32, i32
  }
  func.func @transform_2(%arg0: i32, %arg1: i32) -> (i32, i32) {
    %c0_i32 = arith.constant 0 : i32
    %c0_i32_0 = arith.constant 0 : i32
    %c0_i32_1 = arith.constant 0 : i32
    return %c0_i32, %c0_i32_0 : i32, i32
  }
  func.func @transform_3(%arg0: i32, %arg1: i32) -> (i32, i32) {
    %c0_i32 = arith.constant 0 : i32
    %c0_i32_0 = arith.constant 0 : i32
    %c0_i32_1 = arith.constant 0 : i32
    return %c0_i32, %c0_i32_0 : i32, i32
  }
  func.func @transform_4(%arg0: i32, %arg1: i32) -> (i32, i32, i32, i32) {
    %c0_i32 = arith.constant 0 : i32
    %c0_i32_0 = arith.constant 0 : i32
    %c0_i32_1 = arith.constant 0 : i32
    return %arg0, %arg1, %c0_i32, %c0_i32_0 : i32, i32, i32, i32
  }
}

</mosaic_0001>

<bundles_post_ra>
// kernel: forward.5
= control target key start
LH: loop header
LB: loop body
LE: loop exit
PB: predicated region body
PF: predicated region fallthrough
CT: control target
= control target key end

     0   :  { %s2578_s15 = smov 0   ;;  %s2580_s16 = smov 0   ;;  %s3166_s0 = inlined_call_operand.vmem [shape: bf16[2,17,17,16], index: 0, kind: input, shape index: {}]   ;;  %s3167_s1 = inlined_call_operand.vmem [shape: bf16[4,16,128], index: 1, kind: input, shape index: {}]   ;;  %s3168_s2 = inlined_call_operand.vmem [shape: f32[1,128], index: 2, kind: input, shape index: {}]   ;;  %s3169_s3 = inlined_call_operand.vmem [shape: f32[1,128], index: 3, kind: input, shape index: {}]   ;;  %s3170_s4 = inlined_call_operand.vmem [shape: bf16[2,16,16,128], index: 4, kind: output, shape index: {}]  }
   0x1   :  { %s2582_s17 = smov 0  }
   0x2 LB: > { %s26_s18 = sadd.s32 1, %s2547_s16  ;;  %p2003_p0 = scmp.ge.s32.totalorder %s2551_s17, 1  ;;  %s2551_s17 = sphi %s2582_s17, %s14_s17   ;;  %s2547_s16 = sphi %s2580_s16, %s3182_s16   ;;  %s2543_s15 = sphi %s2578_s15, %s3181_s15  }
   0x3   : > { %p28_p1 = scmp.ge.s32.totalorder %s26_s18, 2  ;;  %p176_p2 = scmp.lt.s32.totalorder %s2551_s17, 3 }
   0x5   : > { %s3184_s18 = smov (%p28_p1, %s26_s18), 0  ;;  %p177_p3 = pnand %p2003_p0, %p176_p2 }
   0x7   : > { %180 = sbr.rel (%p177_p3) target bundleno = 369 (0x171), region = 36 }
   0xc   : > { %v2508_v0 = vld [vmem:[%s3167_s1] sm:$0xff]   ;;  %p207_p4 = scmp.lt.s32.totalorder %s2543_s15, 1  ;;  %v2509_v1 = vld [vmem:[%s3167_s1 + $0x8] sm:$0xff]   ;;  %v2607_v2 = vld [vmem:[%s3167_s1 + $0x10] sm:$0xff]   ;;  %vm725_vm0 = vcmask 130048  }
   0xd   : > { %2381 = vmatprep.subr.bf16.mxu1 %v2508_v0  ;;  %2347 = vmatprep.subr.bf16.mxu0 %v2509_v1  ;;  %v2513_v3 = vld [vmem:[%s3167_s1 + $0x18] sm:$0xff]   ;;  %vm281_vm1 = vsmask.f32 3328  ;;  %vm282_vm2 = vsmask.f32 7440 }
   0xe   : > { %s3186_s15 = smov (!%p207_p4, %s2543_s15), 1  ;;  %2382 = vmatpush3.bf16.msra.mxu1 %v2508_v0  ;;  %2348 = vmatpush3.bf16.msra.mxu0 %v2509_v1  ;;  %vm2631_vm3 = vmor %vm281_vm1, %vm282_vm2 }
   0xf   : > { %s2483_s25 = smul.u32 204, %s3186_s15  ;;  %2415 = vmatprep.subr.bf16.mxu0 %v2607_v2  ;;  %2449 = vmatprep.subr.bf16.mxu1 %v2513_v3  ;;  %s2151_s9 = sshll.u32 %s3186_s15, 7 }
  0x10   : > { %s3045_s12 = scalar_lea.vmem %s3170_s4, %s2151_s9 }
  0x11   : > { %s2617_s30 = scalar_lea.vmem %s3166_s0, %s2483_s25 }
  0x12   : > { %v228_v4 = vld [vmem:[%s2617_s30] sm:$0xf]  ;;  %v229_v5 = vld [vmem:[%s2617_s30 + $0x4] sm:$0xf]  ;;  %v231_v6 = vld [vmem:[%s2617_s30 + $0xc] sm:$0xf] }
  0x13   : > { %v285_v7 = vshrl.u32 %v228_v4, 16  ;;  %v288_v8 = vshll.u32 %v228_v4, 16  ;;  %v294_v9 = vshll.u32 %v229_v5, 16  ;;  %v298_v10 = vshrl.u32 %v229_v5, 16  ;;  %v232_v11 = vld [vmem:[%s2617_s30 + $0x10] sm:$0xf] }
  0x14   : > { %v2042_v12 = vcombine.low %v228_v4, %v229_v5  ;;  %v309_v13 = vshrl.u32 %v231_v6, 16  ;;  %v312_v14 = vshll.u32 %v231_v6, 16  ;;  %v318_v15 = vshll.u32 %v232_v11, 16  ;;  %v230_v16 = vld [vmem:[%s2617_s30 + $0x8] sm:$0x1] }
  0x15   : > { %v287_v17 = vrot.slane %v285_v7, 4  ;;  %v290_v18 = vrot.slane %v288_v8, 5  ;;  %v296_v19 = vrot.slane %v294_v9, 5  ;;  %v300_v20 = vrot.slane %v298_v10, 4  ;;  %v233_v21 = vld [vmem:[%s2617_s30 + $0x14] sm:$0x1] }
  0x16   : > { %2383 = vmatprep.mubr.msk.bf16.mxu1 %vm725_vm0, %v2042_v12  ;;  %v311_v22 = vrot.slane %v309_v13, 4  ;;  %v314_v23 = vrot.slane %v312_v14, 5  ;;  %v320_v24 = vrot.slane %v318_v15, 5  ;;  %v322_v25 = vshrl.u32 %v232_v11, 16  ;;  %v234_v26 = vld [vmem:[%s2617_s30 + $0x18] sm:$0xf] }
  0x17   : > { %v2627_v27 = vcombine.low %v231_v6, %v232_v11  ;;  %v291_v28 = vor.u32 %v290_v18, %v287_v17  ;;  %v301_v29 = vor.u32 %v300_v20, %v296_v19  ;;  %v304_v30 = vshll.u32 %v230_v16, 16  ;;  %v235_v35 = vld [vmem:[%s2617_s30 + $0x1c] sm:$0xf]  ;;  %v237_v45 = vld [vmem:[%s2617_s30 + $0x24] sm:$0xf] }
  0x18   : > { %v324_v31 = vrot.slane %v322_v25, 4  ;;  %v315_v33 = vor.u32 %v314_v23, %v311_v22  ;;  %v328_v34 = vshll.u32 %v233_v21, 16  ;;  %v333_v36 = vshrl.u32 %v234_v26, 16  ;;  %v238_v50 = vld [vmem:[%s2617_s30 + $0x28] sm:$0xf] }
  0x19   : > { %2384 = vmatmul.mubr.msk.bf16.vlgmr.msra.gmra.mxu1 %vm725_vm0, %v2627_v27  ;;  %v292_v37 = vrot.slane %v291_v28, 4  ;;  %v302_v38 = vrot.slane %v301_v29, 4  ;;  %v306_v39 = vrot.slane %v304_v30, 5  ;;  %v336_v40 = vshll.u32 %v234_v26, 16  ;;  %v236_v55 = vld [vmem:[%s2617_s30 + $0x20] sm:$0x1] }
  0x1a   : > { %v316_v41 = vrot.slane %v315_v33, 4  ;;  %v325_v42 = vor.u32 %v324_v31, %v320_v24  ;;  %v330_v43 = vrot.slane %v328_v34, 5  ;;  %2450 = vmatpush3.bf16.msra.mxu1 %v2513_v3  ;;  %v335_v44 = vrot.slane %v333_v36, 4  ;;  %v239_v60 = vld [vmem:[%s2617_s30 + $0x2c] sm:$0x1] }
  0x1b   : > { %v297_v46 = vsel %vm2631_vm3, %v292_v37, %v296_v19  ;;  %v307_v47 = vsel %vm2631_vm3, %v302_v38, %v306_v39  ;;  %v338_v48 = vrot.slane %v336_v40, 5  ;;  %v342_v49 = vshll.u32 %v235_v35, 16  ;;  %v240_v1 = vld [vmem:[%s2617_s30 + $0x30] sm:$0xf]  ;;  %v241_v14 = vld [vmem:[%s2617_s30 + $0x34] sm:$0xf] }
  0x1c   : > { %v2009_v51 = vcombine.low %v297_v46, %v307_v47  ;;  %v321_v52 = vsel %vm2631_vm3, %v316_v41, %v320_v24  ;;  %v326_v53 = vrot.slane %v325_v42, 4  ;;  %v346_v54 = vshrl.u32 %v235_v35, 16  ;;  %v243_v24 = vld [vmem:[%s2617_s30 + $0x3c] sm:$0xf]  ;;  %v244_v30 = vld [vmem:[%s2617_s30 + $0x40] sm:$0xf] }
  0x1d   : > { %v344_v56 = vrot.slane %v342_v49, 5  ;;  %v2647_v57 = vcombine.low %v234_v26, %v235_v35  ;;  %v357_v58 = vshrl.u32 %v237_v45, 16  ;;  %v360_v59 = vshll.u32 %v237_v45, 16  ;;  %v242_v39 = vld [vmem:[%s2617_s30 + $0x38] sm:$0x1] }
  0x1e   : > { %2349 = vmatprep.mubr.msk.bf16.mxu0 %vm725_vm0, %v2009_v51  ;;  %v331_v61 = vsel %vm2631_vm3, %v326_v53, %v330_v43  ;;  %v348_v62 = vrot.slane %v346_v54, 4  ;;  %v366_v63 = vshll.u32 %v238_v50, 16  ;;  %v370_v0 = vshrl.u32 %v238_v50, 16  ;;  %v245_v40 = vld [vmem:[%s2617_s30 + $0x44] sm:$0x1] }
  0x1f   : > { %v2654_v3 = vcombine.low %v321_v52, %v331_v61  ;;  %2387 = vmatprep.mubr.msk.bf16.mxu1 %vm725_vm0, %v2647_v57  ;;  %v359_v4 = vrot.slane %v357_v58, 4  ;;  %v362_v5 = vrot.slane %v360_v59, 5  ;;  %v2658_v6 = vcombine.low %v237_v45, %v238_v50  ;;  %v246_v45 = vld [vmem:[%s2617_s30 + $0x48] sm:$0xf]  ;;  %v247_v58 = vld [vmem:[%s2617_s30 + $0x4c] sm:$0xf] }
  0x20   : > { %v368_v7 = vrot.slane %v366_v63, 5  ;;  %v372_v8 = vrot.slane %v370_v0, 4  ;;  %v339_v9 = vor.u32 %v338_v48, %v335_v44  ;;  %v349_v10 = vor.u32 %v348_v62, %v344_v56 }
  0x21   : > { %2350 = vmatmul.mubr.msk.bf16.vlgmr.msra.gmra.mxu0 %vm725_vm0, %v2654_v3  ;;  %2388 = vmatmul.mubr.msk.bf16.gmra.mxu1 %vm725_vm0, %v2658_v6  ;;  %v352_v11 = vshll.u32 %v236_v55, 16  ;;  %v363_v12 = vor.u32 %v362_v5, %v359_v4  ;;  %v376_v13 = vshll.u32 %v239_v60, 16  ;;  %v381_v15 = vshrl.u32 %v240_v1, 16 }
  0x22   : > { %2416 = vmatpush3.bf16.msra.mxu0 %v2607_v2  ;;  %v340_v16 = vrot.slane %v339_v9, 4  ;;  %v350_v17 = vrot.slane %v349_v10, 4  ;;  %v373_v18 = vor.u32 %v372_v8, %v368_v7  ;;  %v384_v19 = vshll.u32 %v240_v1, 16 }
  0x23   : > { %v354_v20 = vrot.slane %v352_v11, 5  ;;  %v364_v21 = vrot.slane %v363_v12, 4  ;;  %v378_v22 = vrot.slane %v376_v13, 5  ;;  %v383_v23 = vrot.slane %v381_v15, 4  ;;  %v250_v12 = vld [vmem:[%s2617_s30 + $0x58] sm:$0xf] }
  0x24   : > { %v345_v25 = vsel %vm2631_vm3, %v340_v16, %v344_v56  ;;  %v374_v26 = vrot.slane %v373_v18, 4  ;;  %v386_v28 = vrot.slane %v384_v19, 5  ;;  %v390_v29 = vshll.u32 %v241_v14, 16 }
  0x25   : > { %v355_v2 = vsel %vm2631_vm3, %v350_v17, %v354_v20  ;;  %v369_v31 = vsel %vm2631_vm3, %v364_v21, %v368_v7  ;;  %v394_v33 = vshrl.u32 %v241_v14, 16  ;;  %v2674_v34 = vcombine.low %v240_v1, %v241_v14  ;;  %v249_v7 = vld [vmem:[%s2617_s30 + $0x54] sm:$0xf]  ;;  %v248_v17 = vld [vmem:[%s2617_s30 + $0x50] sm:$0x1] }
  0x26   : > { %v2676_v35 = vcombine.low %v345_v25, %v355_v2  ;;  %v379_v36 = vsel %vm2631_vm3, %v374_v26, %v378_v22  ;;  %v392_v37 = vrot.slane %v390_v29, 5  ;;  %v405_v38 = vshrl.u32 %v243_v24, 16  ;;  %v251_v22 = vld [vmem:[%s2617_s30 + $0x5c] sm:$0x1] }
  0x27   : > { %v2682_v41 = vcombine.low %v369_v31, %v379_v36  ;;  %v396_v42 = vrot.slane %v394_v33, 4  ;;  %2391 = vmatprep.mubr.msk.bf16.mxu1 %vm725_vm0, %v2674_v34  ;;  %v408_v43 = vshll.u32 %v243_v24, 16  ;;  %v414_v44 = vshll.u32 %v244_v30, 16 }
  0x28   : > { %2353 = vmatprep.mubr.msk.bf16.mxu0 %vm725_vm0, %v2676_v35  ;;  %v407_v46 = vrot.slane %v405_v38, 4  ;;  %v418_v47 = vshrl.u32 %v244_v30, 16  ;;  %v2689_v48 = vcombine.low %v243_v24, %v244_v30  ;;  %v387_v49 = vor.u32 %v386_v28, %v383_v23  ;;  %v252_v28 = vld [vmem:[%s2617_s30 + $0x60] sm:$0xf] }
  0x29   : > { %2354 = vmatmul.mubr.msk.bf16.gmra.mxu0 %vm725_vm0, %v2682_v41  ;;  %v410_v50 = vrot.slane %v408_v43, 5  ;;  %v416_v51 = vrot.slane %v414_v44, 5  ;;  %v397_v52 = vor.u32 %v396_v42, %v392_v37  ;;  %v400_v53 = vshll.u32 %v242_v39, 16  ;;  %v253_v43 = vld [vmem:[%s2617_s30 + $0x64] sm:$0xf] }
  0x2a   : > { %v420_v54 = vrot.slane %v418_v47, 4  ;;  %2392 = vmatmul.mubr.msk.bf16.gmra.mxu1 %vm725_vm0, %v2689_v48  ;;  %v388_v55 = vrot.slane %v387_v49, 4  ;;  %v424_v56 = vshll.u32 %v245_v40, 16  ;;  %v429_v59 = vshrl.u32 %v246_v45, 16 }
  0x2b   : > { %v398_v60 = vrot.slane %v397_v52, 4  ;;  %v402_v61 = vrot.slane %v400_v53, 5  ;;  %v411_v62 = vor.u32 %v410_v50, %v407_v46  ;;  %v432_v63 = vshll.u32 %v246_v45, 16 }
  0x2c   : > { %v393_v0 = vsel %vm2631_vm3, %v388_v55, %v392_v37  ;;  %v421_v1 = vor.u32 %v420_v54, %v416_v51  ;;  %v426_v4 = vrot.slane %v424_v56, 5  ;;  %v431_v5 = vrot.slane %v429_v59, 4  ;;  %v255_v54 = vld [vmem:[%s2617_s30 + $0x6c] sm:$0xf] }
  0x2d   : > { %v403_v8 = vsel %vm2631_vm3, %v398_v60, %v402_v61  ;;  %v412_v9 = vrot.slane %v411_v62, 4  ;;  %v434_v10 = vrot.slane %v432_v63, 5  ;;  %v438_v11 = vshll.u32 %v247_v58, 16  ;;  %v256_v60 = vld [vmem:[%s2617_s30 + $0x70] sm:$0xf] }
  0x2e   : > { %v2702_v13 = vcombine.low %v393_v0, %v403_v8  ;;  %v422_v14 = vrot.slane %v421_v1, 4  ;;  %v442_v15 = vshrl.u32 %v247_v58, 16  ;;  %v2704_v16 = vcombine.low %v246_v45, %v247_v58  ;;  %v254_v8 = vld [vmem:[%s2617_s30 + $0x68] sm:$0x1] }
  0x2f   : > { %v417_v18 = vsel %vm2631_vm3, %v412_v9, %v416_v51  ;;  %v440_v19 = vrot.slane %v438_v11, 5  ;;  %v453_v20 = vshrl.u32 %v249_v7, 16  ;;  %v456_v21 = vshll.u32 %v249_v7, 16  ;;  %v257_v9 = vld [vmem:[%s2617_s30 + $0x74] sm:$0x1] }
  0x30   : > { %2357 = vmatprep.mubr.msk.bf16.mxu0 %vm725_vm0, %v2702_v13  ;;  %v427_v23 = vsel %vm2631_vm3, %v422_v14, %v426_v4  ;;  %v444_v24 = vrot.slane %v442_v15, 4  ;;  %2395 = vmatprep.mubr.msk.bf16.mxu1 %vm725_vm0, %v2704_v16  ;;  %v462_v25 = vshll.u32 %v250_v12, 16  ;;  %v466_v26 = vshrl.u32 %v250_v12, 16  ;;  %v258_v15 = vld [vmem:[%s2617_s30 + $0x78] sm:$0xf] }
  0x31   : > { %v2717_v29 = vcombine.low %v417_v18, %v427_v23  ;;  %v455_v30 = vrot.slane %v453_v20, 4  ;;  %v458_v2 = vrot.slane %v456_v21, 5  ;;  %v2719_v31 = vcombine.low %v249_v7, %v250_v12 }
  0x32   : > { %v464_v33 = vrot.slane %v462_v25, 5  ;;  %v468_v36 = vrot.slane %v466_v26, 4  ;;  %v435_v37 = vor.u32 %v434_v10, %v431_v5  ;;  %v445_v38 = vor.u32 %v444_v24, %v440_v19 }
  0x33   : > { %2358 = vmatmul.mubr.msk.bf16.gmra.mxu0 %vm725_vm0, %v2717_v29  ;;  %2396 = vmatmul.mubr.msk.bf16.gmra.mxu1 %vm725_vm0, %v2719_v31  ;;  %v448_v39 = vshll.u32 %v248_v17, 16  ;;  %v459_v40 = vor.u32 %v458_v2, %v455_v30  ;;  %v472_v42 = vshll.u32 %v251_v22, 16  ;;  %v477_v44 = vshrl.u32 %v252_v28, 16  ;;  %v259_v30 = vld [vmem:[%s2617_s30 + $0x7c] sm:$0xf] }
  0x34   : > { %v436_v45 = vrot.slane %v435_v37, 4  ;;  %v446_v46 = vrot.slane %v445_v38, 4  ;;  %v469_v47 = vor.u32 %v468_v36, %v464_v33  ;;  %v480_v49 = vshll.u32 %v252_v28, 16 }
  0x35   : > { %v450_v50 = vrot.slane %v448_v39, 5  ;;  %v460_v51 = vrot.slane %v459_v40, 4  ;;  %v474_v52 = vrot.slane %v472_v42, 5  ;;  %v479_v53 = vrot.slane %v477_v44, 4  ;;  %v261_v44 = vld [vmem:[%s2617_s30 + $0x84] sm:$0xf] }
  0x36   : > { %v441_v55 = vsel %vm2631_vm3, %v436_v45, %v440_v19  ;;  %v470_v56 = vrot.slane %v469_v47, 4  ;;  %v482_v58 = vrot.slane %v480_v49, 5  ;;  %v486_v59 = vshll.u32 %v253_v43, 16 }
  0x37   : > { %v451_v61 = vsel %vm2631_vm3, %v446_v46, %v450_v50  ;;  %v465_v62 = vsel %vm2631_vm3, %v460_v51, %v464_v33  ;;  %v490_v63 = vshrl.u32 %v253_v43, 16  ;;  %v2734_v0 = vcombine.low %v252_v28, %v253_v43  ;;  %v262_v50 = vld [vmem:[%s2617_s30 + $0x88] sm:$0xf] }
  0x38   : > { %v2736_v1 = vcombine.low %v441_v55, %v451_v61  ;;  %v475_v4 = vsel %vm2631_vm3, %v470_v56, %v474_v52  ;;  %v488_v5 = vrot.slane %v486_v59, 5  ;;  %v501_v7 = vshrl.u32 %v255_v54, 16  ;;  %v260_v55 = vld [vmem:[%s2617_s30 + $0x80] sm:$0x1]  ;;  %v263_v61 = vld [vmem:[%s2617_s30 + $0x8c] sm:$0x1] }
  0x39   : > { %v2742_v10 = vcombine.low %v465_v62, %v475_v4  ;;  %v492_v11 = vrot.slane %v490_v63, 4  ;;  %2399 = vmatprep.mubr.msk.bf16.mxu1 %vm725_vm0, %v2734_v0  ;;  %v504_v12 = vshll.u32 %v255_v54, 16  ;;  %v510_v14 = vshll.u32 %v256_v60, 16 }
  0x3a   : > { %2361 = vmatprep.mubr.msk.bf16.mxu0 %vm725_vm0, %v2736_v1  ;;  %v503_v17 = vrot.slane %v501_v7, 4  ;;  %v514_v18 = vshrl.u32 %v256_v60, 16  ;;  %v2749_v19 = vcombine.low %v255_v54, %v256_v60  ;;  %v483_v20 = vor.u32 %v482_v58, %v479_v53  ;;  %v264_v7 = vld [vmem:[%s2617_s30 + $0x90] sm:$0xf] }
  0x3b   : > { %2362 = vmatmul.mubr.msk.bf16.gmra.mxu0 %vm725_vm0, %v2742_v10  ;;  %v506_v21 = vrot.slane %v504_v12, 5  ;;  %v512_v22 = vrot.slane %v510_v14, 5  ;;  %v493_v23 = vor.u32 %v492_v11, %v488_v5  ;;  %v496_v24 = vshll.u32 %v254_v8, 16 }
  0x3c   : > { %v516_v25 = vrot.slane %v514_v18, 4  ;;  %2400 = vmatmul.mubr.msk.bf16.gmra.mxu1 %vm725_vm0, %v2749_v19  ;;  %v484_v26 = vrot.slane %v483_v20, 4  ;;  %v520_v28 = vshll.u32 %v257_v9, 16  ;;  %v525_v2 = vshrl.u32 %v258_v15, 16 }
  0x3d   : > { %v494_v33 = vrot.slane %v493_v23, 4  ;;  %v498_v36 = vrot.slane %v496_v24, 5  ;;  %v507_v37 = vor.u32 %v506_v21, %v503_v17  ;;  %v528_v38 = vshll.u32 %v258_v15, 16  ;;  %v265_v23 = vld [vmem:[%s2617_s30 + $0x94] sm:$0xf] }
  0x3e   : > { %v489_v39 = vsel %vm2631_vm3, %v484_v26, %v488_v5  ;;  %v517_v40 = vor.u32 %v516_v25, %v512_v22  ;;  %v522_v42 = vrot.slane %v520_v28, 5  ;;  %v527_v43 = vrot.slane %v525_v2, 4 }
  0x3f   : > { %v499_v45 = vsel %vm2631_vm3, %v494_v33, %v498_v36  ;;  %v508_v46 = vrot.slane %v507_v37, 4  ;;  %v530_v47 = vrot.slane %v528_v38, 5  ;;  %v534_v49 = vshll.u32 %v259_v30, 16  ;;  %v267_v38 = vld [vmem:[%s2617_s30 + $0x9c] sm:$0xf] }
  0x40   : > { %v2762_v51 = vcombine.low %v489_v39, %v499_v45  ;;  %v518_v52 = vrot.slane %v517_v40, 4  ;;  %v538_v53 = vshrl.u32 %v259_v30, 16  ;;  %v2764_v54 = vcombine.low %v258_v15, %v259_v30 }
  0x41   : > { %v513_v56 = vsel %vm2631_vm3, %v508_v46, %v512_v22  ;;  %v536_v58 = vrot.slane %v534_v49, 5  ;;  %v549_v59 = vshrl.u32 %v261_v44, 16  ;;  %v552_v60 = vshll.u32 %v261_v44, 16 }
  0x42   : > { %2365 = vmatprep.mubr.msk.bf16.mxu0 %vm725_vm0, %v2762_v51  ;;  %v523_v62 = vsel %vm2631_vm3, %v518_v52, %v522_v42  ;;  %v540_v63 = vrot.slane %v538_v53, 4  ;;  %2403 = vmatprep.mubr.msk.bf16.mxu1 %vm725_vm0, %v2764_v54  ;;  %v558_v4 = vshll.u32 %v262_v50, 16  ;;  %v562_v5 = vshrl.u32 %v262_v50, 16 }
  0x43   : > { %v2777_v8 = vcombine.low %v513_v56, %v523_v62  ;;  %v551_v9 = vrot.slane %v549_v59, 4  ;;  %v554_v11 = vrot.slane %v552_v60, 5  ;;  %v2779_v12 = vcombine.low %v261_v44, %v262_v50  ;;  %v268_v44 = vld [vmem:[%s2617_s30 + $0xa0] sm:$0xf]  ;;  %v266_v56 = vld [vmem:[%s2617_s30 + $0x98] sm:$0x1] }
  0x44   : > { %v560_v14 = vrot.slane %v558_v4, 5  ;;  %v564_v15 = vrot.slane %v562_v5, 4  ;;  %v531_v17 = vor.u32 %v530_v47, %v527_v43  ;;  %v541_v18 = vor.u32 %v540_v63, %v536_v58  ;;  %v270_v63 = vld [vmem:[%s2617_s30 + $0xa8] sm:$0xf] }
  0x45   : > { %2366 = vmatmul.mubr.msk.bf16.gmra.mxu0 %vm725_vm0, %v2777_v8  ;;  %2404 = vmatmul.mubr.msk.bf16.gmra.mxu1 %vm725_vm0, %v2779_v12  ;;  %v544_v20 = vshll.u32 %v260_v55, 16  ;;  %v555_v21 = vor.u32 %v554_v11, %v551_v9  ;;  %v568_v22 = vshll.u32 %v263_v61, 16  ;;  %v573_v24 = vshrl.u32 %v264_v7, 16 }
  0x46   : > { %v532_v25 = vrot.slane %v531_v17, 4  ;;  %v542_v26 = vrot.slane %v541_v18, 4  ;;  %v565_v28 = vor.u32 %v564_v15, %v560_v14  ;;  %v576_v30 = vshll.u32 %v264_v7, 16 }
  0x47   : > { %v546_v2 = vrot.slane %v544_v20, 5  ;;  %v556_v33 = vrot.slane %v555_v21, 4  ;;  %v570_v36 = vrot.slane %v568_v22, 5  ;;  %v575_v37 = vrot.slane %v573_v24, 4  ;;  %v271_v22 = vld [vmem:[%s2617_s30 + $0xac] sm:$0xf] }
  0x48   : > { %v537_v39 = vsel %vm2631_vm3, %v532_v25, %v536_v58  ;;  %v566_v40 = vrot.slane %v565_v28, 4  ;;  %v578_v42 = vrot.slane %v576_v30, 5  ;;  %v582_v43 = vshll.u32 %v265_v23, 16  ;;  %v269_v58 = vld [vmem:[%s2617_s30 + $0xa4] sm:$0x1] }
  0x49   : > { %v547_v45 = vsel %vm2631_vm3, %v542_v26, %v546_v2  ;;  %v561_v46 = vsel %vm2631_vm3, %v556_v33, %v560_v14  ;;  %v586_v47 = vshrl.u32 %v265_v23, 16  ;;  %v2794_v49 = vcombine.low %v264_v7, %v265_v23 }
  0x4a   : > { %v2796_v50 = vcombine.low %v537_v39, %v547_v45  ;;  %v571_v52 = vsel %vm2631_vm3, %v566_v40, %v570_v36  ;;  %v584_v53 = vrot.slane %v582_v43, 5  ;;  %v597_v55 = vshrl.u32 %v267_v38, 16  ;;  %v274_v43 = vld [vmem:[%s2617_s30 + $0xb8] sm:$0xf] }
  0x4b   : > { %v2802_v59 = vcombine.low %v561_v46, %v571_v52  ;;  %v588_v60 = vrot.slane %v586_v47, 4  ;;  %2407 = vmatprep.mubr.msk.bf16.mxu1 %vm725_vm0, %v2794_v49  ;;  %v600_v61 = vshll.u32 %v267_v38, 16  ;;  %v606_v62 = vshll.u32 %v268_v44, 16 }
  0x4c   : > { %2369 = vmatprep.mubr.msk.bf16.mxu0 %vm725_vm0, %v2796_v50  ;;  %v599_v4 = vrot.slane %v597_v55, 4  ;;  %v610_v5 = vshrl.u32 %v268_v44, 16  ;;  %v2809_v7 = vcombine.low %v267_v38, %v268_v44  ;;  %v579_v9 = vor.u32 %v578_v42, %v575_v37  ;;  %v273_v37 = vld [vmem:[%s2617_s30 + $0xb4] sm:$0xf] }
  0x4d   : > { %2370 = vmatmul.mubr.msk.bf16.gmra.mxu0 %vm725_vm0, %v2802_v59  ;;  %v602_v11 = vrot.slane %v600_v61, 5  ;;  %v608_v14 = vrot.slane %v606_v62, 5  ;;  %v589_v15 = vor.u32 %v588_v60, %v584_v53  ;;  %v592_v17 = vshll.u32 %v266_v56, 16 }
  0x4e   : > { %v612_v18 = vrot.slane %v610_v5, 4  ;;  %2408 = vmatmul.mubr.msk.bf16.gmra.mxu1 %vm725_vm0, %v2809_v7  ;;  %v580_v20 = vrot.slane %v579_v9, 4  ;;  %v616_v21 = vshll.u32 %v269_v58, 16  ;;  %v621_v23 = vshrl.u32 %v270_v63, 16  ;;  %v272_v58 = vld [vmem:[%s2617_s30 + $0xb0] sm:$0x1] }
  0x4f   : > { %v590_v24 = vrot.slane %v589_v15, 4  ;;  %v594_v25 = vrot.slane %v592_v17, 5  ;;  %v603_v26 = vor.u32 %v602_v11, %v599_v4  ;;  %v624_v28 = vshll.u32 %v270_v63, 16  ;;  %v275_v4 = vld [vmem:[%s2617_s30 + $0xbc] sm:$0x1] }
  0x50   : > { %v585_v30 = vsel %vm2631_vm3, %v580_v20, %v584_v53  ;;  %v613_v2 = vor.u32 %v612_v18, %v608_v14  ;;  %v618_v33 = vrot.slane %v616_v21, 5  ;;  %v623_v36 = vrot.slane %v621_v23, 4 }
  0x51   : > { %v595_v38 = vsel %vm2631_vm3, %v590_v24, %v594_v25  ;;  %v604_v39 = vrot.slane %v603_v26, 4  ;;  %v626_v40 = vrot.slane %v624_v28, 5  ;;  %v630_v42 = vshll.u32 %v271_v22, 16 }
  0x52   : > { %v2822_v44 = vcombine.low %v585_v30, %v595_v38  ;;  %v614_v45 = vrot.slane %v613_v2, 4  ;;  %v634_v46 = vshrl.u32 %v271_v22, 16  ;;  %v2824_v47 = vcombine.low %v270_v63, %v271_v22 }
  0x53   : > { %v609_v52 = vsel %vm2631_vm3, %v604_v39, %v608_v14  ;;  %v632_v53 = vrot.slane %v630_v42, 5  ;;  %v645_v55 = vshrl.u32 %v273_v37, 16  ;;  %v648_v56 = vshll.u32 %v273_v37, 16 }
  0x54   : > { %2373 = vmatprep.mubr.msk.bf16.mxu0 %vm725_vm0, %v2822_v44  ;;  %v619_v60 = vsel %vm2631_vm3, %v614_v45, %v618_v33  ;;  %v636_v61 = vrot.slane %v634_v46, 4  ;;  %2411 = vmatprep.mubr.msk.bf16.mxu1 %vm725_vm0, %v2824_v47  ;;  %v654_v62 = vshll.u32 %v274_v43, 16  ;;  %v658_v63 = vshrl.u32 %v274_v43, 16 }
  0x55   : > { %v2022_v5 = vcombine.low %v609_v52, %v619_v60  ;;  %v647_v9 = vrot.slane %v645_v55, 4  ;;  %v650_v11 = vrot.slane %v648_v56, 5  ;;  %v2836_v14 = vcombine.low %v273_v37, %v274_v43 }
  0x56   : > { %v656_v15 = vrot.slane %v654_v62, 5  ;;  %v660_v17 = vrot.slane %v658_v63, 4  ;;  %v627_v18 = vor.u32 %v626_v40, %v623_v36  ;;  %v637_v20 = vor.u32 %v636_v61, %v632_v53 }
  0x57   : > { %2374 = vmatmul.mubr.msk.bf16.gmra.mxu0 %vm725_vm0, %v2022_v5  ;;  %2412 = vmatmul.mubr.msk.bf16.gmra.mxu1 %vm725_vm0, %v2836_v14  ;;  %v640_v21 = vshll.u32 %v272_v58, 16  ;;  %v651_v22 = vor.u32 %v650_v11, %v647_v9  ;;  %v664_v23 = vshll.u32 %v275_v4, 16 }
  0x58   : > { %v628_v24 = vrot.slane %v627_v18, 4  ;;  %v638_v25 = vrot.slane %v637_v20, 4  ;;  %v661_v26 = vor.u32 %v660_v17, %v656_v15  ;;  %2451 = vmatprep.mubr.msk.bf16.mxu1 %vm725_vm0, %v2654_v3 }
  0x59   : > { %v642_v28 = vrot.slane %v640_v21, 5  ;;  %v652_v30 = vrot.slane %v651_v22, 4  ;;  %v666_v2 = vrot.slane %v664_v23, 5 }
  0x5a   : > { %v633_v33 = vsel %vm2631_vm3, %v628_v24, %v632_v53  ;;  %v662_v36 = vrot.slane %v661_v26, 4 }
  0x5b   : > { %v643_v37 = vsel %vm2631_vm3, %v638_v25, %v642_v28  ;;  %v657_v38 = vsel %vm2631_vm3, %v652_v30, %v656_v15 }
  0x5c   : > { %v2023_v39 = vcombine.low %v633_v33, %v643_v37  ;;  %v667_v40 = vsel %vm2631_vm3, %v662_v36, %v666_v2 }
  0x5d   : > { %v2024_v42 = vcombine.low %v657_v38, %v667_v40 }
  0x5e   : > { %2377 = vmatprep.mubr.msk.bf16.mxu0 %vm725_vm0, %v2023_v39 }
  0x5f   : > { %2378 = vmatmul.mubr.msk.bf16.gmra.mxu0 %vm725_vm0, %v2024_v42  ;;  %2452 = vmatmul.mubr.msk.bf16.vlgmr.msra.gmra.mxu1 %vm725_vm0, %v2676_v35 }
  0x60   : > { %2417 = vmatprep.mubr.msk.bf16.mxu0 %vm725_vm0, %v2627_v27  ;;  %2455 = vmatprep.mubr.msk.bf16.mxu1 %vm725_vm0, %v2682_v41  ;;  %v276_v27 = vld [vmem:[%s2617_s30 + $0xc0] sm:$0xf] }
  0x61   : > { %v1441_v3 = vshrl.u32 %v276_v27, 16 }
  0x63   : > { %v1443_v41 = vrot.slane %v1441_v3, 4 }
  0x67   : > { %2418 = vmatmul.mubr.msk.bf16.vlgmr.msra.gmra.mxu0 %vm725_vm0, %v2647_v57  ;;  %2456 = vmatmul.mubr.msk.bf16.gmra.mxu1 %vm725_vm0, %v2702_v13  ;;  %v277_v57 = vld [vmem:[%s2617_s30 + $0xc4] sm:$0xf] }
  0x68   : > { %2421 = vmatprep.mubr.msk.bf16.mxu0 %vm725_vm0, %v2658_v6  ;;  %2459 = vmatprep.mubr.msk.bf16.mxu1 %vm725_vm0, %v2717_v29  ;;  %v1444_v6 = vshll.u32 %v276_v27, 16  ;;  %v1454_v35 = vshrl.u32 %v277_v57, 16  ;;  %v278_v29 = vld [vmem:[%s2617_s30 + $0xc8] sm:$0x1] }
  0x6f   : > { %2422 = vmatmul.mubr.msk.bf16.gmra.mxu0 %vm725_vm0, %v2674_v34  ;;  %2460 = vmatmul.mubr.msk.bf16.gmra.mxu1 %vm725_vm0, %v2736_v1  ;;  %v1450_v34 = vshll.u32 %v277_v57, 16  ;;  %v1460_v1 = vshll.u32 %v278_v29, 16 }
  0x70   : > { %2425 = vmatprep.mubr.msk.bf16.mxu0 %vm725_vm0, %v2689_v48  ;;  %2463 = vmatprep.mubr.msk.bf16.mxu1 %vm725_vm0, %v2742_v10  ;;  %v1446_v48 = vrot.slane %v1444_v6, 5 }
  0x71   : > { %v1452_v13 = vrot.slane %v1450_v34, 5 }
  0x77   : > { %2426 = vmatmul.mubr.msk.bf16.gmra.mxu0 %vm725_vm0, %v2704_v16  ;;  %2464 = vmatmul.mubr.msk.bf16.gmra.mxu1 %vm725_vm0, %v2762_v51  ;;  %v1456_v16 = vrot.slane %v1454_v35, 4  ;;  %v1462_v51 = vrot.slane %v1460_v1, 5 }
  0x78   : > { %2429 = vmatprep.mubr.msk.bf16.mxu0 %vm725_vm0, %v2719_v31  ;;  %2467 = vmatprep.mubr.msk.bf16.mxu1 %vm725_vm0, %v2777_v8  ;;  %v1447_v31 = vor.u32 %v1446_v48, %v1443_v41 }
  0x7a   : > { %v1448_v10 = vrot.slane %v1447_v31, 4 }
  0x7f   : > { %2430 = vmatmul.mubr.msk.bf16.gmra.mxu0 %vm725_vm0, %v2734_v0  ;;  %2468 = vmatmul.mubr.msk.bf16.gmra.mxu1 %vm725_vm0, %v2796_v50  ;;  %v1457_v0 = vor.u32 %v1456_v16, %v1452_v13 }
  0x80   : > { %2433 = vmatprep.mubr.msk.bf16.mxu0 %vm725_vm0, %v2749_v19  ;;  %2471 = vmatprep.mubr.msk.bf16.mxu1 %vm725_vm0, %v2802_v59 }
  0x81   : > { %v1458_v19 = vrot.slane %v1457_v0, 4 }
  0x83   : > { %v1463_v8 = vsel %vm2631_vm3, %v1458_v19, %v1462_v51 }
  0x87   : > { %2434 = vmatmul.mubr.msk.bf16.gmra.mxu0 %vm725_vm0, %v2764_v54  ;;  %2472 = vmatmul.mubr.msk.bf16.gmra.mxu1 %vm725_vm0, %v2822_v44  ;;  %v1453_v54 = vsel %vm2631_vm3, %v1448_v10, %v1452_v13 }
  0x88   : > { %2437 = vmatprep.mubr.msk.bf16.mxu0 %vm725_vm0, %v2779_v12  ;;  %2475 = vmatprep.mubr.msk.bf16.mxu1 %vm725_vm0, %v2022_v5  ;;  %v2097_v12 = vcombine.low %v1453_v54, %v1463_v8 }
  0x8f   : > { %2438 = vmatmul.mubr.msk.bf16.gmra.mxu0 %vm725_vm0, %v2794_v49  ;;  %2476 = vmatmul.mubr.msk.bf16.gmra.mxu1 %vm725_vm0, %v2023_v39  ;;  %v2077_v49 = vcombine.low %v276_v27, %v277_v57 }
  0x90   : > { %2441 = vmatprep.mubr.msk.bf16.mxu0 %vm725_vm0, %v2809_v7  ;;  %2479 = vmatprep.mubr.msk.bf16.mxu1 %vm725_vm0, %v2024_v42 }
  0x97   : > { %2442 = vmatmul.mubr.msk.bf16.gmra.mxu0 %vm725_vm0, %v2824_v47  ;;  %2480 = vmatmul.mubr.msk.bf16.gmra.mxu1 %vm725_vm0, %v2097_v12 }
  0x98   : > { %2445 = vmatprep.mubr.msk.bf16.mxu0 %vm725_vm0, %v2836_v14 }
  0x9f   : > { %2446 = vmatmul.mubr.msk.bf16.gmra.mxu0 %vm725_vm0, %v2077_v49 }
  0xd9   : > { %v2385_v50 = vpop.f32.mrf.mxu1 }
  0xdb   : > { %v1103_v59 = vpop.f32.mrf.mxu1 }
  0xdd   : > { %v2917_v7 = vpop.f32.mrf.mxu1 }
  0xdf   : > { %v2919_v43 = vpop.f32.mrf.mxu1 }
  0xe1   : > { %v2351_v32 = vpop.f32.mrf.mxu0  ;;  %v2389_v44 = vpop.f32.mrf.mxu1 }
  0xe2   : > { %v2921_v45 = vadd.f32 %v2385_v50, %v2351_v32 }
  0xe3   : > { %v808_v46 = vpop.f32.mrf.mxu0  ;;  %v1119_v47 = vpop.f32.mrf.mxu1 }
  0xe4   : > { %v2923_v52 = vadd.f32 %v1103_v59, %v808_v46 }
  0xe5   : > { %v2925_v53 = vpop.f32.mrf.mxu0  ;;  %v2927_v55 = vpop.f32.mrf.mxu1 }
  0xe7   : > { %v2929_v56 = vpop.f32.mrf.mxu0  ;;  %v2931_v58 = vpop.f32.mrf.mxu1 }
  0xe9   : > { %v2355_v60 = vpop.f32.mrf.mxu0 }
  0xea   : > { %v2933_v61 = vadd.f32 %v2389_v44, %v2355_v60  ;;  %v2393_v62 = vpop.f32.mrf.mxu1 }
  0xeb   : > { %v824_v63 = vpop.f32.mrf.mxu0 }
  0xec   : > { %v2935_v4 = vadd.f32 %v1119_v47, %v824_v63  ;;  %v1135_v5 = vpop.f32.mrf.mxu1 }
  0xed   : > { %v2937_v9 = vpop.f32.mrf.mxu0 }
  0xee   : > { %v2939_v11 = vpop.f32.mrf.mxu1 }
  0xef   : > { %v2941_v14 = vpop.f32.mrf.mxu0 }
  0xf0   : > { %v2943_v15 = vpop.f32.mrf.mxu1 }
  0xf3   : > { %v2359_v17 = vpop.f32.mrf.mxu0  ;;  %v2397_v18 = vpop.f32.mrf.mxu1 }
  0xf4   : > { %v2945_v20 = vadd.f32 %v2393_v62, %v2359_v17 }
  0xf5   : > { %v840_v21 = vpop.f32.mrf.mxu0  ;;  %v1151_v22 = vpop.f32.mrf.mxu1 }
  0xf6   : > { %v2947_v23 = vadd.f32 %v1135_v5, %v840_v21 }
  0xf7   : > { %v2949_v24 = vpop.f32.mrf.mxu0  ;;  %v2951_v25 = vpop.f32.mrf.mxu1 }
  0xf9   : > { %v2953_v26 = vpop.f32.mrf.mxu0  ;;  %v2955_v28 = vpop.f32.mrf.mxu1 }
  0xfb   : > { %v2363_v30 = vpop.f32.mrf.mxu0 }
  0xfc   : > { %v2957_v2 = vadd.f32 %v2397_v18, %v2363_v30  ;;  %v2401_v33 = vpop.f32.mrf.mxu1 }
  0xfd   : > { %v856_v36 = vpop.f32.mrf.mxu0 }
  0xfe   : > { %v2959_v37 = vadd.f32 %v1151_v22, %v856_v36  ;;  %v1167_v38 = vpop.f32.mrf.mxu1 }
  0xff   : > { %v2961_v39 = vpop.f32.mrf.mxu0 }
 0x100   : > { %v2963_v40 = vpop.f32.mrf.mxu1 }
 0x101   : > { %v2965_v42 = vpop.f32.mrf.mxu0 }
 0x102   : > { %v2967_v27 = vpop.f32.mrf.mxu1 }
 0x105   : > { %v2367_v57 = vpop.f32.mrf.mxu0  ;;  %v2405_v3 = vpop.f32.mrf.mxu1 }
 0x106   : > { %v2969_v6 = vadd.f32 %v2401_v33, %v2367_v57 }
 0x107   : > { %v872_v34 = vpop.f32.mrf.mxu0  ;;  %v1183_v35 = vpop.f32.mrf.mxu1 }
 0x108   : > { %v2971_v41 = vadd.f32 %v1167_v38, %v872_v34 }
 0x109   : > { %v2973_v48 = vpop.f32.mrf.mxu0  ;;  %v2975_v13 = vpop.f32.mrf.mxu1 }
 0x10b   : > { %v2977_v16 = vpop.f32.mrf.mxu0  ;;  %v2979_v29 = vpop.f32.mrf.mxu1 }
 0x10d   : > { %v2371_v31 = vpop.f32.mrf.mxu0 }
 0x10e   : > { %v2981_v0 = vadd.f32 %v2405_v3, %v2371_v31  ;;  %v2409_v1 = vpop.f32.mrf.mxu1 }
 0x10f   : > { %v888_v10 = vpop.f32.mrf.mxu0 }
 0x110   : > { %v2983_v19 = vadd.f32 %v1183_v35, %v888_v10  ;;  %v1199_v51 = vpop.f32.mrf.mxu1 }
 0x111   : > { %v2985_v54 = vpop.f32.mrf.mxu0 }
 0x112   : > { %v2987_v8 = vpop.f32.mrf.mxu1 }
 0x113   : > { %v2989_v12 = vpop.f32.mrf.mxu0 }
 0x114   : > { %v2991_v49 = vpop.f32.mrf.mxu1 }
 0x117   : > { %v2375_v50 = vpop.f32.mrf.mxu0  ;;  %v2413_v59 = vpop.f32.mrf.mxu1 }
 0x118   : > { %v2993_v32 = vadd.f32 %v2409_v1, %v2375_v50 }
 0x119   : > { %v904_v44 = vpop.f32.mrf.mxu0  ;;  %v1215_v46 = vpop.f32.mrf.mxu1 }
 0x11a   : > { %v2995_v47 = vadd.f32 %v1199_v51, %v904_v44  ;;  %v1115_v51 = vadd.f32 %v2917_v7, %v2925_v53  ;;  %v3020_v44 = vld [vmem:[%s3168_s2] ss:$0 sm:$0xff] }
 0x11b   : > { %v2997_v60 = vpop.f32.mrf.mxu0  ;;  %v2999_v62 = vpop.f32.mrf.mxu1 }
 0x11c   : > { %3173 = vst [vmem:[#allocation2_spill] sm:$0xff] %v2999_v62 }
 0x11d   : > { %v3001_v63 = vpop.f32.mrf.mxu0  ;;  %v3003_v5 = vpop.f32.mrf.mxu1 }
 0x11e   : > { %3174 = vst [vmem:[#allocation3_spill] sm:$0xff] %v3003_v5 }
 0x11f   : > { %v2379_v17 = vpop.f32.mrf.mxu0  ;;  %v2453_v18 = vpop.f32.mrf.mxu1 }
 0x120   : > { %v3005_v21 = vadd.f32 %v2413_v59, %v2379_v17 }
 0x121   : > { %v920_v22 = vpop.f32.mrf.mxu0  ;;  %v1513_v30 = vpop.f32.mrf.mxu1 }
 0x122   : > { %v3007_v33 = vadd.f32 %v1215_v46, %v920_v22  ;;  %v1107_v22 = vadd.f32 %v2919_v43, %v2929_v56 }
 0x123   : > { %v3009_v36 = vpop.f32.mrf.mxu0  ;;  %v2454_v38 = vpop.f32.mrf.mxu1 }
 0x124   : > { %3175 = vst [vmem:[#allocation4_spill] sm:$0xff] %v3009_v36 }
 0x125   : > { %v3011_v57 = vpop.f32.mrf.mxu0  ;;  %v1516_v3 = vpop.f32.mrf.mxu1 }
 0x126   : > { %3176 = vst [vmem:[#allocation5_spill] sm:$0xff] %v3011_v57 }
 0x127   : > { %v2419_v34 = vpop.f32.mrf.mxu0  ;;  %v2457_v35 = vpop.f32.mrf.mxu1 }
 0x128   : > { %v1410_v31 = vadd.f32 %v2419_v34, %v2921_v45 }
 0x129   : > { %v1281_v1 = vpop.f32.mrf.mxu0  ;;  %v1529_v10 = vpop.f32.mrf.mxu1 }
 0x12a   : > { %v1642_v50 = vadd.f32 %v2453_v18, %v1410_v31  ;;  %v1408_v59 = vadd.f32 %v1281_v1, %v2923_v52  ;;  %v3028_v52 = vld [vmem:[%s3169_s3] ss:$0 sm:$0xff] }
 0x12b   : > { %v2420_v46 = vpop.f32.mrf.mxu0  ;;  %v2458_v17 = vpop.f32.mrf.mxu1 }
 0x12c   : > { %v1640_v45 = vadd.f32 %v1513_v30, %v1408_v59  ;;  %v1411_v34 = vadd.f32 %v2420_v46, %v1115_v51  ;;  %v1681_v7 = vmul.f32 %v3020_v44, %v1642_v50 }
 0x12d   : > { %v1284_v5 = vpop.f32.mrf.mxu0  ;;  %v1532_v57 = vpop.f32.mrf.mxu1 }
 0x12e   : > { %v1643_v53 = vadd.f32 %v2454_v38, %v1411_v34  ;;  %v1409_v18 = vadd.f32 %v1284_v5, %v1107_v22  ;;  %v1679_v62 = vmul.f32 %v3020_v44, %v1640_v45  ;;  %v1720_v38 = vadd.f32 %v3028_v52, %v1681_v7 }
 0x12f   : > { %v2423_v31 = vpop.f32.mrf.mxu0  ;;  %v2461_v1 = vpop.f32.mrf.mxu1  ;;  %v1131_v22 = vadd.f32 %v2927_v55, %v2937_v9  ;;  %v1123_v45 = vadd.f32 %v2931_v58, %v2941_v14 }
 0x130   : > { %v1682_v43 = vmul.f32 %v3020_v44, %v1643_v53  ;;  %v1641_v56 = vadd.f32 %v1516_v3, %v1409_v18  ;;  %v1414_v30 = vadd.f32 %v2423_v31, %v2933_v61  ;;  %v1718_v7 = vadd.f32 %v3028_v52, %v1679_v62 }
 0x131   : > { %v1297_v51 = vpop.f32.mrf.mxu0  ;;  %v1545_v59 = vpop.f32.mrf.mxu1 }
 0x132   : > { %v1721_v5 = vadd.f32 %v3028_v52, %v1682_v43  ;;  %v1680_v50 = vmul.f32 %v3020_v44, %v1641_v56  ;;  %v1412_v46 = vadd.f32 %v1297_v51, %v2935_v4  ;;  %v1646_v61 = vadd.f32 %v2457_v35, %v1414_v30 }
 0x133   : > { %v2424_v3 = vpop.f32.mrf.mxu0  ;;  %v2462_v34 = vpop.f32.mrf.mxu1 }
 0x134   : > { %v2192_v53 = vpack.c.bf16 %v1721_v5, %v1720_v38  ;;  %v1719_v4 = vadd.f32 %v3028_v52, %v1680_v50  ;;  %v1644_v18 = vadd.f32 %v1529_v10, %v1412_v46  ;;  %v1415_v55 = vadd.f32 %v2424_v3, %v1131_v22 }
 0x135   : > { %v1300_v9 = vpop.f32.mrf.mxu0  ;;  %v1548_v31 = vpop.f32.mrf.mxu1  ;;  %v1685_v43 = vmul.f32 %v3020_v44, %v1646_v61  ;;  %v1147_v50 = vadd.f32 %v2939_v11, %v2949_v24  ;;  %v1139_v11 = vadd.f32 %v2943_v15, %v2953_v26  ;;  %v1163_v15 = vadd.f32 %v2951_v25, %v2961_v39 }
 0x136   : > { %2264 = vst [vmem:[%s3045_s12 + $0x8] sm:$0xff] %v2192_v53   ;;  %v2187_v58 = vpack.c.bf16 %v1719_v4, %v1718_v7  ;;  %v1413_v14 = vadd.f32 %v1300_v9, %v1123_v45  ;;  %v1647_v56 = vadd.f32 %v2458_v17, %v1415_v55  ;;  %v1683_v30 = vmul.f32 %v3020_v44, %v1644_v18 }
 0x137   : > { %v2427_v51 = vpop.f32.mrf.mxu0  ;;  %v2465_v35 = vpop.f32.mrf.mxu1  ;;  %v1724_v45 = vadd.f32 %v3028_v52, %v1685_v43  ;;  %v1155_v25 = vadd.f32 %v2955_v28, %v2965_v42 }
 0x138   : > { %2188 = vst [vmem:[%s3045_s12] sm:$0xff] %v2187_v58   ;;  %v1645_v36 = vadd.f32 %v1532_v57, %v1413_v14  ;;  %v1418_v62 = vadd.f32 %v2427_v51, %v2945_v20  ;;  %v1686_v38 = vmul.f32 %v3020_v44, %v1647_v56  ;;  %v1722_v20 = vadd.f32 %v3028_v52, %v1683_v30 }
 0x139   : > { %v1313_v10 = vpop.f32.mrf.mxu0  ;;  %v1561_v5 = vpop.f32.mrf.mxu1 }
 0x13a   : > { %v1684_v46 = vmul.f32 %v3020_v44, %v1645_v36  ;;  %v1650_v22 = vadd.f32 %v2461_v1, %v1418_v62  ;;  %v1416_v17 = vadd.f32 %v1313_v10, %v2947_v23  ;;  %v1725_v61 = vadd.f32 %v3028_v52, %v1686_v38 }
 0x13b   : > { %v2428_v57 = vpop.f32.mrf.mxu0  ;;  %v2466_v3 = vpop.f32.mrf.mxu1 }
 0x13c   : > { %v1723_v7 = vadd.f32 %v3028_v52, %v1684_v46  ;;  %v1419_v53 = vadd.f32 %v2428_v57, %v1147_v50  ;;  %v2202_v24 = vpack.c.bf16 %v1725_v61, %v1724_v45  ;;  %v1648_v36 = vadd.f32 %v1545_v59, %v1416_v17 }
 0x13d   : > { %v1316_v1 = vpop.f32.mrf.mxu0  ;;  %v1564_v23 = vpop.f32.mrf.mxu1  ;;  %v1689_v18 = vmul.f32 %v3020_v44, %v1650_v22 }
 0x13e   : > { %v2197_v4 = vpack.c.bf16 %v1723_v7, %v1722_v20  ;;  %v1651_v55 = vadd.f32 %v2462_v34, %v1419_v53  ;;  %2266 = vst [vmem:[%s3045_s12 + $0x18] sm:$0xff] %v2202_v24   ;;  %v1417_v9 = vadd.f32 %v1316_v1, %v1139_v11  ;;  %v1687_v26 = vmul.f32 %v3020_v44, %v1648_v36 }
 0x13f   : > { %v2431_v58 = vpop.f32.mrf.mxu0  ;;  %v2469_v14 = vpop.f32.mrf.mxu1  ;;  %v1728_v34 = vadd.f32 %v3028_v52, %v1689_v18 }
 0x140   : > { %2265 = vst [vmem:[%s3045_s12 + $0x10] sm:$0xff] %v2197_v4   ;;  %v1690_v43 = vmul.f32 %v3020_v44, %v1651_v55  ;;  %v1422_v56 = vadd.f32 %v2431_v58, %v2957_v2  ;;  %v1649_v59 = vadd.f32 %v1548_v31, %v1417_v9  ;;  %v1726_v17 = vadd.f32 %v3028_v52, %v1687_v26 }
 0x141   : > { %v1329_v51 = vpop.f32.mrf.mxu0  ;;  %v1577_v30 = vpop.f32.mrf.mxu1  ;;  %v1179_v9 = vadd.f32 %v2963_v40, %v2973_v48 }
 0x142   : > { %v1729_v62 = vadd.f32 %v3028_v52, %v1690_v43  ;;  %v1654_v38 = vadd.f32 %v2465_v35, %v1422_v56  ;;  %v1420_v10 = vadd.f32 %v1329_v51, %v2959_v37  ;;  %v1688_v50 = vmul.f32 %v3020_v44, %v1649_v59 }
 0x143   : > { %v2432_v46 = vpop.f32.mrf.mxu0  ;;  %v2470_v2 = vpop.f32.mrf.mxu1 }
 0x144   : > { %v2212_v39 = vpack.c.bf16 %v1729_v62, %v1728_v34  ;;  %v1652_v22 = vadd.f32 %v1561_v5, %v1420_v10  ;;  %v1423_v31 = vadd.f32 %v2432_v46, %v1163_v15  ;;  %v1727_v45 = vadd.f32 %v3028_v52, %v1688_v50 }
 0x145   : > { %v1332_v61 = vpop.f32.mrf.mxu0  ;;  %v1580_v57 = vpop.f32.mrf.mxu1  ;;  %v1693_v37 = vmul.f32 %v3020_v44, %v1654_v38 }
 0x146   : > { %2268 = vst [vmem:[%s3045_s12 + $0x28] sm:$0xff] %v2212_v39   ;;  %v1655_v35 = vadd.f32 %v2466_v3, %v1423_v31  ;;  %v1421_v20 = vadd.f32 %v1332_v61, %v1155_v25  ;;  %v2207_v7 = vpack.c.bf16 %v1727_v45, %v1726_v17  ;;  %v1691_v28 = vmul.f32 %v3020_v44, %v1652_v22 }
 0x147   : > { %v2435_v53 = vpop.f32.mrf.mxu0  ;;  %v2473_v11 = vpop.f32.mrf.mxu1  ;;  %v1732_v4 = vadd.f32 %v3028_v52, %v1693_v37  ;;  %v1195_v39 = vadd.f32 %v2975_v13, %v2985_v54  ;;  %v1187_v13 = vadd.f32 %v2979_v29, %v2989_v12 }
 0x148   : > { %v1694_v42 = vmul.f32 %v3020_v44, %v1655_v35  ;;  %v1653_v5 = vadd.f32 %v1564_v23, %v1421_v20  ;;  %v1426_v24 = vadd.f32 %v2435_v53, %v2969_v6  ;;  %2267 = vst [vmem:[%s3045_s12 + $0x20] sm:$0xff] %v2207_v7   ;;  %v1171_v23 = vadd.f32 %v2967_v27, %v2977_v16 }
 0x149   : > { %v1345_v36 = vpop.f32.mrf.mxu0  ;;  %v1593_v1 = vpop.f32.mrf.mxu1  ;;  %v1730_v56 = vadd.f32 %v3028_v52, %v1691_v28 }
 0x14a   : > { %v1733_v18 = vadd.f32 %v3028_v52, %v1694_v42  ;;  %v1692_v3 = vmul.f32 %v3020_v44, %v1653_v5  ;;  %v1424_v55 = vadd.f32 %v1345_v36, %v2971_v41  ;;  %v1658_v58 = vadd.f32 %v2469_v14, %v1426_v24 }
 0x14b   : > { %v2436_v6 = vpop.f32.mrf.mxu0  ;;  %v2474_v43 = vpop.f32.mrf.mxu1 }
 0x14c   : > { %v2222_v15 = vpack.c.bf16 %v1733_v18, %v1732_v4  ;;  %v1731_v26 = vadd.f32 %v3028_v52, %v1692_v3  ;;  %v1656_v59 = vadd.f32 %v1577_v30, %v1424_v55  ;;  %v1427_v51 = vadd.f32 %v2436_v6, %v1179_v9 }
 0x14d   : > { %v1348_v34 = vpop.f32.mrf.mxu0  ;;  %v1596_v62 = vpop.f32.mrf.mxu1  ;;  %v1697_v40 = vmul.f32 %v3020_v44, %v1658_v58  ;;  %v1211_v4 = vadd.f32 %v2987_v8, %v2997_v60 }
 0x14e   : > { %2270 = vst [vmem:[%s3045_s12 + $0x38] sm:$0xff] %v2222_v15   ;;  %v2217_v41 = vpack.c.bf16 %v1731_v26, %v1730_v56  ;;  %v1425_v38 = vadd.f32 %v1348_v34, %v1171_v23  ;;  %v1659_v48 = vadd.f32 %v2470_v2, %v1427_v51  ;;  %v1695_v14 = vmul.f32 %v3020_v44, %v1656_v59 }
 0x14f   : > { %v2439_v27 = vpop.f32.mrf.mxu0  ;;  %v2477_v16 = vpop.f32.mrf.mxu1  ;;  %v1736_v17 = vadd.f32 %v3028_v52, %v1697_v40 }
 0x150   : > { %2269 = vst [vmem:[%s3045_s12 + $0x30] sm:$0xff] %v2217_v41   ;;  %v1657_v10 = vadd.f32 %v1580_v57, %v1425_v38  ;;  %v1430_v50 = vadd.f32 %v2439_v27, %v2981_v0  ;;  %v1698_v46 = vmul.f32 %v3020_v44, %v1659_v48  ;;  %v1734_v57 = vadd.f32 %v3028_v52, %v1695_v14 }
 0x151   : > { %v1361_v30 = vpop.f32.mrf.mxu0  ;;  %v1609_v25 = vpop.f32.mrf.mxu1 }
 0x152   : > { %v1696_v22 = vmul.f32 %v3020_v44, %v1657_v10  ;;  %v1662_v31 = vadd.f32 %v2473_v11, %v1430_v50  ;;  %v1428_v2 = vadd.f32 %v1361_v30, %v2983_v19  ;;  %v1737_v45 = vadd.f32 %v3028_v52, %v1698_v46  ;;  %v3177_v50 = vld [vmem:[#allocation4_spill] sm:$0xff]  ;;  %v3178_v46 = vld [vmem:[#allocation2_spill] sm:$0xff] }
 0x153   : > { %v2440_v61 = vpop.f32.mrf.mxu0  ;;  %v2478_v0 = vpop.f32.mrf.mxu1  ;;  %v1227_v30 = vadd.f32 %v3178_v46, %v3177_v50 }
 0x154   : > { %v1735_v37 = vadd.f32 %v3028_v52, %v1696_v22  ;;  %v1431_v35 = vadd.f32 %v2440_v61, %v1195_v39  ;;  %v2232_v54 = vpack.c.bf16 %v1737_v45, %v1736_v17  ;;  %v1660_v20 = vadd.f32 %v1593_v1, %v1428_v2  ;;  %v3180_v39 = vld [vmem:[#allocation3_spill] sm:$0xff] }
 0x155   : > { %v1364_v7 = vpop.f32.mrf.mxu0  ;;  %v1701_v19 = vmul.f32 %v3020_v44, %v1662_v31  ;;  %v1612_v5 = vpop.f32.mrf.mxu1 }
 0x156   : > { %v2227_v53 = vpack.c.bf16 %v1735_v37, %v1734_v57  ;;  %v1663_v11 = vadd.f32 %v2474_v43, %v1431_v35  ;;  %2272 = vst [vmem:[%s3045_s12 + $0x48] sm:$0xff] %v2232_v54   ;;  %v1429_v28 = vadd.f32 %v1364_v7, %v1187_v13  ;;  %v1699_v29 = vmul.f32 %v3020_v44, %v1660_v20 }
 0x157   : > { %v2443_v42 = vpop.f32.mrf.mxu0  ;;  %v1740_v18 = vadd.f32 %v3028_v52, %v1701_v19  ;;  %v2481_v6 = vpop.f32.mrf.mxu1 }
 0x158   : > { %2271 = vst [vmem:[%s3045_s12 + $0x40] sm:$0xff] %v2227_v53   ;;  %v1702_v24 = vmul.f32 %v3020_v44, %v1663_v11  ;;  %v1434_v36 = vadd.f32 %v2443_v42, %v2993_v32  ;;  %v1661_v12 = vadd.f32 %v1596_v62, %v1429_v28  ;;  %v1203_v32 = vadd.f32 %v2991_v49, %v3001_v63 }
 0x159   : > { %v1377_v1 = vpop.f32.mrf.mxu0  ;;  %v1738_v56 = vadd.f32 %v3028_v52, %v1699_v29  ;;  %v1625_v62 = vpop.f32.mrf.mxu1 }
 0x15a   : > { %v1741_v3 = vadd.f32 %v3028_v52, %v1702_v24  ;;  %v1666_v55 = vadd.f32 %v2477_v16, %v1434_v36  ;;  %v1432_v9 = vadd.f32 %v1377_v1, %v2995_v47  ;;  %v1700_v23 = vmul.f32 %v3020_v44, %v1661_v12 }
 0x15b   : > { %v2444_v58 = vpop.f32.mrf.mxu0 }
 0x15c   : > { %v2242_v8 = vpack.c.bf16 %v1741_v3, %v1740_v18  ;;  %v1664_v60 = vadd.f32 %v1609_v25, %v1432_v9  ;;  %v1435_v43 = vadd.f32 %v2444_v58, %v1211_v4  ;;  %v1739_v15 = vadd.f32 %v3028_v52, %v1700_v23  ;;  %v3179_v25 = vld [vmem:[#allocation5_spill] sm:$0xff] }
 0x15d   : > { %v1380_v26 = vpop.f32.mrf.mxu0  ;;  %v1705_v59 = vmul.f32 %v3020_v44, %v1666_v55  ;;  %v1219_v22 = vadd.f32 %v3180_v39, %v3179_v25 }
 0x15e   : > { %2274 = vst [vmem:[%s3045_s12 + $0x58] sm:$0xff] %v2242_v8   ;;  %v1667_v47 = vadd.f32 %v2478_v0, %v1435_v43  ;;  %v1433_v51 = vadd.f32 %v1380_v26, %v1203_v32  ;;  %v2237_v34 = vpack.c.bf16 %v1739_v15, %v1738_v56  ;;  %v1703_v38 = vmul.f32 %v3020_v44, %v1664_v60 }
 0x15f   : > { %v2447_v41 = vpop.f32.mrf.mxu0  ;;  %v1744_v27 = vadd.f32 %v3028_v52, %v1705_v59 }
 0x160   : > { %v1706_v49 = vmul.f32 %v3020_v44, %v1667_v47  ;;  %v1665_v63 = vadd.f32 %v1612_v5, %v1433_v51  ;;  %v1438_v40 = vadd.f32 %v2447_v41, %v3005_v21  ;;  %2273 = vst [vmem:[%s3045_s12 + $0x50] sm:$0xff] %v2237_v34   ;;  %v2482_v21 = vpop.f32.mrf.mxu1  ;;  %v1742_v17 = vadd.f32 %v3028_v52, %v1703_v38 }
 0x161   : > { %v1393_v48 = vpop.f32.mrf.mxu0 }
 0x162   : > { %v1745_v16 = vadd.f32 %v3028_v52, %v1706_v49  ;;  %v1704_v14 = vmul.f32 %v3020_v44, %v1665_v63  ;;  %v1436_v10 = vadd.f32 %v1393_v48, %v3007_v33  ;;  %v1670_v31 = vadd.f32 %v2481_v6, %v1438_v40  ;;  %v1628_v54 = vpop.f32.mrf.mxu1 }
 0x163   : > { %v2448_v2 = vpop.f32.mrf.mxu0 }
 0x164   : > { %v2252_v45 = vpack.c.bf16 %v1745_v16, %v1744_v27  ;;  %v1743_v61 = vadd.f32 %v3028_v52, %v1704_v14  ;;  %v1668_v0 = vadd.f32 %v1625_v62, %v1436_v10  ;;  %v1439_v57 = vadd.f32 %v2448_v2, %v1227_v30 }
 0x165   : > { %v1396_v37 = vpop.f32.mrf.mxu0  ;;  %v1709_v13 = vmul.f32 %v3020_v44, %v1670_v31 }
 0x166   : > { %2276 = vst [vmem:[%s3045_s12 + $0x68] sm:$0xff] %v2252_v45   ;;  %v2247_v33 = vpack.c.bf16 %v1743_v61, %v1742_v17  ;;  %v1437_v35 = vadd.f32 %v1396_v37, %v1219_v22  ;;  %v1671_v20 = vadd.f32 %v2482_v21, %v1439_v57  ;;  %v1707_v7 = vmul.f32 %v3020_v44, %v1668_v0 }
 0x167   : > { %v1748_v28 = vadd.f32 %v3028_v52, %v1709_v13 }
 0x168   : > { %2275 = vst [vmem:[%s3045_s12 + $0x60] sm:$0xff] %v2247_v33   ;;  %v1669_v53 = vadd.f32 %v1628_v54, %v1437_v35  ;;  %v1710_v19 = vmul.f32 %v3020_v44, %v1671_v20  ;;  %v1746_v5 = vadd.f32 %v3028_v52, %v1707_v7 }
 0x16a   : > { %v1708_v11 = vmul.f32 %v3020_v44, %v1669_v53  ;;  %v1749_v42 = vadd.f32 %v3028_v52, %v1710_v19 }
 0x16c   : > { %v1747_v24 = vadd.f32 %v3028_v52, %v1708_v11  ;;  %v2262_v36 = vpack.c.bf16 %v1749_v42, %v1748_v28 }
 0x16e   : > { %v2257_v4 = vpack.c.bf16 %v1747_v24, %v1746_v5  ;;  %2278 = vst [vmem:[%s3045_s12 + $0x78] sm:$0xff] %v2262_v36  }
 0x170   : > { %2277 = vst [vmem:[%s3045_s12 + $0x70] sm:$0xff] %v2257_v4  }
 0x171 PF: > { %s14_s17 = sadd.s32 1, %s2551_s17   ;;  %s3181_s15 = smov %s2547_s16 }
 0x172   : > { %p11_p5 = scmp.ge.s32.totalorder %s14_s17, 4   ;;  %s3182_s16 = smov %s3184_s18 }
 0x174   :  { %13 = sbr.rel (!%p11_p5) target bundleno = 2 (0x2), region = 70 }

// kernel: forward.6
= control target key start
LH: loop header
LB: loop body
LE: loop exit
PB: predicated region body
PF: predicated region fallthrough
CT: control target
= control target key end

     0   :  { %s3393_s15 = smov 0   ;;  %s3395_s16 = smov 0   ;;  %s4255_s0 = inlined_call_operand.vmem [shape: bf16[2,9,9,512], index: 0, kind: input, shape index: {}]   ;;  %s4256_s1 = inlined_call_operand.vmem [shape: bf16[4,512,128], index: 1, kind: input, shape index: {}]   ;;  %s4257_s2 = inlined_call_operand.vmem [shape: f32[1,128], index: 2, kind: input, shape index: {}]   ;;  %s4258_s3 = inlined_call_operand.vmem [shape: f32[1,128], index: 3, kind: input, shape index: {}]   ;;  %s4259_s4 = inlined_call_operand.vmem [shape: bf16[2,8,8,128], index: 4, kind: output, shape index: {}]  }
   0x1   :  { %s3397_s17 = smov 0  }
   0x2 LB: > { %s26_s18 = sadd.s32 1, %s3362_s16  ;;  %p2455_p0 = scmp.ge.s32.totalorder %s3366_s17, 1  ;;  %s3366_s17 = sphi %s3397_s17, %s14_s17   ;;  %s3362_s16 = sphi %s3395_s16, %s4265_s16   ;;  %s3358_s15 = sphi %s3393_s15, %s4264_s15  }
   0x3   : > { %p28_p1 = scmp.ge.s32.totalorder %s26_s18, 2  ;;  %p176_p2 = scmp.lt.s32.totalorder %s3366_s17, 3 }
   0x5   : > { %s4267_s18 = smov (%p28_p1, %s26_s18), 0  ;;  %p177_p3 = pnand %p2455_p0, %p176_p2 }
   0x6   : > { %p206_p4 = scmp.lt.s32.totalorder (!%p177_p3), %s3358_s15, 1 }
   0x7   : > { %180 = sbr.rel (%p177_p3) target bundleno = 393 (0x189), region = 36 }
   0xc   : > { %v3216_v0 = vld [vmem:[%s4256_s1 + $0x178] sm:$0xff]   ;;  %v3220_v4 = vld [vmem:[%s4256_s1 + $0x170] sm:$0xff]   ;;  %v3224_v8 = vld [vmem:[%s4256_s1 + $0x168] sm:$0xff]   ;;  %s4269_s15 = smov (!%p206_p4, %s3358_s15), 1  ;;  %vm326_vm0 = vsmask.f32 3328 }
   0xd   : > { %v3217_v1 = vld [vmem:[%s4256_s1 + $0x1f8] sm:$0xff]   ;;  %2871 = vmatprep.subr.bf16.mxu0 %v3216_v0  ;;  %v3221_v5 = vld [vmem:[%s4256_s1 + $0x1f0] sm:$0xff]   ;;  %v3225_v9 = vld [vmem:[%s4256_s1 + $0x1e8] sm:$0xff]   ;;  %s3191_s27 = smul.u32 288, %s4269_s15  ;;  %vm327_vm1 = vsmask.f32 7440 }
   0xe   : > { %v3218_v2 = vld [vmem:[%s4256_s1 + $0x138] sm:$0xff]   ;;  %2911 = vmatprep.subr.bf16.mxu1 %v3217_v1  ;;  %v3222_v6 = vld [vmem:[%s4256_s1 + $0x130] sm:$0xff]   ;;  %v3226_v10 = vld [vmem:[%s4256_s1 + $0x128] sm:$0xff]  }
   0xf   : > { %v3219_v3 = vld [vmem:[%s4256_s1 + $0x1b8] sm:$0xff]   ;;  %2872 = vmatpush3.bf16.msra.mxu0 %v3218_v2  ;;  %v3223_v7 = vld [vmem:[%s4256_s1 + $0x1b0] sm:$0xff]   ;;  %v3227_v11 = vld [vmem:[%s4256_s1 + $0x1a8] sm:$0xff]   ;;  %s3511_s12 = scalar_lea.vmem %s4255_s0, %s3191_s27  ;;  %s2847_s27 = sshll.u32 %s4269_s15, 5 }
  0x10   : > { %2912 = vmatpush3.bf16.msra.mxu1 %v3219_v3  ;;  %2873 = vmatprep.subr.bf16.mxu0 %v3220_v4  ;;  %v3228_v12 = vld [vmem:[%s4256_s1 + $0x160] sm:$0xff]   ;;  %v3232_v16 = vld [vmem:[%s4256_s1 + $0x158] sm:$0xff]   ;;  %v3236_v20 = vld [vmem:[%s4256_s1 + $0x150] sm:$0xff]   ;;  %s4217_s30 = scalar_lea.vmem %s4259_s4, %s2847_s27 }
  0x11   : > { %2913 = vmatprep.subr.bf16.mxu1 %v3221_v5  ;;  %v3229_v13 = vld [vmem:[%s4256_s1 + $0x1e0] sm:$0xff]   ;;  %v3233_v17 = vld [vmem:[%s4256_s1 + $0x1d8] sm:$0xff]   ;;  %v3237_v21 = vld [vmem:[%s4256_s1 + $0x1d0] sm:$0xff]  }
  0x12   : > { %v3230_v14 = vld [vmem:[%s4256_s1 + $0x120] sm:$0xff]   ;;  %v3234_v18 = vld [vmem:[%s4256_s1 + $0x118] sm:$0xff]   ;;  %v3238_v22 = vld [vmem:[%s4256_s1 + $0x110] sm:$0xff]  }
  0x13   : > { %2874 = vmatpush3.bf16.msra.mxu0 %v3222_v6  ;;  %v3231_v15 = vld [vmem:[%s4256_s1 + $0x1a0] sm:$0xff]   ;;  %v3235_v19 = vld [vmem:[%s4256_s1 + $0x198] sm:$0xff]   ;;  %v3239_v23 = vld [vmem:[%s4256_s1 + $0x190] sm:$0xff]  }
  0x14   : > { %2914 = vmatpush3.bf16.msra.mxu1 %v3223_v7  ;;  %2875 = vmatprep.subr.bf16.mxu0 %v3224_v8  ;;  %v3240_v24 = vld [vmem:[%s4256_s1 + $0x148] sm:$0xff]   ;;  %v3244_v28 = vld [vmem:[%s4256_s1 + $0x140] sm:$0xff]   ;;  %v228_v33 = vld [vmem:[%s3511_s12 + $0x10] sm:$0x11] }
  0x15   : > { %2915 = vmatprep.subr.bf16.mxu1 %v3225_v9  ;;  %v3241_v25 = vld [vmem:[%s4256_s1 + $0x1c8] sm:$0xff]   ;;  %v3245_v29 = vld [vmem:[%s4256_s1 + $0x1c0] sm:$0xff]   ;;  %v232_v35 = vld [vmem:[%s3511_s12 + $0x30] sm:$0x11]  ;;  %v339_v40 = vshll.u32 %v228_v33, 16 }
  0x16   : > { %v3242_v26 = vld [vmem:[%s4256_s1 + $0x108] sm:$0xff]   ;;  %v3246_v30 = vld [vmem:[%s4256_s1 + $0x100] sm:$0xff]   ;;  %v236_v37 = vld [vmem:[%s3511_s12 + $0x50] sm:$0x11]  ;;  %v367_v45 = vshll.u32 %v232_v35, 16 }
  0x17   : > { %2876 = vmatpush3.bf16.msra.mxu0 %v3226_v10  ;;  %v3243_v27 = vld [vmem:[%s4256_s1 + $0x188] sm:$0xff]   ;;  %v3247_v31 = vld [vmem:[%s4256_s1 + $0x180] sm:$0xff]   ;;  %v229_v47 = vld [vmem:[%s3511_s12 + $0x18] sm:$0x11]  ;;  %v341_v49 = vrot.slane %v339_v40, 5  ;;  %v395_v56 = vshll.u32 %v236_v37, 16 }
  0x18   : > { %2916 = vmatpush3.bf16.msra.mxu1 %v3227_v11  ;;  %2877 = vmatprep.subr.bf16.mxu0 %v3228_v12  ;;  %v3520_v32 = vld [vmem:[%s3511_s12] sm:$0xff]  ;;  %v3535_v42 = vld [vmem:[%s3511_s12 + $0x8] sm:$0xff]  ;;  %v369_v54 = vrot.slane %v367_v45, 5  ;;  %v233_v59 = vld [vmem:[%s3511_s12 + $0x38] sm:$0x11]  ;;  %v353_v2 = vshll.u32 %v229_v47, 16 }
  0x19   : > { %2917 = vmatprep.subr.bf16.mxu1 %v3229_v13  ;;  %v3524_v34 = vld [vmem:[%s3511_s12 + $0x20] sm:$0xff]  ;;  %v330_v38 = vshrl.u32 %v3520_v32, 16  ;;  %v333_v39 = vshll.u32 %v3520_v32, 16  ;;  %v3542_v52 = vld [vmem:[%s3511_s12 + $0x28] sm:$0xff]  ;;  %v344_v60 = vshrl.u32 %v3535_v42, 16  ;;  %v347_v61 = vshll.u32 %v3535_v42, 16  ;;  %vm3552_vm2 = vmor %vm326_vm0, %vm327_vm1 }
  0x1a   : > { %v3528_v36 = vld [vmem:[%s3511_s12 + $0x40] sm:$0xff]  ;;  %v358_v41 = vshrl.u32 %v3524_v34, 16  ;;  %v361_v44 = vshll.u32 %v3524_v34, 16  ;;  %v3248_v62 = vld [vmem:[%s4256_s1 + $0x78] sm:$0xff]   ;;  %v397_v1 = vrot.slane %v395_v56, 5  ;;  %v372_v3 = vshrl.u32 %v3542_v52, 16 }
  0x1b   : > { %2878 = vmatpush3.bf16.msra.mxu0 %v3230_v14  ;;  %v332_v43 = vrot.slane %v330_v38, 4  ;;  %v386_v46 = vshrl.u32 %v3528_v36, 16  ;;  %v335_v48 = vrot.slane %v333_v39, 5  ;;  %v389_v51 = vshll.u32 %v3528_v36, 16  ;;  %v3249_v4 = vld [vmem:[%s4256_s1 + $0xf8] sm:$0xff]   ;;  %v3561_v7 = vld [vmem:[%s3511_s12 + $0x48] sm:$0xff] }
  0x1c   : > { %2918 = vmatpush3.bf16.msra.mxu1 %v3231_v15  ;;  %2879 = vmatprep.subr.bf16.mxu0 %v3232_v16  ;;  %v360_v50 = vrot.slane %v358_v41, 4  ;;  %v363_v53 = vrot.slane %v361_v44, 5  ;;  %v346_v8 = vrot.slane %v344_v60, 4  ;;  %v349_v9 = vrot.slane %v347_v61, 5  ;;  %v237_v11 = vld [vmem:[%s3511_s12 + $0x58] sm:$0x11] }
  0x1d   : > { %2919 = vmatprep.subr.bf16.mxu1 %v3233_v17  ;;  %v388_v55 = vrot.slane %v386_v46, 4  ;;  %v336_v57 = vor.u32 %v335_v48, %v332_v43  ;;  %v391_v58 = vrot.slane %v389_v51, 5  ;;  %v355_v12 = vrot.slane %v353_v2, 5  ;;  %v3251_v45 = vld [vmem:[%s4256_s1 + $0xb8] sm:$0xff]   ;;  %v3254_v46 = vld [vmem:[%s4256_s1 + $0x30] sm:$0xff]   ;;  %v3611_v51 = vld [vmem:[%s3511_s12 + $0x60] sm:$0xff] }
  0x1e   : > { %v364_v0 = vor.u32 %v363_v53, %v360_v50  ;;  %v374_v13 = vrot.slane %v372_v3, 4  ;;  %v375_v14 = vshll.u32 %v3542_v52, 16  ;;  %v350_v17 = vor.u32 %v349_v9, %v346_v8  ;;  %v3253_v50 = vld [vmem:[%s4256_s1 + $0xf0] sm:$0xff]   ;;  %v241_v60 = vld [vmem:[%s3511_s12 + $0x78] sm:$0x11]  ;;  %v3256_v61 = vld [vmem:[%s4256_s1 + $0x68] sm:$0xff]  }
  0x1f   : > { %2880 = vmatpush3.bf16.msra.mxu0 %v3234_v18  ;;  %v337_v5 = vrot.slane %v336_v57, 4  ;;  %v392_v6 = vor.u32 %v391_v58, %v388_v55  ;;  %v381_v18 = vshll.u32 %v233_v59, 16  ;;  %v409_v37 = vshll.u32 %v237_v11, 16  ;;  %v240_v53 = vld [vmem:[%s3511_s12 + $0x70] sm:$0x11]  ;;  %v3620_v59 = vld [vmem:[%s3511_s12 + $0x68] sm:$0xff] }
  0x20   : > { %2920 = vmatpush3.bf16.msra.mxu1 %v3235_v19  ;;  %2881 = vmatprep.subr.bf16.mxu0 %v3236_v20  ;;  %v365_v10 = vrot.slane %v364_v0, 4  ;;  %v377_v20 = vrot.slane %v375_v14, 5  ;;  %v2684_v40 = vcombine.high %v3524_v34, %v3528_v36  ;;  %v2686_v41 = vcombine.high %v3542_v52, %v3561_v7  ;;  %v3255_v8 = vld [vmem:[%s4256_s1 + $0xb0] sm:$0xff]  }
  0x21   : > { %2921 = vmatprep.subr.bf16.mxu1 %v3237_v21  ;;  %v342_v15 = vsel %vm3552_vm2, %v337_v5, %v341_v49  ;;  %v393_v16 = vrot.slane %v392_v6, 4  ;;  %v400_v21 = vshrl.u32 %v3561_v7, 16  ;;  %v411_v44 = vrot.slane %v409_v37, 5  ;;  %v244_v37 = vld [vmem:[%s3511_s12 + $0x90] sm:$0x11] }
  0x22   : > { %v3569_v19 = vsel %vm3552_vm2, %v365_v10, %v369_v54  ;;  %v2683_v47 = vcombine.low %v3524_v34, %v3528_v36  ;;  %v2685_v48 = vcombine.low %v3542_v52, %v3561_v7  ;;  %v414_v58 = vshrl.u32 %v3611_v51, 16 }
  0x23   : > { %2882 = vmatpush3.bf16.msra.mxu0 %v3238_v22  ;;  %v403_v22 = vshll.u32 %v3561_v7, 16  ;;  %v402_v33 = vrot.slane %v400_v21, 4  ;;  %v423_v0 = vshll.u32 %v240_v53, 16  ;;  %v431_v2 = vshll.u32 %v3620_v59, 16 }
  0x24   : > { %2922 = vmatpush3.bf16.msra.mxu1 %v3239_v23  ;;  %2883 = vmatprep.subr.bf16.mxu0 %v3240_v24  ;;  %v3250_v23 = vld [vmem:[%s4256_s1 + $0x38] sm:$0xff]   ;;  %v3578_v24 = vsel %vm3552_vm2, %v393_v16, %v397_v1  ;;  %v428_v1 = vshrl.u32 %v3620_v59, 16  ;;  %v437_v5 = vshll.u32 %v241_v60, 16  ;;  %v451_v53 = vshll.u32 %v244_v37, 16 }
  0x25   : > { %2923 = vmatprep.subr.bf16.mxu1 %v3241_v25  ;;  %v2523_v25 = vcombine.low %v342_v15, %v3569_v19  ;;  %v405_v35 = vrot.slane %v403_v22, 5  ;;  %v2796_v54 = vcombine.high %v3569_v19, %v3578_v24  ;;  %v433_v11 = vrot.slane %v431_v2, 5  ;;  %v3260_v22 = vld [vmem:[%s4256_s1 + $0x60] sm:$0xff]  }
  0x26   : > { %v430_v10 = vrot.slane %v428_v1, 4  ;;  %v425_v14 = vrot.slane %v423_v0, 5  ;;  %v249_v0 = vld [vmem:[%s3511_s12 + $0xb8] sm:$0x11]  ;;  %v453_v2 = vrot.slane %v451_v53, 5 }
  0x27   : > { %2884 = vmatpush3.bf16.msra.mxu0 %v3242_v26  ;;  %v2524_v26 = vcombine.high %v342_v15, %v3569_v19  ;;  %v406_v43 = vor.u32 %v405_v35, %v402_v33  ;;  %v3258_v15 = vld [vmem:[%s4256_s1 + $0x28] sm:$0xff]   ;;  %v3263_v33 = vld [vmem:[%s4256_s1 + $0xa0] sm:$0xff]  }
  0x28   : > { %2924 = vmatpush3.bf16.msra.mxu1 %v3243_v27  ;;  %2885 = vmatprep.subr.bf16.mxu0 %v3244_v28  ;;  %v351_v27 = vrot.slane %v350_v17, 4  ;;  %v3252_v28 = vld [vmem:[%s4256_s1 + $0x70] sm:$0xff]   ;;  %v434_v17 = vor.u32 %v433_v11, %v430_v10  ;;  %v3674_v35 = vld [vmem:[%s3511_s12 + $0x80] sm:$0xff] }
  0x29   : > { %2925 = vmatprep.subr.bf16.mxu1 %v3245_v29  ;;  %v2795_v29 = vcombine.low %v3569_v19, %v3578_v24  ;;  %906 = vmatprep.mubr.bf16.mxu0 %v2524_v26  ;;  %v407_v55 = vrot.slane %v406_v43, 4  ;;  %v3682_v43 = vld [vmem:[%s3511_s12 + $0xa0] sm:$0xff] }
  0x2a   : > { %v356_v38 = vsel %vm3552_vm2, %v351_v27, %v355_v12  ;;  %v3257_v12 = vld [vmem:[%s4256_s1 + $0xe8] sm:$0xff]   ;;  %v3262_v27 = vld [vmem:[%s4256_s1 + $0x20] sm:$0xff]  }
  0x2b   : > { %2886 = vmatpush3.bf16.msra.mxu0 %v3246_v30  ;;  %v378_v30 = vor.u32 %v377_v20, %v374_v13  ;;  %v3631_v3 = vsel %vm3552_vm2, %v407_v55, %v411_v44  ;;  %v3259_v20 = vld [vmem:[%s4256_s1 + $0xa8] sm:$0xff]   ;;  %v248_v44 = vld [vmem:[%s3511_s12 + $0xb0] sm:$0x11]  ;;  %v470_v55 = vshrl.u32 %v3682_v43, 16 }
  0x2c   : > { %2926 = vmatpush3.bf16.msra.mxu1 %v3247_v31  ;;  %2951 = vmatprep.subr.bf16.mxu0 %v3248_v62  ;;  %v383_v31 = vrot.slane %v381_v18, 5  ;;  %v417_v62 = vshll.u32 %v3611_v51, 16  ;;  %v439_v18 = vrot.slane %v437_v5, 5 }
  0x2d   : > { %2991 = vmatprep.subr.bf16.mxu1 %v3249_v4  ;;  %v379_v39 = vrot.slane %v378_v30, 4  ;;  %v416_v4 = vrot.slane %v414_v58, 4  ;;  %v245_v58 = vld [vmem:[%s3511_s12 + $0x98] sm:$0x11] }
  0x2e   : > { %907 = vmatmul.mubr.bf16.vlgmr.msra.gmra.mxu0 %v2523_v25  ;;  %v419_v9 = vrot.slane %v417_v62, 5  ;;  %v3261_v25 = vld [vmem:[%s4256_s1 + $0xe0] sm:$0xff]   ;;  %v3694_v62 = vld [vmem:[%s3511_s12 + $0xa8] sm:$0xff] }
  0x2f   : > { %2952 = vmatpush3.bf16.msra.mxu0 %v3250_v23  ;;  %v3605_v49 = vsel %vm3552_vm2, %v379_v39, %v383_v31  ;;  %v435_v23 = vrot.slane %v434_v17, 4  ;;  %v487_v17 = vshll.u32 %v3694_v62, 16 }
  0x30   : > { %2953 = vmatprep.subr.bf16.mxu0 %v3252_v28  ;;  %v2525_v56 = vcombine.low %v356_v38, %v3605_v49  ;;  %v2526_v57 = vcombine.high %v356_v38, %v3605_v49  ;;  %v2797_v6 = vcombine.low %v3605_v49, %v3631_v3  ;;  %v420_v13 = vor.u32 %v419_v9, %v416_v4 }
  0x31   : > { %v2798_v16 = vcombine.high %v3605_v49, %v3631_v3  ;;  %v3666_v30 = vsel %vm3552_vm2, %v435_v23, %v439_v18  ;;  %v472_v4 = vrot.slane %v470_v55, 4  ;;  %v493_v18 = vshll.u32 %v249_v0, 16  ;;  %v3269_v0 = vld [vmem:[%s4256_s1 + $0xd0] sm:$0xff]  }
  0x32   : > { %971 = vmatprep.mubr.bf16.mxu1 %v2526_v57  ;;  %v421_v21 = vrot.slane %v420_v13, 4  ;;  %v2530_v38 = vcombine.high %v3631_v3, %v3666_v30  ;;  %v2529_v39 = vcombine.low %v3631_v3, %v3666_v30  ;;  %v479_v57 = vshll.u32 %v248_v44, 16  ;;  %v3264_v13 = vld [vmem:[%s4256_s1 + $0x58] sm:$0xff]  }
  0x33   : > { %2954 = vmatpush3.bf16.msra.mxu0 %v3254_v46  ;;  %972 = vmatmul.mubr.bf16.vlgmr.msra.gmra.mxu1 %v2525_v56  ;;  %v445_v46 = vshll.u32 %v3674_v35, 16  ;;  %v473_v56 = vshll.u32 %v3682_v43, 16 }
  0x34   : > { %2955 = vmatprep.subr.bf16.mxu0 %v3256_v61  ;;  %2992 = vmatpush3.bf16.msra.mxu1 %v3251_v45  ;;  %v3657_v26 = vsel %vm3552_vm2, %v421_v21, %v425_v14  ;;  %v442_v45 = vshrl.u32 %v3674_v35, 16 }
  0x35   : > { %2993 = vmatprep.subr.bf16.mxu1 %v3253_v50  ;;  %v2528_v28 = vcombine.high %v3578_v24, %v3657_v26  ;;  %v2527_v31 = vcombine.low %v3578_v24, %v3657_v26  ;;  %v3688_v50 = vld [vmem:[%s3511_s12 + $0x88] sm:$0xff]  ;;  %979 = vmatprep.mubr.bf16.mxu1 %v2530_v38  ;;  %v447_v61 = vrot.slane %v445_v46, 5  ;;  %v475_v5 = vrot.slane %v473_v56, 5 }
  0x36   : > { %v444_v60 = vrot.slane %v442_v45, 4  ;;  %v456_v1 = vshrl.u32 %v3688_v50, 16  ;;  %v459_v11 = vshll.u32 %v3688_v50, 16  ;;  %v3267_v45 = vld [vmem:[%s4256_s1 + $0x98] sm:$0xff]   ;;  %v2688_v46 = vcombine.high %v3611_v51, %v3674_v35 }
  0x37   : > { %2956 = vmatpush3.bf16.msra.mxu0 %v3258_v15  ;;  %914 = vmatprep.mubr.bf16.mxu0 %v2528_v28  ;;  %v476_v14 = vor.u32 %v475_v5, %v472_v4  ;;  %v484_v15 = vshrl.u32 %v3694_v62, 16  ;;  %v2690_v53 = vcombine.high %v3620_v59, %v3688_v50 }
  0x38   : > { %2994 = vmatpush3.bf16.msra.mxu1 %v3255_v8  ;;  %2957 = vmatprep.subr.bf16.mxu0 %v3260_v22  ;;  %v481_v8 = vrot.slane %v479_v57, 5  ;;  %v448_v9 = vor.u32 %v447_v61, %v444_v60  ;;  %v458_v10 = vrot.slane %v456_v1, 4  ;;  %v461_v22 = vrot.slane %v459_v11, 5  ;;  %v3758_v11 = vld [vmem:[%s3511_s12 + $0xc0] sm:$0xff] }
  0x39   : > { %2995 = vmatprep.subr.bf16.mxu1 %v3257_v12  ;;  %915 = vmatmul.mubr.bf16.gmra.mxu0 %v2527_v31  ;;  %v465_v12 = vshll.u32 %v245_v58, 16  ;;  %v486_v28 = vrot.slane %v484_v15, 4  ;;  %v489_v31 = vrot.slane %v487_v17, 5  ;;  %v3268_v58 = vld [vmem:[%s4256_s1 + $0x50] sm:$0xff]   ;;  %v2687_v60 = vcombine.low %v3611_v51, %v3674_v35 }
  0x3a   : > { %v449_v21 = vrot.slane %v448_v9, 4  ;;  %v462_v38 = vor.u32 %v461_v22, %v458_v10  ;;  %v2689_v1 = vcombine.low %v3620_v59, %v3688_v50  ;;  %v3271_v10 = vld [vmem:[%s4256_s1 + $0x90] sm:$0xff]   ;;  %v501_v22 = vshll.u32 %v3758_v11, 16 }
  0x3b   : > { %2958 = vmatpush3.bf16.msra.mxu0 %v3262_v27  ;;  %980 = vmatmul.mubr.bf16.gmra.mxu1 %v2529_v39  ;;  %v467_v23 = vrot.slane %v465_v12, 5  ;;  %v477_v27 = vrot.slane %v476_v14, 4  ;;  %v490_v44 = vor.u32 %v489_v31, %v486_v28  ;;  %v252_v12 = vld [vmem:[%s3511_s12 + $0xd0] sm:$0x11] }
  0x3c   : > { %2996 = vmatpush3.bf16.msra.mxu1 %v3259_v20  ;;  %v3265_v20 = vld [vmem:[%s4256_s1 + $0xd8] sm:$0xff]   ;;  %2959 = vmatprep.subr.bf16.mxu0 %v3264_v13  ;;  %v3712_v37 = vsel %vm3552_vm2, %v449_v21, %v453_v2  ;;  %v463_v56 = vrot.slane %v462_v38, 4  ;;  %v498_v21 = vshrl.u32 %v3758_v11, 16 }
  0x3d   : > { %2997 = vmatprep.subr.bf16.mxu1 %v3261_v25  ;;  %v3266_v25 = vld [vmem:[%s4256_s1 + $0x18] sm:$0xff]   ;;  %v3716_v39 = vsel %vm3552_vm2, %v477_v27, %v481_v8  ;;  %v491_v61 = vrot.slane %v490_v44, 4  ;;  %v2800_v2 = vcombine.high %v3657_v26, %v3712_v37  ;;  %v3270_v8 = vld [vmem:[%s4256_s1 + $0x10] sm:$0xff]   ;;  %v503_v44 = vrot.slane %v501_v22, 5 }
  0x3e   : > { %v2532_v55 = vcombine.high %v3712_v37, %v3716_v39  ;;  %v2531_v57 = vcombine.low %v3712_v37, %v3716_v39  ;;  %v3745_v5 = vsel %vm3552_vm2, %v463_v56, %v467_v23  ;;  %v3776_v23 = vld [vmem:[%s3511_s12 + $0xc8] sm:$0xff]  ;;  %v500_v38 = vrot.slane %v498_v21, 4 }
  0x3f   : > { %2960 = vmatpush3.bf16.msra.mxu0 %v3266_v25  ;;  %v2802_v13 = vcombine.high %v3666_v30, %v3745_v5  ;;  %v507_v25 = vshll.u32 %v252_v12, 16  ;;  %v512_v56 = vshrl.u32 %v3776_v23, 16  ;;  %v515_v12 = vshll.u32 %v3776_v23, 16 }
  0x40   : > { %2998 = vmatpush3.bf16.msra.mxu1 %v3263_v33  ;;  %v495_v33 = vrot.slane %v493_v18, 5  ;;  %922 = vmatprep.mubr.bf16.mxu0 %v2532_v55  ;;  %v3770_v18 = vld [vmem:[%s3511_s12 + $0xe0] sm:$0xff]  ;;  %v257_v55 = vld [vmem:[%s3511_s12 + $0xf8] sm:$0x11] }
  0x41   : > { %2999 = vmatprep.subr.bf16.mxu1 %v3265_v20  ;;  %2961 = vmatprep.subr.bf16.mxu0 %v3268_v58  ;;  %v256_v20 = vld [vmem:[%s3511_s12 + $0xf0] sm:$0x11]  ;;  %v526_v27 = vshrl.u32 %v3770_v18, 16  ;;  %v529_v28 = vshll.u32 %v3770_v18, 16  ;;  %v549_v4 = vshll.u32 %v257_v55, 16 }
  0x42   : > { %v3752_v9 = vsel %vm3552_vm2, %v491_v61, %v495_v33  ;;  %923 = vmatmul.mubr.bf16.gmra.mxu0 %v2531_v57  ;;  %v535_v31 = vshll.u32 %v256_v20, 16  ;;  %v253_v33 = vld [vmem:[%s3511_s12 + $0xd8] sm:$0x11]  ;;  %v509_v57 = vrot.slane %v507_v25, 5 }
  0x43   : > { %v2534_v15 = vcombine.high %v3745_v5, %v3752_v9  ;;  %v2533_v17 = vcombine.low %v3745_v5, %v3752_v9  ;;  %2962 = vmatpush3.bf16.msra.mxu0 %v3270_v8  ;;  %v528_v58 = vrot.slane %v526_v27, 4  ;;  %v531_v61 = vrot.slane %v529_v28, 5  ;;  %v3274_v28 = vld [vmem:[%s4256_s1 + $0x8] sm:$0xff]  }
  0x44   : > { %3000 = vmatpush3.bf16.msra.mxu1 %v3267_v45  ;;  %v3782_v45 = vld [vmem:[%s3511_s12 + $0xe8] sm:$0xff]  ;;  %v504_v8 = vor.u32 %v503_v44, %v500_v38  ;;  %v521_v14 = vshll.u32 %v253_v33, 16  ;;  %v517_v27 = vrot.slane %v515_v12, 5 }
  0x45   : > { %3001 = vmatprep.subr.bf16.mxu1 %v3269_v0  ;;  %987 = vmatprep.mubr.bf16.mxu1 %v2534_v15  ;;  %v537_v0 = vrot.slane %v535_v31, 5  ;;  %v3272_v15 = vld [vmem:[%s4256_s1 + $0x48] sm:$0xff]   ;;  %v532_v20 = vor.u32 %v531_v61, %v528_v58  ;;  %v540_v21 = vshrl.u32 %v3782_v45, 16  ;;  %v543_v22 = vshll.u32 %v3782_v45, 16 }
  0x46   : > { %988 = vmatmul.mubr.bf16.gmra.mxu1 %v2533_v17  ;;  %v3273_v17 = vld [vmem:[%s4256_s1 + $0xc8] sm:$0xff]   ;;  %v505_v25 = vrot.slane %v504_v8, 4  ;;  %2963 = vmatprep.subr.bf16.mxu0 %v3272_v15  ;;  %v523_v33 = vrot.slane %v521_v14, 5  ;;  %v551_v8 = vrot.slane %v549_v4, 5  ;;  %v2572_v14 = vcombine.high %v3520_v32, %v3524_v34 }
  0x47   : > { %v533_v31 = vrot.slane %v532_v20, 4  ;;  %v542_v38 = vrot.slane %v540_v21, 4  ;;  %v545_v44 = vrot.slane %v543_v22, 5  ;;  %2964 = vmatpush3.bf16.msra.mxu0 %v3274_v28  ;;  %v3275_v12 = vld [vmem:[%s4256_s1 + $0x88] sm:$0xff]   ;;  %v2691_v4 = vcombine.low %v3682_v43, %v3758_v11  ;;  %v3277_v21 = vld [vmem:[%s4256_s1 + $0xc0] sm:$0xff]  }
  0x48   : > { %3002 = vmatpush3.bf16.msra.mxu1 %v3271_v10  ;;  %v514_v10 = vrot.slane %v512_v56, 4  ;;  %v3800_v56 = vsel %vm3552_vm2, %v505_v25, %v509_v57  ;;  %v2693_v22 = vcombine.low %v3694_v62, %v3776_v23  ;;  %v3278_v28 = vld [vmem:[%s4256_s1] sm:$0xff]  }
  0x49   : > { %3003 = vmatprep.subr.bf16.mxu1 %v3273_v17  ;;  %v3804_v58 = vsel %vm3552_vm2, %v533_v31, %v537_v0  ;;  %v546_v61 = vor.u32 %v545_v44, %v542_v38  ;;  %v3276_v0 = vld [vmem:[%s4256_s1 + $0x40] sm:$0xff]   ;;  %v2804_v17 = vcombine.high %v3716_v39, %v3800_v56  ;;  %v2803_v25 = vcombine.low %v3716_v39, %v3800_v56 }
  0x4a   : > { %v518_v55 = vor.u32 %v517_v27, %v514_v10  ;;  %v2536_v15 = vcombine.high %v3800_v56, %v3804_v58  ;;  %v2535_v10 = vcombine.low %v3800_v56, %v3804_v58  ;;  %2965 = vmatprep.subr.bf16.mxu0 %v3276_v0  ;;  %v3279_v38 = vld [vmem:[%s4256_s1 + $0x80] sm:$0xff]   ;;  %v3284_v0 = vld [vmem:[%s4256_s1 + $0x270] sm:$0xff]  }
  0x4b   : > { %v547_v20 = vrot.slane %v546_v61, 4  ;;  %2966 = vmatpush3.bf16.msra.mxu0 %v3278_v28  ;;  %v3285_v28 = vld [vmem:[%s4256_s1 + $0x2f0] sm:$0xff]  }
  0x4c   : > { %v519_v57 = vrot.slane %v518_v55, 4  ;;  %3004 = vmatpush3.bf16.msra.mxu1 %v3275_v12  ;;  %930 = vmatprep.mubr.bf16.mxu0 %v2536_v15  ;;  %v3280_v12 = vld [vmem:[%s4256_s1 + $0x278] sm:$0xff]  }
  0x4d   : > { %v3838_v31 = vsel %vm3552_vm2, %v547_v20, %v551_v8  ;;  %931 = vmatmul.mubr.bf16.gmra.mxu0 %v2535_v10  ;;  %3005 = vmatprep.subr.bf16.mxu1 %v3277_v21  ;;  %v2574_v8 = vcombine.high %v3535_v42, %v3542_v52  ;;  %v3281_v15 = vld [vmem:[%s4256_s1 + $0x2f8] sm:$0xff]   ;;  %v2576_v10 = vcombine.high %v3528_v36, %v3611_v51  ;;  %v3286_v21 = vld [vmem:[%s4256_s1 + $0x230] sm:$0xff]  }
  0x4e   : > { %v3831_v27 = vsel %vm3552_vm2, %v519_v57, %v523_v33  ;;  %1308 = vmatprep.mubr.bf16.mxu0 %v2572_v14  ;;  %3031 = vmatprep.subr.bf16.mxu0 %v3280_v12  ;;  %v2571_v57 = vcombine.low %v3520_v32, %v3524_v34  ;;  %v3282_v14 = vld [vmem:[%s4256_s1 + $0x238] sm:$0xff]   ;;  %v2573_v20 = vcombine.low %v3535_v42, %v3542_v52  ;;  %v3287_v42 = vld [vmem:[%s4256_s1 + $0x2b0] sm:$0xff]   ;;  %v3290_v12 = vld [vmem:[%s4256_s1 + $0x228] sm:$0xff]  }
  0x4f   : > { %v2806_v44 = vcombine.high %v3752_v9, %v3831_v27  ;;  %v2805_v33 = vcombine.low %v3752_v9, %v3831_v27  ;;  %v2538_v55 = vcombine.high %v3831_v27, %v3838_v31  ;;  %v2537_v61 = vcombine.low %v3831_v27, %v3838_v31  ;;  %v3283_v32 = vld [vmem:[%s4256_s1 + $0x2b8] sm:$0xff]   ;;  %v3319_v34 = vld [vmem:[%s4256_s1 + $0x3b0] sm:$0xff]   ;;  %v3324_v52 = vld [vmem:[%s4256_s1 + $0x360] sm:$0xff]  }
  0x50   : > { %3006 = vmatpush3.bf16.msra.mxu1 %v3279_v38  ;;  %v2578_v38 = vcombine.high %v3561_v7, %v3620_v59 }
  0x51   : > { %995 = vmatprep.mubr.bf16.mxu1 %v2538_v55  ;;  %3071 = vmatprep.subr.bf16.mxu1 %v3281_v15  ;;  %v3288_v55 = vld [vmem:[%s4256_s1 + $0x268] sm:$0xff]   ;;  %v3292_v15 = vld [vmem:[%s4256_s1 + $0x260] sm:$0xff]  }
  0x52   : > { %996 = vmatmul.mubr.bf16.gmra.mxu1 %v2537_v61  ;;  %v2575_v61 = vcombine.low %v3528_v36, %v3611_v51  ;;  %v3320_v36 = vld [vmem:[%s4256_s1 + $0x368] sm:$0xff]   ;;  %v2694_v51 = vcombine.high %v3694_v62, %v3776_v23 }
  0x53   : > { %1373 = vmatprep.mubr.bf16.mxu1 %v2574_v8  ;;  %v3289_v8 = vld [vmem:[%s4256_s1 + $0x2e8] sm:$0xff]  }
  0x55   : > { %1309 = vmatmul.mubr.bf16.vlgmr.msra.gmra.mxu0 %v2571_v57  ;;  %v2580_v57 = vcombine.high %v3674_v35, %v3682_v43 }
  0x56   : > { %3032 = vmatpush3.bf16.msra.mxu0 %v3282_v14  ;;  %1316 = vmatprep.mubr.bf16.mxu0 %v2576_v10  ;;  %v2577_v14 = vcombine.low %v3561_v7, %v3620_v59  ;;  %v3291_v10 = vld [vmem:[%s4256_s1 + $0x2a8] sm:$0xff]   ;;  %v2692_v7 = vcombine.high %v3682_v43, %v3758_v11  ;;  %v3331_v59 = vld [vmem:[%s4256_s1 + $0x398] sm:$0xff]  }
  0x57   : > { %3033 = vmatprep.subr.bf16.mxu0 %v3284_v0  ;;  %v3294_v0 = vld [vmem:[%s4256_s1 + $0x220] sm:$0xff]  }
  0x5a   : > { %1374 = vmatmul.mubr.bf16.vlgmr.msra.gmra.mxu1 %v2573_v20  ;;  %3034 = vmatpush3.bf16.msra.mxu0 %v3286_v21  ;;  %v3293_v20 = vld [vmem:[%s4256_s1 + $0x2e0] sm:$0xff]  }
  0x5b   : > { %3072 = vmatpush3.bf16.msra.mxu1 %v3283_v32  ;;  %1381 = vmatprep.mubr.bf16.mxu1 %v2578_v38  ;;  %v2582_v32 = vcombine.high %v3688_v50, %v3694_v62  ;;  %v3295_v21 = vld [vmem:[%s4256_s1 + $0x2a0] sm:$0xff]   ;;  %v2579_v38 = vcombine.low %v3674_v35, %v3682_v43  ;;  %v3333_v43 = vld [vmem:[%s4256_s1 + $0x3d0] sm:$0xff]  }
  0x5c   : > { %3073 = vmatprep.subr.bf16.mxu1 %v3285_v28  ;;  %3035 = vmatprep.subr.bf16.mxu0 %v3288_v55  ;;  %v3296_v28 = vld [vmem:[%s4256_s1 + $0x258] sm:$0xff]   ;;  %v3327_v35 = vld [vmem:[%s4256_s1 + $0x3a0] sm:$0xff]  }
  0x5d   : > { %1317 = vmatmul.mubr.bf16.gmra.mxu0 %v2575_v61  ;;  %v3298_v55 = vld [vmem:[%s4256_s1 + $0x218] sm:$0xff]   ;;  %v3300_v61 = vld [vmem:[%s4256_s1 + $0x250] sm:$0xff]  }
  0x5e   : > { %3036 = vmatpush3.bf16.msra.mxu0 %v3290_v12  ;;  %1324 = vmatprep.mubr.bf16.mxu0 %v2580_v57  ;;  %v2581_v12 = vcombine.low %v3688_v50, %v3694_v62  ;;  %v3302_v57 = vld [vmem:[%s4256_s1 + $0x210] sm:$0xff]   ;;  %v258_v50 = vld [vmem:[%s3511_s12 + $0x100] sm:$0xff] }
  0x5f   : > { %3074 = vmatpush3.bf16.msra.mxu1 %v3287_v42  ;;  %3037 = vmatprep.subr.bf16.mxu0 %v3292_v15  ;;  %v3297_v42 = vld [vmem:[%s4256_s1 + $0x2d8] sm:$0xff]  }
  0x60   : > { %3075 = vmatprep.subr.bf16.mxu1 %v3289_v8  ;;  %v2584_v8 = vcombine.high %v3758_v11, %v3770_v18  ;;  %v3299_v15 = vld [vmem:[%s4256_s1 + $0x298] sm:$0xff]  }
  0x62   : > { %1382 = vmatmul.mubr.bf16.gmra.mxu1 %v2577_v14  ;;  %3038 = vmatpush3.bf16.msra.mxu0 %v3294_v0  ;;  %v3301_v14 = vld [vmem:[%s4256_s1 + $0x2d0] sm:$0xff]  }
  0x63   : > { %3076 = vmatpush3.bf16.msra.mxu1 %v3291_v10  ;;  %1389 = vmatprep.mubr.bf16.mxu1 %v2582_v32  ;;  %v2586_v10 = vcombine.high %v3776_v23, %v3782_v45  ;;  %v3303_v0 = vld [vmem:[%s4256_s1 + $0x290] sm:$0xff]   ;;  %v2583_v32 = vcombine.low %v3758_v11, %v3770_v18 }
  0x64   : > { %3077 = vmatprep.subr.bf16.mxu1 %v3293_v20  ;;  %3039 = vmatprep.subr.bf16.mxu0 %v3296_v28  ;;  %v3304_v20 = vld [vmem:[%s4256_s1 + $0x248] sm:$0xff]  }
  0x65   : > { %1325 = vmatmul.mubr.bf16.gmra.mxu0 %v2579_v38  ;;  %v3306_v28 = vld [vmem:[%s4256_s1 + $0x208] sm:$0xff]   ;;  %v3308_v38 = vld [vmem:[%s4256_s1 + $0x240] sm:$0xff]  }
  0x66   : > { %3040 = vmatpush3.bf16.msra.mxu0 %v3298_v55  ;;  %1332 = vmatprep.mubr.bf16.mxu0 %v2584_v8  ;;  %v3307_v55 = vld [vmem:[%s4256_s1 + $0x288] sm:$0xff]   ;;  %v3309_v8 = vld [vmem:[%s4256_s1 + $0x2c0] sm:$0xff]  }
  0x67   : > { %3078 = vmatpush3.bf16.msra.mxu1 %v3295_v21  ;;  %3041 = vmatprep.subr.bf16.mxu0 %v3300_v61  ;;  %v3305_v21 = vld [vmem:[%s4256_s1 + $0x2c8] sm:$0xff]   ;;  %v3310_v61 = vld [vmem:[%s4256_s1 + $0x200] sm:$0xff]  }
  0x68   : > { %3079 = vmatprep.subr.bf16.mxu1 %v3297_v42  ;;  %v2585_v42 = vcombine.low %v3776_v23, %v3782_v45  ;;  %v3342_v23 = vld [vmem:[%s4256_s1 + $0x300] sm:$0xff]  }
  0x6a   : > { %1390 = vmatmul.mubr.bf16.gmra.mxu1 %v2581_v12  ;;  %3042 = vmatpush3.bf16.msra.mxu0 %v3302_v57  ;;  %v3311_v12 = vld [vmem:[%s4256_s1 + $0x280] sm:$0xff]   ;;  %v3313_v57 = vld [vmem:[%s4256_s1 + $0x3f8] sm:$0xff]  }
  0x6b   : > { %3080 = vmatpush3.bf16.msra.mxu1 %v3299_v15  ;;  %1397 = vmatprep.mubr.bf16.mxu1 %v2586_v10  ;;  %v3312_v15 = vld [vmem:[%s4256_s1 + $0x378] sm:$0xff]  }
  0x6c   : > { %3081 = vmatprep.subr.bf16.mxu1 %v3301_v14  ;;  %3043 = vmatprep.subr.bf16.mxu0 %v3304_v20  ;;  %v3314_v14 = vld [vmem:[%s4256_s1 + $0x338] sm:$0xff]   ;;  %v3322_v20 = vld [vmem:[%s4256_s1 + $0x328] sm:$0xff]  }
  0x6d   : > { %1333 = vmatmul.mubr.bf16.gmra.mxu0 %v2583_v32  ;;  %v3315_v10 = vld [vmem:[%s4256_s1 + $0x3b8] sm:$0xff]  }
  0x6e   : > { %3044 = vmatpush3.bf16.msra.mxu0 %v3306_v28  ;;  %1733 = vmatprep.mubr.bf16.mxu0 %v2684_v40  ;;  %v3316_v40 = vld [vmem:[%s4256_s1 + $0x370] sm:$0xff]   ;;  %v3329_v32 = vld [vmem:[%s4256_s1 + $0x3d8] sm:$0xff]  }
  0x6f   : > { %3082 = vmatpush3.bf16.msra.mxu1 %v3303_v0  ;;  %3045 = vmatprep.subr.bf16.mxu0 %v3308_v38  ;;  %v3318_v0 = vld [vmem:[%s4256_s1 + $0x330] sm:$0xff]  }
  0x70   : > { %3083 = vmatprep.subr.bf16.mxu1 %v3305_v21  ;;  %v3330_v21 = vld [vmem:[%s4256_s1 + $0x318] sm:$0xff]   ;;  %v3332_v28 = vld [vmem:[%s4256_s1 + $0x350] sm:$0xff]  }
  0x71   : > { %v3334_v38 = vld [vmem:[%s4256_s1 + $0x310] sm:$0xff]  }
  0x72   : > { %1398 = vmatmul.mubr.bf16.gmra.mxu1 %v2585_v42  ;;  %3046 = vmatpush3.bf16.msra.mxu0 %v3310_v61  ;;  %v2696_v42 = vcombine.high %v3770_v18, %v258_v50  ;;  %v2695_v61 = vcombine.low %v3770_v18, %v258_v50  ;;  %v3339_v18 = vld [vmem:[%s4256_s1 + $0x388] sm:$0xff]  }
  0x73   : > { %3084 = vmatpush3.bf16.msra.mxu1 %v3307_v55  ;;  %1798 = vmatprep.mubr.bf16.mxu1 %v2686_v41  ;;  %v3317_v41 = vld [vmem:[%s4256_s1 + $0x3f0] sm:$0xff]  }
  0x74   : > { %3085 = vmatprep.subr.bf16.mxu1 %v3309_v8  ;;  %3111 = vmatprep.subr.bf16.mxu0 %v3312_v15  ;;  %v3335_v55 = vld [vmem:[%s4256_s1 + $0x390] sm:$0xff]   ;;  %v3337_v8 = vld [vmem:[%s4256_s1 + $0x3c8] sm:$0xff]   ;;  %v3340_v15 = vld [vmem:[%s4256_s1 + $0x340] sm:$0xff]  }
  0x75   : > { %1734 = vmatmul.mubr.bf16.vlgmr.msra.gmra.mxu0 %v2683_v47  ;;  %v3321_v47 = vld [vmem:[%s4256_s1 + $0x3e8] sm:$0xff]  }
  0x76   : > { %3112 = vmatpush3.bf16.msra.mxu0 %v3314_v14  ;;  %1741 = vmatprep.mubr.bf16.mxu0 %v2688_v46  ;;  %v3326_v46 = vld [vmem:[%s4256_s1 + $0x320] sm:$0xff]  }
  0x77   : > { %3086 = vmatpush3.bf16.msra.mxu1 %v3311_v12  ;;  %3113 = vmatprep.subr.bf16.mxu0 %v3316_v40  ;;  %v3338_v12 = vld [vmem:[%s4256_s1 + $0x308] sm:$0xff]   ;;  %v3341_v14 = vld [vmem:[%s4256_s1 + $0x3c0] sm:$0xff]  }
  0x78   : > { %3151 = vmatprep.subr.bf16.mxu1 %v3313_v57  ;;  %v1843_v57 = vshll.u32 %v258_v50, 16 }
  0x7a   : > { %1799 = vmatmul.mubr.bf16.vlgmr.msra.gmra.mxu1 %v2685_v48  ;;  %3114 = vmatpush3.bf16.msra.mxu0 %v3318_v0  ;;  %v3323_v48 = vld [vmem:[%s4256_s1 + $0x3a8] sm:$0xff]  }
  0x7b   : > { %3152 = vmatpush3.bf16.msra.mxu1 %v3315_v10  ;;  %1806 = vmatprep.mubr.bf16.mxu1 %v2690_v53  ;;  %v3325_v53 = vld [vmem:[%s4256_s1 + $0x3e0] sm:$0xff]  }
  0x7c   : > { %3153 = vmatprep.subr.bf16.mxu1 %v3317_v41  ;;  %3115 = vmatprep.subr.bf16.mxu0 %v3320_v36  ;;  %v1845_v41 = vrot.slane %v1843_v57, 5 }
  0x7d   : > { %1742 = vmatmul.mubr.bf16.gmra.mxu0 %v2687_v60  ;;  %v3328_v60 = vld [vmem:[%s4256_s1 + $0x358] sm:$0xff]  }
  0x7e   : > { %3116 = vmatpush3.bf16.msra.mxu0 %v3322_v20  ;;  %1749 = vmatprep.mubr.bf16.mxu0 %v2692_v7 }
  0x7f   : > { %3154 = vmatpush3.bf16.msra.mxu1 %v3319_v34  ;;  %3117 = vmatprep.subr.bf16.mxu0 %v3324_v52  ;;  %v260_v34 = vld [vmem:[%s3511_s12 + $0x110] sm:$0x11]  ;;  %v261_v52 = vld [vmem:[%s3511_s12 + $0x118] sm:$0x11] }
  0x80   : > { %3155 = vmatprep.subr.bf16.mxu1 %v3321_v47  ;;  %v1849_v36 = vshll.u32 %v260_v34, 16 }
  0x82   : > { %1807 = vmatmul.mubr.bf16.gmra.mxu1 %v2689_v1  ;;  %3118 = vmatpush3.bf16.msra.mxu0 %v3326_v46  ;;  %v259_v1 = vld [vmem:[%s3511_s12 + $0x108] sm:$0xff]  ;;  %v1851_v24 = vrot.slane %v1849_v36, 5 }
  0x83   : > { %3156 = vmatpush3.bf16.msra.mxu1 %v3323_v48  ;;  %1814 = vmatprep.mubr.bf16.mxu1 %v2694_v51  ;;  %v2698_v11 = vcombine.high %v3782_v45, %v259_v1  ;;  %v2697_v62 = vcombine.low %v3782_v45, %v259_v1  ;;  %v3343_v45 = vld [vmem:[%s4256_s1 + $0x380] sm:$0xff]   ;;  %v1854_v40 = vshrl.u32 %v259_v1, 16  ;;  %v1857_v10 = vshll.u32 %v259_v1, 16 }
  0x84   : > { %3157 = vmatprep.subr.bf16.mxu1 %v3325_v53  ;;  %3119 = vmatprep.subr.bf16.mxu0 %v3328_v60 }
  0x85   : > { %1750 = vmatmul.mubr.bf16.gmra.mxu0 %v2691_v4  ;;  %v3336_v4 = vld [vmem:[%s4256_s1 + $0x348] sm:$0xff]   ;;  %v1856_v47 = vrot.slane %v1854_v40, 4  ;;  %v1859_v20 = vrot.slane %v1857_v10, 5 }
  0x86   : > { %3120 = vmatpush3.bf16.msra.mxu0 %v3330_v21  ;;  %1757 = vmatprep.mubr.bf16.mxu0 %v2696_v42 }
  0x87   : > { %3158 = vmatpush3.bf16.msra.mxu1 %v3327_v35  ;;  %3121 = vmatprep.subr.bf16.mxu0 %v3332_v28 }
  0x88   : > { %3159 = vmatprep.subr.bf16.mxu1 %v3329_v32 }
  0x8a   : > { %1815 = vmatmul.mubr.bf16.gmra.mxu1 %v2693_v22  ;;  %3122 = vmatpush3.bf16.msra.mxu0 %v3334_v38  ;;  %v1840_v22 = vshrl.u32 %v258_v50, 16 }
  0x8b   : > { %3160 = vmatpush3.bf16.msra.mxu1 %v3331_v59  ;;  %1822 = vmatprep.mubr.bf16.mxu1 %v2698_v11 }
  0x8c   : > { %3161 = vmatprep.subr.bf16.mxu1 %v3333_v43  ;;  %3123 = vmatprep.subr.bf16.mxu0 %v3336_v4  ;;  %v1842_v0 = vrot.slane %v1840_v22, 4 }
  0x8d   : > { %1758 = vmatmul.mubr.bf16.gmra.mxu0 %v2695_v61 }
  0x8e   : > { %3124 = vmatpush3.bf16.msra.mxu0 %v3338_v12  ;;  %2192 = vmatprep.mubr.bf16.mxu0 %v2796_v54  ;;  %v1846_v54 = vor.u32 %v1845_v41, %v1842_v0 }
  0x8f   : > { %3162 = vmatpush3.bf16.msra.mxu1 %v3335_v55  ;;  %3125 = vmatprep.subr.bf16.mxu0 %v3340_v15 }
  0x90   : > { %3163 = vmatprep.subr.bf16.mxu1 %v3337_v8  ;;  %v1847_v19 = vrot.slane %v1846_v54, 4 }
  0x92   : > { %1823 = vmatmul.mubr.bf16.gmra.mxu1 %v2697_v62  ;;  %3126 = vmatpush3.bf16.msra.mxu0 %v3342_v23  ;;  %v1852_v49 = vsel %vm3552_vm2, %v1847_v19, %v1851_v24 }
  0x93   : > { %3164 = vmatpush3.bf16.msra.mxu1 %v3339_v18  ;;  %2257 = vmatprep.mubr.bf16.mxu1 %v2798_v16  ;;  %v1863_v16 = vshll.u32 %v261_v52, 16 }
  0x94   : > { %3165 = vmatprep.subr.bf16.mxu1 %v3341_v14 }
  0x95   : > { %2193 = vmatmul.mubr.bf16.vlgmr.msra.gmra.mxu0 %v2795_v29  ;;  %v1860_v29 = vor.u32 %v1859_v20, %v1856_v47 }
  0x96   : > { %2200 = vmatprep.mubr.bf16.mxu0 %v2800_v2  ;;  %v4262_v2 = vcombine.low %v3657_v26, %v3712_v37  ;;  %v2808_v26 = vcombine.high %v3804_v58, %v1852_v49 }
  0x97   : > { %3166 = vmatpush3.bf16.msra.mxu1 %v3343_v45  ;;  %v1861_v3 = vrot.slane %v1860_v29, 4 }
  0x9a   : > { %2258 = vmatmul.mubr.bf16.vlgmr.msra.gmra.mxu1 %v2797_v6  ;;  %v1865_v6 = vrot.slane %v1863_v16, 5 }
  0x9b   : > { %2265 = vmatprep.mubr.bf16.mxu1 %v2802_v13  ;;  %v4263_v13 = vcombine.low %v3666_v30, %v3745_v5  ;;  %v2807_v30 = vcombine.low %v3804_v58, %v1852_v49 }
  0x9c   : > { %v1866_v37 = vsel %vm3552_vm2, %v1861_v3, %v1865_v6 }
  0x9d   : > { %2201 = vmatmul.mubr.bf16.gmra.mxu0 %v4262_v2  ;;  %v2809_v5 = vcombine.low %v3838_v31, %v1866_v37 }
  0x9e   : > { %2208 = vmatprep.mubr.bf16.mxu0 %v2804_v17  ;;  %v2810_v17 = vcombine.high %v3838_v31, %v1866_v37 }
  0xa2   : > { %2266 = vmatmul.mubr.bf16.gmra.mxu1 %v4263_v13 }
  0xa3   : > { %2273 = vmatprep.mubr.bf16.mxu1 %v2806_v44 }
  0xa5   : > { %2209 = vmatmul.mubr.bf16.gmra.mxu0 %v2803_v25 }
  0xa6   : > { %2216 = vmatprep.mubr.bf16.mxu0 %v2808_v26 }
  0xaa   : > { %2274 = vmatmul.mubr.bf16.gmra.mxu1 %v2805_v33 }
  0xab   : > { %2281 = vmatprep.mubr.bf16.mxu1 %v2810_v17 }
  0xad   : > { %2217 = vmatmul.mubr.bf16.gmra.mxu0 %v2807_v30 }
  0xb2   : > { %2282 = vmatmul.mubr.bf16.gmra.mxu1 %v2809_v5 }
  0xee   : > { %v2887_v63 = vpop.f32.mrf.mxu0 }
  0xf0   : > { %v2888_v44 = vpop.f32.mrf.mxu0 }
  0xf1   : > { %v2889_v7 = vadd.f32 %v2888_v44, %v2887_v63 }
  0xf2   : > { %v2890_v48 = vpop.f32.mrf.mxu0 }
  0xf3   : > { %v2927_v39 = vpop.f32.mrf.mxu1 }
  0xf4   : > { %v2891_v56 = vpop.f32.mrf.mxu0 }
  0xf5   : > { %v2892_v25 = vadd.f32 %v2891_v56, %v2890_v48  ;;  %v2928_v46 = vpop.f32.mrf.mxu1 }
  0xf6   : > { %v2929_v53 = vadd.f32 %v2928_v46, %v2927_v39 }
  0xf7   : > { %v2930_v51 = vpop.f32.mrf.mxu1 }
  0xf8   : > { %v974_v35 = vadd.f32 %v2929_v53, %v2889_v7 }
  0xf9   : > { %v2931_v9 = vpop.f32.mrf.mxu1  ;;  %v2893_v58 = vpop.f32.mrf.mxu0 }
  0xfa   : > { %v2932_v27 = vadd.f32 %v2931_v9, %v2930_v51 }
  0xfb   : > { %v2933_v60 = vpop.f32.mrf.mxu1  ;;  %v2894_v32 = vpop.f32.mrf.mxu0 }
  0xfc   : > { %v977_v33 = vadd.f32 %v2932_v27, %v2892_v25  ;;  %v2895_v21 = vadd.f32 %v2894_v32, %v2893_v58 }
  0xfd   : > { %v2934_v31 = vpop.f32.mrf.mxu1  ;;  %v2896_v59 = vpop.f32.mrf.mxu0 }
  0xfe   : > { %v2935_v28 = vadd.f32 %v2934_v31, %v2933_v60 }
  0xff   : > { %v2936_v50 = vpop.f32.mrf.mxu1  ;;  %v2897_v38 = vpop.f32.mrf.mxu0 }
 0x100   : > { %v982_v1 = vadd.f32 %v2935_v28, %v2895_v21  ;;  %v2898_v42 = vadd.f32 %v2897_v38, %v2896_v59 }
 0x101   : > { %v2937_v43 = vpop.f32.mrf.mxu1 }
 0x102   : > { %v2938_v11 = vadd.f32 %v2937_v43, %v2936_v50  ;;  %v2899_v55 = vpop.f32.mrf.mxu0 }
 0x104   : > { %v985_v4 = vadd.f32 %v2938_v11, %v2898_v42  ;;  %v2900_v61 = vpop.f32.mrf.mxu0 }
 0x105   : > { %v2901_v8 = vadd.f32 %v2900_v61, %v2899_v55 }
 0x106   : > { %v2939_v12 = vpop.f32.mrf.mxu1  ;;  %v2902_v15 = vpop.f32.mrf.mxu0 }
 0x108   : > { %v2940_v62 = vpop.f32.mrf.mxu1  ;;  %v2903_v18 = vpop.f32.mrf.mxu0 }
 0x109   : > { %v2941_v23 = vadd.f32 %v2940_v62, %v2939_v12  ;;  %v2904_v22 = vadd.f32 %v2903_v18, %v2902_v15 }
 0x10a   : > { %v2942_v57 = vpop.f32.mrf.mxu1 }
 0x10b   : > { %v990_v14 = vadd.f32 %v2941_v23, %v2901_v8 }
 0x10c   : > { %v2943_v45 = vpop.f32.mrf.mxu1 }
 0x10d   : > { %v2944_v40 = vadd.f32 %v2943_v45, %v2942_v57  ;;  %v2905_v0 = vpop.f32.mrf.mxu0 }
 0x10f   : > { %v993_v10 = vadd.f32 %v2944_v40, %v2904_v22  ;;  %v2906_v41 = vpop.f32.mrf.mxu0 }
 0x110   : > { %v2907_v34 = vadd.f32 %v2906_v41, %v2905_v0 }
 0x111   : > { %v2908_v36 = vpop.f32.mrf.mxu0 }
 0x112   : > { %v2945_v54 = vpop.f32.mrf.mxu1 }
 0x113   : > { %v2909_v20 = vpop.f32.mrf.mxu0 }
 0x114   : > { %v2946_v47 = vpop.f32.mrf.mxu1  ;;  %v2910_v19 = vadd.f32 %v2909_v20, %v2908_v36 }
 0x115   : > { %v2947_v52 = vadd.f32 %v2946_v47, %v2945_v54  ;;  %v2967_v29 = vpop.f32.mrf.mxu0 }
 0x116   : > { %v2948_v24 = vpop.f32.mrf.mxu1 }
 0x117   : > { %v998_v16 = vadd.f32 %v2947_v52, %v2907_v34  ;;  %v2968_v49 = vpop.f32.mrf.mxu0 }
 0x118   : > { %v2949_v2 = vpop.f32.mrf.mxu1  ;;  %v2969_v6 = vadd.f32 %v2968_v49, %v2967_v29 }
 0x119   : > { %v2950_v3 = vadd.f32 %v2949_v2, %v2948_v24  ;;  %v2970_v26 = vpop.f32.mrf.mxu0 }
 0x11a   : > { %v3007_v13 = vpop.f32.mrf.mxu1  ;;  %v1311_v17 = vadd.f32 %v2969_v6, %v974_v35 }
 0x11b   : > { %v1001_v37 = vadd.f32 %v2950_v3, %v2910_v19  ;;  %v2971_v5 = vpop.f32.mrf.mxu0 }
 0x11c   : > { %v3008_v30 = vpop.f32.mrf.mxu1  ;;  %v2972_v44 = vadd.f32 %v2971_v5, %v2970_v26 }
 0x11d   : > { %v3009_v63 = vadd.f32 %v3008_v30, %v3007_v13  ;;  %v2973_v48 = vpop.f32.mrf.mxu0 }
 0x11e   : > { %v3010_v7 = vpop.f32.mrf.mxu1  ;;  %v1314_v56 = vadd.f32 %v2972_v44, %v977_v33 }
 0x11f   : > { %v4159_v39 = vadd.f32 %v3009_v63, %v1311_v17  ;;  %v2974_v46 = vpop.f32.mrf.mxu0 }
 0x120   : > { %v3011_v25 = vpop.f32.mrf.mxu1  ;;  %v2975_v51 = vadd.f32 %v2974_v46, %v2973_v48 }
 0x121   : > { %v3012_v53 = vadd.f32 %v3011_v25, %v3010_v7  ;;  %v2976_v27 = vpop.f32.mrf.mxu0 }
 0x122   : > { %v3013_v9 = vpop.f32.mrf.mxu1  ;;  %v1319_v60 = vadd.f32 %v2975_v51, %v982_v1 }
 0x123   : > { %v4161_v58 = vadd.f32 %v3012_v53, %v1314_v56  ;;  %v2977_v35 = vpop.f32.mrf.mxu0 }
 0x124   : > { %v3014_v32 = vpop.f32.mrf.mxu1  ;;  %v2978_v31 = vadd.f32 %v2977_v35, %v2976_v27 }
 0x125   : > { %v3015_v21 = vadd.f32 %v3014_v32, %v3013_v9  ;;  %v2979_v59 = vpop.f32.mrf.mxu0 }
 0x126   : > { %v3016_v28 = vpop.f32.mrf.mxu1  ;;  %v1322_v38 = vadd.f32 %v2978_v31, %v985_v4 }
 0x127   : > { %v4163_v50 = vadd.f32 %v3015_v21, %v1319_v60  ;;  %v2980_v33 = vpop.f32.mrf.mxu0 }
 0x128   : > { %v3017_v42 = vpop.f32.mrf.mxu1  ;;  %v2981_v11 = vadd.f32 %v2980_v33, %v2979_v59 }
 0x129   : > { %v3018_v43 = vadd.f32 %v3017_v42, %v3016_v28  ;;  %v2982_v61 = vpop.f32.mrf.mxu0 }
 0x12a   : > { %v3019_v55 = vpop.f32.mrf.mxu1  ;;  %v1327_v12 = vadd.f32 %v2981_v11, %v990_v14 }
 0x12b   : > { %v4165_v8 = vadd.f32 %v3018_v43, %v1322_v38  ;;  %v2983_v1 = vpop.f32.mrf.mxu0 }
 0x12c   : > { %v3020_v15 = vpop.f32.mrf.mxu1  ;;  %v2984_v18 = vadd.f32 %v2983_v1, %v2982_v61 }
 0x12d   : > { %v3021_v62 = vadd.f32 %v3020_v15, %v3019_v55  ;;  %v2985_v22 = vpop.f32.mrf.mxu0 }
 0x12e   : > { %v3022_v23 = vpop.f32.mrf.mxu1  ;;  %v1330_v45 = vadd.f32 %v2984_v18, %v993_v10 }
 0x12f   : > { %v4167_v57 = vadd.f32 %v3021_v62, %v1327_v12  ;;  %v2986_v4 = vpop.f32.mrf.mxu0 }
 0x130   : > { %v3023_v40 = vpop.f32.mrf.mxu1  ;;  %v2987_v41 = vadd.f32 %v2986_v4, %v2985_v22 }
 0x131   : > { %v3024_v0 = vadd.f32 %v3023_v40, %v3022_v23  ;;  %v2988_v54 = vpop.f32.mrf.mxu0 }
 0x132   : > { %v3025_v34 = vpop.f32.mrf.mxu1  ;;  %v1335_v47 = vadd.f32 %v2987_v41, %v998_v16 }
 0x133   : > { %v4169_v36 = vadd.f32 %v3024_v0, %v1330_v45  ;;  %v2989_v14 = vpop.f32.mrf.mxu0 }
 0x134   : > { %v3026_v20 = vpop.f32.mrf.mxu1  ;;  %v2990_v19 = vadd.f32 %v2989_v14, %v2988_v54 }
 0x135   : > { %v3027_v52 = vadd.f32 %v3026_v20, %v3025_v34  ;;  %v3047_v29 = vpop.f32.mrf.mxu0 }
 0x136   : > { %v3028_v24 = vpop.f32.mrf.mxu1  ;;  %v1338_v49 = vadd.f32 %v2990_v19, %v1001_v37 }
 0x137   : > { %v4171_v2 = vadd.f32 %v3027_v52, %v1335_v47  ;;  %v3048_v10 = vpop.f32.mrf.mxu0 }
 0x138   : > { %v3029_v3 = vpop.f32.mrf.mxu1  ;;  %v3049_v11 = vadd.f32 %v3048_v10, %v3047_v29  ;;  %v4197_v29 = vld [vmem:[%s4257_s2] ss:$0 sm:$0xff] }
 0x139   : > { %v3030_v6 = vadd.f32 %v3029_v3, %v3028_v24  ;;  %v3050_v26 = vpop.f32.mrf.mxu0 }
 0x13a   : > { %v3087_v13 = vpop.f32.mrf.mxu1 }
 0x13b   : > { %v4173_v17 = vadd.f32 %v3030_v6, %v1338_v49  ;;  %v3051_v5 = vpop.f32.mrf.mxu0 }
 0x13c   : > { %v3088_v30 = vpop.f32.mrf.mxu1  ;;  %v3052_v18 = vadd.f32 %v3051_v5, %v3050_v26 }
 0x13d   : > { %v3053_v16 = vpop.f32.mrf.mxu0  ;;  %v3089_v55 = vadd.f32 %v3088_v30, %v3087_v13  ;;  %v4203_v30 = vld [vmem:[%s4258_s3] ss:$0 sm:$0xff] }
 0x13e   : > { %v3090_v63 = vpop.f32.mrf.mxu1 }
 0x13f   : > { %v3054_v7 = vpop.f32.mrf.mxu0  ;;  %v1801_v62 = vadd.f32 %v3089_v55, %v3049_v11 }
 0x140   : > { %v3091_v44 = vpop.f32.mrf.mxu1  ;;  %v3055_v14 = vadd.f32 %v3054_v7, %v3053_v16 }
 0x141   : > { %v3056_v56 = vpop.f32.mrf.mxu0  ;;  %v3092_v23 = vadd.f32 %v3091_v44, %v3090_v63  ;;  %v1831_v34 = vadd.f32 %v1801_v62, %v4159_v39 }
 0x142   : > { %v3093_v48 = vpop.f32.mrf.mxu1 }
 0x143   : > { %v3057_v46 = vpop.f32.mrf.mxu0  ;;  %v1804_v54 = vadd.f32 %v3092_v23, %v3052_v18 }
 0x144   : > { %v3094_v25 = vpop.f32.mrf.mxu1  ;;  %v3058_v26 = vadd.f32 %v3057_v46, %v3056_v56 }
 0x145   : > { %v3059_v51 = vpop.f32.mrf.mxu0  ;;  %v3095_v52 = vadd.f32 %v3094_v25, %v3093_v48  ;;  %v1832_v13 = vadd.f32 %v1804_v54, %v4161_v58 }
 0x146   : > { %v3096_v53 = vpop.f32.mrf.mxu1 }
 0x147   : > { %v3060_v9 = vpop.f32.mrf.mxu0  ;;  %v1809_v16 = vadd.f32 %v3095_v52, %v3055_v14 }
 0x148   : > { %v3097_v37 = vpop.f32.mrf.mxu1  ;;  %v3061_v46 = vadd.f32 %v3060_v9, %v3059_v51 }
 0x149   : > { %v4175_v60 = vpop.f32.mrf.mxu0  ;;  %v3098_v39 = vadd.f32 %v3097_v37, %v3096_v53  ;;  %v1833_v62 = vadd.f32 %v1809_v16, %v4163_v50 }
 0x14a   : > { %v3099_v27 = vpop.f32.mrf.mxu1 }
 0x14b   : > { %v3063_v35 = vpop.f32.mrf.mxu0  ;;  %v1812_v56 = vadd.f32 %v3098_v39, %v3058_v26 }
 0x14c   : > { %v3100_v32 = vpop.f32.mrf.mxu1 }
 0x14d   : > { %v4177_v31 = vpop.f32.mrf.mxu0  ;;  %v3101_v53 = vadd.f32 %v3100_v32, %v3099_v27  ;;  %v1834_v27 = vadd.f32 %v1812_v56, %v4165_v8 }
 0x14e   : > { %v3102_v21 = vpop.f32.mrf.mxu1 }
 0x14f   : > { %v4179_v59 = vpop.f32.mrf.mxu0  ;;  %v1817_v32 = vadd.f32 %v3101_v53, %v3061_v46 }
 0x150   : > { %v3103_v28 = vpop.f32.mrf.mxu1 }
 0x151   : > { %v4183_v42 = vpop.f32.mrf.mxu0  ;;  %v1835_v39 = vadd.f32 %v1817_v32, %v4167_v57 }
 0x152   : > { %v4181_v38 = vpop.f32.mrf.mxu1 }
 0x153   : > { %v4187_v43 = vpop.f32.mrf.mxu0 }
 0x154   : > { %v4185_v33 = vpop.f32.mrf.mxu1 }
 0x155   : > { %v3127_v12 = vpop.f32.mrf.mxu0 }
 0x156   : > { %v4189_v61 = vpop.f32.mrf.mxu1 }
 0x157   : > { %v3128_v1 = vpop.f32.mrf.mxu0 }
 0x158   : > { %v4191_v15 = vpop.f32.mrf.mxu1  ;;  %v3129_v40 = vadd.f32 %v3128_v1, %v3127_v12 }
 0x159   : > { %v3130_v45 = vpop.f32.mrf.mxu0  ;;  %v3110_v57 = vadd.f32 %v4191_v15, %v4189_v61 }
 0x15a   : > { %v3167_v22 = vpop.f32.mrf.mxu1 }
 0x15b   : > { %v3131_v0 = vpop.f32.mrf.mxu0 }
 0x15c   : > { %v3168_v4 = vpop.f32.mrf.mxu1  ;;  %v3132_v24 = vadd.f32 %v3131_v0, %v3130_v45  ;;  %v3064_v45 = vadd.f32 %v3063_v35, %v4175_v60 }
 0x15d   : > { %v3169_v41 = vadd.f32 %v3168_v4, %v3167_v22  ;;  %v3133_v20 = vpop.f32.mrf.mxu0 }
 0x15e   : > { %v3170_v47 = vpop.f32.mrf.mxu1 }
 0x15f   : > { %v2260_v19 = vadd.f32 %v3169_v41, %v3129_v40  ;;  %v3134_v3 = vpop.f32.mrf.mxu0  ;;  %v3104_v40 = vadd.f32 %v3103_v28, %v3102_v21 }
 0x160   : > { %v3171_v49 = vpop.f32.mrf.mxu1  ;;  %v3135_v48 = vadd.f32 %v3134_v3, %v3133_v20  ;;  %v3067_v3 = vadd.f32 %v4179_v59, %v4177_v31 }
 0x161   : > { %v2290_v10 = vadd.f32 %v2260_v19, %v1831_v34  ;;  %v3172_v6 = vadd.f32 %v3171_v49, %v3170_v47  ;;  %v3136_v63 = vpop.f32.mrf.mxu0  ;;  %v1820_v21 = vadd.f32 %v3104_v40, %v3064_v45 }
 0x162   : > { %v3173_v5 = vpop.f32.mrf.mxu1 }
 0x163   : > { %v2305_v44 = vmul.f32 %v4197_v29, %v2290_v10  ;;  %v2263_v7 = vadd.f32 %v3172_v6, %v3132_v24  ;;  %v3137_v11 = vpop.f32.mrf.mxu0  ;;  %v3107_v10 = vadd.f32 %v4185_v33, %v4181_v38 }
 0x164   : > { %v3174_v25 = vpop.f32.mrf.mxu1  ;;  %v3138_v22 = vadd.f32 %v3137_v11, %v3136_v63  ;;  %v3070_v11 = vadd.f32 %v4187_v43, %v4183_v42 }
 0x165   : > { %v2320_v55 = vadd.f32 %v4203_v30, %v2305_v44  ;;  %v2291_v12 = vadd.f32 %v2263_v7, %v1832_v13  ;;  %v3175_v58 = vadd.f32 %v3174_v25, %v3173_v5  ;;  %v3139_v1 = vpop.f32.mrf.mxu0  ;;  %v1836_v44 = vadd.f32 %v1820_v21, %v4169_v36 }
 0x166   : > { %v3176_v37 = vpop.f32.mrf.mxu1  ;;  %v1825_v33 = vadd.f32 %v3107_v10, %v3067_v3  ;;  %v1828_v43 = vadd.f32 %v3110_v57, %v3070_v11 }
 0x167   : > { %v2306_v18 = vmul.f32 %v4197_v29, %v2291_v12  ;;  %v2268_v23 = vadd.f32 %v3175_v58, %v3135_v48  ;;  %v2336_v4 = vmul.f32 0.2, %v2320_v55  ;;  %v3140_v41 = vpop.f32.mrf.mxu0  ;;  %vm2328_vm3 = vcmp.ge.f32.partialorder %v2320_v55, 0.0 }
 0x168   : > { %v3177_v0 = vpop.f32.mrf.mxu1  ;;  %v3141_v54 = vadd.f32 %v3140_v41, %v3139_v1  ;;  %v1837_v15 = vadd.f32 %v1825_v33, %v4171_v2 }
 0x169   : > { %v2321_v34 = vadd.f32 %v4203_v30, %v2306_v18  ;;  %v2292_v51 = vadd.f32 %v2268_v23, %v1833_v62  ;;  %v3178_v9 = vadd.f32 %v3177_v0, %v3176_v37  ;;  %v3142_v47 = vpop.f32.mrf.mxu0  ;;  %v2344_v28 = vsel %vm2328_vm3, %v2320_v55, %v2336_v4 }
 0x16a   : > { %v3179_v50 = vpop.f32.mrf.mxu1 }
 0x16b   : > { %vm2329_vm4 = vcmp.ge.f32.partialorder %v2321_v34, 0.0  ;;  %v2337_v20 = vmul.f32 0.2, %v2321_v34  ;;  %v2307_v60 = vmul.f32 %v4197_v29, %v2292_v51  ;;  %v2271_v35 = vadd.f32 %v3178_v9, %v3138_v22  ;;  %v3143_v52 = vpop.f32.mrf.mxu0 }
 0x16c   : > { %v3180_v14 = vpop.f32.mrf.mxu1  ;;  %v3144_v16 = vadd.f32 %v3143_v52, %v3142_v47 }
 0x16d   : > { %v2345_v8 = vsel %vm2329_vm4, %v2321_v34, %v2337_v20  ;;  %v2322_v19 = vadd.f32 %v4203_v30, %v2307_v60  ;;  %v2293_v24 = vadd.f32 %v2271_v35, %v1834_v27  ;;  %v3181_v49 = vadd.f32 %v3180_v14, %v3179_v50  ;;  %v3145_v26 = vpop.f32.mrf.mxu0 }
 0x16e   : > { %v2851_v6 = vpack.c.bf16 %v2345_v8, %v2344_v28  ;;  %v3182_v13 = vpop.f32.mrf.mxu1  ;;  %v1838_v27 = vadd.f32 %v1828_v43, %v4173_v17 }
 0x16f   : > { %v2308_v5 = vmul.f32 %v4197_v29, %v2293_v24  ;;  %v2276_v63 = vadd.f32 %v3181_v49, %v3141_v54  ;;  %v2338_v7 = vmul.f32 0.2, %v2322_v19  ;;  %v3146_v25 = vpop.f32.mrf.mxu0  ;;  %vm2330_vm5 = vcmp.ge.f32.partialorder %v2322_v19, 0.0 }
 0x170   : > { %2852 = vst [vmem:[%s4217_s30] sm:$0xff] %v2851_v6   ;;  %v3183_v48 = vpop.f32.mrf.mxu1  ;;  %v3147_v12 = vadd.f32 %v3146_v25, %v3145_v26 }
 0x171   : > { %v2323_v31 = vadd.f32 %v4203_v30, %v2308_v5  ;;  %v2294_v59 = vadd.f32 %v2276_v63, %v1835_v39  ;;  %v3184_v38 = vadd.f32 %v3183_v48, %v3182_v13  ;;  %v3148_v58 = vpop.f32.mrf.mxu0  ;;  %v2346_v53 = vsel %vm2330_vm5, %v2322_v19, %v2338_v7 }
 0x172   : > { %v3185_v55 = vpop.f32.mrf.mxu1 }
 0x173   : > { %vm2331_vm6 = vcmp.ge.f32.partialorder %v2323_v31, 0.0  ;;  %v2339_v36 = vmul.f32 0.2, %v2323_v31  ;;  %v2309_v56 = vmul.f32 %v4197_v29, %v2294_v59  ;;  %v2279_v46 = vadd.f32 %v3184_v38, %v3144_v16  ;;  %v3149_v1 = vpop.f32.mrf.mxu0 }
 0x174   : > { %v3186_v37 = vpop.f32.mrf.mxu1  ;;  %v3150_v4 = vadd.f32 %v3149_v1, %v3148_v58 }
 0x175   : > { %v2347_v62 = vsel %vm2331_vm6, %v2323_v31, %v2339_v36  ;;  %v2324_v18 = vadd.f32 %v4203_v30, %v2309_v56  ;;  %v2295_v23 = vadd.f32 %v2279_v46, %v1836_v44  ;;  %v3187_v42 = vadd.f32 %v3186_v37, %v3185_v55 }
 0x176   : > { %v2856_v22 = vpack.c.bf16 %v2347_v62, %v2346_v53  ;;  %v3188_v61 = vpop.f32.mrf.mxu1 }
 0x177   : > { %v2310_v45 = vmul.f32 %v4197_v29, %v2295_v23  ;;  %v2284_v40 = vadd.f32 %v3187_v42, %v3147_v12  ;;  %v2340_v41 = vmul.f32 0.2, %v2324_v18  ;;  %vm2332_vm7 = vcmp.ge.f32.partialorder %v2324_v18, 0.0 }
 0x178   : > { %2868 = vst [vmem:[%s4217_s30 + $0x8] sm:$0xff] %v2856_v22   ;;  %v3189_v0 = vpop.f32.mrf.mxu1 }
 0x179   : > { %v2325_v34 = vadd.f32 %v4203_v30, %v2310_v45  ;;  %v2296_v51 = vadd.f32 %v2284_v40, %v1837_v15  ;;  %v3190_v9 = vadd.f32 %v3189_v0, %v3188_v61  ;;  %v2348_v54 = vsel %vm2332_vm7, %v2324_v18, %v2340_v41 }
 0x17b   : > { %vm2333_vm8 = vcmp.ge.f32.partialorder %v2325_v34, 0.0  ;;  %v2341_v32 = vmul.f32 0.2, %v2325_v34  ;;  %v2311_v50 = vmul.f32 %v4197_v29, %v2296_v51  ;;  %v2287_v2 = vadd.f32 %v3190_v9, %v3150_v4 }
 0x17d   : > { %v2349_v47 = vsel %vm2333_vm8, %v2325_v34, %v2341_v32  ;;  %v2326_v20 = vadd.f32 %v4203_v30, %v2311_v50  ;;  %v2297_v60 = vadd.f32 %v2287_v2, %v1838_v27 }
 0x17e   : > { %v2861_v35 = vpack.c.bf16 %v2349_v47, %v2348_v54 }
 0x17f   : > { %v2312_v21 = vmul.f32 %v4197_v29, %v2297_v60  ;;  %v2342_v28 = vmul.f32 0.2, %v2326_v20  ;;  %vm2334_vm9 = vcmp.ge.f32.partialorder %v2326_v20, 0.0 }
 0x180   : > { %2869 = vst [vmem:[%s4217_s30 + $0x10] sm:$0xff] %v2861_v35  }
 0x181   : > { %v2327_v14 = vadd.f32 %v4203_v30, %v2312_v21  ;;  %v2350_v52 = vsel %vm2334_vm9, %v2326_v20, %v2342_v28 }
 0x183   : > { %vm2335_vm10 = vcmp.ge.f32.partialorder %v2327_v14, 0.0  ;;  %v2343_v17 = vmul.f32 0.2, %v2327_v14 }
 0x185   : > { %v2351_v8 = vsel %vm2335_vm10, %v2327_v14, %v2343_v17 }
 0x186   : > { %v2866_v19 = vpack.c.bf16 %v2351_v8, %v2350_v52 }
 0x188   : > { %2870 = vst [vmem:[%s4217_s30 + $0x18] sm:$0xff] %v2866_v19  }
 0x189 PF: > { %s14_s17 = sadd.s32 1, %s3366_s17   ;;  %s4264_s15 = smov %s3362_s16 }
 0x18a   : > { %p11_p5 = scmp.ge.s32.totalorder %s14_s17, 4   ;;  %s4265_s16 = smov %s4267_s18 }
 0x18c   :  { %13 = sbr.rel (!%p11_p5) target bundleno = 2 (0x2), region = 70 }

// kernel: forward.7
= control target key start
LH: loop header
LB: loop body
LE: loop exit
PB: predicated region body
PF: predicated region fallthrough
CT: control target
= control target key end

     0   :  { %s2846_s15 = smov 0   ;;  %s2848_s16 = smov 0   ;;  %s3445_s0 = inlined_call_operand.vmem [shape: bf16[2,5,9,512], index: 0, kind: input, shape index: {}]   ;;  %s3446_s1 = inlined_call_operand.vmem [shape: bf16[4,512,128], index: 1, kind: input, shape index: {}]   ;;  %s3447_s2 = inlined_call_operand.vmem [shape: f32[1,128], index: 2, kind: input, shape index: {}]   ;;  %s3448_s3 = inlined_call_operand.vmem [shape: f32[1,128], index: 3, kind: input, shape index: {}]   ;;  %s3449_s4 = inlined_call_operand.vmem [shape: bf16[2,4,4,128], index: 4, kind: output, shape index: {}]  }
   0x1   :  { %s2850_s17 = smov 0  }
   0x2 LB: > { %s26_s18 = sadd.s32 1, %s2815_s16  ;;  %p2059_p0 = scmp.ge.s32.totalorder %s2819_s17, 1  ;;  %s2819_s17 = sphi %s2850_s17, %s14_s17   ;;  %s2815_s16 = sphi %s2848_s16, %s3455_s16   ;;  %s2811_s15 = sphi %s2846_s15, %s3454_s15  }
   0x3   : > { %p28_p1 = scmp.ge.s32.totalorder %s26_s18, 2  ;;  %p176_p2 = scmp.lt.s32.totalorder %s2819_s17, 3 }
   0x5   : > { %s3457_s18 = smov (%p28_p1, %s26_s18), 0  ;;  %p177_p3 = pnand %p2059_p0, %p176_p2 }
   0x7   : > { %180 = sbr.rel (%p177_p3) target bundleno = 370 (0x172), region = 36 }
   0xc   : > { %v2669_v0 = vld [vmem:[%s3446_s1 + $0x178] sm:$0xff]   ;;  %v2673_v4 = vld [vmem:[%s3446_s1 + $0x170] sm:$0xff]   ;;  %v2677_v8 = vld [vmem:[%s3446_s1 + $0x168] sm:$0xff]   ;;  %p206_p4 = scmp.lt.s32.totalorder %s2811_s15, 1  ;;  %vm310_vm0 = vsmask.f32 3328 }
   0xd   : > { %v2670_v1 = vld [vmem:[%s3446_s1 + $0x1f8] sm:$0xff]   ;;  %2420 = vmatprep.subr.bf16.mxu0 %v2669_v0  ;;  %v2674_v5 = vld [vmem:[%s3446_s1 + $0x1f0] sm:$0xff]   ;;  %v2678_v9 = vld [vmem:[%s3446_s1 + $0x1e8] sm:$0xff]   ;;  %vm311_vm1 = vsmask.f32 7440 }
   0xe   : > { %v2671_v2 = vld [vmem:[%s3446_s1 + $0x138] sm:$0xff]   ;;  %2448 = vmatprep.subr.bf16.mxu1 %v2670_v1  ;;  %v2675_v6 = vld [vmem:[%s3446_s1 + $0x130] sm:$0xff]   ;;  %v2679_v10 = vld [vmem:[%s3446_s1 + $0x128] sm:$0xff]   ;;  %s3459_s15 = smov (!%p206_p4, %s2811_s15), 1 }
   0xf   : > { %v2672_v3 = vld [vmem:[%s3446_s1 + $0x1b8] sm:$0xff]   ;;  %2421 = vmatpush3.bf16.msra.mxu0 %v2671_v2  ;;  %v2676_v7 = vld [vmem:[%s3446_s1 + $0x1b0] sm:$0xff]   ;;  %v2680_v11 = vld [vmem:[%s3446_s1 + $0x1a8] sm:$0xff]   ;;  %s2644_s27 = smul.u32 160, %s3459_s15 }
  0x10   : > { %2449 = vmatpush3.bf16.msra.mxu1 %v2672_v3  ;;  %2422 = vmatprep.subr.bf16.mxu0 %v2673_v4  ;;  %v2681_v12 = vld [vmem:[%s3446_s1 + $0x160] sm:$0xff]   ;;  %v2685_v16 = vld [vmem:[%s3446_s1 + $0x158] sm:$0xff]   ;;  %v2689_v20 = vld [vmem:[%s3446_s1 + $0x150] sm:$0xff]  }
  0x11   : > { %2450 = vmatprep.subr.bf16.mxu1 %v2674_v5  ;;  %v2682_v13 = vld [vmem:[%s3446_s1 + $0x1e0] sm:$0xff]   ;;  %v2686_v17 = vld [vmem:[%s3446_s1 + $0x1d8] sm:$0xff]   ;;  %v2690_v21 = vld [vmem:[%s3446_s1 + $0x1d0] sm:$0xff]   ;;  %s2964_s12 = scalar_lea.vmem %s3445_s0, %s2644_s27  ;;  %s2419_s27 = sshll.u32 %s3459_s15, 3 }
  0x12   : > { %v2683_v14 = vld [vmem:[%s3446_s1 + $0x120] sm:$0xff]   ;;  %v2687_v18 = vld [vmem:[%s3446_s1 + $0x118] sm:$0xff]   ;;  %v2691_v22 = vld [vmem:[%s3446_s1 + $0x110] sm:$0xff]   ;;  %s219_s30 = scalar_lea.vmem %s3449_s4, %s2419_s27 }
  0x13   : > { %2423 = vmatpush3.bf16.msra.mxu0 %v2675_v6  ;;  %v2684_v15 = vld [vmem:[%s3446_s1 + $0x1a0] sm:$0xff]   ;;  %v2688_v19 = vld [vmem:[%s3446_s1 + $0x198] sm:$0xff]   ;;  %v2692_v23 = vld [vmem:[%s3446_s1 + $0x190] sm:$0xff]  }
  0x14   : > { %2451 = vmatpush3.bf16.msra.mxu1 %v2676_v7  ;;  %2424 = vmatprep.subr.bf16.mxu0 %v2677_v8  ;;  %v2693_v24 = vld [vmem:[%s3446_s1 + $0x148] sm:$0xff]   ;;  %v2697_v28 = vld [vmem:[%s3446_s1 + $0x140] sm:$0xff]   ;;  %v228_v33 = vld [vmem:[%s2964_s12 + $0x10] sm:$0x11] }
  0x15   : > { %2452 = vmatprep.subr.bf16.mxu1 %v2678_v9  ;;  %v2694_v25 = vld [vmem:[%s3446_s1 + $0x1c8] sm:$0xff]   ;;  %v2698_v29 = vld [vmem:[%s3446_s1 + $0x1c0] sm:$0xff]   ;;  %v232_v35 = vld [vmem:[%s2964_s12 + $0x30] sm:$0x11]  ;;  %v323_v40 = vshll.u32 %v228_v33, 16 }
  0x16   : > { %v2695_v26 = vld [vmem:[%s3446_s1 + $0x108] sm:$0xff]   ;;  %v2699_v30 = vld [vmem:[%s3446_s1 + $0x100] sm:$0xff]   ;;  %v236_v37 = vld [vmem:[%s2964_s12 + $0x50] sm:$0x11]  ;;  %v351_v45 = vshll.u32 %v232_v35, 16 }
  0x17   : > { %2425 = vmatpush3.bf16.msra.mxu0 %v2679_v10  ;;  %v2696_v27 = vld [vmem:[%s3446_s1 + $0x188] sm:$0xff]   ;;  %v2700_v31 = vld [vmem:[%s3446_s1 + $0x180] sm:$0xff]   ;;  %v229_v47 = vld [vmem:[%s2964_s12 + $0x18] sm:$0x11]  ;;  %v325_v49 = vrot.slane %v323_v40, 5  ;;  %v379_v56 = vshll.u32 %v236_v37, 16 }
  0x18   : > { %2453 = vmatpush3.bf16.msra.mxu1 %v2680_v11  ;;  %2426 = vmatprep.subr.bf16.mxu0 %v2681_v12  ;;  %v2973_v32 = vld [vmem:[%s2964_s12] sm:$0xff]  ;;  %v2988_v42 = vld [vmem:[%s2964_s12 + $0x8] sm:$0xff]  ;;  %v353_v54 = vrot.slane %v351_v45, 5  ;;  %v233_v59 = vld [vmem:[%s2964_s12 + $0x38] sm:$0x11]  ;;  %v337_v2 = vshll.u32 %v229_v47, 16 }
  0x19   : > { %2454 = vmatprep.subr.bf16.mxu1 %v2682_v13  ;;  %v2977_v34 = vld [vmem:[%s2964_s12 + $0x20] sm:$0xff]  ;;  %v314_v38 = vshrl.u32 %v2973_v32, 16  ;;  %v317_v39 = vshll.u32 %v2973_v32, 16  ;;  %v2995_v52 = vld [vmem:[%s2964_s12 + $0x28] sm:$0xff]  ;;  %v328_v60 = vshrl.u32 %v2988_v42, 16  ;;  %v331_v61 = vshll.u32 %v2988_v42, 16  ;;  %vm3005_vm2 = vmor %vm310_vm0, %vm311_vm1 }
  0x1a   : > { %v2981_v36 = vld [vmem:[%s2964_s12 + $0x40] sm:$0xff]  ;;  %v342_v41 = vshrl.u32 %v2977_v34, 16  ;;  %v345_v44 = vshll.u32 %v2977_v34, 16  ;;  %v2701_v62 = vld [vmem:[%s3446_s1 + $0x78] sm:$0xff]   ;;  %v381_v1 = vrot.slane %v379_v56, 5  ;;  %v356_v3 = vshrl.u32 %v2995_v52, 16 }
  0x1b   : > { %2427 = vmatpush3.bf16.msra.mxu0 %v2683_v14  ;;  %v316_v43 = vrot.slane %v314_v38, 4  ;;  %v370_v46 = vshrl.u32 %v2981_v36, 16  ;;  %v319_v48 = vrot.slane %v317_v39, 5  ;;  %v373_v51 = vshll.u32 %v2981_v36, 16  ;;  %v2702_v4 = vld [vmem:[%s3446_s1 + $0xf8] sm:$0xff]   ;;  %v3014_v7 = vld [vmem:[%s2964_s12 + $0x48] sm:$0xff] }
  0x1c   : > { %2455 = vmatpush3.bf16.msra.mxu1 %v2684_v15  ;;  %2428 = vmatprep.subr.bf16.mxu0 %v2685_v16  ;;  %v344_v50 = vrot.slane %v342_v41, 4  ;;  %v347_v53 = vrot.slane %v345_v44, 5  ;;  %v330_v8 = vrot.slane %v328_v60, 4  ;;  %v333_v9 = vrot.slane %v331_v61, 5  ;;  %v237_v11 = vld [vmem:[%s2964_s12 + $0x58] sm:$0x11] }
  0x1d   : > { %2456 = vmatprep.subr.bf16.mxu1 %v2686_v17  ;;  %v372_v55 = vrot.slane %v370_v46, 4  ;;  %v320_v57 = vor.u32 %v319_v48, %v316_v43  ;;  %v375_v58 = vrot.slane %v373_v51, 5  ;;  %v339_v12 = vrot.slane %v337_v2, 5  ;;  %v2707_v43 = vld [vmem:[%s3446_s1 + $0x30] sm:$0xff]   ;;  %v2704_v45 = vld [vmem:[%s3446_s1 + $0xb8] sm:$0xff]   ;;  %v2713_v56 = vld [vmem:[%s3446_s1 + $0x60] sm:$0xff]  }
  0x1e   : > { %v348_v0 = vor.u32 %v347_v53, %v344_v50  ;;  %v358_v13 = vrot.slane %v356_v3, 4  ;;  %v359_v14 = vshll.u32 %v2995_v52, 16  ;;  %v334_v17 = vor.u32 %v333_v9, %v330_v8  ;;  %v2706_v50 = vld [vmem:[%s3446_s1 + $0xf0] sm:$0xff]   ;;  %v2711_v53 = vld [vmem:[%s3446_s1 + $0x28] sm:$0xff]   ;;  %v2717_v60 = vld [vmem:[%s3446_s1 + $0x58] sm:$0xff]  }
  0x1f   : > { %2429 = vmatpush3.bf16.msra.mxu0 %v2687_v18  ;;  %v321_v5 = vrot.slane %v320_v57, 4  ;;  %v376_v6 = vor.u32 %v375_v58, %v372_v55  ;;  %v365_v18 = vshll.u32 %v233_v59, 16  ;;  %v393_v37 = vshll.u32 %v237_v11, 16  ;;  %v2708_v55 = vld [vmem:[%s3446_s1 + $0xb0] sm:$0xff]   ;;  %v2710_v57 = vld [vmem:[%s3446_s1 + $0xe8] sm:$0xff]   ;;  %v2715_v58 = vld [vmem:[%s3446_s1 + $0x20] sm:$0xff]  }
  0x20   : > { %2457 = vmatpush3.bf16.msra.mxu1 %v2688_v19  ;;  %2430 = vmatprep.subr.bf16.mxu0 %v2689_v20  ;;  %v349_v10 = vrot.slane %v348_v0, 4  ;;  %v361_v20 = vrot.slane %v359_v14, 5  ;;  %v2712_v59 = vld [vmem:[%s3446_s1 + $0xa8] sm:$0xff]   ;;  %v2714_v61 = vld [vmem:[%s3446_s1 + $0xe0] sm:$0xff]   ;;  %v2719_v0 = vld [vmem:[%s3446_s1 + $0x18] sm:$0xff]  }
  0x21   : > { %2458 = vmatprep.subr.bf16.mxu1 %v2690_v21  ;;  %v326_v15 = vsel %vm3005_vm2, %v321_v5, %v325_v49  ;;  %v377_v16 = vrot.slane %v376_v6, 4  ;;  %v384_v21 = vshrl.u32 %v3014_v7, 16  ;;  %v395_v41 = vrot.slane %v393_v37, 5  ;;  %v2709_v49 = vld [vmem:[%s3446_s1 + $0x68] sm:$0xff]   ;;  %v3100_v2 = vld [vmem:[%s2964_s12 + $0x60] sm:$0xff]  ;;  %v2720_v14 = vld [vmem:[%s3446_s1 + $0x98] sm:$0xff]  }
  0x22   : > { %v3022_v19 = vsel %vm3005_vm2, %v349_v10, %v353_v54  ;;  %v240_v3 = vld [vmem:[%s2964_s12 + $0x70] sm:$0x11]  ;;  %v401_v5 = vshll.u32 %v3100_v2, 16  ;;  %v3106_v8 = vld [vmem:[%s2964_s12 + $0x68] sm:$0xff]  ;;  %v241_v9 = vld [vmem:[%s2964_s12 + $0x78] sm:$0x11] }
  0x23   : > { %2431 = vmatpush3.bf16.msra.mxu0 %v2691_v22  ;;  %v387_v22 = vshll.u32 %v3014_v7, 16  ;;  %v386_v33 = vrot.slane %v384_v21, 4  ;;  %v407_v6 = vshll.u32 %v240_v3, 16  ;;  %v412_v10 = vshrl.u32 %v3106_v8, 16  ;;  %v2723_v21 = vld [vmem:[%s3446_s1 + $0x10] sm:$0xff]  }
  0x24   : > { %2459 = vmatpush3.bf16.msra.mxu1 %v2692_v23  ;;  %2432 = vmatprep.subr.bf16.mxu0 %v2693_v24  ;;  %v2703_v23 = vld [vmem:[%s3446_s1 + $0x38] sm:$0xff]   ;;  %v3031_v24 = vsel %vm3005_vm2, %v377_v16, %v381_v1  ;;  %v415_v11 = vshll.u32 %v3106_v8, 16  ;;  %v403_v16 = vrot.slane %v401_v5, 5  ;;  %v2740_v3 = vld [vmem:[%s3446_s1 + $0x2b0] sm:$0xff]   ;;  %v2743_v5 = vld [vmem:[%s3446_s1 + $0x228] sm:$0xff]  }
  0x25   : > { %2460 = vmatprep.subr.bf16.mxu1 %v2694_v25  ;;  %v2127_v25 = vcombine.low %v326_v15, %v3022_v19  ;;  %v389_v35 = vrot.slane %v387_v22, 5  ;;  %v2718_v1 = vld [vmem:[%s3446_s1 + $0xd8] sm:$0xff]  }
  0x27   : > { %2433 = vmatpush3.bf16.msra.mxu0 %v2695_v26  ;;  %v2128_v26 = vcombine.high %v326_v15, %v3022_v19  ;;  %v390_v40 = vor.u32 %v389_v35, %v386_v33  ;;  %v2727_v33 = vld [vmem:[%s3446_s1 + $0x8] sm:$0xff]  }
  0x28   : > { %2461 = vmatpush3.bf16.msra.mxu1 %v2696_v27  ;;  %2434 = vmatprep.subr.bf16.mxu0 %v2697_v28  ;;  %v335_v27 = vrot.slane %v334_v17, 4  ;;  %v2705_v28 = vld [vmem:[%s3446_s1 + $0x70] sm:$0xff]   ;;  %v409_v17 = vrot.slane %v407_v6, 5  ;;  %v2272_v6 = vcombine.high %v2977_v34, %v2981_v36 }
  0x29   : > { %2462 = vmatprep.subr.bf16.mxu1 %v2698_v29  ;;  %v2375_v29 = vcombine.low %v3022_v19, %v3031_v24  ;;  %746 = vmatprep.mubr.bf16.mxu0 %v2128_v26  ;;  %v391_v46 = vrot.slane %v390_v40, 4  ;;  %v2722_v26 = vld [vmem:[%s3446_s1 + $0xd0] sm:$0xff]  }
  0x2a   : > { %v340_v38 = vsel %vm3005_vm2, %v335_v27, %v339_v12  ;;  %v421_v12 = vshll.u32 %v241_v9, 16  ;;  %v2745_v9 = vld [vmem:[%s3446_s1 + $0x260] sm:$0xff]  }
  0x2b   : > { %2435 = vmatpush3.bf16.msra.mxu0 %v2699_v30  ;;  %v362_v30 = vor.u32 %v361_v20, %v358_v13  ;;  %v3062_v51 = vsel %vm3005_vm2, %v391_v46, %v395_v41  ;;  %v2721_v13 = vld [vmem:[%s3446_s1 + $0x50] sm:$0xff]   ;;  %v417_v20 = vrot.slane %v415_v11, 5  ;;  %v2168_v46 = vcombine.high %v2973_v32, %v2977_v34  ;;  %v2744_v11 = vld [vmem:[%s3446_s1 + $0x2a8] sm:$0xff]  }
  0x2c   : > { %2463 = vmatpush3.bf16.msra.mxu1 %v2700_v31  ;;  %2476 = vmatprep.subr.bf16.mxu0 %v2701_v62  ;;  %v367_v31 = vrot.slane %v365_v18, 5  ;;  %v2716_v62 = vld [vmem:[%s3446_s1 + $0xa0] sm:$0xff]   ;;  %v414_v18 = vrot.slane %v412_v10, 4  ;;  %v2742_v10 = vld [vmem:[%s3446_s1 + $0x2e8] sm:$0xff]  }
  0x2d   : > { %2504 = vmatprep.subr.bf16.mxu1 %v2702_v4  ;;  %v363_v39 = vrot.slane %v362_v30, 4  ;;  %v398_v4 = vshrl.u32 %v3100_v2, 16 }
  0x2e   : > { %747 = vmatmul.mubr.bf16.vlgmr.msra.gmra.mxu0 %v2127_v25  ;;  %v423_v25 = vrot.slane %v421_v12, 5  ;;  %v2173_v12 = vcombine.low %v3014_v7, %v3106_v8 }
  0x2f   : > { %2477 = vmatpush3.bf16.msra.mxu0 %v2703_v23  ;;  %v3047_v44 = vsel %vm3005_vm2, %v363_v39, %v367_v31  ;;  %v400_v15 = vrot.slane %v398_v4, 4  ;;  %v418_v23 = vor.u32 %v417_v20, %v414_v18  ;;  %v2724_v39 = vld [vmem:[%s3446_s1 + $0x90] sm:$0xff]   ;;  %v2171_v4 = vcombine.low %v2981_v36, %v3100_v2  ;;  %v2751_v18 = vld [vmem:[%s3446_s1 + $0x218] sm:$0xff]  }
  0x30   : > { %2478 = vmatprep.subr.bf16.mxu0 %v2705_v28  ;;  %v2129_v47 = vcombine.low %v340_v38, %v3047_v44  ;;  %v2130_v48 = vcombine.high %v340_v38, %v3047_v44  ;;  %v2377_v54 = vcombine.low %v3047_v44, %v3062_v51  ;;  %v2725_v28 = vld [vmem:[%s3446_s1 + $0x48] sm:$0xff]   ;;  %v2753_v20 = vld [vmem:[%s3446_s1 + $0x250] sm:$0xff]  }
  0x31   : > { %v404_v22 = vor.u32 %v403_v16, %v400_v15  ;;  %v419_v30 = vrot.slane %v418_v23, 4  ;;  %v2746_v15 = vld [vmem:[%s3446_s1 + $0x2e0] sm:$0xff]   ;;  %v2274_v16 = vcombine.high %v2995_v52, %v3014_v7  ;;  %v2755_v23 = vld [vmem:[%s3446_s1 + $0x210] sm:$0xff]  }
  0x32   : > { %795 = vmatprep.mubr.bf16.mxu1 %v2130_v48  ;;  %v2170_v48 = vcombine.high %v2988_v42, %v2995_v52 }
  0x33   : > { %2479 = vmatpush3.bf16.msra.mxu0 %v2707_v43  ;;  %796 = vmatmul.mubr.bf16.vlgmr.msra.gmra.mxu1 %v2129_v47  ;;  %v405_v27 = vrot.slane %v404_v22, 4  ;;  %v3137_v37 = vsel %vm3005_vm2, %v419_v30, %v423_v25  ;;  %v2729_v43 = vld [vmem:[%s3446_s1 + $0x40] sm:$0xff]   ;;  %v2752_v22 = vld [vmem:[%s3446_s1 + $0x298] sm:$0xff]   ;;  %v2757_v25 = vld [vmem:[%s3446_s1 + $0x248] sm:$0xff]  }
  0x34   : > { %2480 = vmatprep.subr.bf16.mxu0 %v2709_v49  ;;  %2505 = vmatpush3.bf16.msra.mxu1 %v2704_v45  ;;  %v2134_v40 = vcombine.high %v3062_v51, %v3137_v37  ;;  %v2133_v41 = vcombine.low %v3062_v51, %v3137_v37  ;;  %v2726_v45 = vld [vmem:[%s3446_s1 + $0xc8] sm:$0xff]   ;;  %v2731_v47 = vld [vmem:[%s3446_s1] sm:$0xff]  }
  0x35   : > { %2506 = vmatprep.subr.bf16.mxu1 %v2706_v50  ;;  %v3128_v31 = vsel %vm3005_vm2, %v405_v27, %v409_v17  ;;  %v2728_v49 = vld [vmem:[%s3446_s1 + $0x88] sm:$0xff]   ;;  %v2733_v50 = vld [vmem:[%s3446_s1 + $0x278] sm:$0xff]   ;;  %v2748_v17 = vld [vmem:[%s3446_s1 + $0x2a0] sm:$0xff]  }
  0x36   : > { %v2132_v35 = vcombine.high %v3031_v24, %v3128_v31  ;;  %v2131_v38 = vcombine.low %v3031_v24, %v3128_v31  ;;  %803 = vmatprep.mubr.bf16.mxu1 %v2134_v40  ;;  %v2756_v27 = vld [vmem:[%s3446_s1 + $0x290] sm:$0xff]   ;;  %v2761_v30 = vld [vmem:[%s3446_s1 + $0x240] sm:$0xff]  }
  0x37   : > { %2481 = vmatpush3.bf16.msra.mxu0 %v2711_v53  ;;  %v2730_v53 = vld [vmem:[%s3446_s1 + $0xc0] sm:$0xff]  }
  0x38   : > { %2482 = vmatprep.subr.bf16.mxu0 %v2713_v56  ;;  %2507 = vmatpush3.bf16.msra.mxu1 %v2708_v55  ;;  %v2732_v55 = vld [vmem:[%s3446_s1 + $0x80] sm:$0xff]   ;;  %v2167_v56 = vcombine.low %v2973_v32, %v2977_v34  ;;  %v2736_v32 = vld [vmem:[%s3446_s1 + $0x2b8] sm:$0xff]  }
  0x39   : > { %2508 = vmatprep.subr.bf16.mxu1 %v2710_v57  ;;  %754 = vmatprep.mubr.bf16.mxu0 %v2132_v35  ;;  %v2735_v57 = vld [vmem:[%s3446_s1 + $0x238] sm:$0xff]   ;;  %v2760_v35 = vld [vmem:[%s3446_s1 + $0x288] sm:$0xff]   ;;  %v2762_v40 = vld [vmem:[%s3446_s1 + $0x2c0] sm:$0xff]  }
  0x3a   : > { %755 = vmatmul.mubr.bf16.gmra.mxu0 %v2131_v38  ;;  %v2763_v38 = vld [vmem:[%s3446_s1 + $0x200] sm:$0xff]  }
  0x3b   : > { %2483 = vmatpush3.bf16.msra.mxu0 %v2715_v58  ;;  %804 = vmatmul.mubr.bf16.gmra.mxu1 %v2133_v41  ;;  %v2172_v58 = vcombine.high %v2981_v36, %v3100_v2  ;;  %v2764_v41 = vld [vmem:[%s3446_s1 + $0x280] sm:$0xff]  }
  0x3c   : > { %2484 = vmatprep.subr.bf16.mxu0 %v2717_v60  ;;  %2509 = vmatpush3.bf16.msra.mxu1 %v2712_v59  ;;  %v2737_v59 = vld [vmem:[%s3446_s1 + $0x270] sm:$0xff]   ;;  %v2734_v60 = vld [vmem:[%s3446_s1 + $0x2f8] sm:$0xff]  }
  0x3d   : > { %2510 = vmatprep.subr.bf16.mxu1 %v2714_v61  ;;  %1076 = vmatprep.mubr.bf16.mxu0 %v2168_v46  ;;  %v2169_v61 = vcombine.low %v2988_v42, %v2995_v52  ;;  %v2174_v42 = vcombine.high %v3014_v7, %v3106_v8  ;;  %v2769_v46 = vld [vmem:[%s3446_s1 + $0x370] sm:$0xff]  }
  0x3e   : > { %1125 = vmatprep.mubr.bf16.mxu1 %v2170_v48  ;;  %v2771_v48 = vld [vmem:[%s3446_s1 + $0x330] sm:$0xff]  }
  0x3f   : > { %2485 = vmatpush3.bf16.msra.mxu0 %v2719_v0  ;;  %v2741_v0 = vld [vmem:[%s3446_s1 + $0x268] sm:$0xff]  }
  0x40   : > { %2486 = vmatprep.subr.bf16.mxu0 %v2721_v13  ;;  %2511 = vmatpush3.bf16.msra.mxu1 %v2716_v62  ;;  %v2739_v62 = vld [vmem:[%s3446_s1 + $0x230] sm:$0xff]   ;;  %v2747_v13 = vld [vmem:[%s3446_s1 + $0x220] sm:$0xff]  }
  0x41   : > { %2512 = vmatprep.subr.bf16.mxu1 %v2718_v1  ;;  %v2738_v1 = vld [vmem:[%s3446_s1 + $0x2f0] sm:$0xff]  }
  0x43   : > { %2487 = vmatpush3.bf16.msra.mxu0 %v2723_v21  ;;  %v2750_v21 = vld [vmem:[%s3446_s1 + $0x2d8] sm:$0xff]  }
  0x44   : > { %2513 = vmatpush3.bf16.msra.mxu1 %v2720_v14  ;;  %2488 = vmatprep.subr.bf16.mxu0 %v2725_v28  ;;  %v2749_v14 = vld [vmem:[%s3446_s1 + $0x258] sm:$0xff]   ;;  %v2759_v28 = vld [vmem:[%s3446_s1 + $0x208] sm:$0xff]  }
  0x45   : > { %2514 = vmatprep.subr.bf16.mxu1 %v2722_v26  ;;  %v2754_v26 = vld [vmem:[%s3446_s1 + $0x2d0] sm:$0xff]  }
  0x47   : > { %2489 = vmatpush3.bf16.msra.mxu0 %v2727_v33  ;;  %v2758_v33 = vld [vmem:[%s3446_s1 + $0x2c8] sm:$0xff]  }
  0x48   : > { %2490 = vmatprep.subr.bf16.mxu0 %v2729_v43  ;;  %2515 = vmatpush3.bf16.msra.mxu1 %v2724_v39  ;;  %v2765_v39 = vld [vmem:[%s3446_s1 + $0x378] sm:$0xff]   ;;  %v2271_v43 = vcombine.low %v2977_v34, %v2981_v36  ;;  %v2273_v36 = vcombine.low %v2995_v52, %v3014_v7  ;;  %v2772_v52 = vld [vmem:[%s3446_s1 + $0x3b0] sm:$0xff]  }
  0x49   : > { %2516 = vmatprep.subr.bf16.mxu1 %v2726_v45  ;;  %v2767_v45 = vld [vmem:[%s3446_s1 + $0x338] sm:$0xff]  }
  0x4a   : > { %v2768_v34 = vld [vmem:[%s3446_s1 + $0x3b8] sm:$0xff]  }
  0x4b   : > { %2491 = vmatpush3.bf16.msra.mxu0 %v2731_v47  ;;  %v2766_v47 = vld [vmem:[%s3446_s1 + $0x3f8] sm:$0xff]  }
  0x4c   : > { %2532 = vmatprep.subr.bf16.mxu0 %v2733_v50  ;;  %2517 = vmatpush3.bf16.msra.mxu1 %v2728_v49  ;;  %v242_v49 = vld [vmem:[%s2964_s12 + $0x80] sm:$0xff]  ;;  %v243_v50 = vld [vmem:[%s2964_s12 + $0x88] sm:$0xff] }
  0x4d   : > { %2518 = vmatprep.subr.bf16.mxu1 %v2730_v53  ;;  %v2770_v53 = vld [vmem:[%s3446_s1 + $0x3f0] sm:$0xff]   ;;  %v2275_v7 = vcombine.low %v3100_v2, %v242_v49 }
  0x4e   : > { %1077 = vmatmul.mubr.bf16.vlgmr.msra.gmra.mxu0 %v2167_v56  ;;  %v2278_v56 = vcombine.high %v3106_v8, %v243_v50 }
  0x4f   : > { %2533 = vmatpush3.bf16.msra.mxu0 %v2735_v57  ;;  %1084 = vmatprep.mubr.bf16.mxu0 %v2172_v58  ;;  %v2773_v57 = vld [vmem:[%s3446_s1 + $0x368] sm:$0xff]  }
  0x50   : > { %2519 = vmatpush3.bf16.msra.mxu1 %v2732_v55  ;;  %2534 = vmatprep.subr.bf16.mxu0 %v2737_v59  ;;  %v2276_v55 = vcombine.high %v3100_v2, %v242_v49  ;;  %v2775_v58 = vld [vmem:[%s3446_s1 + $0x328] sm:$0xff]   ;;  %v2376_v59 = vcombine.high %v3022_v19, %v3031_v24  ;;  %v2777_v2 = vld [vmem:[%s3446_s1 + $0x360] sm:$0xff]  }
  0x51   : > { %2560 = vmatprep.subr.bf16.mxu1 %v2734_v60  ;;  %v2774_v60 = vld [vmem:[%s3446_s1 + $0x3e8] sm:$0xff]  }
  0x53   : > { %1126 = vmatmul.mubr.bf16.vlgmr.msra.gmra.mxu1 %v2169_v61  ;;  %2535 = vmatpush3.bf16.msra.mxu0 %v2739_v62  ;;  %v2277_v61 = vcombine.low %v3106_v8, %v243_v50  ;;  %v2779_v62 = vld [vmem:[%s3446_s1 + $0x320] sm:$0xff]   ;;  %v2378_v8 = vcombine.high %v3047_v44, %v3062_v51 }
  0x54   : > { %2561 = vmatpush3.bf16.msra.mxu1 %v2736_v32  ;;  %2536 = vmatprep.subr.bf16.mxu0 %v2741_v0  ;;  %v2776_v32 = vld [vmem:[%s3446_s1 + $0x3a8] sm:$0xff]   ;;  %v2778_v0 = vld [vmem:[%s3446_s1 + $0x3e0] sm:$0xff]  }
  0x55   : > { %2562 = vmatprep.subr.bf16.mxu1 %v2738_v1  ;;  %1133 = vmatprep.mubr.bf16.mxu1 %v2174_v42  ;;  %v2781_v1 = vld [vmem:[%s3446_s1 + $0x358] sm:$0xff]   ;;  %v2780_v42 = vld [vmem:[%s3446_s1 + $0x3a0] sm:$0xff]  }
  0x56   : > { %1085 = vmatmul.mubr.bf16.gmra.mxu0 %v2171_v4  ;;  %v2783_v4 = vld [vmem:[%s3446_s1 + $0x318] sm:$0xff]  }
  0x57   : > { %2537 = vmatpush3.bf16.msra.mxu0 %v2743_v5  ;;  %1453 = vmatprep.mubr.bf16.mxu0 %v2272_v6  ;;  %v1527_v5 = vshll.u32 %v242_v49, 16  ;;  %v2782_v6 = vld [vmem:[%s3446_s1 + $0x3d8] sm:$0xff]  }
  0x58   : > { %2563 = vmatpush3.bf16.msra.mxu1 %v2740_v3  ;;  %2538 = vmatprep.subr.bf16.mxu0 %v2745_v9  ;;  %v1524_v3 = vshrl.u32 %v242_v49, 16  ;;  %v1538_v9 = vshrl.u32 %v243_v50, 16 }
  0x59   : > { %2564 = vmatprep.subr.bf16.mxu1 %v2742_v10  ;;  %v2785_v10 = vld [vmem:[%s3446_s1 + $0x350] sm:$0xff]  }
  0x5b   : > { %1134 = vmatmul.mubr.bf16.gmra.mxu1 %v2173_v12  ;;  %2539 = vmatpush3.bf16.msra.mxu0 %v2747_v13  ;;  %v2784_v12 = vld [vmem:[%s3446_s1 + $0x398] sm:$0xff]   ;;  %v2787_v13 = vld [vmem:[%s3446_s1 + $0x310] sm:$0xff]  }
  0x5c   : > { %2565 = vmatpush3.bf16.msra.mxu1 %v2744_v11  ;;  %2540 = vmatprep.subr.bf16.mxu0 %v2749_v14  ;;  %v1541_v11 = vshll.u32 %v243_v50, 16  ;;  %v1526_v14 = vrot.slane %v1524_v3, 4 }
  0x5d   : > { %2566 = vmatprep.subr.bf16.mxu1 %v2746_v15  ;;  %1502 = vmatprep.mubr.bf16.mxu1 %v2274_v16  ;;  %v2786_v15 = vld [vmem:[%s3446_s1 + $0x3d0] sm:$0xff]   ;;  %v1529_v16 = vrot.slane %v1527_v5, 5 }
  0x5f   : > { %2541 = vmatpush3.bf16.msra.mxu0 %v2751_v18  ;;  %v1540_v18 = vrot.slane %v1538_v9, 4 }
  0x60   : > { %2567 = vmatpush3.bf16.msra.mxu1 %v2748_v17  ;;  %2542 = vmatprep.subr.bf16.mxu0 %v2753_v20  ;;  %v2789_v17 = vld [vmem:[%s3446_s1 + $0x348] sm:$0xff]   ;;  %v2788_v20 = vld [vmem:[%s3446_s1 + $0x390] sm:$0xff]  }
  0x61   : > { %2568 = vmatprep.subr.bf16.mxu1 %v2750_v21  ;;  %v1543_v21 = vrot.slane %v1541_v11, 5 }
  0x63   : > { %2543 = vmatpush3.bf16.msra.mxu0 %v2755_v23  ;;  %v2790_v23 = vld [vmem:[%s3446_s1 + $0x3c8] sm:$0xff]  }
  0x64   : > { %2569 = vmatpush3.bf16.msra.mxu1 %v2752_v22  ;;  %2544 = vmatprep.subr.bf16.mxu0 %v2757_v25  ;;  %v2791_v22 = vld [vmem:[%s3446_s1 + $0x308] sm:$0xff]   ;;  %v2793_v25 = vld [vmem:[%s3446_s1 + $0x340] sm:$0xff]  }
  0x65   : > { %2570 = vmatprep.subr.bf16.mxu1 %v2754_v26  ;;  %v1530_v26 = vor.u32 %v1529_v16, %v1526_v14 }
  0x67   : > { %2545 = vmatpush3.bf16.msra.mxu0 %v2759_v28  ;;  %v2795_v28 = vld [vmem:[%s3446_s1 + $0x300] sm:$0xff]  }
  0x68   : > { %2571 = vmatpush3.bf16.msra.mxu1 %v2756_v27  ;;  %2546 = vmatprep.subr.bf16.mxu0 %v2761_v30  ;;  %v1544_v27 = vor.u32 %v1543_v21, %v1540_v18  ;;  %v2792_v30 = vld [vmem:[%s3446_s1 + $0x388] sm:$0xff]  }
  0x69   : > { %2572 = vmatprep.subr.bf16.mxu1 %v2758_v33  ;;  %v2794_v33 = vld [vmem:[%s3446_s1 + $0x3c0] sm:$0xff]  }
  0x6b   : > { %2547 = vmatpush3.bf16.msra.mxu0 %v2763_v38  ;;  %v245_v38 = vld [vmem:[%s2964_s12 + $0x98] sm:$0x11] }
  0x6c   : > { %2573 = vmatpush3.bf16.msra.mxu1 %v2760_v35  ;;  %2588 = vmatprep.subr.bf16.mxu0 %v2765_v39  ;;  %v244_v35 = vld [vmem:[%s2964_s12 + $0x90] sm:$0x11]  ;;  %v1531_v39 = vrot.slane %v1530_v26, 4 }
  0x6d   : > { %2574 = vmatprep.subr.bf16.mxu1 %v2762_v40  ;;  %v1533_v40 = vshll.u32 %v244_v35, 16 }
  0x6e   : > { %1454 = vmatmul.mubr.bf16.vlgmr.msra.gmra.mxu0 %v2271_v43  ;;  %v1547_v43 = vshll.u32 %v245_v38, 16 }
  0x6f   : > { %2589 = vmatpush3.bf16.msra.mxu0 %v2767_v45  ;;  %1461 = vmatprep.mubr.bf16.mxu0 %v2276_v55  ;;  %v2796_v45 = vld [vmem:[%s3446_s1 + $0x380] sm:$0xff]  }
  0x70   : > { %2575 = vmatpush3.bf16.msra.mxu1 %v2764_v41  ;;  %2590 = vmatprep.subr.bf16.mxu0 %v2769_v46  ;;  %v1545_v41 = vrot.slane %v1544_v27, 4  ;;  %v1535_v46 = vrot.slane %v1533_v40, 5 }
  0x71   : > { %2616 = vmatprep.subr.bf16.mxu1 %v2766_v47  ;;  %v1549_v47 = vrot.slane %v1547_v43, 5 }
  0x73   : > { %1503 = vmatmul.mubr.bf16.vlgmr.msra.gmra.mxu1 %v2273_v36  ;;  %2591 = vmatpush3.bf16.msra.mxu0 %v2771_v48  ;;  %v1550_v36 = vsel %vm3005_vm2, %v1545_v41, %v1549_v47 }
  0x74   : > { %2617 = vmatpush3.bf16.msra.mxu1 %v2768_v34  ;;  %1510 = vmatprep.mubr.bf16.mxu1 %v2278_v56  ;;  %v1536_v34 = vsel %vm3005_vm2, %v1531_v39, %v1535_v46  ;;  %v2382_v49 = vcombine.high %v3137_v37, %v1550_v36  ;;  %v2381_v19 = vcombine.low %v3137_v37, %v1550_v36 }
  0x75   : > { %2618 = vmatprep.subr.bf16.mxu1 %v2770_v53  ;;  %2592 = vmatprep.subr.bf16.mxu0 %v2773_v57  ;;  %v2380_v48 = vcombine.high %v3128_v31, %v1536_v34  ;;  %v2379_v50 = vcombine.low %v3128_v31, %v1536_v34 }
  0x76   : > { %1462 = vmatmul.mubr.bf16.gmra.mxu0 %v2275_v7 }
  0x77   : > { %2593 = vmatpush3.bf16.msra.mxu0 %v2775_v58  ;;  %1860 = vmatprep.mubr.bf16.mxu0 %v2376_v59 }
  0x78   : > { %2619 = vmatpush3.bf16.msra.mxu1 %v2772_v52  ;;  %2594 = vmatprep.subr.bf16.mxu0 %v2777_v2 }
  0x79   : > { %2620 = vmatprep.subr.bf16.mxu1 %v2774_v60 }
  0x7b   : > { %1511 = vmatmul.mubr.bf16.gmra.mxu1 %v2277_v61  ;;  %2595 = vmatpush3.bf16.msra.mxu0 %v2779_v62 }
  0x7c   : > { %2621 = vmatpush3.bf16.msra.mxu1 %v2776_v32  ;;  %2596 = vmatprep.subr.bf16.mxu0 %v2781_v1 }
  0x7d   : > { %2622 = vmatprep.subr.bf16.mxu1 %v2778_v0  ;;  %1909 = vmatprep.mubr.bf16.mxu1 %v2378_v8 }
  0x7f   : > { %2597 = vmatpush3.bf16.msra.mxu0 %v2783_v4 }
  0x80   : > { %2623 = vmatpush3.bf16.msra.mxu1 %v2780_v42  ;;  %2598 = vmatprep.subr.bf16.mxu0 %v2785_v10 }
  0x81   : > { %2624 = vmatprep.subr.bf16.mxu1 %v2782_v6 }
  0x83   : > { %2599 = vmatpush3.bf16.msra.mxu0 %v2787_v13 }
  0x84   : > { %2625 = vmatpush3.bf16.msra.mxu1 %v2784_v12  ;;  %2600 = vmatprep.subr.bf16.mxu0 %v2789_v17 }
  0x85   : > { %2626 = vmatprep.subr.bf16.mxu1 %v2786_v15 }
  0x87   : > { %2601 = vmatpush3.bf16.msra.mxu0 %v2791_v22 }
  0x88   : > { %2627 = vmatpush3.bf16.msra.mxu1 %v2788_v20  ;;  %2602 = vmatprep.subr.bf16.mxu0 %v2793_v25 }
  0x89   : > { %2628 = vmatprep.subr.bf16.mxu1 %v2790_v23 }
  0x8b   : > { %2603 = vmatpush3.bf16.msra.mxu0 %v2795_v28 }
  0x8c   : > { %2629 = vmatpush3.bf16.msra.mxu1 %v2792_v30 }
  0x8d   : > { %2630 = vmatprep.subr.bf16.mxu1 %v2794_v33 }
  0x8e   : > { %1861 = vmatmul.mubr.bf16.vlgmr.msra.gmra.mxu0 %v2375_v29 }
  0x8f   : > { %1868 = vmatprep.mubr.bf16.mxu0 %v2380_v48 }
  0x90   : > { %2631 = vmatpush3.bf16.msra.mxu1 %v2796_v45 }
  0x93   : > { %1910 = vmatmul.mubr.bf16.vlgmr.msra.gmra.mxu1 %v2377_v54 }
  0x94   : > { %1917 = vmatprep.mubr.bf16.mxu1 %v2382_v49 }
  0x96   : > { %1869 = vmatmul.mubr.bf16.gmra.mxu0 %v2379_v50 }
  0x9b   : > { %1918 = vmatmul.mubr.bf16.gmra.mxu1 %v2381_v19 }
  0xee   : > { %v2436_v24 = vpop.f32.mrf.mxu0 }
  0xf0   : > { %v2437_v63 = vpop.f32.mrf.mxu0 }
  0xf1   : > { %v2438_v27 = vadd.f32 %v2437_v63, %v2436_v24 }
  0xf2   : > { %v2439_v53 = vpop.f32.mrf.mxu0 }
  0xf3   : > { %v2464_v29 = vpop.f32.mrf.mxu1 }
  0xf4   : > { %v2440_v56 = vpop.f32.mrf.mxu0 }
  0xf5   : > { %v2465_v55 = vpop.f32.mrf.mxu1  ;;  %v2441_v39 = vadd.f32 %v2440_v56, %v2439_v53 }
  0xf6   : > { %v2466_v28 = vadd.f32 %v2465_v55, %v2464_v29 }
  0xf7   : > { %v2467_v52 = vpop.f32.mrf.mxu1 }
  0xf8   : > { %v798_v41 = vadd.f32 %v2466_v28, %v2438_v27 }
  0xf9   : > { %v2468_v58 = vpop.f32.mrf.mxu1 }
  0xfa   : > { %v2442_v7 = vpop.f32.mrf.mxu0  ;;  %v2469_v40 = vadd.f32 %v2468_v58, %v2467_v52 }
  0xfb   : > { %v2470_v31 = vpop.f32.mrf.mxu1 }
  0xfc   : > { %v2443_v57 = vpop.f32.mrf.mxu0  ;;  %v801_v19 = vadd.f32 %v2469_v40, %v2441_v39 }
  0xfd   : > { %v2471_v44 = vpop.f32.mrf.mxu1  ;;  %v2444_v47 = vadd.f32 %v2443_v57, %v2442_v7 }
  0xfe   : > { %v3408_v59 = vpop.f32.mrf.mxu0  ;;  %v2472_v34 = vadd.f32 %v2471_v44, %v2470_v31 }
  0xff   : > { %v3410_v60 = vpop.f32.mrf.mxu1 }
 0x100   : > { %v2446_v51 = vpop.f32.mrf.mxu0  ;;  %v806_v53 = vadd.f32 %v2472_v34, %v2444_v47 }
 0x101   : > { %v2474_v2 = vpop.f32.mrf.mxu1  ;;  %v2447_v58 = vadd.f32 %v2446_v51, %v3408_v59  ;;  %v2415_v51 = vld [vmem:[%s3447_s2] ss:$0 sm:$0xff] }
 0x102   : > { %v2475_v44 = vadd.f32 %v2474_v2, %v3410_v60 }
 0x10e   : > { %v2492_v54 = vpop.f32.mrf.mxu0 }
 0x110   : > { %v2493_v37 = vpop.f32.mrf.mxu0 }
 0x111   : > { %v2494_v35 = vadd.f32 %v2493_v37, %v2492_v54 }
 0x112   : > { %v2495_v61 = vpop.f32.mrf.mxu0 }
 0x113   : > { %v2520_v32 = vpop.f32.mrf.mxu1  ;;  %v1079_v48 = vadd.f32 %v2494_v35, %v798_v41 }
 0x114   : > { %v2496_v0 = vpop.f32.mrf.mxu0 }
 0x115   : > { %v2521_v62 = vpop.f32.mrf.mxu1  ;;  %v2497_v49 = vadd.f32 %v2496_v0, %v2495_v61 }
 0x116   : > { %v2498_v8 = vpop.f32.mrf.mxu0 }
 0x117   : > { %v2523_v1 = vpop.f32.mrf.mxu1  ;;  %v1082_v7 = vadd.f32 %v2497_v49, %v801_v19 }
 0x118   : > { %v2499_v3 = vpop.f32.mrf.mxu0 }
 0x119   : > { %v2524_v42 = vpop.f32.mrf.mxu1  ;;  %v2500_v56 = vadd.f32 %v2499_v3, %v2498_v8 }
 0x11a   : > { %v3414_v5 = vpop.f32.mrf.mxu0  ;;  %v2525_v61 = vadd.f32 %v2524_v42, %v2523_v1 }
 0x11b   : > { %v3412_v4 = vpop.f32.mrf.mxu1 }
 0x11c   : > { %v2502_v9 = vpop.f32.mrf.mxu0  ;;  %v1131_v60 = vadd.f32 %v2525_v61, %v1082_v7 }
 0x11d   : > { %v2527_v6 = vpop.f32.mrf.mxu1  ;;  %v2503_v59 = vadd.f32 %v2502_v9, %v3414_v5 }
 0x11e   : > { %v2528_v8 = vadd.f32 %v2527_v6, %v3412_v4 }
 0x11f   : > { %v3416_v10 = vpop.f32.mrf.mxu1 }
 0x121   : > { %v3418_v12 = vpop.f32.mrf.mxu1 }
 0x122   : > { %3452 = vst [vmem:[#allocation2_spill] sm:$0xff] %v3418_v12  ;;  %v2522_v12 = vadd.f32 %v2521_v62, %v2520_v32 }
 0x12e   : > { %v2548_v11 = vpop.f32.mrf.mxu0 }
 0x130   : > { %v2549_v13 = vpop.f32.mrf.mxu0 }
 0x131   : > { %v2550_v43 = vadd.f32 %v2549_v13, %v2548_v11  ;;  %v1128_v11 = vadd.f32 %v2522_v12, %v1079_v48  ;;  %v809_v12 = vadd.f32 %v2475_v44, %v2447_v58 }
 0x132   : > { %v2551_v15 = vpop.f32.mrf.mxu0 }
 0x133   : > { %v2576_v14 = vpop.f32.mrf.mxu1  ;;  %v1090_v35 = vadd.f32 %v2503_v59, %v809_v12 }
 0x134   : > { %v2552_v17 = vpop.f32.mrf.mxu0 }
 0x135   : > { %v2577_v16 = vpop.f32.mrf.mxu1  ;;  %v2553_v29 = vadd.f32 %v2552_v17, %v2551_v15 }
 0x136   : > { %v2554_v20 = vpop.f32.mrf.mxu0  ;;  %v2578_v45 = vadd.f32 %v2577_v16, %v2576_v14 }
 0x137   : > { %v2579_v18 = vpop.f32.mrf.mxu1 }
 0x138   : > { %v2555_v22 = vpop.f32.mrf.mxu0  ;;  %v1505_v63 = vadd.f32 %v2578_v45, %v2550_v43 }
 0x139   : > { %v2580_v21 = vpop.f32.mrf.mxu1  ;;  %v2556_v0 = vadd.f32 %v2555_v22, %v2554_v20 }
 0x13a   : > { %v2557_v25 = vpop.f32.mrf.mxu0  ;;  %v2581_v55 = vadd.f32 %v2580_v21, %v2579_v18  ;;  %v1519_v13 = vadd.f32 %v1505_v63, %v1128_v11  ;;  %v1087_v18 = vadd.f32 %v2500_v56, %v806_v53 }
 0x13b   : > { %v2582_v23 = vpop.f32.mrf.mxu1 }
 0x13c   : > { %v2558_v30 = vpop.f32.mrf.mxu0  ;;  %v1508_v14 = vadd.f32 %v2581_v55, %v2553_v29  ;;  %v1136_v28 = vadd.f32 %v2528_v8, %v1087_v18 }
 0x13d   : > { %v2583_v26 = vpop.f32.mrf.mxu1  ;;  %v2559_v21 = vadd.f32 %v2558_v30, %v2557_v25 }
 0x13e   : > { %v2584_v32 = vadd.f32 %v2583_v26, %v2582_v23  ;;  %v2416_v23 = vld [vmem:[%s3448_s3] ss:$0 sm:$0xff]  ;;  %v1520_v5 = vadd.f32 %v1508_v14, %v1131_v60 }
 0x13f   : > { %v2585_v33 = vpop.f32.mrf.mxu1 }
 0x140   : > { %v1513_v20 = vadd.f32 %v2584_v32, %v2556_v0 }
 0x141   : > { %v2586_v36 = vpop.f32.mrf.mxu1 }
 0x142   : > { %v2587_v22 = vadd.f32 %v2586_v36, %v2585_v33  ;;  %v1521_v33 = vadd.f32 %v1513_v20, %v1136_v28 }
 0x144   : > { %v1516_v43 = vadd.f32 %v2587_v22, %v2559_v21 }
 0x14e   : > { %v2604_v38 = vpop.f32.mrf.mxu0 }
 0x150   : > { %v2605_v46 = vpop.f32.mrf.mxu0 }
 0x151   : > { %v2606_v54 = vadd.f32 %v2605_v46, %v2604_v38  ;;  %v3453_v38 = vld [vmem:[#allocation2_spill] sm:$0xff] }
 0x152   : > { %v2607_v50 = vpop.f32.mrf.mxu0  ;;  %v2531_v39 = vadd.f32 %v3453_v38, %v3416_v10 }
 0x153   : > { %v2632_v24 = vpop.f32.mrf.mxu1 }
 0x154   : > { %v2608_v37 = vpop.f32.mrf.mxu0  ;;  %v1139_v48 = vadd.f32 %v2531_v39, %v1090_v35 }
 0x155   : > { %v2633_v52 = vpop.f32.mrf.mxu1  ;;  %v2609_v16 = vadd.f32 %v2608_v37, %v2607_v50 }
 0x156   : > { %v2634_v57 = vadd.f32 %v2633_v52, %v2632_v24  ;;  %v2610_v31 = vpop.f32.mrf.mxu0  ;;  %v1522_v63 = vadd.f32 %v1516_v43, %v1139_v48 }
 0x157   : > { %v2635_v62 = vpop.f32.mrf.mxu1 }
 0x158   : > { %v1912_v15 = vadd.f32 %v2634_v57, %v2606_v54  ;;  %v2611_v17 = vpop.f32.mrf.mxu0 }
 0x159   : > { %v2636_v3 = vpop.f32.mrf.mxu1  ;;  %v2612_v26 = vadd.f32 %v2611_v17, %v2610_v31 }
 0x15a   : > { %v1926_v2 = vadd.f32 %v1912_v15, %v1519_v13  ;;  %v2637_v1 = vadd.f32 %v2636_v3, %v2635_v62  ;;  %v2613_v42 = vpop.f32.mrf.mxu0 }
 0x15b   : > { %v2638_v4 = vpop.f32.mrf.mxu1 }
 0x15c   : > { %v1937_v6 = vmul.f32 %v2415_v51, %v1926_v2  ;;  %v1915_v9 = vadd.f32 %v2637_v1, %v2609_v16  ;;  %v2614_v27 = vpop.f32.mrf.mxu0 }
 0x15d   : > { %v2639_v40 = vpop.f32.mrf.mxu1  ;;  %v2615_v46 = vadd.f32 %v2614_v27, %v2613_v42 }
 0x15e   : > { %v1948_v41 = vadd.f32 %v2416_v23, %v1937_v6  ;;  %v1927_v25 = vadd.f32 %v1915_v9, %v1520_v5  ;;  %v2640_v30 = vadd.f32 %v2639_v40, %v2638_v4 }
 0x15f   : > { %v2641_v45 = vpop.f32.mrf.mxu1 }
 0x160   : > { %vm1952_vm3 = vcmp.ge.f32.partialorder %v1948_v41, 0.0  ;;  %v1956_v47 = vmul.f32 0.2, %v1948_v41  ;;  %v1938_v34 = vmul.f32 %v2415_v51, %v1927_v25  ;;  %v1920_v36 = vadd.f32 %v2640_v30, %v2612_v26 }
 0x161   : > { %v2642_v49 = vpop.f32.mrf.mxu1 }
 0x162   : > { %v1960_v10 = vsel %vm1952_vm3, %v1948_v41, %v1956_v47  ;;  %v1949_v50 = vadd.f32 %v2416_v23, %v1938_v34  ;;  %v1928_v19 = vadd.f32 %v1920_v36, %v1521_v33  ;;  %v2643_v24 = vadd.f32 %v2642_v49, %v2641_v45 }
 0x163   : > { %v1964_v29 = vpack.c.bf16 %v1960_v10, %v1960_v10 }
 0x164   : > { %vm1953_vm4 = vcmp.ge.f32.partialorder %v1949_v50, 0.0  ;;  %v1957_v55 = vmul.f32 0.2, %v1949_v50  ;;  %v1939_v54 = vmul.f32 %v2415_v51, %v1928_v19  ;;  %v1923_v37 = vadd.f32 %v2643_v24, %v2615_v46 }
 0x165   : > { %1968 = vst [vmem:[%s219_s30] sm:$0x3] %v1964_v29 }
 0x166   : > { %v1961_v53 = vsel %vm1953_vm4, %v1949_v50, %v1957_v55  ;;  %v1950_v56 = vadd.f32 %v2416_v23, %v1939_v54  ;;  %v1929_v52 = vadd.f32 %v1923_v37, %v1522_v63 }
 0x167   : > { %v1965_v58 = vpack.c.bf16 %v1961_v53, %v1961_v53 }
 0x168   : > { %vm1954_vm5 = vcmp.ge.f32.partialorder %v1950_v56, 0.0  ;;  %v1958_v11 = vmul.f32 0.2, %v1950_v56  ;;  %v1940_v7 = vmul.f32 %v2415_v51, %v1929_v52 }
 0x169   : > { %1969 = vst [vmem:[%s219_s30 + $0x2] sm:$0x3] %v1965_v58 }
 0x16a   : > { %v1962_v57 = vsel %vm1954_vm5, %v1950_v56, %v1958_v11  ;;  %v1951_v31 = vadd.f32 %v2416_v23, %v1940_v7 }
 0x16b   : > { %v1966_v44 = vpack.c.bf16 %v1962_v57, %v1962_v57 }
 0x16c   : > { %vm1955_vm6 = vcmp.ge.f32.partialorder %v1951_v31, 0.0  ;;  %v1959_v61 = vmul.f32 0.2, %v1951_v31 }
 0x16d   : > { %1970 = vst [vmem:[%s219_s30 + $0x4] sm:$0x3] %v1966_v44 }
 0x16e   : > { %v1963_v0 = vsel %vm1955_vm6, %v1951_v31, %v1959_v61 }
 0x16f   : > { %v1967_v32 = vpack.c.bf16 %v1963_v0, %v1963_v0 }
 0x171   : > { %1971 = vst [vmem:[%s219_s30 + $0x6] sm:$0x3] %v1967_v32 }
 0x172 PF: > { %s14_s17 = sadd.s32 1, %s2819_s17   ;;  %s3454_s15 = smov %s2815_s16 }
 0x173   : > { %p11_p5 = scmp.ge.s32.totalorder %s14_s17, 4   ;;  %s3455_s16 = smov %s3457_s18 }
 0x175   :  { %13 = sbr.rel (!%p11_p5) target bundleno = 2 (0x2), region = 70 }

// kernel: forward.8
= control target key start
LH: loop header
LB: loop body
LE: loop exit
PB: predicated region body
PF: predicated region fallthrough
CT: control target
= control target key end

     0   :  { %s3599_s15 = smov 0   ;;  %s3601_s16 = smov 0   ;;  %s4310_s0 = inlined_call_operand.vmem [shape: bf16[2,6,11,128], index: 0, kind: input, shape index: {}]   ;;  %s4311_s1 = inlined_call_operand.vmem [shape: bf16[16,128,128], index: 1, kind: input, shape index: {}]   ;;  %s4312_s2 = inlined_call_operand.vmem [shape: f32[1,128], index: 2, kind: input, shape index: {}]   ;;  %s4313_s3 = inlined_call_operand.vmem [shape: f32[1,128], index: 3, kind: input, shape index: {}]   ;;  %s4314_s4 = inlined_call_operand.vmem [shape: bf16[2,3,3,128], index: 4, kind: output, shape index: {}]  }
   0x1   :  { %s3603_s17 = smov 0  }
   0x2 LB: > { %s26_s18 = sadd.s32 1, %s3568_s16  ;;  %p2495_p0 = scmp.ge.s32.totalorder %s3572_s17, 1  ;;  %s3572_s17 = sphi %s3603_s17, %s14_s17   ;;  %s3568_s16 = sphi %s3601_s16, %s4324_s16   ;;  %s3564_s15 = sphi %s3599_s15, %s4323_s15  }
   0x3   : > { %p28_p1 = scmp.ge.s32.totalorder %s26_s18, 2  ;;  %p176_p2 = scmp.lt.s32.totalorder %s3572_s17, 3 }
   0x5   : > { %s4326_s18 = smov (%p28_p1, %s26_s18), 0  ;;  %p177_p3 = pnand %p2495_p0, %p176_p2 }
   0x6   : > { %p206_p4 = scmp.lt.s32.totalorder (!%p177_p3), %s3564_s15, 1 }
   0x7   : > { %180 = sbr.rel (%p177_p3) target bundleno = 483 (0x1e3), region = 36 }
   0xc   : > { %v3414_v0 = vld [vmem:[%s4311_s1 + $0x78] sm:$0xff]   ;;  %v3416_v2 = vld [vmem:[%s4311_s1 + $0x70] sm:$0xff]   ;;  %v3418_v4 = vld [vmem:[%s4311_s1 + $0x68] sm:$0xff]   ;;  %s4328_s15 = smov (!%p206_p4, %s3564_s15), 1  ;;  %vm254_vm0 = vsmask.f32 3328 }
   0xd   : > { %v3415_v1 = vld [vmem:[%s4311_s1 + $0x38] sm:$0xff]   ;;  %3068 = vmatprep.subr.bf16.mxu0 %v3414_v0  ;;  %v3417_v3 = vld [vmem:[%s4311_s1 + $0x30] sm:$0xff]   ;;  %v3419_v5 = vld [vmem:[%s4311_s1 + $0x28] sm:$0xff]   ;;  %s3388_s9 = smul.u32 48, %s4328_s15  ;;  %vm255_vm1 = vsmask.f32 7440 }
   0xe   : > { %3088 = vmatprep.subr.bf16.mxu1 %v3415_v1  ;;  %3069 = vmatpush3.bf16.msra.mxu0 %v3414_v0  ;;  %v3420_v6 = vld [vmem:[%s4311_s1 + $0x60] sm:$0xff]   ;;  %v3422_v8 = vld [vmem:[%s4311_s1 + $0x58] sm:$0xff]   ;;  %v3424_v10 = vld [vmem:[%s4311_s1 + $0x50] sm:$0xff]   ;;  %vm528_vm3 = vcmask 1042432   ;;  %vm529_vm4 = vcmask 1046532   ;;  %s3389_s26 = smul.u32 6, %s4328_s15 }
   0xf   : > { %3089 = vmatpush3.bf16.msra.mxu1 %v3415_v1  ;;  %3070 = vmatprep.subr.bf16.mxu0 %v3416_v2  ;;  %v3421_v7 = vld [vmem:[%s4311_s1 + $0x20] sm:$0xff]   ;;  %v3423_v9 = vld [vmem:[%s4311_s1 + $0x18] sm:$0xff]   ;;  %s3653_s20 = scalar_lea.vmem %s4310_s0, %s3388_s9  ;;  %v3425_v11 = vld [vmem:[%s4311_s1 + $0x10] sm:$0xff]   ;;  %vm666_vm6 = vsmask.f32 2304  ;;  %vm2396_vm9 = vcmask 1041408  }
  0x10   : > { %3090 = vmatprep.subr.bf16.mxu1 %v3417_v3  ;;  %v3662_v12 = vld [vmem:[%s3653_s20] sm:$0xf]  ;;  %v3665_v13 = vld [vmem:[%s3653_s20 + $0x4] sm:$0x3]  ;;  %v3668_v14 = vld [vmem:[%s3653_s20 + $0x8] sm:$0xf]  ;;  %s219_s5 = scalar_lea.vmem %s4314_s4, %s3389_s26 }
  0x11   : > { %v3671_v15 = vld [vmem:[%s3653_s20 + $0xc] sm:$0x3]  ;;  %v3674_v16 = vld [vmem:[%s3653_s20 + $0x10] sm:$0xf]  ;;  %v3677_v17 = vld [vmem:[%s3653_s20 + $0x14] sm:$0x3]  ;;  %v2524_v18 = vcombine.low %v3662_v12, %v3668_v14 }
  0x12   : > { %3071 = vmatpush3.bf16.msra.mxu0 %v3416_v2  ;;  %v3426_v19 = vld [vmem:[%s4311_s1 + $0x48] sm:$0xff]   ;;  %v258_v20 = vshrl.u32 %v3662_v12, 16  ;;  %v261_v21 = vshll.u32 %v3662_v12, 16  ;;  %v267_v22 = vshll.u32 %v3665_v13, 16  ;;  %v272_v23 = vshrl.u32 %v3668_v14, 16  ;;  %vm3710_vm2 = vmor %vm254_vm0, %vm255_vm1  ;;  %v3428_v41 = vld [vmem:[%s4311_s1 + $0x40] sm:$0xff]  }
  0x13   : > { %3091 = vmatpush3.bf16.msra.mxu1 %v3417_v3  ;;  %3072 = vmatprep.subr.bf16.mxu0 %v3418_v4  ;;  %v275_v24 = vshll.u32 %v3668_v14, 16  ;;  %v281_v25 = vshll.u32 %v3671_v15, 16  ;;  %v286_v28 = vshrl.u32 %v3674_v16, 16  ;;  %v289_v29 = vshll.u32 %v3674_v16, 16  ;;  %v3427_v30 = vld [vmem:[%s4311_s1 + $0x8] sm:$0xff]   ;;  %v3429_v45 = vld [vmem:[%s4311_s1] sm:$0xff]   ;;  %vm3744_vm5 = vmor %vm528_vm3, %vm529_vm4 }
  0x14   : > { %3092 = vmatprep.subr.bf16.mxu1 %v3419_v5  ;;  %3104 = vmatprep.mubr.bf16.mxu1 %v2524_v18  ;;  %v260_v26 = vrot.slane %v258_v20, 4  ;;  %v263_v27 = vrot.slane %v261_v21, 5  ;;  %v269_v31 = vrot.slane %v267_v22, 5  ;;  %v274_v32 = vrot.slane %v272_v23, 4  ;;  %v3432_v49 = vld [vmem:[%s4311_s1 + $0xb8] sm:$0xff]   ;;  %v3434_v59 = vld [vmem:[%s4311_s1 + $0xb0] sm:$0xff]  }
  0x15   : > { %v277_v33 = vrot.slane %v275_v24, 5  ;;  %v288_v35 = vrot.slane %v286_v28, 4  ;;  %v291_v36 = vrot.slane %v289_v29, 5  ;;  %v295_v37 = vshll.u32 %v3677_v17, 16  ;;  %v3433_v51 = vld [vmem:[%s4311_s1 + $0xf8] sm:$0xff]   ;;  %v3435_v61 = vld [vmem:[%s4311_s1 + $0xf0] sm:$0xff]  }
  0x16   : > { %3073 = vmatpush3.bf16.msra.mxu0 %v3418_v4  ;;  %v264_v34 = vor.u32 %v263_v27, %v260_v26  ;;  %v283_v40 = vrot.slane %v281_v25, 5  ;;  %v2534_v56 = vrot.slane %v3662_v12, 9  ;;  %v2525_v57 = vcombine.low %v3674_v16, %v3674_v16  ;;  %v3436_v4 = vld [vmem:[%s4311_s1 + $0xa8] sm:$0xff]   ;;  %v3440_v27 = vld [vmem:[%s4311_s1 + $0x98] sm:$0xff]   ;;  %v3536_v38 = vld [vmem:[%s4311_s1 + $0x3b0] sm:$0xff]  }
  0x17   : > { %3093 = vmatpush3.bf16.msra.mxu1 %v3419_v5  ;;  %3074 = vmatprep.subr.bf16.mxu0 %v3420_v6  ;;  %v278_v39 = vor.u32 %v277_v33, %v274_v32  ;;  %v292_v43 = vor.u32 %v291_v36, %v288_v35  ;;  %v297_v44 = vrot.slane %v295_v37, 5  ;;  %v533_v58 = vrot.slane %v3665_v13, 5  ;;  %v3442_v36 = vld [vmem:[%s4311_s1 + $0x90] sm:$0xff]  }
  0x18   : > { %3094 = vmatprep.subr.bf16.mxu1 %v3421_v7  ;;  %v265_v42 = vrot.slane %v264_v34, 4  ;;  %v2535_v60 = vrot.slane %v3668_v14, 9  ;;  %v537_v63 = vrot.slane %v3671_v15, 5  ;;  %v669_v0 = vrot.slane %v258_v20, 5 }
  0x19   : > { %v279_v46 = vrot.slane %v278_v39, 4  ;;  %v293_v48 = vrot.slane %v292_v43, 4  ;;  %v534_v62 = vsel %vm3744_vm5, %v2534_v56, %v533_v58  ;;  %v676_v1 = vrot.slane %v267_v22, 6  ;;  %v3443_v39 = vld [vmem:[%s4311_s1 + $0xd0] sm:$0xff]  }
  0x1a   : > { %3075 = vmatpush3.bf16.msra.mxu0 %v3420_v6  ;;  %v270_v47 = vsel %vm3710_vm2, %v265_v42, %v269_v31  ;;  %v3766_v2 = vsel %vm3744_vm5, %v2535_v60, %v537_v63  ;;  %v670_v3 = vrot.slane %v261_v21, 6  ;;  %v673_v6 = vshrl.u32 %v3665_v13, 16  ;;  %v3438_v13 = vld [vmem:[%s4311_s1 + $0xa0] sm:$0xff]   ;;  %v3445_v42 = vld [vmem:[%s4311_s1 + $0xc8] sm:$0xff]   ;;  %v3450_v56 = vld [vmem:[%s4311_s1 + $0x130] sm:$0xff]  }
  0x1b   : > { %3095 = vmatpush3.bf16.msra.mxu1 %v3421_v7  ;;  %3076 = vmatprep.subr.bf16.mxu0 %v3422_v8  ;;  %v3731_v50 = vsel %vm3710_vm2, %v279_v46, %v283_v40  ;;  %v3738_v52 = vsel %vm3710_vm2, %v293_v48, %v297_v44  ;;  %v2553_v5 = vcombine.low %v534_v62, %v3766_v2  ;;  %v3437_v7 = vld [vmem:[%s4311_s1 + $0xe8] sm:$0xff]   ;;  %vm667_vm7 = vsmask.f32 6416  ;;  %v3876_v62 = vld [vmem:[%s3653_s20 + $0x18] sm:$0xf] }
  0x1c   : > { %3096 = vmatprep.subr.bf16.mxu1 %v3423_v9  ;;  %v2514_v53 = vcombine.low %v270_v47, %v3731_v50  ;;  %v2515_v54 = vcombine.low %v3738_v52, %v3738_v52  ;;  %v686_v12 = vrot.slane %v281_v25, 6  ;;  %vm3788_vm8 = vmor %vm666_vm6, %vm667_vm7  ;;  %v689_v33 = vrot.slane %v286_v28, 5  ;;  %v3444_v40 = vld [vmem:[%s4311_s1 + $0x88] sm:$0xff]   ;;  %v3447_v47 = vld [vmem:[%s4311_s1 + $0xc0] sm:$0xff]  }
  0x1d   : > { %v690_v34 = vrot.slane %v289_v29, 6  ;;  %v693_v35 = vshrl.u32 %v3677_v17, 16  ;;  %v696_v28 = vrot.slane %v295_v37, 6  ;;  %v2536_v43 = vrot.slane %v3674_v16, 9  ;;  %v3446_v37 = vld [vmem:[%s4311_s1 + $0x80] sm:$0xff]   ;;  %v3452_v60 = vld [vmem:[%s4311_s1 + $0x128] sm:$0xff]  }
  0x1e   : > { %3077 = vmatpush3.bf16.msra.mxu0 %v3422_v8  ;;  %3084 = vmatprep.mubr.bf16.mxu0 %v2514_v53  ;;  %v671_v8 = vor.u32 %v670_v3, %v669_v0  ;;  %v541_v44 = vrot.slane %v3677_v17, 5  ;;  %v3448_v17 = vld [vmem:[%s4311_s1 + $0x138] sm:$0xff]   ;;  %v2605_v58 = vcombine.low %v3668_v14, %v3674_v16  ;;  %v3454_v14 = vld [vmem:[%s4311_s1 + $0x120] sm:$0xff]   ;;  %v945_v0 = vshrl.u32 %v3876_v62, 16 }
  0x1f   : > { %3097 = vmatpush3.bf16.msra.mxu1 %v3423_v9  ;;  %3078 = vmatprep.subr.bf16.mxu0 %v3424_v10  ;;  %v679_v9 = vrot.slane %v272_v23, 5  ;;  %v3439_v23 = vld [vmem:[%s4311_s1 + $0xe0] sm:$0xff]   ;;  %v695_v29 = vrot.slane %v693_v35, 5  ;;  %v3456_v63 = vld [vmem:[%s4311_s1 + $0x118] sm:$0xff]   ;;  %vm2397_vm10 = vsmask.f32 1280 }
  0x20   : > { %3098 = vmatprep.subr.bf16.mxu1 %v3425_v11  ;;  %v672_v18 = vrot.slane %v671_v8, 4  ;;  %v3837_v48 = vsel %vm3744_vm5, %v2536_v43, %v541_v44  ;;  %v3457_v3 = vld [vmem:[%s4311_s1 + $0x158] sm:$0xff]   ;;  %v3478_v43 = vld [vmem:[%s4311_s1 + $0x188] sm:$0xff]   ;;  %vm4291_vm12 = vmand %vm2396_vm9, %vm2397_vm10 }
  0x21   : > { %v697_v46 = vor.u32 %v696_v28, %v695_v29  ;;  %v2554_v53 = vcombine.low %v3837_v48, %v3837_v48  ;;  %v3897_v8 = vld [vmem:[%s3653_s20 + $0x1c] sm:$0x3]  ;;  %v3476_v29 = vld [vmem:[%s4311_s1 + $0x190] sm:$0xff]  }
  0x22   : > { %3079 = vmatpush3.bf16.msra.mxu0 %v3424_v10  ;;  %v675_v10 = vrot.slane %v673_v6, 5  ;;  %v947_v6 = vrot.slane %v945_v0, 4  ;;  %v3474_v35 = vld [vmem:[%s4311_s1 + $0x198] sm:$0xff]  }
  0x23   : > { %3099 = vmatpush3.bf16.msra.mxu1 %v3425_v11  ;;  %3080 = vmatprep.subr.bf16.mxu0 %v3426_v19  ;;  %v680_v11 = vrot.slane %v275_v24, 6 }
  0x24   : > { %3100 = vmatprep.subr.bf16.mxu1 %v3427_v30  ;;  %v677_v21 = vor.u32 %v676_v1, %v675_v10  ;;  %v948_v1 = vshll.u32 %v3876_v62, 16 }
  0x25   : > { %v681_v22 = vor.u32 %v680_v11, %v679_v9  ;;  %v3460_v9 = vld [vmem:[%s4311_s1 + $0x108] sm:$0xff]   ;;  %v954_v11 = vshll.u32 %v3897_v8, 16 }
  0x26   : > { %3081 = vmatpush3.bf16.msra.mxu0 %v3426_v19  ;;  %v683_v19 = vshrl.u32 %v3671_v15, 16  ;;  %v678_v26 = vsel %vm3788_vm8, %v672_v18, %v677_v21  ;;  %v3463_v21 = vld [vmem:[%s4311_s1 + $0x140] sm:$0xff]   ;;  %v1206_v28 = vrot.slane %v948_v1, 6 }
  0x27   : > { %3101 = vmatpush3.bf16.msra.mxu1 %v3427_v30  ;;  %3082 = vmatprep.subr.bf16.mxu0 %v3428_v41  ;;  %v682_v25 = vrot.slane %v681_v22, 4  ;;  %v3441_v30 = vld [vmem:[%s4311_s1 + $0xd8] sm:$0xff]  }
  0x28   : > { %3102 = vmatprep.subr.bf16.mxu1 %v3429_v45  ;;  %v685_v24 = vrot.slane %v683_v19, 5  ;;  %v956_v19 = vrot.slane %v954_v11, 5  ;;  %v3466_v22 = vld [vmem:[%s4311_s1 + $0x1b8] sm:$0xff]  }
  0x2a   : > { %3083 = vmatpush3.bf16.msra.mxu0 %v3428_v41  ;;  %v687_v15 = vor.u32 %v686_v12, %v685_v24  ;;  %v691_v41 = vor.u32 %v690_v34, %v689_v33  ;;  %v3461_v12 = vld [vmem:[%s4311_s1 + $0x148] sm:$0xff]   ;;  %v3467_v24 = vld [vmem:[%s4311_s1 + $0x1f8] sm:$0xff]  }
  0x2b   : > { %3103 = vmatpush3.bf16.msra.mxu1 %v3429_v45  ;;  %3108 = vmatprep.subr.bf16.mxu0 %v3432_v49  ;;  %v3470_v33 = vld [vmem:[%s4311_s1 + $0x1a8] sm:$0xff]  }
  0x2c   : > { %3128 = vmatprep.subr.bf16.mxu1 %v3433_v51  ;;  %v3805_v31 = vsel %vm3788_vm8, %v682_v25, %v687_v15  ;;  %v692_v45 = vrot.slane %v691_v41, 4  ;;  %v2606_v25 = vcombine.low %v3876_v62, %v3876_v62  ;;  %v3468_v15 = vld [vmem:[%s4311_s1 + $0x1b0] sm:$0xff]   ;;  %v3471_v34 = vld [vmem:[%s4311_s1 + $0x1e8] sm:$0xff]  }
  0x2d   : > { %3085 = vmatmul.mubr.bf16.vlgmr.msra.gmra.mxu0 %v2515_v54  ;;  %v2579_v32 = vcombine.low %v678_v26, %v3805_v31  ;;  %v3477_v41 = vld [vmem:[%s4311_s1 + $0x1d0] sm:$0xff]  }
  0x2e   : > { %3105 = vmatmul.mubr.bf16.vlgmr.msra.gmra.mxu1 %v2525_v57  ;;  %3109 = vmatpush3.bf16.msra.mxu0 %v3432_v49  ;;  %v3844_v49 = vsel %vm3788_vm8, %v692_v45, %v697_v46  ;;  %v3451_v57 = vld [vmem:[%s4311_s1 + $0x170] sm:$0xff]   ;;  %v3479_v45 = vld [vmem:[%s4311_s1 + $0x1c8] sm:$0xff]   ;;  %v2641_v46 = vrot.slane %v3876_v62, 9 }
  0x2f   : > { %3129 = vmatpush3.bf16.msra.mxu1 %v3433_v51  ;;  %3110 = vmatprep.subr.bf16.mxu0 %v3434_v59  ;;  %v3449_v51 = vld [vmem:[%s4311_s1 + $0x178] sm:$0xff]   ;;  %v2580_v54 = vcombine.low %v3844_v49, %v3844_v49 }
  0x30   : > { %3130 = vmatprep.subr.bf16.mxu1 %v3435_v61  ;;  %3124 = vmatprep.mubr.bf16.mxu0 %v2553_v5  ;;  %v3459_v5 = vld [vmem:[%s4311_s1 + $0x150] sm:$0xff]  }
  0x31   : > { %3144 = vmatprep.mubr.bf16.mxu1 %v2579_v32  ;;  %v2684_v32 = vcombine.low %v3805_v31, %v3844_v49  ;;  %v3473_v31 = vld [vmem:[%s4311_s1 + $0x1e0] sm:$0xff]  }
  0x32   : > { %3111 = vmatpush3.bf16.msra.mxu0 %v3434_v59  ;;  %v2631_v59 = vcombine.low %v3731_v50, %v3738_v52  ;;  %v3455_v50 = vld [vmem:[%s4311_s1 + $0x160] sm:$0xff]  }
  0x33   : > { %3131 = vmatpush3.bf16.msra.mxu1 %v3435_v61  ;;  %3112 = vmatprep.subr.bf16.mxu0 %v3436_v4  ;;  %v3453_v61 = vld [vmem:[%s4311_s1 + $0x168] sm:$0xff]  }
  0x34   : > { %3132 = vmatprep.subr.bf16.mxu1 %v3437_v7 }
  0x36   : > { %3113 = vmatpush3.bf16.msra.mxu0 %v3436_v4  ;;  %v3458_v4 = vld [vmem:[%s4311_s1 + $0x110] sm:$0xff]  }
  0x37   : > { %3133 = vmatpush3.bf16.msra.mxu1 %v3437_v7  ;;  %3114 = vmatprep.subr.bf16.mxu0 %v3438_v13  ;;  %v950_v7 = vrot.slane %v948_v1, 5  ;;  %v3486_v1 = vld [vmem:[%s4311_s1 + $0x228] sm:$0xff]  }
  0x38   : > { %3134 = vmatprep.subr.bf16.mxu1 %v3439_v23 }
  0x39   : > { %v951_v10 = vor.u32 %v950_v7, %v947_v6 }
  0x3a   : > { %3115 = vmatpush3.bf16.msra.mxu0 %v3438_v13  ;;  %v3462_v13 = vld [vmem:[%s4311_s1 + $0x100] sm:$0xff]  }
  0x3b   : > { %3135 = vmatpush3.bf16.msra.mxu1 %v3439_v23  ;;  %3116 = vmatprep.subr.bf16.mxu0 %v3440_v27  ;;  %v952_v18 = vrot.slane %v951_v10, 4 }
  0x3c   : > { %3136 = vmatprep.subr.bf16.mxu1 %v3441_v30 }
  0x3d   : > { %v3917_v23 = vsel %vm3710_vm2, %v952_v18, %v956_v19  ;;  %v3494_v18 = vld [vmem:[%s4311_s1 + $0x208] sm:$0xff]  }
  0x3e   : > { %3117 = vmatpush3.bf16.msra.mxu0 %v3440_v27  ;;  %v2632_v26 = vcombine.low %v3917_v23, %v3917_v23  ;;  %v3469_v27 = vld [vmem:[%s4311_s1 + $0x1f0] sm:$0xff]  }
  0x3f   : > { %3137 = vmatpush3.bf16.msra.mxu1 %v3441_v30  ;;  %3118 = vmatprep.subr.bf16.mxu0 %v3442_v36  ;;  %v2658_v30 = vcombine.low %v3766_v2, %v3837_v48  ;;  %v3472_v2 = vld [vmem:[%s4311_s1 + $0x1a0] sm:$0xff]  }
  0x40   : > { %3138 = vmatprep.subr.bf16.mxu1 %v3443_v39 }
  0x42   : > { %3119 = vmatpush3.bf16.msra.mxu0 %v3442_v36  ;;  %v3475_v36 = vld [vmem:[%s4311_s1 + $0x1d8] sm:$0xff]  }
  0x43   : > { %3139 = vmatpush3.bf16.msra.mxu1 %v3443_v39  ;;  %3120 = vmatprep.subr.bf16.mxu0 %v3444_v40  ;;  %v1205_v39 = vrot.slane %v945_v0, 5  ;;  %v2736_v0 = vcombine.low %v3738_v52, %v3917_v23  ;;  %v3489_v52 = vld [vmem:[%s4311_s1 + $0x260] sm:$0xff]  }
  0x44   : > { %3140 = vmatprep.subr.bf16.mxu1 %v3445_v42 }
  0x45   : > { %v1207_v44 = vor.u32 %v1206_v28, %v1205_v39  ;;  %v3504_v39 = vld [vmem:[%s4311_s1 + $0x2a8] sm:$0xff]  }
  0x46   : > { %3121 = vmatpush3.bf16.msra.mxu0 %v3444_v40  ;;  %v1209_v40 = vshrl.u32 %v3897_v8, 16  ;;  %v3505_v28 = vld [vmem:[%s4311_s1 + $0x2e8] sm:$0xff]  }
  0x47   : > { %3141 = vmatpush3.bf16.msra.mxu1 %v3445_v42  ;;  %3122 = vmatprep.subr.bf16.mxu0 %v3446_v37  ;;  %v1212_v42 = vrot.slane %v954_v11, 6 }
  0x48   : > { %3142 = vmatprep.subr.bf16.mxu1 %v3447_v47 }
  0x4a   : > { %3123 = vmatpush3.bf16.msra.mxu0 %v3446_v37  ;;  %v1211_v37 = vrot.slane %v1209_v40, 5  ;;  %v3509_v40 = vld [vmem:[%s4311_s1 + $0x2d8] sm:$0xff]  }
  0x4b   : > { %3143 = vmatpush3.bf16.msra.mxu1 %v3447_v47  ;;  %3148 = vmatprep.subr.bf16.mxu0 %v3448_v17  ;;  %v1082_v47 = vrot.slane %v3897_v8, 5  ;;  %v3491_v8 = vld [vmem:[%s4311_s1 + $0x258] sm:$0xff]  }
  0x4c   : > { %3168 = vmatprep.subr.bf16.mxu1 %v3449_v51 }
  0x4d   : > { %3125 = vmatmul.mubr.bf16.vlgmr.msra.gmra.mxu0 %v2554_v53  ;;  %v1213_v53 = vor.u32 %v1212_v42, %v1211_v37  ;;  %v3511_v37 = vld [vmem:[%s4311_s1 + $0x2d0] sm:$0xff]  }
  0x4e   : > { %3145 = vmatmul.mubr.bf16.vlgmr.msra.gmra.mxu1 %v2580_v54  ;;  %3149 = vmatpush3.bf16.msra.mxu0 %v3448_v17  ;;  %v3480_v17 = vld [vmem:[%s4311_s1 + $0x180] sm:$0xff]  }
  0x4f   : > { %3169 = vmatpush3.bf16.msra.mxu1 %v3449_v51  ;;  %3150 = vmatprep.subr.bf16.mxu0 %v3450_v56  ;;  %v1208_v51 = vrot.slane %v1207_v44, 4  ;;  %v3481_v54 = vld [vmem:[%s4311_s1 + $0x1c0] sm:$0xff]  }
  0x50   : > { %3170 = vmatprep.subr.bf16.mxu1 %v3451_v57  ;;  %3164 = vmatprep.mubr.bf16.mxu0 %v2605_v58  ;;  %v3482_v58 = vld [vmem:[%s4311_s1 + $0x238] sm:$0xff]  }
  0x51   : > { %3184 = vmatprep.mubr.bf16.mxu1 %v2631_v59  ;;  %v3483_v59 = vld [vmem:[%s4311_s1 + $0x278] sm:$0xff]  }
  0x52   : > { %3151 = vmatpush3.bf16.msra.mxu0 %v3450_v56  ;;  %v3981_v56 = vsel %vm3744_vm5, %v2641_v46, %v1082_v47 }
  0x53   : > { %3171 = vmatpush3.bf16.msra.mxu1 %v3451_v57  ;;  %3152 = vmatprep.subr.bf16.mxu0 %v3452_v60  ;;  %v3985_v57 = vsel %vm3788_vm8, %v1208_v51, %v1213_v53  ;;  %v3513_v51 = vld [vmem:[%s4311_s1 + $0x2c8] sm:$0xff]  }
  0x54   : > { %3172 = vmatprep.subr.bf16.mxu1 %v3453_v61 }
  0x56   : > { %3153 = vmatpush3.bf16.msra.mxu0 %v3452_v60  ;;  %v2659_v60 = vcombine.low %v3981_v56, %v3981_v56 }
  0x57   : > { %3173 = vmatpush3.bf16.msra.mxu1 %v3453_v61  ;;  %3154 = vmatprep.subr.bf16.mxu0 %v3454_v14  ;;  %v2685_v61 = vcombine.low %v3985_v57, %v3985_v57 }
  0x58   : > { %3174 = vmatprep.subr.bf16.mxu1 %v3455_v50 }
  0x5a   : > { %3155 = vmatpush3.bf16.msra.mxu0 %v3454_v14  ;;  %v3484_v14 = vld [vmem:[%s4311_s1 + $0x230] sm:$0xff]  }
  0x5b   : > { %3175 = vmatpush3.bf16.msra.mxu1 %v3455_v50  ;;  %3156 = vmatprep.subr.bf16.mxu0 %v3456_v63  ;;  %v3485_v50 = vld [vmem:[%s4311_s1 + $0x270] sm:$0xff]  }
  0x5c   : > { %3176 = vmatprep.subr.bf16.mxu1 %v3457_v3 }
  0x5e   : > { %3157 = vmatpush3.bf16.msra.mxu0 %v3456_v63  ;;  %v2710_v63 = vcombine.low %v3674_v16, %v3876_v62  ;;  %v3488_v16 = vld [vmem:[%s4311_s1 + $0x220] sm:$0xff]  }
  0x5f   : > { %3177 = vmatpush3.bf16.msra.mxu1 %v3457_v3  ;;  %3158 = vmatprep.subr.bf16.mxu0 %v3458_v4  ;;  %v3487_v3 = vld [vmem:[%s4311_s1 + $0x268] sm:$0xff]  }
  0x60   : > { %3178 = vmatprep.subr.bf16.mxu1 %v3459_v5 }
  0x62   : > { %3159 = vmatpush3.bf16.msra.mxu0 %v3458_v4  ;;  %v4020_v4 = vld [vmem:[%s3653_s20 + $0x20] sm:$0xf] }
  0x63   : > { %3179 = vmatpush3.bf16.msra.mxu1 %v3459_v5  ;;  %3160 = vmatprep.subr.bf16.mxu0 %v3460_v9  ;;  %v3490_v5 = vld [vmem:[%s4311_s1 + $0x218] sm:$0xff]   ;;  %v1459_v6 = vshrl.u32 %v4020_v4, 16  ;;  %v1462_v7 = vshll.u32 %v4020_v4, 16  ;;  %v2746_v53 = vrot.slane %v4020_v4, 9 }
  0x64   : > { %3180 = vmatprep.subr.bf16.mxu1 %v3461_v12 }
  0x65   : > { %v1461_v10 = vrot.slane %v1459_v6, 4  ;;  %v1464_v11 = vrot.slane %v1462_v7, 5  ;;  %v1719_v42 = vrot.slane %v1459_v6, 5 }
  0x66   : > { %3161 = vmatpush3.bf16.msra.mxu0 %v3460_v9  ;;  %v3492_v9 = vld [vmem:[%s4311_s1 + $0x210] sm:$0xff]  }
  0x67   : > { %3181 = vmatpush3.bf16.msra.mxu1 %v3461_v12  ;;  %3162 = vmatprep.subr.bf16.mxu0 %v3462_v13  ;;  %v3493_v12 = vld [vmem:[%s4311_s1 + $0x250] sm:$0xff]   ;;  %v1465_v19 = vor.u32 %v1464_v11, %v1461_v10 }
  0x68   : > { %3182 = vmatprep.subr.bf16.mxu1 %v3463_v21 }
  0x6a   : > { %3163 = vmatpush3.bf16.msra.mxu0 %v3462_v13  ;;  %v4041_v13 = vld [vmem:[%s3653_s20 + $0x24] sm:$0x3] }
  0x6b   : > { %3183 = vmatpush3.bf16.msra.mxu1 %v3463_v21  ;;  %3188 = vmatprep.subr.bf16.mxu0 %v3466_v22  ;;  %v1468_v21 = vshll.u32 %v4041_v13, 16  ;;  %v1723_v44 = vshrl.u32 %v4041_v13, 16 }
  0x6c   : > { %3208 = vmatprep.subr.bf16.mxu1 %v3467_v24 }
  0x6d   : > { %3165 = vmatmul.mubr.bf16.vlgmr.msra.gmra.mxu0 %v2606_v25  ;;  %v1466_v25 = vrot.slane %v1465_v19, 4  ;;  %v1725_v47 = vrot.slane %v1723_v44, 5 }
  0x6e   : > { %3185 = vmatmul.mubr.bf16.vlgmr.msra.gmra.mxu1 %v2632_v26  ;;  %3189 = vmatpush3.bf16.msra.mxu0 %v3466_v22  ;;  %v3495_v22 = vld [vmem:[%s4311_s1 + $0x248] sm:$0xff]   ;;  %v1470_v26 = vrot.slane %v1468_v21, 5 }
  0x6f   : > { %3209 = vmatpush3.bf16.msra.mxu1 %v3467_v24  ;;  %3190 = vmatprep.subr.bf16.mxu0 %v3468_v15  ;;  %v3496_v24 = vld [vmem:[%s4311_s1 + $0x200] sm:$0xff]  }
  0x70   : > { %3210 = vmatprep.subr.bf16.mxu1 %v3469_v27  ;;  %3204 = vmatprep.mubr.bf16.mxu0 %v2658_v30  ;;  %v3500_v30 = vld [vmem:[%s4311_s1 + $0x2b8] sm:$0xff]  }
  0x71   : > { %3224 = vmatprep.mubr.bf16.mxu1 %v2684_v32  ;;  %v3501_v32 = vld [vmem:[%s4311_s1 + $0x2f8] sm:$0xff]  }
  0x72   : > { %3191 = vmatpush3.bf16.msra.mxu0 %v3468_v15  ;;  %v3497_v15 = vld [vmem:[%s4311_s1 + $0x240] sm:$0xff]  }
  0x73   : > { %3211 = vmatpush3.bf16.msra.mxu1 %v3469_v27  ;;  %3192 = vmatprep.subr.bf16.mxu0 %v3470_v33  ;;  %v4060_v27 = vsel %vm3710_vm2, %v1466_v25, %v1470_v26 }
  0x74   : > { %3212 = vmatprep.subr.bf16.mxu1 %v3471_v34  ;;  %v2841_v6 = vcombine.low %v3917_v23, %v4060_v27  ;;  %v3523_v23 = vld [vmem:[%s4311_s1 + $0x360] sm:$0xff]  }
  0x76   : > { %3193 = vmatpush3.bf16.msra.mxu0 %v3470_v33  ;;  %v2711_v33 = vcombine.low %v4020_v4, %v4020_v4 }
  0x77   : > { %3213 = vmatpush3.bf16.msra.mxu1 %v3471_v34  ;;  %3194 = vmatprep.subr.bf16.mxu0 %v3472_v2  ;;  %v2737_v34 = vcombine.low %v4060_v27, %v4060_v27  ;;  %v3530_v27 = vld [vmem:[%s4311_s1 + $0x300] sm:$0xff]  }
  0x78   : > { %3214 = vmatprep.subr.bf16.mxu1 %v3473_v31 }
  0x7a   : > { %3195 = vmatpush3.bf16.msra.mxu0 %v3472_v2  ;;  %v3502_v2 = vld [vmem:[%s4311_s1 + $0x2b0] sm:$0xff]  }
  0x7b   : > { %3215 = vmatpush3.bf16.msra.mxu1 %v3473_v31  ;;  %3196 = vmatprep.subr.bf16.mxu0 %v3474_v35  ;;  %v3503_v31 = vld [vmem:[%s4311_s1 + $0x2f0] sm:$0xff]  }
  0x7c   : > { %3216 = vmatprep.subr.bf16.mxu1 %v3475_v36 }
  0x7e   : > { %3197 = vmatpush3.bf16.msra.mxu0 %v3474_v35  ;;  %v2763_v35 = vcombine.low %v3837_v48, %v3981_v56  ;;  %v3506_v48 = vld [vmem:[%s4311_s1 + $0x2a0] sm:$0xff]  }
  0x7f   : > { %3217 = vmatpush3.bf16.msra.mxu1 %v3475_v36  ;;  %3198 = vmatprep.subr.bf16.mxu0 %v3476_v29  ;;  %v2789_v36 = vcombine.low %v3844_v49, %v3985_v57  ;;  %v3507_v49 = vld [vmem:[%s4311_s1 + $0x2e0] sm:$0xff]  }
  0x80   : > { %3218 = vmatprep.subr.bf16.mxu1 %v3477_v41 }
  0x82   : > { %3199 = vmatpush3.bf16.msra.mxu0 %v3476_v29  ;;  %v3508_v29 = vld [vmem:[%s4311_s1 + $0x298] sm:$0xff]  }
  0x83   : > { %3219 = vmatpush3.bf16.msra.mxu1 %v3477_v41  ;;  %3200 = vmatprep.subr.bf16.mxu0 %v3478_v43  ;;  %v3510_v41 = vld [vmem:[%s4311_s1 + $0x290] sm:$0xff]  }
  0x84   : > { %3220 = vmatprep.subr.bf16.mxu1 %v3479_v45 }
  0x86   : > { %3201 = vmatpush3.bf16.msra.mxu0 %v3478_v43  ;;  %v1720_v43 = vrot.slane %v1462_v7, 6  ;;  %v3520_v7 = vld [vmem:[%s4311_s1 + $0x328] sm:$0xff]  }
  0x87   : > { %3221 = vmatpush3.bf16.msra.mxu1 %v3479_v45  ;;  %3202 = vmatprep.subr.bf16.mxu0 %v3480_v17  ;;  %v3512_v45 = vld [vmem:[%s4311_s1 + $0x288] sm:$0xff]  }
  0x88   : > { %3222 = vmatprep.subr.bf16.mxu1 %v3481_v54  ;;  %v1721_v46 = vor.u32 %v1720_v43, %v1719_v42  ;;  %v3538_v42 = vld [vmem:[%s4311_s1 + $0x3a8] sm:$0xff]  }
  0x8a   : > { %3203 = vmatpush3.bf16.msra.mxu0 %v3480_v17  ;;  %v1726_v17 = vrot.slane %v1468_v21, 6  ;;  %v3527_v21 = vld [vmem:[%s4311_s1 + $0x350] sm:$0xff]  }
  0x8b   : > { %3223 = vmatpush3.bf16.msra.mxu1 %v3481_v54  ;;  %3228 = vmatprep.subr.bf16.mxu0 %v3482_v58  ;;  %v1596_v54 = vrot.slane %v4041_v13, 5  ;;  %v3526_v13 = vld [vmem:[%s4311_s1 + $0x310] sm:$0xff]  }
  0x8c   : > { %3248 = vmatprep.subr.bf16.mxu1 %v3483_v59 }
  0x8d   : > { %3205 = vmatmul.mubr.bf16.vlgmr.msra.gmra.mxu0 %v2659_v60  ;;  %v1727_v60 = vor.u32 %v1726_v17, %v1725_v47  ;;  %v3541_v17 = vld [vmem:[%s4311_s1 + $0x3e0] sm:$0xff]  }
  0x8e   : > { %3225 = vmatmul.mubr.bf16.vlgmr.msra.gmra.mxu1 %v2685_v61  ;;  %3229 = vmatpush3.bf16.msra.mxu0 %v3482_v58  ;;  %v3514_v58 = vld [vmem:[%s4311_s1 + $0x280] sm:$0xff]  }
  0x8f   : > { %3249 = vmatpush3.bf16.msra.mxu1 %v3483_v59  ;;  %3230 = vmatprep.subr.bf16.mxu0 %v3484_v14  ;;  %v1722_v59 = vrot.slane %v1721_v46, 4  ;;  %v3515_v61 = vld [vmem:[%s4311_s1 + $0x2c0] sm:$0xff]  }
  0x90   : > { %3250 = vmatprep.subr.bf16.mxu1 %v3485_v50  ;;  %3244 = vmatprep.mubr.bf16.mxu0 %v2710_v63  ;;  %v3516_v63 = vld [vmem:[%s4311_s1 + $0x338] sm:$0xff]   ;;  %v3540_v46 = vld [vmem:[%s4311_s1 + $0x3a0] sm:$0xff]  }
  0x91   : > { %3264 = vmatprep.mubr.bf16.mxu1 %v2736_v0  ;;  %v3517_v0 = vld [vmem:[%s4311_s1 + $0x378] sm:$0xff]  }
  0x92   : > { %3231 = vmatpush3.bf16.msra.mxu0 %v3484_v14  ;;  %v4129_v14 = vsel %vm3744_vm5, %v2746_v53, %v1596_v54  ;;  %v3542_v53 = vld [vmem:[%s4311_s1 + $0x398] sm:$0xff]  }
  0x93   : > { %3251 = vmatpush3.bf16.msra.mxu1 %v3485_v50  ;;  %3232 = vmatprep.subr.bf16.mxu0 %v3486_v1  ;;  %v4133_v50 = vsel %vm3788_vm8, %v1722_v59, %v1727_v60  ;;  %v3543_v54 = vld [vmem:[%s4311_s1 + $0x3d8] sm:$0xff]  }
  0x94   : > { %3252 = vmatprep.subr.bf16.mxu1 %v3487_v3 }
  0x96   : > { %3233 = vmatpush3.bf16.msra.mxu0 %v3486_v1  ;;  %v2764_v1 = vcombine.low %v4129_v14, %v4129_v14 }
  0x97   : > { %3253 = vmatpush3.bf16.msra.mxu1 %v3487_v3  ;;  %3234 = vmatprep.subr.bf16.mxu0 %v3488_v16  ;;  %v2790_v3 = vcombine.low %v4133_v50, %v4133_v50 }
  0x98   : > { %3254 = vmatprep.subr.bf16.mxu1 %v3489_v52 }
  0x9a   : > { %3235 = vmatpush3.bf16.msra.mxu0 %v3488_v16  ;;  %v3518_v16 = vld [vmem:[%s4311_s1 + $0x330] sm:$0xff]  }
  0x9b   : > { %3255 = vmatpush3.bf16.msra.mxu1 %v3489_v52  ;;  %3236 = vmatprep.subr.bf16.mxu0 %v3490_v5  ;;  %v3519_v52 = vld [vmem:[%s4311_s1 + $0x370] sm:$0xff]  }
  0x9c   : > { %3256 = vmatprep.subr.bf16.mxu1 %v3491_v8 }
  0x9e   : > { %3237 = vmatpush3.bf16.msra.mxu0 %v3490_v5  ;;  %v2815_v5 = vcombine.low %v3876_v62, %v4020_v4  ;;  %v3522_v62 = vld [vmem:[%s4311_s1 + $0x320] sm:$0xff]   ;;  %v4168_v4 = vld [vmem:[%s3653_s20 + $0x28] sm:$0xf] }
  0x9f   : > { %3257 = vmatpush3.bf16.msra.mxu1 %v3491_v8  ;;  %3238 = vmatprep.subr.bf16.mxu0 %v3492_v9  ;;  %v3521_v8 = vld [vmem:[%s4311_s1 + $0x368] sm:$0xff]   ;;  %v1973_v10 = vshrl.u32 %v4168_v4, 16  ;;  %v1976_v11 = vshll.u32 %v4168_v4, 16 }
  0xa0   : > { %3258 = vmatprep.subr.bf16.mxu1 %v3493_v12 }
  0xa1   : > { %v1978_v19 = vrot.slane %v1976_v11, 5  ;;  %v2233_v59 = vrot.slane %v1973_v10, 5  ;;  %v2234_v60 = vrot.slane %v1976_v11, 6 }
  0xa2   : > { %3239 = vmatpush3.bf16.msra.mxu0 %v3492_v9  ;;  %v3524_v9 = vld [vmem:[%s4311_s1 + $0x318] sm:$0xff]  }
  0xa3   : > { %3259 = vmatpush3.bf16.msra.mxu1 %v3493_v12  ;;  %3240 = vmatprep.subr.bf16.mxu0 %v3494_v18  ;;  %v3525_v12 = vld [vmem:[%s4311_s1 + $0x358] sm:$0xff]  }
  0xa4   : > { %3260 = vmatprep.subr.bf16.mxu1 %v3495_v22 }
  0xa6   : > { %3241 = vmatpush3.bf16.msra.mxu0 %v3494_v18  ;;  %v1975_v18 = vrot.slane %v1973_v10, 4 }
  0xa7   : > { %3261 = vmatpush3.bf16.msra.mxu1 %v3495_v22  ;;  %3242 = vmatprep.subr.bf16.mxu0 %v3496_v24  ;;  %v4189_v22 = vld [vmem:[%s3653_s20 + $0x2c] sm:$0x3] }
  0xa8   : > { %3262 = vmatprep.subr.bf16.mxu1 %v3497_v15  ;;  %v1979_v25 = vor.u32 %v1978_v19, %v1975_v18  ;;  %v1982_v26 = vshll.u32 %v4189_v22, 16 }
  0xaa   : > { %3243 = vmatpush3.bf16.msra.mxu0 %v3496_v24  ;;  %v3528_v24 = vld [vmem:[%s4311_s1 + $0x308] sm:$0xff]  }
  0xab   : > { %3263 = vmatpush3.bf16.msra.mxu1 %v3497_v15  ;;  %3268 = vmatprep.subr.bf16.mxu0 %v3500_v30  ;;  %v3529_v15 = vld [vmem:[%s4311_s1 + $0x348] sm:$0xff]  }
  0xac   : > { %3288 = vmatprep.subr.bf16.mxu1 %v3501_v32 }
  0xad   : > { %3245 = vmatmul.mubr.bf16.vlgmr.msra.gmra.mxu0 %v2711_v33  ;;  %v3531_v33 = vld [vmem:[%s4311_s1 + $0x340] sm:$0xff]  }
  0xae   : > { %3265 = vmatmul.mubr.bf16.vlgmr.msra.gmra.mxu1 %v2737_v34  ;;  %3269 = vmatpush3.bf16.msra.mxu0 %v3500_v30  ;;  %v1980_v30 = vrot.slane %v1979_v25, 4 }
  0xaf   : > { %3289 = vmatpush3.bf16.msra.mxu1 %v3501_v32  ;;  %3270 = vmatprep.subr.bf16.mxu0 %v3502_v2  ;;  %v1984_v32 = vrot.slane %v1982_v26, 5 }
  0xb0   : > { %3290 = vmatprep.subr.bf16.mxu1 %v3503_v31  ;;  %3284 = vmatprep.mubr.bf16.mxu0 %v2763_v35  ;;  %v2816_v35 = vcombine.low %v4168_v4, %v4168_v4 }
  0xb1   : > { %3304 = vmatprep.mubr.bf16.mxu1 %v2789_v36  ;;  %v1985_v34 = vsel %vm3710_vm2, %v1980_v30, %v1984_v32 }
  0xb2   : > { %3271 = vmatpush3.bf16.msra.mxu0 %v3502_v2  ;;  %v3534_v2 = vld [vmem:[%s4311_s1 + $0x3b8] sm:$0xff]   ;;  %v2842_v36 = vcombine.low %v1985_v34, %v1985_v34 }
  0xb3   : > { %3291 = vmatpush3.bf16.msra.mxu1 %v3503_v31  ;;  %3272 = vmatprep.subr.bf16.mxu0 %v3504_v39  ;;  %v3535_v31 = vld [vmem:[%s4311_s1 + $0x3f8] sm:$0xff]  }
  0xb4   : > { %3292 = vmatprep.subr.bf16.mxu1 %v3505_v28 }
  0xb6   : > { %3273 = vmatpush3.bf16.msra.mxu0 %v3504_v39  ;;  %v3537_v39 = vld [vmem:[%s4311_s1 + $0x3f0] sm:$0xff]  }
  0xb7   : > { %3293 = vmatpush3.bf16.msra.mxu1 %v3505_v28  ;;  %3274 = vmatprep.subr.bf16.mxu0 %v3506_v48  ;;  %v2868_v28 = vcombine.low %v3981_v56, %v4129_v14  ;;  %v3539_v56 = vld [vmem:[%s4311_s1 + $0x3e8] sm:$0xff]   ;;  %v3545_v14 = vld [vmem:[%s4311_s1 + $0x3d0] sm:$0xff]  }
  0xb8   : > { %3294 = vmatprep.subr.bf16.mxu1 %v3507_v49 }
  0xba   : > { %3275 = vmatpush3.bf16.msra.mxu0 %v3506_v48 }
  0xbb   : > { %3295 = vmatpush3.bf16.msra.mxu1 %v3507_v49  ;;  %3276 = vmatprep.subr.bf16.mxu0 %v3508_v29  ;;  %v2894_v49 = vcombine.low %v3985_v57, %v4133_v50  ;;  %v3546_v50 = vld [vmem:[%s4311_s1 + $0x388] sm:$0xff]  }
  0xbc   : > { %3296 = vmatprep.subr.bf16.mxu1 %v3509_v40 }
  0xbe   : > { %3277 = vmatpush3.bf16.msra.mxu0 %v3508_v29 }
  0xbf   : > { %3297 = vmatpush3.bf16.msra.mxu1 %v3509_v40  ;;  %3278 = vmatprep.subr.bf16.mxu0 %v3510_v41 }
  0xc0   : > { %3298 = vmatprep.subr.bf16.mxu1 %v3511_v37 }
  0xc2   : > { %3279 = vmatpush3.bf16.msra.mxu0 %v3510_v41 }
  0xc3   : > { %3299 = vmatpush3.bf16.msra.mxu1 %v3511_v37  ;;  %3280 = vmatprep.subr.bf16.mxu0 %v3512_v45 }
  0xc4   : > { %3300 = vmatprep.subr.bf16.mxu1 %v3513_v51 }
  0xc6   : > { %3281 = vmatpush3.bf16.msra.mxu0 %v3512_v45 }
  0xc7   : > { %3301 = vmatpush3.bf16.msra.mxu1 %v3513_v51  ;;  %3282 = vmatprep.subr.bf16.mxu0 %v3514_v58 }
  0xc8   : > { %3302 = vmatprep.subr.bf16.mxu1 %v3515_v61 }
  0xca   : > { %3283 = vmatpush3.bf16.msra.mxu0 %v3514_v58  ;;  %v3544_v58 = vld [vmem:[%s4311_s1 + $0x390] sm:$0xff]  }
  0xcb   : > { %3303 = vmatpush3.bf16.msra.mxu1 %v3515_v61  ;;  %3308 = vmatprep.subr.bf16.mxu0 %v3516_v63  ;;  %v2237_v61 = vshrl.u32 %v4189_v22, 16 }
  0xcc   : > { %3328 = vmatprep.subr.bf16.mxu1 %v3517_v0 }
  0xcd   : > { %3285 = vmatmul.mubr.bf16.vlgmr.msra.gmra.mxu0 %v2764_v1  ;;  %v2240_v1 = vrot.slane %v1982_v26, 6 }
  0xce   : > { %3305 = vmatmul.mubr.bf16.vlgmr.msra.gmra.mxu1 %v2790_v3  ;;  %3309 = vmatpush3.bf16.msra.mxu0 %v3516_v63  ;;  %v2235_v63 = vor.u32 %v2234_v60, %v2233_v59  ;;  %v3547_v3 = vld [vmem:[%s4311_s1 + $0x3c8] sm:$0xff]  }
  0xcf   : > { %3329 = vmatpush3.bf16.msra.mxu1 %v3517_v0  ;;  %3310 = vmatprep.subr.bf16.mxu0 %v3518_v16  ;;  %v2239_v0 = vrot.slane %v2237_v61, 5 }
  0xd0   : > { %3330 = vmatprep.subr.bf16.mxu1 %v3519_v52  ;;  %3324 = vmatprep.mubr.bf16.mxu0 %v2815_v5  ;;  %v3548_v5 = vld [vmem:[%s4311_s1 + $0x380] sm:$0xff]  }
  0xd1   : > { %3344 = vmatprep.mubr.bf16.mxu1 %v2841_v6  ;;  %v2236_v6 = vrot.slane %v2235_v63, 4 }
  0xd2   : > { %3311 = vmatpush3.bf16.msra.mxu0 %v3518_v16  ;;  %v2851_v16 = vrot.slane %v4168_v4, 9 }
  0xd3   : > { %3331 = vmatpush3.bf16.msra.mxu1 %v3519_v52  ;;  %3312 = vmatprep.subr.bf16.mxu0 %v3520_v7  ;;  %v2110_v52 = vrot.slane %v4189_v22, 5 }
  0xd4   : > { %3332 = vmatprep.subr.bf16.mxu1 %v3521_v8 }
  0xd6   : > { %3313 = vmatpush3.bf16.msra.mxu0 %v3520_v7  ;;  %v2241_v7 = vor.u32 %v2240_v1, %v2239_v0 }
  0xd7   : > { %3333 = vmatpush3.bf16.msra.mxu1 %v3521_v8  ;;  %3314 = vmatprep.subr.bf16.mxu0 %v3522_v62  ;;  %v3549_v8 = vld [vmem:[%s4311_s1 + $0x3c0] sm:$0xff]  }
  0xd8   : > { %3334 = vmatprep.subr.bf16.mxu1 %v3523_v23 }
  0xda   : > { %3315 = vmatpush3.bf16.msra.mxu0 %v3522_v62  ;;  %v2111_v62 = vsel %vm3744_vm5, %v2851_v16, %v2110_v52 }
  0xdb   : > { %3335 = vmatpush3.bf16.msra.mxu1 %v3523_v23  ;;  %3316 = vmatprep.subr.bf16.mxu0 %v3524_v9  ;;  %v2242_v23 = vsel %vm3788_vm8, %v2236_v6, %v2241_v7  ;;  %v2869_v4 = vcombine.low %v2111_v62, %v2111_v62 }
  0xdc   : > { %3336 = vmatprep.subr.bf16.mxu1 %v3525_v12 }
  0xde   : > { %3317 = vmatpush3.bf16.msra.mxu0 %v3524_v9  ;;  %v2895_v9 = vcombine.low %v2242_v23, %v2242_v23 }
  0xdf   : > { %3337 = vmatpush3.bf16.msra.mxu1 %v3525_v12  ;;  %3318 = vmatprep.subr.bf16.mxu0 %v3526_v13 }
  0xe0   : > { %3338 = vmatprep.subr.bf16.mxu1 %v3527_v21 }
  0xe2   : > { %3319 = vmatpush3.bf16.msra.mxu0 %v3526_v13 }
  0xe3   : > { %3339 = vmatpush3.bf16.msra.mxu1 %v3527_v21  ;;  %3320 = vmatprep.subr.bf16.mxu0 %v3528_v24 }
  0xe4   : > { %3340 = vmatprep.subr.bf16.mxu1 %v3529_v15 }
  0xe6   : > { %3321 = vmatpush3.bf16.msra.mxu0 %v3528_v24 }
  0xe7   : > { %3341 = vmatpush3.bf16.msra.mxu1 %v3529_v15  ;;  %3322 = vmatprep.subr.bf16.mxu0 %v3530_v27 }
  0xe8   : > { %3342 = vmatprep.subr.bf16.mxu1 %v3531_v33 }
  0xea   : > { %3323 = vmatpush3.bf16.msra.mxu0 %v3530_v27 }
  0xeb   : > { %3343 = vmatpush3.bf16.msra.mxu1 %v3531_v33  ;;  %3348 = vmatprep.subr.bf16.mxu0 %v3534_v2 }
  0xec   : > { %3368 = vmatprep.subr.bf16.mxu1 %v3535_v31 }
  0xed   : > { %v3086_v48 = vpop.f32.mrf.mxu0  ;;  %3325 = vmatmul.mubr.bf16.vlgmr.msra.gmra.mxu0 %v2816_v35 }
  0xee   : > { %v3106_v29 = vpop.f32.mrf.mxu1  ;;  %3345 = vmatmul.mubr.bf16.vlgmr.msra.gmra.mxu1 %v2842_v36  ;;  %3349 = vmatpush3.bf16.msra.mxu0 %v3534_v2 }
  0xef   : > { %v4226_v40 = vadd.f32 %v3106_v29, %v3086_v48  ;;  %3369 = vmatpush3.bf16.msra.mxu1 %v3535_v31  ;;  %v405_v41 = vpop.f32.mrf.mxu0  ;;  %3350 = vmatprep.subr.bf16.mxu0 %v3536_v38 }
  0xf0   : > { %v511_v43 = vpop.f32.mrf.mxu1  ;;  %3370 = vmatprep.subr.bf16.mxu1 %v3537_v39  ;;  %3364 = vmatprep.mubr.bf16.mxu0 %v2868_v28 }
  0xf1   : > { %v4234_v57 = vadd.f32 %v511_v43, %v405_v41  ;;  %v3087_v44 = vpop.f32.mrf.mxu0  ;;  %3384 = vmatprep.mubr.bf16.mxu1 %v2894_v49 }
  0xf2   : > { %v3107_v37 = vpop.f32.mrf.mxu1  ;;  %3351 = vmatpush3.bf16.msra.mxu0 %v3536_v38 }
  0xf3   : > { %3371 = vmatpush3.bf16.msra.mxu1 %v3537_v39  ;;  %v408_v45 = vpop.f32.mrf.mxu0  ;;  %3352 = vmatprep.subr.bf16.mxu0 %v3538_v42 }
  0xf4   : > { %v514_v47 = vpop.f32.mrf.mxu1  ;;  %3372 = vmatprep.subr.bf16.mxu1 %v3539_v56 }
  0xf5   : > { %v515_v51 = vadd.f32 %v514_v47, %v408_v45 }
  0xf6   : > { %3353 = vmatpush3.bf16.msra.mxu0 %v3538_v42 }
  0xf7   : > { %3373 = vmatpush3.bf16.msra.mxu1 %v3539_v56  ;;  %3354 = vmatprep.subr.bf16.mxu0 %v3540_v46 }
  0xf8   : > { %3374 = vmatprep.subr.bf16.mxu1 %v3541_v17 }
  0xfa   : > { %3355 = vmatpush3.bf16.msra.mxu0 %v3540_v46 }
  0xfb   : > { %3375 = vmatpush3.bf16.msra.mxu1 %v3541_v17  ;;  %3356 = vmatprep.subr.bf16.mxu0 %v3542_v53 }
  0xfc   : > { %3376 = vmatprep.subr.bf16.mxu1 %v3543_v54 }
  0xfe   : > { %3357 = vmatpush3.bf16.msra.mxu0 %v3542_v53 }
  0xff   : > { %3377 = vmatpush3.bf16.msra.mxu1 %v3543_v54  ;;  %3358 = vmatprep.subr.bf16.mxu0 %v3544_v58 }
 0x100   : > { %3378 = vmatprep.subr.bf16.mxu1 %v3545_v14 }
 0x102   : > { %3359 = vmatpush3.bf16.msra.mxu0 %v3544_v58 }
 0x103   : > { %3379 = vmatpush3.bf16.msra.mxu1 %v3545_v14  ;;  %3360 = vmatprep.subr.bf16.mxu0 %v3546_v50 }
 0x104   : > { %3380 = vmatprep.subr.bf16.mxu1 %v3547_v3 }
 0x106   : > { %3361 = vmatpush3.bf16.msra.mxu0 %v3546_v50 }
 0x107   : > { %3381 = vmatpush3.bf16.msra.mxu1 %v3547_v3  ;;  %3362 = vmatprep.subr.bf16.mxu0 %v3548_v5 }
 0x108   : > { %3382 = vmatprep.subr.bf16.mxu1 %v3549_v8 }
 0x10a   : > { %3363 = vmatpush3.bf16.msra.mxu0 %v3548_v5 }
 0x10b   : > { %3383 = vmatpush3.bf16.msra.mxu1 %v3549_v8 }
 0x10d   : > { %v3126_v10 = vpop.f32.mrf.mxu0  ;;  %3365 = vmatmul.mubr.bf16.vlgmr.msra.gmra.mxu0 %v2869_v4 }
 0x10e   : > { %v665_v11 = vadd.f32 %v3126_v10, %v4226_v40  ;;  %v3146_v12 = vpop.f32.mrf.mxu1  ;;  %3385 = vmatmul.mubr.bf16.vlgmr.msra.gmra.mxu1 %v2895_v9 }
 0x10f   : > { %v649_v13 = vpop.f32.mrf.mxu0 }
 0x110   : > { %v821_v18 = vadd.f32 %v3146_v12, %v665_v11  ;;  %v663_v55 = vadd.f32 %v649_v13, %v4234_v57  ;;  %v805_v19 = vpop.f32.mrf.mxu1 }
 0x111   : > { %v3127_v21 = vpop.f32.mrf.mxu0 }
 0x112   : > { %v819_v22 = vadd.f32 %v805_v19, %v663_v55  ;;  %v3147_v20 = vpop.f32.mrf.mxu1 }
 0x113   : > { %v652_v24 = vpop.f32.mrf.mxu0 }
 0x114   : > { %v664_v25 = vadd.f32 %v652_v24, %v515_v51  ;;  %v808_v26 = vpop.f32.mrf.mxu1 }
 0x116   : > { %v820_v15 = vadd.f32 %v808_v26, %v664_v25 }
 0x12d   : > { %v3166_v27 = vpop.f32.mrf.mxu0 }
 0x12e   : > { %v943_v30 = vadd.f32 %v3166_v27, %v821_v18  ;;  %v3186_v32 = vpop.f32.mrf.mxu1 }
 0x12f   : > { %v927_v33 = vpop.f32.mrf.mxu0 }
 0x130   : > { %v1078_v34 = vadd.f32 %v3186_v32, %v943_v30  ;;  %v941_v2 = vadd.f32 %v927_v33, %v819_v22  ;;  %v1062_v31 = vpop.f32.mrf.mxu1 }
 0x131   : > { %v3167_v35 = vpop.f32.mrf.mxu0 }
 0x132   : > { %v1076_v36 = vadd.f32 %v1062_v31, %v941_v2  ;;  %v3187_v38 = vpop.f32.mrf.mxu1 }
 0x133   : > { %v930_v39 = vpop.f32.mrf.mxu0 }
 0x134   : > { %v942_v28 = vadd.f32 %v930_v39, %v820_v15  ;;  %v1065_v48 = vpop.f32.mrf.mxu1 }
 0x136   : > { %v1077_v49 = vadd.f32 %v1065_v48, %v942_v28 }
 0x14d   : > { %v3206_v29 = vpop.f32.mrf.mxu0 }
 0x14e   : > { %v1204_v40 = vadd.f32 %v3206_v29, %v1078_v34  ;;  %v3226_v41 = vpop.f32.mrf.mxu1 }
 0x14f   : > { %v1188_v42 = vpop.f32.mrf.mxu0 }
 0x150   : > { %v1335_v43 = vadd.f32 %v3226_v41, %v1204_v40  ;;  %v1202_v56 = vadd.f32 %v1188_v42, %v1076_v36  ;;  %v1319_v57 = vpop.f32.mrf.mxu1  ;;  %v2904_v36 = vld [vmem:[%s4312_s2] ss:$0 sm:$0xff] }
 0x151   : > { %v3207_v44 = vpop.f32.mrf.mxu0 }
 0x152   : > { %v1333_v37 = vadd.f32 %v1319_v57, %v1202_v56  ;;  %v3227_v45 = vpop.f32.mrf.mxu1 }
 0x153   : > { %v1191_v46 = vpop.f32.mrf.mxu0 }
 0x154   : > { %v1203_v47 = vadd.f32 %v1191_v46, %v1077_v49  ;;  %v1322_v17 = vpop.f32.mrf.mxu1  ;;  %v2905_v49 = vld [vmem:[%s4313_s3] ss:$0 sm:$0xff] }
 0x156   : > { %v1334_v51 = vadd.f32 %v1322_v17, %v1203_v47 }
 0x16d   : > { %v3246_v53 = vpop.f32.mrf.mxu0 }
 0x16e   : > { %v1457_v54 = vadd.f32 %v3246_v53, %v1335_v43  ;;  %v3266_v58 = vpop.f32.mrf.mxu1 }
 0x16f   : > { %v1441_v59 = vpop.f32.mrf.mxu0 }
 0x170   : > { %v1592_v60 = vadd.f32 %v3266_v58, %v1457_v54  ;;  %v1455_v61 = vadd.f32 %v1441_v59, %v1333_v37  ;;  %v1576_v14 = vpop.f32.mrf.mxu1  ;;  %v2405_v54 = vld [vmem:[%s219_s5 + $0x4] sm:$0x3] }
 0x171   : > { %v3247_v50 = vpop.f32.mrf.mxu0 }
 0x172   : > { %v1590_v63 = vadd.f32 %v1576_v14, %v1455_v61  ;;  %v3267_v0 = vpop.f32.mrf.mxu1  ;;  %v2399_v14 = vld [vmem:[%s219_s5] sm:$0x3] }
 0x173   : > { %v1444_v1 = vpop.f32.mrf.mxu0 }
 0x174   : > { %v1579_v3 = vpop.f32.mrf.mxu1  ;;  %v1456_v18 = vadd.f32 %v1444_v1, %v1334_v51 }
 0x176   : > { %v1591_v21 = vadd.f32 %v1579_v3, %v1456_v18 }
 0x18d   : > { %v3286_v16 = vpop.f32.mrf.mxu0 }
 0x18e   : > { %v3306_v52 = vpop.f32.mrf.mxu1  ;;  %v1718_v55 = vadd.f32 %v3286_v16, %v1592_v60 }
 0x18f   : > { %v1702_v5 = vpop.f32.mrf.mxu0 }
 0x190   : > { %v1833_v6 = vpop.f32.mrf.mxu1  ;;  %v1716_v19 = vadd.f32 %v1702_v5, %v1590_v63  ;;  %v1849_v22 = vadd.f32 %v3306_v52, %v1718_v55  ;;  %v2402_v52 = vld [vmem:[%s219_s5 + $0x2] sm:$0x3] }
 0x191   : > { %v3287_v7 = vpop.f32.mrf.mxu0 }
 0x192   : > { %v3307_v8 = vpop.f32.mrf.mxu1  ;;  %v1847_v20 = vadd.f32 %v1833_v6, %v1716_v19 }
 0x193   : > { %v1705_v62 = vpop.f32.mrf.mxu0 }
 0x194   : > { %v1836_v23 = vpop.f32.mrf.mxu1  ;;  %v1717_v24 = vadd.f32 %v1705_v62, %v1591_v21 }
 0x196   : > { %v1848_v27 = vadd.f32 %v1836_v23, %v1717_v24 }
 0x1ad   : > { %v3326_v4 = vpop.f32.mrf.mxu0 }
 0x1ae   : > { %v3346_v9 = vpop.f32.mrf.mxu1  ;;  %v1971_v25 = vadd.f32 %v3326_v4, %v1849_v22 }
 0x1af   : > { %v1955_v10 = vpop.f32.mrf.mxu0 }
 0x1b0   : > { %v2090_v11 = vpop.f32.mrf.mxu1  ;;  %v1969_v26 = vadd.f32 %v1955_v10, %v1847_v20  ;;  %v2106_v30 = vadd.f32 %v3346_v9, %v1971_v25 }
 0x1b1   : > { %v3327_v12 = vpop.f32.mrf.mxu0 }
 0x1b2   : > { %v3347_v13 = vpop.f32.mrf.mxu1  ;;  %v2104_v34 = vadd.f32 %v2090_v11, %v1969_v26 }
 0x1b3   : > { %v1958_v15 = vpop.f32.mrf.mxu0 }
 0x1b4   : > { %v2093_v32 = vpop.f32.mrf.mxu1  ;;  %v1970_v2 = vadd.f32 %v1958_v15, %v1848_v27 }
 0x1b6   : > { %v2105_v40 = vadd.f32 %v2093_v32, %v1970_v2 }
 0x1cd   : > { %v3366_v33 = vpop.f32.mrf.mxu0 }
 0x1ce   : > { %v2232_v31 = vadd.f32 %v3366_v33, %v2106_v30  ;;  %v3386_v35 = vpop.f32.mrf.mxu1 }
 0x1cf   : > { %v2216_v38 = vpop.f32.mrf.mxu0 }
 0x1d0   : > { %v2363_v39 = vadd.f32 %v3386_v35, %v2232_v31  ;;  %v2230_v28 = vadd.f32 %v2216_v38, %v2104_v34  ;;  %v2347_v48 = vpop.f32.mrf.mxu1 }
 0x1d1   : > { %v3367_v29 = vpop.f32.mrf.mxu0 }
 0x1d2   : > { %v2373_v41 = vmul.f32 %v2904_v36, %v2363_v39  ;;  %v2361_v42 = vadd.f32 %v2347_v48, %v2230_v28  ;;  %v3387_v43 = vpop.f32.mrf.mxu1 }
 0x1d3   : > { %v2219_v56 = vpop.f32.mrf.mxu0 }
 0x1d4   : > { %v2383_v57 = vadd.f32 %v2905_v49, %v2373_v41  ;;  %v2371_v44 = vmul.f32 %v2904_v36, %v2361_v42  ;;  %v2231_v37 = vadd.f32 %v2219_v56, %v2105_v40  ;;  %v2350_v45 = vpop.f32.mrf.mxu1 }
 0x1d6   : > { %vm2386_vm11 = vcmp.ge.f32.partialorder %v2383_v57, 0.0  ;;  %v2389_v46 = vmul.f32 0.2, %v2383_v57  ;;  %v2381_v47 = vadd.f32 %v2905_v49, %v2371_v44  ;;  %v2362_v17 = vadd.f32 %v2350_v45, %v2231_v37 }
 0x1d8   : > { %v2392_v51 = vsel %vm2386_vm11, %v2383_v57, %v2389_v46  ;;  %vm2384_vm13 = vcmp.ge.f32.partialorder %v2381_v47, 0.0  ;;  %v2387_v58 = vmul.f32 0.2, %v2381_v47  ;;  %v2372_v59 = vmul.f32 %v2904_v36, %v2362_v17 }
 0x1d9   : > { %v2395_v60 = vpack.c.bf16 %v2392_v51, %v2392_v51 }
 0x1da   : > { %v2390_v61 = vsel %vm2384_vm13, %v2381_v47, %v2387_v58  ;;  %v2382_v50 = vadd.f32 %v2905_v49, %v2372_v59 }
 0x1db   : > { %v2406_v63 = vsel %vm4291_vm12, %v2395_v60, %v2405_v54  ;;  %v2393_v0 = vpack.c.bf16 %v2390_v61, %v2390_v61 }
 0x1dc   : > { %2407 = vst [vmem:[%s219_s5 + $0x4] sm:$0x3] %v2406_v63  ;;  %vm2385_vm14 = vcmp.ge.f32.partialorder %v2382_v50, 0.0  ;;  %v2388_v1 = vmul.f32 0.2, %v2382_v50 }
 0x1dd   : > { %v2400_v3 = vsel %vm4291_vm12, %v2393_v0, %v2399_v14 }
 0x1de   : > { %2401 = vst [vmem:[%s219_s5] sm:$0x3] %v2400_v3  ;;  %v2391_v16 = vsel %vm2385_vm14, %v2382_v50, %v2388_v1 }
 0x1df   : > { %v2394_v5 = vpack.c.bf16 %v2391_v16, %v2391_v16 }
 0x1e1   : > { %v2403_v6 = vsel %vm4291_vm12, %v2394_v5, %v2402_v52 }
 0x1e2   : > { %2404 = vst [vmem:[%s219_s5 + $0x2] sm:$0x3] %v2403_v6 }
 0x1e3 PF: > { %s14_s17 = sadd.s32 1, %s3572_s17   ;;  %s4323_s15 = smov %s3568_s16 }
 0x1e4   : > { %p11_p5 = scmp.ge.s32.totalorder %s14_s17, 4   ;;  %s4324_s16 = smov %s4326_s18 }
 0x1e6   :  { %13 = sbr.rel (!%p11_p5) target bundleno = 2 (0x2), region = 82 }

// kernel: forward.9
= control target key start
LH: loop header
LB: loop body
LE: loop exit
PB: predicated region body
PF: predicated region fallthrough
CT: control target
= control target key end

     0   :  { %s3349_s15 = smov 0   ;;  %s3351_s16 = smov 0   ;;  %s4138_s0 = inlined_call_operand.vmem [shape: bf16[2,5,11,128], index: 0, kind: input, shape index: {}]   ;;  %s4139_s1 = inlined_call_operand.vmem [shape: bf16[16,128,128], index: 1, kind: input, shape index: {}]   ;;  %s4140_s2 = inlined_call_operand.vmem [shape: f32[1,128], index: 2, kind: input, shape index: {}]   ;;  %s4141_s3 = inlined_call_operand.vmem [shape: f32[1,128], index: 3, kind: input, shape index: {}]   ;;  %s4142_s4 = inlined_call_operand.vmem [shape: f32[2,2,2,128], index: 4, kind: output, shape index: {}]  }
   0x1   :  { %s3353_s17 = smov 0  }
   0x2 LB: > { %s26_s18 = sadd.s32 1, %s3316_s16  ;;  %p2277_p0 = scmp.ge.s32.totalorder %s3320_s17, 1  ;;  %s3320_s17 = sphi %s3353_s17, %s14_s17   ;;  %s3316_s16 = sphi %s3351_s16, %s4150_s16   ;;  %s3312_s15 = sphi %s3349_s15, %s4149_s15  }
   0x3   : > { %p28_p1 = scmp.ge.s32.totalorder %s26_s18, 2  ;;  %p176_p2 = scmp.lt.s32.totalorder %s3320_s17, 3 }
   0x5   : > { %s4152_s18 = smov (%p28_p1, %s26_s18), 0  ;;  %p177_p3 = pnand %p2277_p0, %p176_p2 }
   0x6   : > { %p206_p4 = scmp.lt.s32.totalorder (!%p177_p3), %s3312_s15, 1 }
   0x7   : > { %180 = sbr.rel (%p177_p3) target bundleno = 475 (0x1db), region = 36 }
   0xc   : > { %v3166_v0 = vld [vmem:[%s4139_s1 + $0x78] sm:$0xff]   ;;  %v3322_v1 = vmov 0.0   ;;  %v3168_v3 = vld [vmem:[%s4139_s1 + $0x70] sm:$0xff]   ;;  %vm3323_vm0 = vmmov 0   ;;  %s4154_s15 = smov (!%p206_p4, %s3312_s15), 1  ;;  %v3170_v5 = vld [vmem:[%s4139_s1 + $0x68] sm:$0xff]  }
   0xd   : > { %2819 = vmatprep.subr.bf16.mxu0 %v3322_v1  ;;  %2839 = vmatprep.subr.bf16.mxu1 %v3322_v1  ;;  %v3167_v2 = vld [vmem:[%s4139_s1 + $0x38] sm:$0xff]   ;;  %v3169_v4 = vld [vmem:[%s4139_s1 + $0x30] sm:$0xff]   ;;  %v3171_v6 = vld [vmem:[%s4139_s1 + $0x28] sm:$0xff]   ;;  %s3139_s5 = smul.u32 40, %s4154_s15  ;;  %vm252_vm1 = vsmask.f32 3328 }
   0xe   : > { %2820 = vmatpush3.bf16.msra.mxu0 %v3166_v0  ;;  %2835 = vmatprep.mubr.msk.bf16.mxu0 %vm3323_vm0, %v3322_v1  ;;  %v3172_v7 = vld [vmem:[%s4139_s1 + $0x60] sm:$0xff]   ;;  %v3174_v9 = vld [vmem:[%s4139_s1 + $0x58] sm:$0xff]   ;;  %v3176_v15 = vld [vmem:[%s4139_s1 + $0x50] sm:$0xff]   ;;  %vm253_vm2 = vsmask.f32 7440  ;;  %vm490_vm4 = vcmask 1042432  }
   0xf   : > { %2840 = vmatpush3.bf16.msra.mxu1 %v3167_v2  ;;  %2821 = vmatprep.subr.bf16.mxu0 %v3322_v1  ;;  %v3173_v8 = vld [vmem:[%s4139_s1 + $0x20] sm:$0xff]   ;;  %s3409_s12 = scalar_lea.vmem %s4138_s0, %s3139_s5  ;;  %v3175_v10 = vld [vmem:[%s4139_s1 + $0x18] sm:$0xff]   ;;  %v3177_v16 = vld [vmem:[%s4139_s1 + $0x10] sm:$0xff]   ;;  %vm491_vm5 = vcmask 1046532   ;;  %vm613_vm6 = vsmask.f32 2304 }
  0x10   : > { %2841 = vmatprep.subr.bf16.mxu1 %v3322_v1  ;;  %2855 = vmatprep.mubr.msk.bf16.mxu1 %vm3323_vm0, %v3322_v1  ;;  %v3420_v11 = vld [vmem:[%s3409_s12] sm:$0xf]  ;;  %v3423_v12 = vld [vmem:[%s3409_s12 + $0x4] sm:$0x3]  ;;  %v3426_v13 = vld [vmem:[%s3409_s12 + $0x8] sm:$0xf] }
  0x11   : > { %v3429_v14 = vld [vmem:[%s3409_s12 + $0xc] sm:$0x3]  ;;  %v256_v17 = vshrl.u32 %v3420_v11, 16  ;;  %v259_v18 = vshll.u32 %v3420_v11, 16  ;;  %v265_v19 = vshll.u32 %v3423_v12, 16  ;;  %v270_v20 = vshrl.u32 %v3426_v13, 16  ;;  %vm3461_vm3 = vmor %vm252_vm1, %vm253_vm2 }
  0x12   : > { %2822 = vmatpush3.bf16.msra.mxu0 %v3168_v3  ;;  %v273_v21 = vshll.u32 %v3426_v13, 16  ;;  %v279_v22 = vshll.u32 %v3429_v14, 16  ;;  %v3178_v27 = vld [vmem:[%s4139_s1 + $0x48] sm:$0xff]   ;;  %v3180_v36 = vld [vmem:[%s4139_s1 + $0x40] sm:$0xff]   ;;  %v2306_v41 = vcombine.low %v3420_v11, %v3426_v13  ;;  %v3183_v42 = vld [vmem:[%s4139_s1 + $0xb8] sm:$0xff]   ;;  %v620_v55 = vshrl.u32 %v3423_v12, 16 }
  0x13   : > { %2842 = vmatpush3.bf16.msra.mxu1 %v3169_v4  ;;  %2823 = vmatprep.subr.bf16.mxu0 %v3322_v1  ;;  %v258_v23 = vrot.slane %v256_v17, 4  ;;  %v261_v24 = vrot.slane %v259_v18, 5  ;;  %v272_v25 = vrot.slane %v270_v20, 4  ;;  %v3179_v28 = vld [vmem:[%s4139_s1 + $0x8] sm:$0xff]   ;;  %v267_v30 = vrot.slane %v265_v19, 5  ;;  %v3181_v38 = vld [vmem:[%s4139_s1] sm:$0xff]   ;;  %vm3562_vm8 = vmor %vm490_vm4, %vm491_vm5 }
  0x14   : > { %2843 = vmatprep.subr.bf16.mxu1 %v3322_v1  ;;  %v275_v26 = vrot.slane %v273_v21, 5  ;;  %v281_v33 = vrot.slane %v279_v22, 5  ;;  %v3184_v43 = vld [vmem:[%s4139_s1 + $0xf8] sm:$0xff]   ;;  %v3185_v44 = vld [vmem:[%s4139_s1 + $0xb0] sm:$0xff]   ;;  %v3187_v46 = vld [vmem:[%s4139_s1 + $0xa8] sm:$0xff]   ;;  %v623_v50 = vrot.slane %v265_v19, 6 }
  0x15   : > { %v262_v29 = vor.u32 %v261_v24, %v258_v23  ;;  %v3186_v45 = vld [vmem:[%s4139_s1 + $0xf0] sm:$0xff]   ;;  %v3188_v47 = vld [vmem:[%s4139_s1 + $0xe8] sm:$0xff]   ;;  %v3189_v48 = vld [vmem:[%s4139_s1 + $0xa0] sm:$0xff]   ;;  %v616_v53 = vrot.slane %v256_v17, 5  ;;  %v617_v54 = vrot.slane %v259_v18, 6  ;;  %v626_v56 = vrot.slane %v270_v20, 5 }
  0x16   : > { %2824 = vmatpush3.bf16.msra.mxu0 %v3170_v5  ;;  %v276_v32 = vor.u32 %v275_v26, %v272_v25  ;;  %v3190_v49 = vld [vmem:[%s4139_s1 + $0xe0] sm:$0xff]   ;;  %v3191_v51 = vld [vmem:[%s4139_s1 + $0x98] sm:$0xff]   ;;  %v627_v57 = vrot.slane %v273_v21, 6  ;;  %v630_v58 = vshrl.u32 %v3429_v14, 16  ;;  %v633_v59 = vrot.slane %v279_v22, 6  ;;  %v3193_v61 = vld [vmem:[%s4139_s1 + $0x90] sm:$0xff]  }
  0x17   : > { %2844 = vmatpush3.bf16.msra.mxu1 %v3171_v6  ;;  %2825 = vmatprep.subr.bf16.mxu0 %v3322_v1  ;;  %v263_v34 = vrot.slane %v262_v29, 4  ;;  %v3192_v52 = vld [vmem:[%s4139_s1 + $0xd8] sm:$0xff]   ;;  %v2315_v60 = vrot.slane %v3420_v11, 9  ;;  %v495_v62 = vrot.slane %v3423_v12, 5  ;;  %v3194_v63 = vld [vmem:[%s4139_s1 + $0xd0] sm:$0xff]   ;;  %v2316_v0 = vrot.slane %v3426_v13, 9 }
  0x18   : > { %2845 = vmatprep.subr.bf16.mxu1 %v3322_v1  ;;  %v277_v35 = vrot.slane %v276_v32, 4  ;;  %v618_v2 = vor.u32 %v617_v54, %v616_v53  ;;  %v622_v3 = vrot.slane %v620_v55, 5  ;;  %v628_v4 = vor.u32 %v627_v57, %v626_v56  ;;  %v3195_v6 = vld [vmem:[%s4139_s1 + $0x88] sm:$0xff]   ;;  %v3198_v19 = vld [vmem:[%s4139_s1 + $0xc0] sm:$0xff]   ;;  %v3199_v24 = vld [vmem:[%s4139_s1 + $0x138] sm:$0xff]   ;;  %s2674_s26 = sshll.u32 %s4154_s15, 2 }
  0x19   : > { %v268_v37 = vsel %vm3461_vm3, %v263_v34, %v267_v30  ;;  %v632_v5 = vrot.slane %v630_v58, 5  ;;  %vm614_vm7 = vsmask.f32 6416  ;;  %v496_v17 = vsel %vm3562_vm8, %v2315_v60, %v495_v62  ;;  %v3200_v25 = vld [vmem:[%s4139_s1 + $0x178] sm:$0xff]   ;;  %v3201_v26 = vld [vmem:[%s4139_s1 + $0x130] sm:$0xff]   ;;  %v3203_v29 = vld [vmem:[%s4139_s1 + $0x128] sm:$0xff]   ;;  %s219_s30 = scalar_lea.vmem %s4142_s4, %s2674_s26 }
  0x1a   : > { %2826 = vmatpush3.bf16.msra.mxu0 %v3172_v7  ;;  %v3479_v39 = vsel %vm3461_vm3, %v277_v35, %v281_v33  ;;  %v3196_v7 = vld [vmem:[%s4139_s1 + $0xc8] sm:$0xff]   ;;  %v624_v11 = vor.u32 %v623_v50, %v622_v3  ;;  %v629_v12 = vrot.slane %v628_v4, 4  ;;  %vm3567_vm9 = vmor %vm613_vm6, %vm614_vm7  ;;  %v3205_v33 = vld [vmem:[%s4139_s1 + $0x120] sm:$0xff]  }
  0x1b   : > { %2846 = vmatpush3.bf16.msra.mxu1 %v3173_v8  ;;  %2827 = vmatprep.subr.bf16.mxu0 %v3322_v1  ;;  %v2297_v40 = vcombine.low %v268_v37, %v3479_v39  ;;  %v499_v8 = vrot.slane %v3429_v14, 5  ;;  %v3197_v14 = vld [vmem:[%s4139_s1 + $0x80] sm:$0xff]   ;;  %v3204_v30 = vld [vmem:[%s4139_s1 + $0x168] sm:$0xff]   ;;  %v3207_v37 = vld [vmem:[%s4139_s1 + $0x118] sm:$0xff]  }
  0x1c   : > { %2847 = vmatprep.subr.bf16.mxu1 %v3322_v1  ;;  %v3206_v35 = vld [vmem:[%s4139_s1 + $0x160] sm:$0xff]   ;;  %v3216_v55 = vld [vmem:[%s4139_s1 + $0x1b8] sm:$0xff]   ;;  %v3220_v57 = vld [vmem:[%s4139_s1 + $0x1a8] sm:$0xff]  }
  0x1d   : > { %v3578_v18 = vsel %vm3562_vm8, %v2316_v0, %v499_v8  ;;  %v3213_v50 = vld [vmem:[%s4139_s1 + $0x100] sm:$0xff]   ;;  %v3217_v56 = vld [vmem:[%s4139_s1 + $0x1f8] sm:$0xff]   ;;  %v3221_v58 = vld [vmem:[%s4139_s1 + $0x1e8] sm:$0xff]  }
  0x1e   : > { %2828 = vmatpush3.bf16.msra.mxu0 %v3174_v9  ;;  %v2333_v22 = vcombine.low %v496_v17, %v3578_v18  ;;  %v3223_v60 = vld [vmem:[%s4139_s1 + $0x1e0] sm:$0xff]   ;;  %v3224_v62 = vld [vmem:[%s4139_s1 + $0x198] sm:$0xff]   ;;  %v3226_v3 = vld [vmem:[%s4139_s1 + $0x190] sm:$0xff]  }
  0x1f   : > { %2848 = vmatpush3.bf16.msra.mxu1 %v3175_v10  ;;  %2829 = vmatprep.subr.bf16.mxu0 %v3322_v1  ;;  %v619_v10 = vrot.slane %v618_v2, 4  ;;  %v3225_v0 = vld [vmem:[%s4139_s1 + $0x1d8] sm:$0xff]   ;;  %v3230_v17 = vld [vmem:[%s4139_s1 + $0x180] sm:$0xff]  }
  0x20   : > { %2849 = vmatprep.subr.bf16.mxu1 %v3322_v1  ;;  %v3283_v31 = vld [vmem:[%s4139_s1 + $0x3f8] sm:$0xff]  }
  0x21   : > { %v625_v20 = vsel %vm3567_vm9, %v619_v10, %v624_v11  ;;  %v3228_v10 = vld [vmem:[%s4139_s1 + $0x188] sm:$0xff]  }
  0x22   : > { %2830 = vmatpush3.bf16.msra.mxu0 %v3176_v15  ;;  %v634_v15 = vor.u32 %v633_v59, %v632_v5  ;;  %v3222_v59 = vld [vmem:[%s4139_s1 + $0x1a0] sm:$0xff]   ;;  %v3227_v5 = vld [vmem:[%s4139_s1 + $0x1d0] sm:$0xff]  }
  0x23   : > { %2850 = vmatpush3.bf16.msra.mxu1 %v3177_v16  ;;  %2831 = vmatprep.subr.bf16.mxu0 %v3322_v1 }
  0x24   : > { %2851 = vmatprep.subr.bf16.mxu1 %v3322_v1  ;;  %v3588_v21 = vsel %vm3567_vm9, %v629_v12, %v634_v15  ;;  %v3229_v12 = vld [vmem:[%s4139_s1 + $0x1c8] sm:$0xff]  }
  0x25   : > { %v2358_v23 = vcombine.low %v625_v20, %v3588_v21  ;;  %v3231_v20 = vld [vmem:[%s4139_s1 + $0x1c0] sm:$0xff]  }
  0x26   : > { %2832 = vmatpush3.bf16.msra.mxu0 %v3178_v27  ;;  %v3202_v27 = vld [vmem:[%s4139_s1 + $0x170] sm:$0xff]  }
  0x27   : > { %2852 = vmatpush3.bf16.msra.mxu1 %v3179_v28  ;;  %2833 = vmatprep.subr.bf16.mxu0 %v3322_v1  ;;  %v3612_v28 = vld [vmem:[%s3409_s12 + $0x10] sm:$0xf] }
  0x28   : > { %2853 = vmatprep.subr.bf16.mxu1 %v3322_v1  ;;  %v861_v32 = vshrl.u32 %v3612_v28, 16  ;;  %v864_v34 = vshll.u32 %v3612_v28, 16  ;;  %v2383_v53 = vcombine.low %v3426_v13, %v3612_v28  ;;  %v3218_v13 = vld [vmem:[%s4139_s1 + $0x1b0] sm:$0xff]   ;;  %v2417_v8 = vrot.slane %v3612_v28, 9 }
  0x2a   : > { %2834 = vmatpush3.bf16.msra.mxu0 %v3180_v36  ;;  %v863_v36 = vrot.slane %v861_v32, 4 }
  0x2b   : > { %2854 = vmatpush3.bf16.msra.mxu1 %v3181_v38  ;;  %2859 = vmatprep.subr.bf16.mxu0 %v3322_v1  ;;  %v866_v38 = vrot.slane %v864_v34, 5 }
  0x2c   : > { %2879 = vmatprep.subr.bf16.mxu1 %v3322_v1 }
  0x2d   : > { %2836 = vmatmul.mubr.bf16.vlgmr.msra.gmra.mxu0 %v2297_v40  ;;  %v3208_v40 = vld [vmem:[%s4139_s1 + $0x158] sm:$0xff]  }
  0x2e   : > { %2856 = vmatmul.mubr.bf16.vlgmr.msra.gmra.mxu1 %v2306_v41  ;;  %2860 = vmatpush3.bf16.msra.mxu0 %v3183_v42  ;;  %v3646_v41 = vld [vmem:[%s3409_s12 + $0x14] sm:$0x3] }
  0x2f   : > { %2880 = vmatpush3.bf16.msra.mxu1 %v3184_v43  ;;  %2861 = vmatprep.subr.bf16.mxu0 %v3322_v1  ;;  %v3209_v42 = vld [vmem:[%s4139_s1 + $0x110] sm:$0xff]   ;;  %v867_v43 = vor.u32 %v866_v38, %v863_v36  ;;  %v1105_v2 = vshrl.u32 %v3646_v41, 16  ;;  %v988_v11 = vrot.slane %v3646_v41, 5  ;;  %v3240_v36 = vld [vmem:[%s4139_s1 + $0x218] sm:$0xff]  }
  0x30   : > { %2881 = vmatprep.subr.bf16.mxu1 %v3322_v1  ;;  %2875 = vmatprep.mubr.msk.bf16.mxu0 %vm3323_vm0, %v3322_v1 }
  0x31   : > { %2895 = vmatprep.mubr.msk.bf16.mxu1 %vm3323_vm0, %v3322_v1 }
  0x32   : > { %2862 = vmatpush3.bf16.msra.mxu0 %v3185_v44  ;;  %v870_v44 = vshll.u32 %v3646_v41, 16  ;;  %v3823_v41 = vld [vmem:[%s3409_s12 + $0x1c] sm:$0x3] }
  0x33   : > { %2882 = vmatpush3.bf16.msra.mxu1 %v3186_v45  ;;  %2863 = vmatprep.subr.bf16.mxu0 %v3322_v1  ;;  %v3210_v45 = vld [vmem:[%s4139_s1 + $0x150] sm:$0xff]  }
  0x34   : > { %2883 = vmatprep.subr.bf16.mxu1 %v3322_v1  ;;  %v1108_v4 = vrot.slane %v870_v44, 6 }
  0x36   : > { %2864 = vmatpush3.bf16.msra.mxu0 %v3187_v46  ;;  %v3211_v46 = vld [vmem:[%s4139_s1 + $0x108] sm:$0xff]  }
  0x37   : > { %2884 = vmatpush3.bf16.msra.mxu1 %v3188_v47  ;;  %2865 = vmatprep.subr.bf16.mxu0 %v3322_v1  ;;  %v868_v47 = vrot.slane %v867_v43, 4  ;;  %v3243_v43 = vld [vmem:[%s4139_s1 + $0x250] sm:$0xff]  }
  0x38   : > { %2885 = vmatprep.subr.bf16.mxu1 %v3322_v1 }
  0x3a   : > { %2866 = vmatpush3.bf16.msra.mxu0 %v3189_v48  ;;  %v872_v48 = vrot.slane %v870_v44, 5 }
  0x3b   : > { %2886 = vmatpush3.bf16.msra.mxu1 %v3190_v49  ;;  %2867 = vmatprep.subr.bf16.mxu0 %v3322_v1  ;;  %v3212_v49 = vld [vmem:[%s4139_s1 + $0x148] sm:$0xff]  }
  0x3c   : > { %2887 = vmatprep.subr.bf16.mxu1 %v3322_v1 }
  0x3e   : > { %2868 = vmatpush3.bf16.msra.mxu0 %v3191_v51  ;;  %v3214_v51 = vld [vmem:[%s4139_s1 + $0x140] sm:$0xff]  }
  0x3f   : > { %2888 = vmatpush3.bf16.msra.mxu1 %v3192_v52  ;;  %2869 = vmatprep.subr.bf16.mxu0 %v3322_v1  ;;  %v3674_v52 = vsel %vm3461_vm3, %v868_v47, %v872_v48  ;;  %v3245_v47 = vld [vmem:[%s4139_s1 + $0x248] sm:$0xff]  }
  0x40   : > { %2889 = vmatprep.subr.bf16.mxu1 %v3322_v1  ;;  %v2408_v54 = vcombine.low %v3479_v39, %v3674_v52  ;;  %v3219_v39 = vld [vmem:[%s4139_s1 + $0x1f0] sm:$0xff]  }
  0x42   : > { %2870 = vmatpush3.bf16.msra.mxu0 %v3193_v61  ;;  %v1101_v61 = vrot.slane %v861_v32, 5  ;;  %v3238_v32 = vld [vmem:[%s4139_s1 + $0x220] sm:$0xff]  }
  0x43   : > { %2890 = vmatpush3.bf16.msra.mxu1 %v3194_v63  ;;  %2871 = vmatprep.subr.bf16.mxu0 %v3322_v1  ;;  %v1102_v63 = vrot.slane %v864_v34, 6 }
  0x44   : > { %2891 = vmatprep.subr.bf16.mxu1 %v3322_v1 }
  0x46   : > { %2872 = vmatpush3.bf16.msra.mxu0 %v3195_v6  ;;  %v1103_v6 = vor.u32 %v1102_v63, %v1101_v61  ;;  %v3258_v61 = vld [vmem:[%s4139_s1 + $0x2d8] sm:$0xff]  }
  0x47   : > { %2892 = vmatpush3.bf16.msra.mxu1 %v3196_v7  ;;  %2873 = vmatprep.subr.bf16.mxu0 %v3322_v1  ;;  %v1107_v7 = vrot.slane %v1105_v2, 5  ;;  %v3259_v2 = vld [vmem:[%s4139_s1 + $0x290] sm:$0xff]  }
  0x48   : > { %2893 = vmatprep.subr.bf16.mxu1 %v3322_v1  ;;  %v1104_v15 = vrot.slane %v1103_v6, 4 }
  0x4a   : > { %2874 = vmatpush3.bf16.msra.mxu0 %v3197_v14  ;;  %v1109_v14 = vor.u32 %v1108_v4, %v1107_v7  ;;  %v3261_v7 = vld [vmem:[%s4139_s1 + $0x288] sm:$0xff]  }
  0x4b   : > { %2894 = vmatpush3.bf16.msra.mxu1 %v3198_v19  ;;  %2899 = vmatprep.subr.bf16.mxu0 %v3322_v1  ;;  %v3754_v19 = vsel %vm3562_vm8, %v2417_v8, %v988_v11  ;;  %v3262_v11 = vld [vmem:[%s4139_s1 + $0x2c8] sm:$0xff]  }
  0x4c   : > { %2919 = vmatprep.subr.bf16.mxu1 %v3322_v1 }
  0x4d   : > { %2876 = vmatmul.mubr.bf16.vlgmr.msra.gmra.mxu0 %v2333_v22  ;;  %v3762_v22 = vsel %vm3567_vm9, %v1104_v15, %v1109_v14  ;;  %v3263_v14 = vld [vmem:[%s4139_s1 + $0x280] sm:$0xff]  }
  0x4e   : > { %2896 = vmatmul.mubr.bf16.vlgmr.msra.gmra.mxu1 %v2358_v23  ;;  %2900 = vmatpush3.bf16.msra.mxu0 %v3199_v24  ;;  %v2434_v23 = vcombine.low %v3578_v18, %v3754_v19  ;;  %v2459_v24 = vcombine.low %v3588_v21, %v3762_v22  ;;  %v3234_v18 = vld [vmem:[%s4139_s1 + $0x230] sm:$0xff]  }
  0x4f   : > { %2920 = vmatpush3.bf16.msra.mxu1 %v3200_v25  ;;  %2901 = vmatprep.subr.bf16.mxu0 %v3322_v1  ;;  %v3232_v25 = vld [vmem:[%s4139_s1 + $0x238] sm:$0xff]   ;;  %v3235_v21 = vld [vmem:[%s4139_s1 + $0x270] sm:$0xff]  }
  0x50   : > { %2921 = vmatprep.subr.bf16.mxu1 %v3322_v1  ;;  %2915 = vmatprep.mubr.msk.bf16.mxu0 %vm3323_vm0, %v3322_v1 }
  0x51   : > { %2935 = vmatprep.mubr.msk.bf16.mxu1 %vm3323_vm0, %v3322_v1 }
  0x52   : > { %2902 = vmatpush3.bf16.msra.mxu0 %v3201_v26  ;;  %v3233_v26 = vld [vmem:[%s4139_s1 + $0x278] sm:$0xff]  }
  0x53   : > { %2922 = vmatpush3.bf16.msra.mxu1 %v3202_v27  ;;  %2903 = vmatprep.subr.bf16.mxu0 %v3322_v1  ;;  %v3236_v27 = vld [vmem:[%s4139_s1 + $0x228] sm:$0xff]  }
  0x54   : > { %2923 = vmatprep.subr.bf16.mxu1 %v3322_v1 }
  0x56   : > { %2904 = vmatpush3.bf16.msra.mxu0 %v3203_v29  ;;  %v3237_v29 = vld [vmem:[%s4139_s1 + $0x268] sm:$0xff]  }
  0x57   : > { %2924 = vmatpush3.bf16.msra.mxu1 %v3204_v30  ;;  %2905 = vmatprep.subr.bf16.mxu0 %v3322_v1  ;;  %v3798_v30 = vld [vmem:[%s3409_s12 + $0x18] sm:$0xf] }
  0x58   : > { %2925 = vmatprep.subr.bf16.mxu1 %v3322_v1  ;;  %v1335_v34 = vshrl.u32 %v3798_v30, 16  ;;  %v2518_v8 = vrot.slane %v3798_v30, 9 }
  0x5a   : > { %2906 = vmatpush3.bf16.msra.mxu0 %v3205_v33  ;;  %v3239_v33 = vld [vmem:[%s4139_s1 + $0x260] sm:$0xff]   ;;  %v1337_v38 = vrot.slane %v1335_v34, 4 }
  0x5b   : > { %2926 = vmatpush3.bf16.msra.mxu1 %v3206_v35  ;;  %2907 = vmatprep.subr.bf16.mxu0 %v3322_v1  ;;  %v1338_v35 = vshll.u32 %v3798_v30, 16 }
  0x5c   : > { %2927 = vmatprep.subr.bf16.mxu1 %v3322_v1 }
  0x5d   : > { %v1576_v63 = vrot.slane %v1338_v35, 6 }
  0x5e   : > { %2908 = vmatpush3.bf16.msra.mxu0 %v3207_v37  ;;  %v3241_v37 = vld [vmem:[%s4139_s1 + $0x258] sm:$0xff]  }
  0x5f   : > { %2928 = vmatpush3.bf16.msra.mxu1 %v3208_v40  ;;  %2909 = vmatprep.subr.bf16.mxu0 %v3322_v1  ;;  %v1340_v40 = vrot.slane %v1338_v35, 5 }
  0x60   : > { %2929 = vmatprep.subr.bf16.mxu1 %v3322_v1 }
  0x61   : > { %v1341_v44 = vor.u32 %v1340_v40, %v1337_v38 }
  0x62   : > { %2910 = vmatpush3.bf16.msra.mxu0 %v3209_v42  ;;  %v3242_v42 = vld [vmem:[%s4139_s1 + $0x210] sm:$0xff]  }
  0x63   : > { %2930 = vmatpush3.bf16.msra.mxu1 %v3210_v45  ;;  %2911 = vmatprep.subr.bf16.mxu0 %v3322_v1  ;;  %v1344_v45 = vshll.u32 %v3823_v41, 16  ;;  %v1342_v48 = vrot.slane %v1341_v44, 4 }
  0x64   : > { %2931 = vmatprep.subr.bf16.mxu1 %v3322_v1 }
  0x65   : > { %v1582_v6 = vrot.slane %v1344_v45, 6 }
  0x66   : > { %2912 = vmatpush3.bf16.msra.mxu0 %v3211_v46  ;;  %v3244_v46 = vld [vmem:[%s4139_s1 + $0x208] sm:$0xff]  }
  0x67   : > { %2932 = vmatpush3.bf16.msra.mxu1 %v3212_v49  ;;  %2913 = vmatprep.subr.bf16.mxu0 %v3322_v1  ;;  %v1346_v49 = vrot.slane %v1344_v45, 5 }
  0x68   : > { %2933 = vmatprep.subr.bf16.mxu1 %v3322_v1 }
  0x6a   : > { %2914 = vmatpush3.bf16.msra.mxu0 %v3213_v50  ;;  %v3246_v50 = vld [vmem:[%s4139_s1 + $0x200] sm:$0xff]  }
  0x6b   : > { %2934 = vmatpush3.bf16.msra.mxu1 %v3214_v51  ;;  %2939 = vmatprep.subr.bf16.mxu0 %v3322_v1  ;;  %v3247_v51 = vld [vmem:[%s4139_s1 + $0x240] sm:$0xff]  }
  0x6c   : > { %2959 = vmatprep.subr.bf16.mxu1 %v3322_v1 }
  0x6d   : > { %2916 = vmatmul.mubr.bf16.vlgmr.msra.gmra.mxu0 %v2383_v53  ;;  %v3851_v53 = vsel %vm3461_vm3, %v1342_v48, %v1346_v49 }
  0x6e   : > { %2936 = vmatmul.mubr.bf16.vlgmr.msra.gmra.mxu1 %v2408_v54  ;;  %2940 = vmatpush3.bf16.msra.mxu0 %v3216_v55  ;;  %v2484_v54 = vcombine.low %v3612_v28, %v3798_v30  ;;  %v2509_v55 = vcombine.low %v3674_v52, %v3851_v53  ;;  %v3251_v28 = vld [vmem:[%s4139_s1 + $0x2b0] sm:$0xff]  }
  0x6f   : > { %2960 = vmatpush3.bf16.msra.mxu1 %v3217_v56  ;;  %2941 = vmatprep.subr.bf16.mxu0 %v3322_v1  ;;  %v3249_v56 = vld [vmem:[%s4139_s1 + $0x2b8] sm:$0xff]   ;;  %v3252_v52 = vld [vmem:[%s4139_s1 + $0x2f0] sm:$0xff]  }
  0x70   : > { %2961 = vmatprep.subr.bf16.mxu1 %v3322_v1  ;;  %2955 = vmatprep.mubr.msk.bf16.mxu0 %vm3323_vm0, %v3322_v1 }
  0x71   : > { %2975 = vmatprep.mubr.msk.bf16.mxu1 %vm3323_vm0, %v3322_v1 }
  0x72   : > { %2942 = vmatpush3.bf16.msra.mxu0 %v3218_v13  ;;  %v3250_v13 = vld [vmem:[%s4139_s1 + $0x2f8] sm:$0xff]  }
  0x73   : > { %2962 = vmatpush3.bf16.msra.mxu1 %v3219_v39  ;;  %2943 = vmatprep.subr.bf16.mxu0 %v3322_v1  ;;  %v3253_v39 = vld [vmem:[%s4139_s1 + $0x2a8] sm:$0xff]  }
  0x74   : > { %2963 = vmatprep.subr.bf16.mxu1 %v3322_v1 }
  0x76   : > { %2944 = vmatpush3.bf16.msra.mxu0 %v3220_v57  ;;  %v3254_v57 = vld [vmem:[%s4139_s1 + $0x2e8] sm:$0xff]  }
  0x77   : > { %2964 = vmatpush3.bf16.msra.mxu1 %v3221_v58  ;;  %2945 = vmatprep.subr.bf16.mxu0 %v3322_v1  ;;  %v3255_v58 = vld [vmem:[%s4139_s1 + $0x2a0] sm:$0xff]  }
  0x78   : > { %2965 = vmatprep.subr.bf16.mxu1 %v3322_v1 }
  0x7a   : > { %2946 = vmatpush3.bf16.msra.mxu0 %v3222_v59  ;;  %v3256_v59 = vld [vmem:[%s4139_s1 + $0x2e0] sm:$0xff]  }
  0x7b   : > { %2966 = vmatpush3.bf16.msra.mxu1 %v3223_v60  ;;  %2947 = vmatprep.subr.bf16.mxu0 %v3322_v1  ;;  %v3257_v60 = vld [vmem:[%s4139_s1 + $0x298] sm:$0xff]  }
  0x7c   : > { %2967 = vmatprep.subr.bf16.mxu1 %v3322_v1 }
  0x7e   : > { %2948 = vmatpush3.bf16.msra.mxu0 %v3224_v62  ;;  %v1575_v62 = vrot.slane %v1335_v34, 5 }
  0x7f   : > { %2968 = vmatpush3.bf16.msra.mxu1 %v3225_v0  ;;  %2949 = vmatprep.subr.bf16.mxu0 %v3322_v1  ;;  %v1579_v0 = vshrl.u32 %v3823_v41, 16 }
  0x80   : > { %2969 = vmatprep.subr.bf16.mxu1 %v3322_v1  ;;  %v1577_v4 = vor.u32 %v1576_v63, %v1575_v62 }
  0x82   : > { %2950 = vmatpush3.bf16.msra.mxu0 %v3226_v3  ;;  %v3260_v3 = vld [vmem:[%s4139_s1 + $0x2d0] sm:$0xff]  }
  0x83   : > { %2970 = vmatpush3.bf16.msra.mxu1 %v3227_v5  ;;  %2951 = vmatprep.subr.bf16.mxu0 %v3322_v1  ;;  %v1581_v5 = vrot.slane %v1579_v0, 5  ;;  %v3287_v0 = vld [vmem:[%s4139_s1 + $0x3e8] sm:$0xff]  }
  0x84   : > { %2971 = vmatprep.subr.bf16.mxu1 %v3322_v1 }
  0x85   : > { %v1583_v15 = vor.u32 %v1582_v6, %v1581_v5  ;;  %v3290_v5 = vld [vmem:[%s4139_s1 + $0x398] sm:$0xff]  }
  0x86   : > { %2952 = vmatpush3.bf16.msra.mxu0 %v3228_v10  ;;  %v1462_v10 = vrot.slane %v3823_v41, 5  ;;  %v3999_v41 = vld [vmem:[%s3409_s12 + $0x24] sm:$0x3]  ;;  %v3291_v6 = vld [vmem:[%s4139_s1 + $0x3d8] sm:$0xff]  }
  0x87   : > { %2972 = vmatpush3.bf16.msra.mxu1 %v3229_v12  ;;  %2953 = vmatprep.subr.bf16.mxu0 %v3322_v1  ;;  %v1578_v12 = vrot.slane %v1577_v4, 4  ;;  %v1818_v45 = vshll.u32 %v3999_v41, 16  ;;  %v3289_v4 = vld [vmem:[%s4139_s1 + $0x3e0] sm:$0xff]  }
  0x88   : > { %2973 = vmatprep.subr.bf16.mxu1 %v3322_v1 }
  0x89   : > { %v1820_v49 = vrot.slane %v1818_v45, 5 }
  0x8a   : > { %2954 = vmatpush3.bf16.msra.mxu0 %v3230_v17  ;;  %v3930_v17 = vsel %vm3562_vm8, %v2518_v8, %v1462_v10  ;;  %v2053_v10 = vshrl.u32 %v3999_v41, 16 }
  0x8b   : > { %2974 = vmatpush3.bf16.msra.mxu1 %v3231_v20  ;;  %2979 = vmatprep.subr.bf16.mxu0 %v3322_v1  ;;  %v3264_v20 = vld [vmem:[%s4139_s1 + $0x2c0] sm:$0xff]  }
  0x8c   : > { %2999 = vmatprep.subr.bf16.mxu1 %v3322_v1 }
  0x8d   : > { %2956 = vmatmul.mubr.bf16.vlgmr.msra.gmra.mxu0 %v2434_v23  ;;  %v3938_v23 = vsel %vm3567_vm9, %v1578_v12, %v1583_v15  ;;  %v3293_v12 = vld [vmem:[%s4139_s1 + $0x3d0] sm:$0xff]  }
  0x8e   : > { %2976 = vmatmul.mubr.bf16.vlgmr.msra.gmra.mxu1 %v2459_v24  ;;  %2980 = vmatpush3.bf16.msra.mxu0 %v3232_v25  ;;  %v2535_v24 = vcombine.low %v3754_v19, %v3930_v17  ;;  %v2560_v25 = vcombine.low %v3762_v22, %v3938_v23  ;;  %v3267_v19 = vld [vmem:[%s4139_s1 + $0x330] sm:$0xff]  }
  0x8f   : > { %3000 = vmatpush3.bf16.msra.mxu1 %v3233_v26  ;;  %2981 = vmatprep.subr.bf16.mxu0 %v3322_v1  ;;  %v3265_v26 = vld [vmem:[%s4139_s1 + $0x338] sm:$0xff]   ;;  %v3268_v22 = vld [vmem:[%s4139_s1 + $0x370] sm:$0xff]  }
  0x90   : > { %3001 = vmatprep.subr.bf16.mxu1 %v3322_v1  ;;  %2995 = vmatprep.mubr.msk.bf16.mxu0 %vm3323_vm0, %v3322_v1 }
  0x91   : > { %3015 = vmatprep.mubr.msk.bf16.mxu1 %vm3323_vm0, %v3322_v1 }
  0x92   : > { %2982 = vmatpush3.bf16.msra.mxu0 %v3234_v18  ;;  %v3266_v18 = vld [vmem:[%s4139_s1 + $0x378] sm:$0xff]  }
  0x93   : > { %3002 = vmatpush3.bf16.msra.mxu1 %v3235_v21  ;;  %2983 = vmatprep.subr.bf16.mxu0 %v3322_v1  ;;  %v3269_v21 = vld [vmem:[%s4139_s1 + $0x328] sm:$0xff]  }
  0x94   : > { %3003 = vmatprep.subr.bf16.mxu1 %v3322_v1 }
  0x96   : > { %2984 = vmatpush3.bf16.msra.mxu0 %v3236_v27  ;;  %v3270_v27 = vld [vmem:[%s4139_s1 + $0x368] sm:$0xff]  }
  0x97   : > { %3004 = vmatpush3.bf16.msra.mxu1 %v3237_v29  ;;  %2985 = vmatprep.subr.bf16.mxu0 %v3322_v1  ;;  %v3974_v29 = vld [vmem:[%s3409_s12 + $0x20] sm:$0xf] }
  0x98   : > { %3005 = vmatprep.subr.bf16.mxu1 %v3322_v1  ;;  %v1809_v34 = vshrl.u32 %v3974_v29, 16  ;;  %v1812_v35 = vshll.u32 %v3974_v29, 16 }
  0x9a   : > { %2986 = vmatpush3.bf16.msra.mxu0 %v3238_v32  ;;  %v3271_v32 = vld [vmem:[%s4139_s1 + $0x320] sm:$0xff]   ;;  %v1811_v38 = vrot.slane %v1809_v34, 4  ;;  %v1814_v40 = vrot.slane %v1812_v35, 5  ;;  %v2050_v8 = vrot.slane %v1812_v35, 6 }
  0x9b   : > { %3006 = vmatpush3.bf16.msra.mxu1 %v3239_v33  ;;  %2987 = vmatprep.subr.bf16.mxu0 %v3322_v1  ;;  %v3272_v33 = vld [vmem:[%s4139_s1 + $0x360] sm:$0xff]  }
  0x9c   : > { %3007 = vmatprep.subr.bf16.mxu1 %v3322_v1  ;;  %v1815_v44 = vor.u32 %v1814_v40, %v1811_v38 }
  0x9e   : > { %2988 = vmatpush3.bf16.msra.mxu0 %v3240_v36  ;;  %v3273_v36 = vld [vmem:[%s4139_s1 + $0x318] sm:$0xff]   ;;  %v1816_v48 = vrot.slane %v1815_v44, 4 }
  0x9f   : > { %3008 = vmatpush3.bf16.msra.mxu1 %v3241_v37  ;;  %2989 = vmatprep.subr.bf16.mxu0 %v3322_v1  ;;  %v3274_v37 = vld [vmem:[%s4139_s1 + $0x358] sm:$0xff]  }
  0xa0   : > { %3009 = vmatprep.subr.bf16.mxu1 %v3322_v1 }
  0xa2   : > { %2990 = vmatpush3.bf16.msra.mxu0 %v3242_v42  ;;  %v3275_v42 = vld [vmem:[%s4139_s1 + $0x310] sm:$0xff]  }
  0xa3   : > { %3010 = vmatpush3.bf16.msra.mxu1 %v3243_v43  ;;  %2991 = vmatprep.subr.bf16.mxu0 %v3322_v1  ;;  %v3276_v43 = vld [vmem:[%s4139_s1 + $0x350] sm:$0xff]  }
  0xa4   : > { %3011 = vmatprep.subr.bf16.mxu1 %v3322_v1 }
  0xa6   : > { %2992 = vmatpush3.bf16.msra.mxu0 %v3244_v46  ;;  %v3277_v46 = vld [vmem:[%s4139_s1 + $0x308] sm:$0xff]  }
  0xa7   : > { %3012 = vmatpush3.bf16.msra.mxu1 %v3245_v47  ;;  %2993 = vmatprep.subr.bf16.mxu0 %v3322_v1  ;;  %v3278_v47 = vld [vmem:[%s4139_s1 + $0x348] sm:$0xff]  }
  0xa8   : > { %3013 = vmatprep.subr.bf16.mxu1 %v3322_v1 }
  0xaa   : > { %2994 = vmatpush3.bf16.msra.mxu0 %v3246_v50  ;;  %v3279_v50 = vld [vmem:[%s4139_s1 + $0x300] sm:$0xff]  }
  0xab   : > { %3014 = vmatpush3.bf16.msra.mxu1 %v3247_v51  ;;  %3019 = vmatprep.subr.bf16.mxu0 %v3322_v1  ;;  %v3280_v51 = vld [vmem:[%s4139_s1 + $0x340] sm:$0xff]  }
  0xac   : > { %3039 = vmatprep.subr.bf16.mxu1 %v3322_v1 }
  0xad   : > { %2996 = vmatmul.mubr.bf16.vlgmr.msra.gmra.mxu0 %v2484_v54  ;;  %v1821_v54 = vsel %vm3461_vm3, %v1816_v48, %v1820_v49 }
  0xae   : > { %3016 = vmatmul.mubr.bf16.vlgmr.msra.gmra.mxu1 %v2509_v55  ;;  %3020 = vmatpush3.bf16.msra.mxu0 %v3249_v56  ;;  %v2585_v55 = vcombine.low %v3798_v30, %v3974_v29  ;;  %v2610_v56 = vcombine.low %v3851_v53, %v1821_v54  ;;  %v3284_v30 = vld [vmem:[%s4139_s1 + $0x3b0] sm:$0xff]  }
  0xaf   : > { %3040 = vmatpush3.bf16.msra.mxu1 %v3250_v13  ;;  %3021 = vmatprep.subr.bf16.mxu0 %v3322_v1  ;;  %v3282_v13 = vld [vmem:[%s4139_s1 + $0x3b8] sm:$0xff]  }
  0xb0   : > { %3041 = vmatprep.subr.bf16.mxu1 %v3322_v1  ;;  %3035 = vmatprep.mubr.msk.bf16.mxu0 %vm3323_vm0, %v3322_v1 }
  0xb1   : > { %3055 = vmatprep.mubr.msk.bf16.mxu1 %vm3323_vm0, %v3322_v1 }
  0xb2   : > { %3022 = vmatpush3.bf16.msra.mxu0 %v3251_v28 }
  0xb3   : > { %3042 = vmatpush3.bf16.msra.mxu1 %v3252_v52  ;;  %3023 = vmatprep.subr.bf16.mxu0 %v3322_v1 }
  0xb4   : > { %3043 = vmatprep.subr.bf16.mxu1 %v3322_v1 }
  0xb6   : > { %3024 = vmatpush3.bf16.msra.mxu0 %v3253_v39 }
  0xb7   : > { %3044 = vmatpush3.bf16.msra.mxu1 %v3254_v57  ;;  %3025 = vmatprep.subr.bf16.mxu0 %v3322_v1  ;;  %v3285_v57 = vld [vmem:[%s4139_s1 + $0x3f0] sm:$0xff]  }
  0xb8   : > { %3045 = vmatprep.subr.bf16.mxu1 %v3322_v1 }
  0xba   : > { %3026 = vmatpush3.bf16.msra.mxu0 %v3255_v58 }
  0xbb   : > { %3046 = vmatpush3.bf16.msra.mxu1 %v3256_v59  ;;  %3027 = vmatprep.subr.bf16.mxu0 %v3322_v1 }
  0xbc   : > { %3047 = vmatprep.subr.bf16.mxu1 %v3322_v1 }
  0xbe   : > { %3028 = vmatpush3.bf16.msra.mxu0 %v3257_v60 }
  0xbf   : > { %3048 = vmatpush3.bf16.msra.mxu1 %v3258_v61  ;;  %3029 = vmatprep.subr.bf16.mxu0 %v3322_v1  ;;  %v3286_v61 = vld [vmem:[%s4139_s1 + $0x3a8] sm:$0xff]  }
  0xc0   : > { %3049 = vmatprep.subr.bf16.mxu1 %v3322_v1 }
  0xc2   : > { %3030 = vmatpush3.bf16.msra.mxu0 %v3259_v2 }
  0xc3   : > { %3050 = vmatpush3.bf16.msra.mxu1 %v3260_v3  ;;  %3031 = vmatprep.subr.bf16.mxu0 %v3322_v1  ;;  %v3288_v3 = vld [vmem:[%s4139_s1 + $0x3a0] sm:$0xff]  }
  0xc4   : > { %3051 = vmatprep.subr.bf16.mxu1 %v3322_v1 }
  0xc6   : > { %3032 = vmatpush3.bf16.msra.mxu0 %v3261_v7  ;;  %v2049_v7 = vrot.slane %v1809_v34, 5 }
  0xc7   : > { %3052 = vmatpush3.bf16.msra.mxu1 %v3262_v11  ;;  %3033 = vmatprep.subr.bf16.mxu0 %v3322_v1  ;;  %v3292_v11 = vld [vmem:[%s4139_s1 + $0x390] sm:$0xff]  }
  0xc8   : > { %3053 = vmatprep.subr.bf16.mxu1 %v3322_v1  ;;  %v2051_v15 = vor.u32 %v2050_v8, %v2049_v7 }
  0xca   : > { %3034 = vmatpush3.bf16.msra.mxu0 %v3263_v14  ;;  %v2055_v14 = vrot.slane %v2053_v10, 5 }
  0xcb   : > { %3054 = vmatpush3.bf16.msra.mxu1 %v3264_v20  ;;  %3059 = vmatprep.subr.bf16.mxu0 %v3322_v1  ;;  %v2056_v20 = vrot.slane %v1818_v45, 6 }
  0xcc   : > { %3079 = vmatprep.subr.bf16.mxu1 %v3322_v1 }
  0xcd   : > { %3036 = vmatmul.mubr.bf16.vlgmr.msra.gmra.mxu0 %v2535_v24  ;;  %v3294_v24 = vld [vmem:[%s4139_s1 + $0x388] sm:$0xff]  }
  0xce   : > { %3056 = vmatmul.mubr.bf16.vlgmr.msra.gmra.mxu1 %v2560_v25  ;;  %3060 = vmatpush3.bf16.msra.mxu0 %v3265_v26  ;;  %v2619_v25 = vrot.slane %v3974_v29, 9  ;;  %v1936_v26 = vrot.slane %v3999_v41, 5  ;;  %v3297_v29 = vld [vmem:[%s4139_s1 + $0x3c0] sm:$0xff]  }
  0xcf   : > { %3080 = vmatpush3.bf16.msra.mxu1 %v3266_v18  ;;  %3061 = vmatprep.subr.bf16.mxu0 %v3322_v1  ;;  %v3295_v18 = vld [vmem:[%s4139_s1 + $0x3c8] sm:$0xff]  }
  0xd0   : > { %3081 = vmatprep.subr.bf16.mxu1 %v3322_v1  ;;  %3075 = vmatprep.mubr.msk.bf16.mxu0 %vm3323_vm0, %v3322_v1 }
  0xd1   : > { %3095 = vmatprep.mubr.msk.bf16.mxu1 %vm3323_vm0, %v3322_v1 }
  0xd2   : > { %3062 = vmatpush3.bf16.msra.mxu0 %v3267_v19  ;;  %v2052_v19 = vrot.slane %v2051_v15, 4 }
  0xd3   : > { %3082 = vmatpush3.bf16.msra.mxu1 %v3268_v22  ;;  %3063 = vmatprep.subr.bf16.mxu0 %v3322_v1  ;;  %v2057_v22 = vor.u32 %v2056_v20, %v2055_v14 }
  0xd4   : > { %3083 = vmatprep.subr.bf16.mxu1 %v3322_v1 }
  0xd6   : > { %3064 = vmatpush3.bf16.msra.mxu0 %v3269_v21  ;;  %v3296_v21 = vld [vmem:[%s4139_s1 + $0x380] sm:$0xff]  }
  0xd7   : > { %3084 = vmatpush3.bf16.msra.mxu1 %v3270_v27  ;;  %3065 = vmatprep.subr.bf16.mxu0 %v3322_v1  ;;  %v1937_v27 = vsel %vm3562_vm8, %v2619_v25, %v1936_v26 }
  0xd8   : > { %3085 = vmatprep.subr.bf16.mxu1 %v3322_v1 }
  0xda   : > { %3066 = vmatpush3.bf16.msra.mxu0 %v3271_v32  ;;  %v2058_v32 = vsel %vm3567_vm9, %v2052_v19, %v2057_v22 }
  0xdb   : > { %3086 = vmatpush3.bf16.msra.mxu1 %v3272_v33  ;;  %3067 = vmatprep.subr.bf16.mxu0 %v3322_v1  ;;  %v2636_v33 = vcombine.low %v3930_v17, %v1937_v27  ;;  %v2661_v34 = vcombine.low %v3938_v23, %v2058_v32 }
  0xdc   : > { %3087 = vmatprep.subr.bf16.mxu1 %v3322_v1 }
  0xde   : > { %3068 = vmatpush3.bf16.msra.mxu0 %v3273_v36 }
  0xdf   : > { %3088 = vmatpush3.bf16.msra.mxu1 %v3274_v37  ;;  %3069 = vmatprep.subr.bf16.mxu0 %v3322_v1 }
  0xe0   : > { %3089 = vmatprep.subr.bf16.mxu1 %v3322_v1 }
  0xe2   : > { %3070 = vmatpush3.bf16.msra.mxu0 %v3275_v42 }
  0xe3   : > { %3090 = vmatpush3.bf16.msra.mxu1 %v3276_v43  ;;  %3071 = vmatprep.subr.bf16.mxu0 %v3322_v1 }
  0xe4   : > { %3091 = vmatprep.subr.bf16.mxu1 %v3322_v1 }
  0xe6   : > { %3072 = vmatpush3.bf16.msra.mxu0 %v3277_v46 }
  0xe7   : > { %3092 = vmatpush3.bf16.msra.mxu1 %v3278_v47  ;;  %3073 = vmatprep.subr.bf16.mxu0 %v3322_v1 }
  0xe8   : > { %3093 = vmatprep.subr.bf16.mxu1 %v3322_v1 }
  0xea   : > { %3074 = vmatpush3.bf16.msra.mxu0 %v3279_v50 }
  0xeb   : > { %3094 = vmatpush3.bf16.msra.mxu1 %v3280_v51  ;;  %3099 = vmatprep.subr.bf16.mxu0 %v3322_v1 }
  0xec   : > { %3119 = vmatprep.subr.bf16.mxu1 %v3322_v1 }
  0xed   : > { %v386_v28 = vpop.f32.mrf.mxu0  ;;  %3076 = vmatmul.mubr.bf16.vlgmr.msra.gmra.mxu0 %v2585_v55 }
  0xee   : > { %v481_v52 = vpop.f32.mrf.mxu1  ;;  %3096 = vmatmul.mubr.bf16.vlgmr.msra.gmra.mxu1 %v2610_v56  ;;  %3100 = vmatpush3.bf16.msra.mxu0 %v3282_v13 }
  0xef   : > { %v4044_v53 = vadd.f32 %v481_v52, %v386_v28  ;;  %3120 = vmatpush3.bf16.msra.mxu1 %v3283_v31  ;;  %v2837_v39 = vpop.f32.mrf.mxu0  ;;  %3101 = vmatprep.subr.bf16.mxu0 %v3322_v1 }
  0xf0   : > { %v2857_v58 = vpop.f32.mrf.mxu1  ;;  %3121 = vmatprep.subr.bf16.mxu1 %v3322_v1  ;;  %3115 = vmatprep.mubr.msk.bf16.mxu0 %vm3323_vm0, %v3322_v1 }
  0xf1   : > { %v389_v59 = vpop.f32.mrf.mxu0  ;;  %3135 = vmatprep.mubr.msk.bf16.mxu1 %vm3323_vm0, %v3322_v1 }
  0xf2   : > { %v484_v60 = vpop.f32.mrf.mxu1  ;;  %3102 = vmatpush3.bf16.msra.mxu0 %v3284_v30 }
  0xf3   : > { %v485_v62 = vadd.f32 %v484_v60, %v389_v59  ;;  %3122 = vmatpush3.bf16.msra.mxu1 %v3285_v57  ;;  %v2838_v63 = vpop.f32.mrf.mxu0  ;;  %3103 = vmatprep.subr.bf16.mxu0 %v3322_v1 }
  0xf4   : > { %v2858_v2 = vpop.f32.mrf.mxu1  ;;  %3123 = vmatprep.subr.bf16.mxu1 %v3322_v1 }
  0xf6   : > { %3104 = vmatpush3.bf16.msra.mxu0 %v3286_v61 }
  0xf7   : > { %3124 = vmatpush3.bf16.msra.mxu1 %v3287_v0  ;;  %3105 = vmatprep.subr.bf16.mxu0 %v3322_v1 }
  0xf8   : > { %3125 = vmatprep.subr.bf16.mxu1 %v3322_v1 }
  0xfa   : > { %3106 = vmatpush3.bf16.msra.mxu0 %v3288_v3 }
  0xfb   : > { %3126 = vmatpush3.bf16.msra.mxu1 %v3289_v4  ;;  %3107 = vmatprep.subr.bf16.mxu0 %v3322_v1 }
  0xfc   : > { %3127 = vmatprep.subr.bf16.mxu1 %v3322_v1 }
  0xfe   : > { %3108 = vmatpush3.bf16.msra.mxu0 %v3290_v5 }
  0xff   : > { %3128 = vmatpush3.bf16.msra.mxu1 %v3291_v6  ;;  %3109 = vmatprep.subr.bf16.mxu0 %v3322_v1 }
 0x100   : > { %3129 = vmatprep.subr.bf16.mxu1 %v3322_v1 }
 0x102   : > { %3110 = vmatpush3.bf16.msra.mxu0 %v3292_v11 }
 0x103   : > { %3130 = vmatpush3.bf16.msra.mxu1 %v3293_v12  ;;  %3111 = vmatprep.subr.bf16.mxu0 %v3322_v1 }
 0x104   : > { %3131 = vmatprep.subr.bf16.mxu1 %v3322_v1 }
 0x106   : > { %3112 = vmatpush3.bf16.msra.mxu0 %v3294_v24 }
 0x107   : > { %3132 = vmatpush3.bf16.msra.mxu1 %v3295_v18  ;;  %3113 = vmatprep.subr.bf16.mxu0 %v3322_v1 }
 0x108   : > { %3133 = vmatprep.subr.bf16.mxu1 %v3322_v1 }
 0x10a   : > { %3114 = vmatpush3.bf16.msra.mxu0 %v3296_v21 }
 0x10b   : > { %3134 = vmatpush3.bf16.msra.mxu1 %v3297_v29 }
 0x10d   : > { %v604_v9 = vpop.f32.mrf.mxu0  ;;  %3116 = vmatmul.mubr.bf16.vlgmr.msra.gmra.mxu0 %v2636_v33 }
 0x10e   : > { %v611_v35 = vadd.f32 %v604_v9, %v4044_v53  ;;  %v739_v36 = vpop.f32.mrf.mxu1  ;;  %3136 = vmatmul.mubr.bf16.vlgmr.msra.gmra.mxu1 %v2661_v34 }
 0x10f   : > { %v2877_v37 = vpop.f32.mrf.mxu0 }
 0x110   : > { %v746_v38 = vadd.f32 %v739_v36, %v611_v35  ;;  %v2897_v40 = vpop.f32.mrf.mxu1 }
 0x111   : > { %v607_v41 = vpop.f32.mrf.mxu0 }
 0x112   : > { %v612_v16 = vadd.f32 %v607_v41, %v485_v62  ;;  %v742_v42 = vpop.f32.mrf.mxu1 }
 0x113   : > { %v2878_v43 = vpop.f32.mrf.mxu0 }
 0x114   : > { %v747_v1 = vadd.f32 %v742_v42, %v612_v16  ;;  %v2898_v44 = vpop.f32.mrf.mxu1 }
 0x12d   : > { %v851_v17 = vpop.f32.mrf.mxu0 }
 0x12e   : > { %v858_v45 = vadd.f32 %v851_v17, %v746_v38  ;;  %v976_v46 = vpop.f32.mrf.mxu1 }
 0x12f   : > { %v2917_v23 = vpop.f32.mrf.mxu0 }
 0x130   : > { %v983_v47 = vadd.f32 %v976_v46, %v858_v45  ;;  %v2937_v48 = vpop.f32.mrf.mxu1  ;;  %v2671_v23 = vld [vmem:[%s4141_s3] ss:$0 sm:$0xff] }
 0x131   : > { %v854_v49 = vpop.f32.mrf.mxu0 }
 0x132   : > { %v859_v50 = vadd.f32 %v854_v49, %v747_v1  ;;  %v979_v51 = vpop.f32.mrf.mxu1  ;;  %v2670_v1 = vld [vmem:[%s4140_s2] ss:$0 sm:$0xff] }
 0x133   : > { %v2918_v54 = vpop.f32.mrf.mxu0 }
 0x134   : > { %v984_v55 = vadd.f32 %v979_v51, %v859_v50  ;;  %v2938_v56 = vpop.f32.mrf.mxu1 }
 0x14d   : > { %v1092_v13 = vpop.f32.mrf.mxu0 }
 0x14e   : > { %v1099_v31 = vadd.f32 %v1092_v13, %v983_v47  ;;  %v1213_v28 = vpop.f32.mrf.mxu1 }
 0x14f   : > { %v2957_v52 = vpop.f32.mrf.mxu0 }
 0x150   : > { %v1220_v30 = vadd.f32 %v1213_v28, %v1099_v31  ;;  %v2977_v53 = vpop.f32.mrf.mxu1 }
 0x151   : > { %v1095_v39 = vpop.f32.mrf.mxu0 }
 0x152   : > { %v1100_v57 = vadd.f32 %v1095_v39, %v984_v55  ;;  %v1216_v58 = vpop.f32.mrf.mxu1 }
 0x153   : > { %v2958_v59 = vpop.f32.mrf.mxu0 }
 0x154   : > { %v1221_v60 = vadd.f32 %v1216_v58, %v1100_v57  ;;  %v2978_v61 = vpop.f32.mrf.mxu1 }
 0x16d   : > { %v1325_v62 = vpop.f32.mrf.mxu0 }
 0x16e   : > { %v1332_v63 = vadd.f32 %v1325_v62, %v1220_v30  ;;  %v1450_v0 = vpop.f32.mrf.mxu1 }
 0x16f   : > { %v2997_v2 = vpop.f32.mrf.mxu0 }
 0x170   : > { %v1457_v3 = vadd.f32 %v1450_v0, %v1332_v63  ;;  %v3017_v4 = vpop.f32.mrf.mxu1 }
 0x171   : > { %v1328_v5 = vpop.f32.mrf.mxu0 }
 0x172   : > { %v1333_v6 = vadd.f32 %v1328_v5, %v1221_v60  ;;  %v1453_v7 = vpop.f32.mrf.mxu1 }
 0x173   : > { %v2998_v8 = vpop.f32.mrf.mxu0 }
 0x174   : > { %v1458_v10 = vadd.f32 %v1453_v7, %v1333_v6  ;;  %v3018_v11 = vpop.f32.mrf.mxu1 }
 0x18d   : > { %v1566_v12 = vpop.f32.mrf.mxu0 }
 0x18e   : > { %v1687_v15 = vpop.f32.mrf.mxu1  ;;  %v1573_v9 = vadd.f32 %v1566_v12, %v1457_v3 }
 0x18f   : > { %v3037_v14 = vpop.f32.mrf.mxu0 }
 0x190   : > { %v3057_v20 = vpop.f32.mrf.mxu1  ;;  %v1694_v35 = vadd.f32 %v1687_v15, %v1573_v9 }
 0x191   : > { %v1569_v24 = vpop.f32.mrf.mxu0 }
 0x192   : > { %v1690_v25 = vpop.f32.mrf.mxu1  ;;  %v1574_v36 = vadd.f32 %v1569_v24, %v1458_v10 }
 0x193   : > { %v3038_v26 = vpop.f32.mrf.mxu0 }
 0x194   : > { %v3058_v18 = vpop.f32.mrf.mxu1  ;;  %v1695_v38 = vadd.f32 %v1690_v25, %v1574_v36 }
 0x1ad   : > { %v1799_v19 = vpop.f32.mrf.mxu0 }
 0x1ae   : > { %v1924_v22 = vpop.f32.mrf.mxu1  ;;  %v1806_v37 = vadd.f32 %v1799_v19, %v1694_v35 }
 0x1af   : > { %v3077_v21 = vpop.f32.mrf.mxu0 }
 0x1b0   : > { %v3097_v27 = vpop.f32.mrf.mxu1  ;;  %v1931_v40 = vadd.f32 %v1924_v22, %v1806_v37 }
 0x1b1   : > { %v1802_v29 = vpop.f32.mrf.mxu0 }
 0x1b2   : > { %v1927_v32 = vpop.f32.mrf.mxu1  ;;  %v1807_v41 = vadd.f32 %v1802_v29, %v1695_v38 }
 0x1b3   : > { %v3078_v33 = vpop.f32.mrf.mxu0 }
 0x1b4   : > { %v3098_v34 = vpop.f32.mrf.mxu1  ;;  %v1932_v17 = vadd.f32 %v1927_v32, %v1807_v41 }
 0x1cd   : > { %v2040_v16 = vpop.f32.mrf.mxu0 }
 0x1ce   : > { %v2047_v42 = vadd.f32 %v2040_v16, %v1931_v40  ;;  %v2161_v43 = vpop.f32.mrf.mxu1 }
 0x1cf   : > { %v3117_v44 = vpop.f32.mrf.mxu0 }
 0x1d0   : > { %v2168_v45 = vadd.f32 %v2161_v43, %v2047_v42  ;;  %v3137_v46 = vpop.f32.mrf.mxu1 }
 0x1d1   : > { %v2043_v47 = vpop.f32.mrf.mxu0 }
 0x1d2   : > { %v2177_v48 = vmul.f32 %v2670_v1, %v2168_v45  ;;  %v2048_v49 = vadd.f32 %v2043_v47, %v1932_v17  ;;  %v2164_v50 = vpop.f32.mrf.mxu1 }
 0x1d3   : > { %v3118_v51 = vpop.f32.mrf.mxu0 }
 0x1d4   : > { %v2186_v54 = vadd.f32 %v2671_v23, %v2177_v48  ;;  %v2169_v55 = vadd.f32 %v2164_v50, %v2048_v49  ;;  %v3138_v56 = vpop.f32.mrf.mxu1 }
 0x1d6   : > { %2188 = vst [vmem:[%s219_s30] sm:$0x3] %v2186_v54  ;;  %v2178_v13 = vmul.f32 %v2670_v1, %v2169_v55 }
 0x1d8   : > { %v2187_v31 = vadd.f32 %v2671_v23, %v2178_v13 }
 0x1da   : > { %2189 = vst [vmem:[%s219_s30 + $0x2] sm:$0x3] %v2187_v31 }
 0x1db PF: > { %s14_s17 = sadd.s32 1, %s3320_s17   ;;  %s4149_s15 = smov %s3316_s16 }
 0x1dc   : > { %p11_p5 = scmp.ge.s32.totalorder %s14_s17, 4   ;;  %s4150_s16 = smov %s4152_s18 }
 0x1de   :  { %13 = sbr.rel (!%p11_p5) target bundleno = 2 (0x2), region = 82 }

</bundles_post_ra>
